<compile_context>
chip_gen: v6e
topology: v6e:2x2x1
jax: 0.10.0
libtpu: 0.0.40
codegen_flags: <defaults>
</compile_context>

<pallas_src>
import functools
import math

import jax
import jax.numpy as jnp
from jax.experimental import pallas as pl
from jax.experimental.pallas import tpu as pltpu


_VMEM_LIMIT = 32 * 1024 * 1024          # safe on v5e/v6e/v7x for the chosen tiles


# ----------------------------------------------------------------------------
# small helpers
# ----------------------------------------------------------------------------
def _rup(v, m):
    return ((v + m - 1) // m) * m


def _erf_poly(x):
    """Abramowitz & Stegun 7.1.26, |err| <= 1.5e-7.  Uses only ops with
    guaranteed Mosaic lowerings (exp/mul/add/where)."""
    a1, a2, a3, a4, a5 = (0.254829592, -0.284496736, 1.421413741,
                          -1.453152027, 1.061405429)
    p = 0.3275911
    ax = jnp.abs(x)
    t = 1.0 / (1.0 + p * ax)
    poly = ((((a5 * t + a4) * t + a3) * t + a2) * t + a1) * t
    y = 1.0 - poly * jnp.exp(-ax * ax)
    return jnp.where(x >= 0, y, -y)


def _apply_act(y, activation):
    if activation is None:
        return y
    if activation == 'relu':
        return jnp.maximum(y, 0.0)
    if activation == 'gelu':            # exact (erf) GELU, matches nn.GELU()
        return 0.5 * y * (1.0 + _erf_poly(y * (1.0 / math.sqrt(2.0))))
    if activation == 'sigmoid':
        return jax.nn.sigmoid(y)
    raise ValueError(activation)


def _amp_to_db(y):
    # AmplitudeToDB(stype='power'), top_db=None, ref=1.0
    return (10.0 / math.log(10.0)) * jnp.log(jnp.maximum(y, 1e-10))


def _pick_tm(M):
    if M <= 512:
        return _rup(M, 8)
    if M <= 8192:
        return 512
    return 1024


# ----------------------------------------------------------------------------
# shared fused epilogue:  y (+bias) [elementwise] [act pre] (+res) [act post]
#                         [*scale + shift]
# ----------------------------------------------------------------------------
def _mm_epilogue(y, b_ref, r_ref, s_ref, t_ref, activation, act_pos,
                 elementwise_fn):
    if b_ref is not None:
        y = y + b_ref[...]
    if elementwise_fn is not None:
        y = elementwise_fn(y)
    if act_pos == 'pre':
        y = _apply_act(y, activation)
    if r_ref is not None:
        y = y + r_ref[...].astype(jnp.float32)
    if act_pos == 'post':
        y = _apply_act(y, activation)
    if s_ref is not None:
        y = y * s_ref[...] + t_ref[...]
    return y


# ----------------------------------------------------------------------------
# Pallas kernel 1a: single-K-step matmul, no accumulator scratch (gk == 1)
# ----------------------------------------------------------------------------
def _mm1_kernel(*refs, has_bias, has_res, has_aff, activation, act_pos,
                elementwise_fn):
    x_ref, w_ref = refs[0], refs[1]
    idx = 2
    b_ref = refs[idx] if has_bias else None
    idx += 1 if has_bias else 0
    r_ref = refs[idx] if has_res else None
    idx += 1 if has_res else 0
    if has_aff:
        s_ref, t_ref = refs[idx], refs[idx + 1]
        idx += 2
    else:
        s_ref = t_ref = None
    o_ref = refs[idx]

    y = jnp.dot(x_ref[...], w_ref[...], preferred_element_type=jnp.float32)
    y = _mm_epilogue(y, b_ref, r_ref, s_ref, t_ref, activation, act_pos,
                     elementwise_fn)
    o_ref[...] = y.astype(o_ref.dtype)


# ----------------------------------------------------------------------------
# Pallas kernel 1b: multi-K-step matmul with f32 VMEM accumulator (gk > 1)
# ----------------------------------------------------------------------------
def _mm_kernel(*refs, has_bias, has_res, has_aff, activation, act_pos,
               elementwise_fn):
    x_ref, w_ref = refs[0], refs[1]
    idx = 2
    b_ref = refs[idx] if has_bias else None
    idx += 1 if has_bias else 0
    r_ref = refs[idx] if has_res else None
    idx += 1 if has_res else 0
    if has_aff:
        s_ref, t_ref = refs[idx], refs[idx + 1]
        idx += 2
    else:
        s_ref = t_ref = None
    o_ref, acc_ref = refs[idx], refs[idx + 1]

    @pl.when(pl.program_id(2) == 0)
    def _init():
        acc_ref[...] = jnp.zeros_like(acc_ref)

    acc_ref[...] += jnp.dot(x_ref[...], w_ref[...],
                            preferred_element_type=jnp.float32)

    @pl.when(pl.program_id(2) == pl.num_programs(2) - 1)
    def _epilogue():
        y = _mm_epilogue(acc_ref[...], b_ref, r_ref, s_ref, t_ref, activation,
                         act_pos, elementwise_fn)
        o_ref[...] = y.astype(o_ref.dtype)


def matmul_fused(x, w, bias=None, residual=None, activation=None,
                 act_pos='pre', elementwise_fn=None, affine=None,
                 out_dtype=jnp.float32):
    """(M,K) @ (K,N) in bf16 on the MXU with f32 accumulation and a fused
    epilogue.  `affine` = (scale_vec, shift_vec) of shape (N,), applied last."""
    M, K = x.shape
    K2, N = w.shape
    assert K == K2

    xb = x if x.dtype == jnp.bfloat16 else x.astype(jnp.bfloat16)
    wb = w if w.dtype == jnp.bfloat16 else w.astype(jnp.bfloat16)

    # tile selection: full-extent ragged K/N blocks (no padding MACs), big M tiles
    tm = _pick_tm(M)
    Mp = _rup(M, tm)
    if N <= 1024:
        tn, Np = N, N
    else:
        tn, Np = 512, _rup(N, 512)
    if K <= 1024:
        tk, Kp = K, K
    else:
        tk, Kp = 512, _rup(K, 512)
    gm, gn, gk = Mp // tm, Np // tn, Kp // tk

    if (Mp, Kp) != (M, K):
        xb = jnp.pad(xb, ((0, Mp - M), (0, Kp - K)))
    if (Kp, Np) != (K, N):
        wb = jnp.pad(wb, ((0, Kp - K), (0, Np - N)))

    inputs = [xb, wb]
    extra = []                                   # (array, 'row' | 'full')
    if bias is not None:
        b2 = bias.reshape(1, N).astype(jnp.float32)
        if Np != N:
            b2 = jnp.pad(b2, ((0, 0), (0, Np - N)))
        extra.append((b2, 'row'))
    if residual is not None:
        r = residual
        if (Mp, Np) != (M, N):
            r = jnp.pad(r, ((0, Mp - M), (0, Np - N)))
        extra.append((r, 'full'))
    if affine is not None:
        s, t = affine
        s2 = s.reshape(1, N).astype(jnp.float32)
        t2 = t.reshape(1, N).astype(jnp.float32)
        if Np != N:
            s2 = jnp.pad(s2, ((0, 0), (0, Np - N)))
            t2 = jnp.pad(t2, ((0, 0), (0, Np - N)))
        extra.append((s2, 'row'))
        extra.append((t2, 'row'))

    common = dict(has_bias=bias is not None, has_res=residual is not None,
                  has_aff=affine is not None, activation=activation,
                  act_pos=act_pos, elementwise_fn=elementwise_fn)

    if gk == 1:
        in_specs = [pl.BlockSpec((tm, tk), lambda i, j: (i, 0)),
                    pl.BlockSpec((tk, tn), lambda i, j: (0, j))]
        row_spec = pl.BlockSpec((1, tn), lambda i, j: (0, j))
        full_spec = pl.BlockSpec((tm, tn), lambda i, j: (i, j))
        grid = (gm, gn)
        kern = functools.partial(_mm1_kernel, **common)
        scratch = []
        dims = ("parallel", "parallel")
    else:
        in_specs = [pl.BlockSpec((tm, tk), lambda i, j, k: (i, k)),
                    pl.BlockSpec((tk, tn), lambda i, j, k: (k, j))]
        row_spec = pl.BlockSpec((1, tn), lambda i, j, k: (0, j))
        full_spec = pl.BlockSpec((tm, tn), lambda i, j, k: (i, j))
        grid = (gm, gn, gk)
        kern = functools.partial(_mm_kernel, **common)
        scratch = [pltpu.VMEM((tm, tn), jnp.float32)]
        dims = ("parallel", "parallel", "arbitrary")

    for arr, kind in extra:
        inputs.append(arr)
        in_specs.append(row_spec if kind == 'row' else full_spec)

    out = pl.pallas_call(
        kern,
        out_shape=jax.ShapeDtypeStruct((Mp, Np), out_dtype),
        grid=grid,
        in_specs=in_specs,
        out_specs=full_spec,
        scratch_shapes=scratch,
        compiler_params=pltpu.CompilerParams(
            dimension_semantics=dims,
            vmem_limit_bytes=_VMEM_LIMIT),
    )(*inputs)
    if (Mp, Np) != (M, N):
        out = out[:M, :N]
    return out


# ----------------------------------------------------------------------------
# Pallas kernel 2: fused LayerNorm + matmul (+bias, +activation)
# ----------------------------------------------------------------------------
def _ln_mm_kernel(x_ref, g_ref, bt_ref, w_ref, *rest, has_bias, activation,
                  cache_h):
    b_ref = rest[0] if has_bias else None
    o_ref = rest[1 if has_bias else 0]

    def _norm():
        x = x_ref[...].astype(jnp.float32)
        mu = jnp.mean(x, axis=-1, keepdims=True)
        var = jnp.mean(jnp.square(x - mu), axis=-1, keepdims=True)
        h = (x - mu) * jax.lax.rsqrt(var + 1e-5) * g_ref[...] + bt_ref[...]
        return h.astype(jnp.bfloat16)

    if cache_h:
        h_ref = rest[(2 if has_bias else 1)]

        @pl.when(pl.program_id(1) == 0)
        def _fill():
            h_ref[...] = _norm()

        h = h_ref[...]
    else:
        h = _norm()

    y = jnp.dot(h, w_ref[...], preferred_element_type=jnp.float32)
    if has_bias:
        y = y + b_ref[...]
    y = _apply_act(y, activation)
    o_ref[...] = y.astype(o_ref.dtype)


def ln_matmul_fused(x, gamma, beta, w, bias=None, activation=None,
                    out_dtype=jnp.float32):
    """LayerNorm(x) @ w (+bias, +activation).  K (=D) is kept whole so the LN
    statistics see the full feature dim; the normalized activations are cached
    in VMEM when the N axis is tiled."""
    M, D = x.shape
    D2, N = w.shape
    assert D == D2
    tm = _pick_tm(M)
    Mp = _rup(M, tm)
    if N <= 1024:
        tn, Np = N, N
    else:
        tn, Np = 512, _rup(N, 512)
    gm, gn = Mp // tm, Np // tn
    cache_h = gn > 1

    xf = x.astype(jnp.float32)
    if Mp != M:
        xf = jnp.pad(xf, ((0, Mp - M), (0, 0)))
    wb = w if w.dtype == jnp.bfloat16 else w.astype(jnp.bfloat16)
    if Np != N:
        wb = jnp.pad(wb, ((0, 0), (0, Np - N)))

    inputs = [xf,
              gamma.reshape(1, D).astype(jnp.float32),
              beta.reshape(1, D).astype(jnp.float32),
              wb]
    in_specs = [pl.BlockSpec((tm, D), lambda i, j: (i, 0)),
                pl.BlockSpec((1, D), lambda i, j: (0, 0)),
                pl.BlockSpec((1, D), lambda i, j: (0, 0)),
                pl.BlockSpec((D, tn), lambda i, j: (0, j))]
    if bias is not None:
        b2 = bias.reshape(1, N).astype(jnp.float32)
        if Np != N:
            b2 = jnp.pad(b2, ((0, 0), (0, Np - N)))
        inputs.append(b2)
        in_specs.append(pl.BlockSpec((1, tn), lambda i, j: (0, j)))

    kern = functools.partial(_ln_mm_kernel, has_bias=bias is not None,
                             activation=activation, cache_h=cache_h)
    out = pl.pallas_call(
        kern,
        out_shape=jax.ShapeDtypeStruct((Mp, Np), out_dtype),
        grid=(gm, gn),
        in_specs=in_specs,
        out_specs=pl.BlockSpec((tm, tn), lambda i, j: (i, j)),
        scratch_shapes=([pltpu.VMEM((tm, D), jnp.bfloat16)] if cache_h else []),
        compiler_params=pltpu.CompilerParams(
            dimension_semantics=("parallel", "arbitrary"),
            vmem_limit_bytes=_VMEM_LIMIT),
    )(*inputs)
    if (Mp, Np) != (M, N):
        out = out[:M, :N]
    return out


# ----------------------------------------------------------------------------
# Pallas kernel 3: multi-head self-attention, grid = (batch, head), head-major
# ----------------------------------------------------------------------------
def _attn_kernel(q_ref, k_ref, v_ref, o_ref, *, scale):
    q = q_ref[0, 0]                    # (N, dh) bf16, head-contiguous block
    k = k_ref[0, 0]
    v = v_ref[0, 0]
    # TODO(synk): flash-style kv tiling with running max/denominator for long N.
    s = jax.lax.dot_general(q, k, (((1,), (1,)), ((), ())),
                            preferred_element_type=jnp.float32) * scale
    s = s - jnp.max(s, axis=-1, keepdims=True)
    p = jnp.exp(s)
    p = p * pl.reciprocal(jnp.sum(p, axis=-1, keepdims=True), approx=True)
    o_ref[0, 0] = jax.lax.dot_general(p.astype(v.dtype), v,
                                      (((1,), (0,)), ((), ())),
                                      preferred_element_type=jnp.float32
                                      ).astype(o_ref.dtype)


def pallas_attention(q, k, v, scale):
    """q,k,v: (B, heads, N, dh) bf16 -> (B, heads, N, dh) bf16."""
    B, H, N, dh = q.shape
    spec = pl.BlockSpec((1, 1, N, dh), lambda b, h: (b, h, 0, 0))
    return pl.pallas_call(
        functools.partial(_attn_kernel, scale=scale),
        out_shape=jax.ShapeDtypeStruct((B, H, N, dh), jnp.bfloat16),
        grid=(B, H),
        in_specs=[spec, spec, spec],
        out_specs=spec,
        compiler_params=pltpu.CompilerParams(
            dimension_semantics=("parallel", "parallel"),
            vmem_limit_bytes=_VMEM_LIMIT),
    )(q, k, v)


# ----------------------------------------------------------------------------
# Frontend (NHWC): conv = bf16 im2col + fused matmul; BN folded; maxpool in XLA
# ----------------------------------------------------------------------------
def conv2d_3x3(x_nhwc, cp, residual=None, activation=None, act_pos='pre'):
    """3x3 same-padding conv in NHWC.  cp['w']: (9*Cin, Cout) bf16, cp['b']: f32.
    # TODO(synk): replace the XLA im2col with an in-kernel 9-tap accumulation;
    # tiny channel counts (Cin<=16) make NHWC lane-hostile in VMEM, so the
    # straightforward in-kernel variant would lane-pad badly — needs a
    # W-on-lanes stencil layout."""
    B, H, W, C = x_nhwc.shape
    xb = x_nhwc if x_nhwc.dtype == jnp.bfloat16 else x_nhwc.astype(jnp.bfloat16)
    xp = jnp.pad(xb, ((0, 0), (1, 1), (1, 1), (0, 0)))
    cols = [xp[:, kh:kh + H, kw:kw + W, :] for kh in range(3) for kw in range(3)]
    patches = jnp.stack(cols, axis=3).reshape(B * H * W, 9 * C)
    out = matmul_fused(patches, cp['w'], bias=cp['b'], residual=residual,
                       activation=activation, act_pos=act_pos,
                       out_dtype=jnp.bfloat16)
    return out.reshape(B, H, W, cp['w'].shape[1])


def maxpool_nhwc(x, pool):
    ph, pw = pool
    B, H, W, C = x.shape
    Ho, Wo = H // ph, W // pw
    x = x[:, :Ho * ph, :Wo * pw, :]
    return jnp.max(x.reshape(B, Ho, ph, Wo, pw, C), axis=(2, 4))


def res_block(x, p, pooling):
    """Res2DMaxPoolModule (eval): BN folded into convs, residual-add + ReLU fused
    into the second conv's matmul epilogue.  Everything runs in bf16."""
    B, H, W, C = x.shape
    h1 = conv2d_3x3(x, p['conv1'], activation='relu')
    if 'conv3' in p:
        shortcut = conv2d_3x3(x, p['conv3']).reshape(B * H * W, -1)
    else:
        shortcut = x.reshape(B * H * W, C)
    out = conv2d_3x3(h1, p['conv2'], residual=shortcut,
                     activation='relu', act_pos='post')
    return maxpool_nhwc(out, pooling)


def frontend_forward(x_nhwc, fp):
    x = res_block(x_nhwc, fp['layer1'], (2, 2))
    x = res_block(x, fp['layer2'], (2, 2))
    x = res_block(x, fp['layer3'], (2, 1))
    B, F3, T3, C = x.shape
    # matches PyTorch (b,c,f,t).permute(0,3,1,2).view(b,t,c*f)
    x = jnp.transpose(x, (0, 2, 3, 1)).reshape(B * T3, C * F3)
    x = matmul_fused(x, fp['fc_w'], bias=fp['fc_b'], out_dtype=jnp.float32)
    return x.reshape(B, T3, -1)


# ----------------------------------------------------------------------------
# Mel spectrogram (torchaudio-like); dB + input-BN fused into the mel matmul
# ----------------------------------------------------------------------------
def mel_filterbank(n_freqs, n_mels, sample_rate, f_min, f_max):
    def hz_to_mel(f):
        return 2595.0 * jnp.log10(1.0 + f / 700.0)

    def mel_to_hz(m):
        return 700.0 * (10.0 ** (m / 2595.0) - 1.0)

    all_freqs = jnp.linspace(0.0, sample_rate / 2.0, n_freqs)
    m_pts = jnp.linspace(hz_to_mel(jnp.float32(f_min)),
                         hz_to_mel(jnp.float32(f_max)), n_mels + 2)
    f_pts = mel_to_hz(m_pts)
    f_diff = f_pts[1:] - f_pts[:-1]
    slopes = f_pts[None, :] - all_freqs[:, None]
    down = -slopes[:, :-2] / f_diff[:-1]
    up = slopes[:, 2:] / f_diff[1:]
    return jnp.maximum(0.0, jnp.minimum(down, up)).astype(jnp.float32)


def melspectrogram_db(wave, n_fft, hop, fb, bn_scale, bn_shift):
    # TODO(synk): reflect-pad / framing / rFFT have no Pallas equivalent; XLA.
    B, T = wave.shape
    pad = n_fft // 2
    xp = jnp.pad(wave, ((0, 0), (pad, pad)), mode='reflect')
    n_frames = 1 + (xp.shape[1] - n_fft) // hop
    idx = jnp.arange(n_frames)[:, None] * hop + jnp.arange(n_fft)[None, :]
    frames = xp[:, idx]                                   # (B, frames, n_fft)
    window = 0.5 - 0.5 * jnp.cos(2.0 * jnp.pi * jnp.arange(n_fft) / n_fft)
    spec = jnp.fft.rfft(frames * window, axis=-1)
    power = (jnp.abs(spec) ** 2).astype(jnp.float32)      # (B, frames, n_freqs)
    n_freqs = power.shape[-1]
    # fused: power @ mel_fb  ->  10*log10(max(., 1e-10))  ->  input-BN affine
    mel = matmul_fused(power.reshape(B * n_frames, n_freqs), fb,
                       elementwise_fn=_amp_to_db,
                       affine=(bn_scale, bn_shift),
                       out_dtype=jnp.bfloat16)
    return mel.reshape(B, n_frames, fb.shape[1]).transpose(0, 2, 1)


# ----------------------------------------------------------------------------
# Transformer blocks
# ----------------------------------------------------------------------------
def attention_block(x, p, heads):
    B, N, D = x.shape
    assert D % heads == 0
    dh = D // heads
    x2 = x.reshape(B * N, D)                                        # f32
    qkv = ln_matmul_fused(x2, p['ln_g'], p['ln_b'], p['qkv_w'],
                          out_dtype=jnp.bfloat16)                   # (B*N, 3D)
    # head-major layout for the attention kernel (one bf16 XLA transpose)
    qkv = qkv.reshape(B, N, 3, heads, dh).transpose(2, 0, 3, 1, 4)  # (3,B,h,N,dh)
    o = pallas_attention(qkv[0], qkv[1], qkv[2], float(dh) ** (-0.5))
    o = o.transpose(0, 2, 1, 3).reshape(B * N, D)                   # (B*N, D) bf16
    out = matmul_fused(o, p['out_w'], bias=p['out_b'], residual=x2,
                       out_dtype=jnp.float32)                       # + residual fused
    return out.reshape(B, N, D)


def ff_block(x, p):
    B, N, D = x.shape
    x2 = x.reshape(B * N, D)
    h = ln_matmul_fused(x2, p['ln_g'], p['ln_b'], p['w1'], bias=p['b1'],
                        activation='gelu', out_dtype=jnp.bfloat16)
    out = matmul_fused(h, p['w2'], bias=p['b2'], residual=x2,
                       out_dtype=jnp.float32)
    return out.reshape(B, N, D)


def music_tagging_transformer_forward(wave, params, cfg):
    mel_db = melspectrogram_db(wave, cfg['n_fft'], cfg['hop'], params['mel_fb'],
                               params['mel_scale'], params['mel_shift'])
    x = mel_db[:, :, :, None]                         # (B, F, T, 1) NHWC, bf16
    x = frontend_forward(x, params['frontend'])       # (B, T3, D) f32
    B, T, D = x.shape
    cls = jnp.broadcast_to(params['cls_token'].reshape(1, 1, D), (B, 1, D))
    x = jnp.concatenate([cls, x], axis=1)
    n = x.shape[1]
    assert n <= params['pos_embedding'].shape[1], "sequence exceeds max_len + 1"
    x = x + params['pos_embedding'][:, :n]
    # dropout: identity in eval mode
    for lp in params['layers']:
        x = attention_block(x, lp['attn'], cfg['heads'])
        x = ff_block(x, lp['ff'])
    cls_out = x[:, 0]                                 # (B, D)
    # mlp_head (LayerNorm + Linear) + sigmoid fused into one tiny kernel
    return ln_matmul_fused(cls_out, params['head_ln_g'], params['head_ln_b'],
                           params['head_w'], bias=params['head_b'],
                           activation='sigmoid', out_dtype=jnp.float32)


# ----------------------------------------------------------------------------
# Parameter preparation: fold eval BatchNorm, pre-transpose / pre-cast weights
# ----------------------------------------------------------------------------
def _fold_bn_into_conv(w, b, bn, eps=1e-5):
    gamma, beta, mean, var = bn
    scale = gamma / jnp.sqrt(var + eps)
    return w * scale[:, None, None, None], (b - mean) * scale + beta


def prepare_params(raw, eps=1e-5):
    """One-time (outside jit) prep: BN folding, im2col weight reshape, weight
    transposes and bf16 casts, input-BN scalars as per-mel-bin affine rows."""
    def prep_conv(w, b, bn):
        w, b = _fold_bn_into_conv(w, b, bn, eps)
        cout = w.shape[0]
        wm = jnp.transpose(w, (2, 3, 1, 0)).reshape(-1, cout)   # (9*Cin, Cout)
        return {'w': wm.astype(jnp.bfloat16), 'b': b.astype(jnp.float32)}

    fe_raw = raw['frontend']
    frontend = {}
    for name in ('layer1', 'layer2', 'layer3'):
        lp = fe_raw[name]
        d = {'conv1': prep_conv(lp['conv1_w'], lp['conv1_b'], lp['bn1']),
             'conv2': prep_conv(lp['conv2_w'], lp['conv2_b'], lp['bn2'])}
        if 'conv3_w' in lp:
            d['conv3'] = prep_conv(lp['conv3_w'], lp['conv3_b'], lp['bn3'])
        frontend[name] = d
    frontend['fc_w'] = fe_raw['fc_w'].T.astype(jnp.bfloat16)
    frontend['fc_b'] = fe_raw['fc_b'].astype(jnp.float32)

    # input BN (1 channel) -> scalar affine, broadcast to per-mel-bin rows so it
    # can ride the mel matmul's bias/affine epilogue path
    g, b, m, v = fe_raw['input_bn']
    scale = g / jnp.sqrt(v + eps)
    shift = b - m * scale
    n_mels = raw['mel_fb'].shape[1]

    layers = []
    for lp in raw['layers']:
        a, f = lp['attn'], lp['ff']
        layers.append({
            'attn': {'ln_g': a['ln_g'], 'ln_b': a['ln_b'],
                     'qkv_w': a['qkv_w'].T.astype(jnp.bfloat16),
                     'out_w': a['out_w'].T.astype(jnp.bfloat16),
                     'out_b': a['out_b'].astype(jnp.float32)},
            'ff': {'ln_g': f['ln_g'], 'ln_b': f['ln_b'],
                   'w1': f['w1'].T.astype(jnp.bfloat16),
                   'b1': f['b1'].astype(jnp.float32),
                   'w2': f['w2'].T.astype(jnp.bfloat16),
                   'b2': f['b2'].astype(jnp.float32)},
        })

    return {
        'mel_fb': raw['mel_fb'].astype(jnp.bfloat16),
        'mel_scale': jnp.full((n_mels,), scale[0], jnp.float32),
        'mel_shift': jnp.full((n_mels,), shift[0], jnp.float32),
        'frontend': frontend,
        'pos_embedding': raw['pos_embedding'].astype(jnp.float32),
        'cls_token': raw['cls_token'].astype(jnp.float32),
        'layers': layers,
        'head_ln_g': raw['head_ln_g'],
        'head_ln_b': raw['head_ln_b'],
        'head_w': raw['head_w'].T.astype(jnp.bfloat16),
        'head_b': raw['head_b'].astype(jnp.float32),
    }


# ----------------------------------------------------------------------------
# Deterministic parameter init (shapes follow the PyTorch __init__)
# ----------------------------------------------------------------------------
def init_params(key, cfg):
    D = cfg['attention_ndim']
    C = cfg['conv_ndim']
    n_mels = cfg['n_mels']
    mlp = 4 * D
    ks = iter(jax.random.split(key, 256))

    def nrm(shape, scale):
        return jax.random.normal(next(ks), shape, jnp.float32) * scale

    def linear_p(din, dout, bias=True):
        w = nrm((dout, din), 1.0 / math.sqrt(din))
        b = nrm((dout,), 0.01) if bias else None
        return w, b

    def conv_p(cin, cout):
        return nrm((cout, cin, 3, 3), 1.0 / math.sqrt(cin * 9)), nrm((cout,), 0.01)

    def bn_p(c):  # (gamma, beta, running_mean, running_var) -- eval semantics
        gamma = 1.0 + 0.1 * jax.random.normal(next(ks), (c,), jnp.float32)
        beta = 0.1 * jax.random.normal(next(ks), (c,), jnp.float32)
        mean = 0.1 * jax.random.normal(next(ks), (c,), jnp.float32)
        var = 1.0 + 0.5 * jax.random.uniform(next(ks), (c,), jnp.float32)
        return (gamma, beta, mean, var)

    def res_p(cin, cout):
        p = {}
        p['conv1_w'], p['conv1_b'] = conv_p(cin, cout)
        p['bn1'] = bn_p(cout)
        p['conv2_w'], p['conv2_b'] = conv_p(cout, cout)
        p['bn2'] = bn_p(cout)
        if cin != cout:
            p['conv3_w'], p['conv3_b'] = conv_p(cin, cout)
            p['bn3'] = bn_p(cout)
        return p

    frontend = {
        'input_bn': bn_p(1),
        'layer1': res_p(1, C),
        'layer2': res_p(C, C),
        'layer3': res_p(C, C),
    }
    fc_in = (n_mels // 2 // 2 // 2) * C
    frontend['fc_w'], frontend['fc_b'] = linear_p(fc_in, D)

    layers = []
    for _ in range(cfg['nlayers']):
        qkv_w, _ = linear_p(D, 3 * D, bias=False)
        out_w, out_b = linear_p(D, D)
        w1, b1 = linear_p(D, mlp)
        w2, b2 = linear_p(mlp, D)
        layers.append({
            'attn': {'ln_g': jnp.ones((D,), jnp.float32),
                     'ln_b': jnp.zeros((D,), jnp.float32),
                     'qkv_w': qkv_w, 'out_w': out_w, 'out_b': out_b},
            'ff': {'ln_g': jnp.ones((D,), jnp.float32),
                   'ln_b': jnp.zeros((D,), jnp.float32),
                   'w1': w1, 'b1': b1, 'w2': w2, 'b2': b2},
        })

    head_w, head_b = linear_p(D, cfg['n_seq_cls'])
    return {
        'mel_fb': mel_filterbank(cfg['n_fft'] // 2 + 1, n_mels, cfg['sample_rate'],
                                 cfg['f_min'], cfg['f_max']),
        'frontend': frontend,
        'pos_embedding': nrm((1, cfg['max_len'] + 1, D), 0.02),
        'cls_token': nrm((D,), 0.02),
        'layers': layers,
        'head_ln_g': jnp.ones((D,), jnp.float32),
        'head_ln_b': jnp.zeros((D,), jnp.float32),
        'head_w': head_w,
        'head_b': head_b,
    }


if __name__ == "__main__":
    cfg = dict(conv_ndim=8, n_mels=32, sample_rate=8000, n_fft=64, hop=32,
               f_min=0.0, f_max=4000.0, attention_ndim=32, heads=4, nlayers=2,
               max_len=64, n_seq_cls=1)
    key = jax.random.PRNGKey(0)
    pkey, xkey = jax.random.split(key)
    params = prepare_params(init_params(pkey, cfg))
    wave = jax.random.normal(xkey, (2, 1024), jnp.float32)   # (batch, time)

    fwd = jax.jit(lambda w_, p_: music_tagging_transformer_forward(w_, p_, cfg))
    out = jax.block_until_ready(fwd(wave, params))
    assert out.shape == (2, cfg['n_seq_cls'])
    assert bool(jnp.all(jnp.isfinite(out)))
    print("KERNEL_OK")
</pallas_src>

<mosaic_0001>
module attributes {stable_mosaic.version = 11 : i64} {
  func.func @_mm1_kernel(%arg0: i32, %arg1: i32, %arg2: memref<72x33xbf16, #tpu.memory_space<vmem>>, %arg3: memref<33x32xbf16, #tpu.memory_space<vmem>>, %arg4: memref<1x32xf32, #tpu.memory_space<vmem>>, %arg5: memref<1x32xf32, #tpu.memory_space<vmem>>, %arg6: memref<72x32xbf16, #tpu.memory_space<vmem>>) attributes {dimension_semantics = [#tpu.dimension_semantics<parallel>, #tpu.dimension_semantics<parallel>], iteration_bounds = array<i64: 1, 1>, scalar_prefetch = 0 : i64, scratch_operands = 0 : i64, tpu.core_type = #tpu.core_type<tc>, window_params = [{transform_indices = @transform_0, window_bounds = array<i64: 72, 33>}, {transform_indices = @transform_1, window_bounds = array<i64: 33, 32>}, {transform_indices = @transform_2, window_bounds = array<i64: 1, 32>}, {transform_indices = @transform_3, window_bounds = array<i64: 1, 32>}, {transform_indices = @transform_4, window_bounds = array<i64: 72, 32>}]} {
    %c0 = arith.constant 0 : index
    %c0_0 = arith.constant 0 : index
    %0 = vector.load %arg2[%c0, %c0_0] : memref<72x33xbf16, #tpu.memory_space<vmem>>, vector<72x33xbf16>
    %c0_1 = arith.constant 0 : index
    %c0_2 = arith.constant 0 : index
    %1 = vector.load %arg3[%c0_1, %c0_2] : memref<33x32xbf16, #tpu.memory_space<vmem>>, vector<33x32xbf16>
    %cst = arith.constant dense<0.000000e+00> : vector<72x32xf32>
    %2 = tpu.matmul %0, %1, %cst {dimension_numbers = #tpu.dot_dimension_numbers<[1], [0], [0], [1], [0, 0, 1, 1], [], []>} : vector<72x33xbf16>, vector<33x32xbf16>, vector<72x32xf32> -> vector<72x32xf32>
    %cst_3 = arith.constant 1.000000e-10 : f32
    %3 = vector.broadcast %cst_3 : f32 to vector<72x32xf32>
    %4 = arith.maximumf %2, %3 : vector<72x32xf32>
    %5 = math.log %4 : vector<72x32xf32>
    %cst_4 = arith.constant 4.34294462 : f32
    %6 = vector.broadcast %cst_4 : f32 to vector<72x32xf32>
    %7 = arith.mulf %6, %5 : vector<72x32xf32>
    %c0_5 = arith.constant 0 : index
    %c0_6 = arith.constant 0 : index
    %8 = vector.load %arg4[%c0_5, %c0_6] : memref<1x32xf32, #tpu.memory_space<vmem>>, vector<1x32xf32>
    %9 = vector.broadcast %8 : vector<1x32xf32> to vector<72x32xf32>
    %10 = arith.mulf %7, %9 : vector<72x32xf32>
    %c0_7 = arith.constant 0 : index
    %c0_8 = arith.constant 0 : index
    %11 = vector.load %arg5[%c0_7, %c0_8] : memref<1x32xf32, #tpu.memory_space<vmem>>, vector<1x32xf32>
    %12 = vector.broadcast %11 : vector<1x32xf32> to vector<72x32xf32>
    %13 = arith.addf %10, %12 : vector<72x32xf32>
    %14 = arith.truncf %13 : vector<72x32xf32> to vector<72x32xbf16>
    %c0_9 = arith.constant 0 : index
    %c0_10 = arith.constant 0 : index
    %15 = vector.load %arg6[%c0_9, %c0_10] : memref<72x32xbf16, #tpu.memory_space<vmem>>, vector<72x32xbf16>
    tpu.vector_store %arg6[%c0_9, %c0_10], %14 {strides = array<i32>} : memref<72x32xbf16, #tpu.memory_space<vmem>>, vector<72x32xbf16>,
    return
  }
  func.func @transform_0(%arg0: i32, %arg1: i32) -> (i32, i32) {
    %c0_i32 = arith.constant 0 : i32
    %c0_i32_0 = arith.constant 0 : i32
    return %arg0, %c0_i32 : i32, i32
  }
  func.func @transform_1(%arg0: i32, %arg1: i32) -> (i32, i32) {
    %c0_i32 = arith.constant 0 : i32
    %c0_i32_0 = arith.constant 0 : i32
    return %c0_i32, %arg1 : i32, i32
  }
  func.func @transform_2(%arg0: i32, %arg1: i32) -> (i32, i32) {
    %c0_i32 = arith.constant 0 : i32
    %c0_i32_0 = arith.constant 0 : i32
    return %c0_i32, %arg1 : i32, i32
  }
  func.func @transform_3(%arg0: i32, %arg1: i32) -> (i32, i32) {
    %c0_i32 = arith.constant 0 : i32
    %c0_i32_0 = arith.constant 0 : i32
    return %c0_i32, %arg1 : i32, i32
  }
  func.func @transform_4(%arg0: i32, %arg1: i32) -> (i32, i32) {
    %c0_i32 = arith.constant 0 : i32
    return %arg0, %arg1 : i32, i32
  }
}

module attributes {stable_mosaic.version = 11 : i64} {
  func.func @_mm1_kernel(%arg0: i32, %arg1: i32, %arg2: memref<512x9xbf16, #tpu.memory_space<vmem>>, %arg3: memref<9x8xbf16, #tpu.memory_space<vmem>>, %arg4: memref<1x8xf32, #tpu.memory_space<vmem>>, %arg5: memref<512x8xbf16, #tpu.memory_space<vmem>>) attributes {dimension_semantics = [#tpu.dimension_semantics<parallel>, #tpu.dimension_semantics<parallel>], iteration_bounds = array<i64: 5, 1>, scalar_prefetch = 0 : i64, scratch_operands = 0 : i64, tpu.core_type = #tpu.core_type<tc>, window_params = [{transform_indices = @transform_0, window_bounds = array<i64: 512, 9>}, {transform_indices = @transform_1, window_bounds = array<i64: 9, 8>}, {transform_indices = @transform_2, window_bounds = array<i64: 1, 8>}, {transform_indices = @transform_3, window_bounds = array<i64: 512, 8>}]} {
    %c0 = arith.constant 0 : index
    %c0_0 = arith.constant 0 : index
    %0 = vector.load %arg2[%c0, %c0_0] : memref<512x9xbf16, #tpu.memory_space<vmem>>, vector<512x9xbf16>
    %c0_1 = arith.constant 0 : index
    %c0_2 = arith.constant 0 : index
    %1 = vector.load %arg3[%c0_1, %c0_2] : memref<9x8xbf16, #tpu.memory_space<vmem>>, vector<9x8xbf16>
    %cst = arith.constant dense<0.000000e+00> : vector<512x8xf32>
    %2 = tpu.matmul %0, %1, %cst {dimension_numbers = #tpu.dot_dimension_numbers<[1], [0], [0], [1], [0, 0, 1, 1], [], []>} : vector<512x9xbf16>, vector<9x8xbf16>, vector<512x8xf32> -> vector<512x8xf32>
    %c0_3 = arith.constant 0 : index
    %c0_4 = arith.constant 0 : index
    %3 = vector.load %arg4[%c0_3, %c0_4] : memref<1x8xf32, #tpu.memory_space<vmem>>, vector<1x8xf32>
    %4 = vector.broadcast %3 : vector<1x8xf32> to vector<512x8xf32>
    %5 = arith.addf %2, %4 : vector<512x8xf32>
    %cst_5 = arith.constant 0.000000e+00 : f32
    %6 = vector.broadcast %cst_5 : f32 to vector<512x8xf32>
    %7 = arith.maximumf %5, %6 : vector<512x8xf32>
    %8 = arith.truncf %7 : vector<512x8xf32> to vector<512x8xbf16>
    %c0_6 = arith.constant 0 : index
    %c0_7 = arith.constant 0 : index
    %9 = vector.load %arg5[%c0_6, %c0_7] : memref<512x8xbf16, #tpu.memory_space<vmem>>, vector<512x8xbf16>
    tpu.vector_store %arg5[%c0_6, %c0_7], %8 {strides = array<i32>} : memref<512x8xbf16, #tpu.memory_space<vmem>>, vector<512x8xbf16>,
    return
  }
  func.func @transform_0(%arg0: i32, %arg1: i32) -> (i32, i32) {
    %c0_i32 = arith.constant 0 : i32
    %c0_i32_0 = arith.constant 0 : i32
    return %arg0, %c0_i32 : i32, i32
  }
  func.func @transform_1(%arg0: i32, %arg1: i32) -> (i32, i32) {
    %c0_i32 = arith.constant 0 : i32
    %c0_i32_0 = arith.constant 0 : i32
    return %c0_i32, %arg1 : i32, i32
  }
  func.func @transform_2(%arg0: i32, %arg1: i32) -> (i32, i32) {
    %c0_i32 = arith.constant 0 : i32
    %c0_i32_0 = arith.constant 0 : i32
    return %c0_i32, %arg1 : i32, i32
  }
  func.func @transform_3(%arg0: i32, %arg1: i32) -> (i32, i32) {
    %c0_i32 = arith.constant 0 : i32
    return %arg0, %arg1 : i32, i32
  }
}

module attributes {stable_mosaic.version = 11 : i64} {
  func.func @_mm1_kernel(%arg0: i32, %arg1: i32, %arg2: memref<512x9xbf16, #tpu.memory_space<vmem>>, %arg3: memref<9x8xbf16, #tpu.memory_space<vmem>>, %arg4: memref<1x8xf32, #tpu.memory_space<vmem>>, %arg5: memref<512x8xbf16, #tpu.memory_space<vmem>>) attributes {dimension_semantics = [#tpu.dimension_semantics<parallel>, #tpu.dimension_semantics<parallel>], iteration_bounds = array<i64: 5, 1>, scalar_prefetch = 0 : i64, scratch_operands = 0 : i64, tpu.core_type = #tpu.core_type<tc>, window_params = [{transform_indices = @transform_0, window_bounds = array<i64: 512, 9>}, {transform_indices = @transform_1, window_bounds = array<i64: 9, 8>}, {transform_indices = @transform_2, window_bounds = array<i64: 1, 8>}, {transform_indices = @transform_3, window_bounds = array<i64: 512, 8>}]} {
    %c0 = arith.constant 0 : index
    %c0_0 = arith.constant 0 : index
    %0 = vector.load %arg2[%c0, %c0_0] : memref<512x9xbf16, #tpu.memory_space<vmem>>, vector<512x9xbf16>
    %c0_1 = arith.constant 0 : index
    %c0_2 = arith.constant 0 : index
    %1 = vector.load %arg3[%c0_1, %c0_2] : memref<9x8xbf16, #tpu.memory_space<vmem>>, vector<9x8xbf16>
    %cst = arith.constant dense<0.000000e+00> : vector<512x8xf32>
    %2 = tpu.matmul %0, %1, %cst {dimension_numbers = #tpu.dot_dimension_numbers<[1], [0], [0], [1], [0, 0, 1, 1], [], []>} : vector<512x9xbf16>, vector<9x8xbf16>, vector<512x8xf32> -> vector<512x8xf32>
    %c0_3 = arith.constant 0 : index
    %c0_4 = arith.constant 0 : index
    %3 = vector.load %arg4[%c0_3, %c0_4] : memref<1x8xf32, #tpu.memory_space<vmem>>, vector<1x8xf32>
    %4 = vector.broadcast %3 : vector<1x8xf32> to vector<512x8xf32>
    %5 = arith.addf %2, %4 : vector<512x8xf32>
    %6 = arith.truncf %5 : vector<512x8xf32> to vector<512x8xbf16>
    %c0_5 = arith.constant 0 : index
    %c0_6 = arith.constant 0 : index
    %7 = vector.load %arg5[%c0_5, %c0_6] : memref<512x8xbf16, #tpu.memory_space<vmem>>, vector<512x8xbf16>
    tpu.vector_store %arg5[%c0_5, %c0_6], %6 {strides = array<i32>} : memref<512x8xbf16, #tpu.memory_space<vmem>>, vector<512x8xbf16>,
    return
  }
  func.func @transform_0(%arg0: i32, %arg1: i32) -> (i32, i32) {
    %c0_i32 = arith.constant 0 : i32
    %c0_i32_0 = arith.constant 0 : i32
    return %arg0, %c0_i32 : i32, i32
  }
  func.func @transform_1(%arg0: i32, %arg1: i32) -> (i32, i32) {
    %c0_i32 = arith.constant 0 : i32
    %c0_i32_0 = arith.constant 0 : i32
    return %c0_i32, %arg1 : i32, i32
  }
  func.func @transform_2(%arg0: i32, %arg1: i32) -> (i32, i32) {
    %c0_i32 = arith.constant 0 : i32
    %c0_i32_0 = arith.constant 0 : i32
    return %c0_i32, %arg1 : i32, i32
  }
  func.func @transform_3(%arg0: i32, %arg1: i32) -> (i32, i32) {
    %c0_i32 = arith.constant 0 : i32
    return %arg0, %arg1 : i32, i32
  }
}

module attributes {stable_mosaic.version = 11 : i64} {
  func.func @_mm1_kernel(%arg0: i32, %arg1: i32, %arg2: memref<512x72xbf16, #tpu.memory_space<vmem>>, %arg3: memref<72x8xbf16, #tpu.memory_space<vmem>>, %arg4: memref<1x8xf32, #tpu.memory_space<vmem>>, %arg5: memref<512x8xbf16, #tpu.memory_space<vmem>>, %arg6: memref<512x8xbf16, #tpu.memory_space<vmem>>) attributes {dimension_semantics = [#tpu.dimension_semantics<parallel>, #tpu.dimension_semantics<parallel>], iteration_bounds = array<i64: 5, 1>, scalar_prefetch = 0 : i64, scratch_operands = 0 : i64, tpu.core_type = #tpu.core_type<tc>, window_params = [{transform_indices = @transform_0, window_bounds = array<i64: 512, 72>}, {transform_indices = @transform_1, window_bounds = array<i64: 72, 8>}, {transform_indices = @transform_2, window_bounds = array<i64: 1, 8>}, {transform_indices = @transform_3, window_bounds = array<i64: 512, 8>}, {transform_indices = @transform_4, window_bounds = array<i64: 512, 8>}]} {
    %c0 = arith.constant 0 : index
    %c0_0 = arith.constant 0 : index
    %0 = vector.load %arg2[%c0, %c0_0] : memref<512x72xbf16, #tpu.memory_space<vmem>>, vector<512x72xbf16>
    %c0_1 = arith.constant 0 : index
    %c0_2 = arith.constant 0 : index
    %1 = vector.load %arg3[%c0_1, %c0_2] : memref<72x8xbf16, #tpu.memory_space<vmem>>, vector<72x8xbf16>
    %cst = arith.constant dense<0.000000e+00> : vector<512x8xf32>
    %2 = tpu.matmul %0, %1, %cst {dimension_numbers = #tpu.dot_dimension_numbers<[1], [0], [0], [1], [0, 0, 1, 1], [], []>} : vector<512x72xbf16>, vector<72x8xbf16>, vector<512x8xf32> -> vector<512x8xf32>
    %c0_3 = arith.constant 0 : index
    %c0_4 = arith.constant 0 : index
    %3 = vector.load %arg4[%c0_3, %c0_4] : memref<1x8xf32, #tpu.memory_space<vmem>>, vector<1x8xf32>
    %4 = vector.broadcast %3 : vector<1x8xf32> to vector<512x8xf32>
    %5 = arith.addf %2, %4 : vector<512x8xf32>
    %c0_5 = arith.constant 0 : index
    %c0_6 = arith.constant 0 : index
    %6 = vector.load %arg5[%c0_5, %c0_6] : memref<512x8xbf16, #tpu.memory_space<vmem>>, vector<512x8xbf16>
    %7 = arith.extf %6 : vector<512x8xbf16> to vector<512x8xf32>
    %8 = arith.addf %5, %7 : vector<512x8xf32>
    %cst_7 = arith.constant 0.000000e+00 : f32
    %9 = vector.broadcast %cst_7 : f32 to vector<512x8xf32>
    %10 = arith.maximumf %8, %9 : vector<512x8xf32>
    %11 = arith.truncf %10 : vector<512x8xf32> to vector<512x8xbf16>
    %c0_8 = arith.constant 0 : index
    %c0_9 = arith.constant 0 : index
    %12 = vector.load %arg6[%c0_8, %c0_9] : memref<512x8xbf16, #tpu.memory_space<vmem>>, vector<512x8xbf16>
    tpu.vector_store %arg6[%c0_8, %c0_9], %11 {strides = array<i32>} : memref<512x8xbf16, #tpu.memory_space<vmem>>, vector<512x8xbf16>,
    return
  }
  func.func @transform_0(%arg0: i32, %arg1: i32) -> (i32, i32) {
    %c0_i32 = arith.constant 0 : i32
    %c0_i32_0 = arith.constant 0 : i32
    return %arg0, %c0_i32 : i32, i32
  }
  func.func @transform_1(%arg0: i32, %arg1: i32) -> (i32, i32) {
    %c0_i32 = arith.constant 0 : i32
    %c0_i32_0 = arith.constant 0 : i32
    return %c0_i32, %arg1 : i32, i32
  }
  func.func @transform_2(%arg0: i32, %arg1: i32) -> (i32, i32) {
    %c0_i32 = arith.constant 0 : i32
    %c0_i32_0 = arith.constant 0 : i32
    return %c0_i32, %arg1 : i32, i32
  }
  func.func @transform_3(%arg0: i32, %arg1: i32) -> (i32, i32) {
    %c0_i32 = arith.constant 0 : i32
    return %arg0, %arg1 : i32, i32
  }
  func.func @transform_4(%arg0: i32, %arg1: i32) -> (i32, i32) {
    %c0_i32 = arith.constant 0 : i32
    return %arg0, %arg1 : i32, i32
  }
}

module attributes {stable_mosaic.version = 11 : i64} {
  func.func @_mm1_kernel(%arg0: i32, %arg1: i32, %arg2: memref<512x72xbf16, #tpu.memory_space<vmem>>, %arg3: memref<72x8xbf16, #tpu.memory_space<vmem>>, %arg4: memref<1x8xf32, #tpu.memory_space<vmem>>, %arg5: memref<512x8xbf16, #tpu.memory_space<vmem>>) attributes {dimension_semantics = [#tpu.dimension_semantics<parallel>, #tpu.dimension_semantics<parallel>], iteration_bounds = array<i64: 1, 1>, scalar_prefetch = 0 : i64, scratch_operands = 0 : i64, tpu.core_type = #tpu.core_type<tc>, window_params = [{transform_indices = @transform_0, window_bounds = array<i64: 512, 72>}, {transform_indices = @transform_1, window_bounds = array<i64: 72, 8>}, {transform_indices = @transform_2, window_bounds = array<i64: 1, 8>}, {transform_indices = @transform_3, window_bounds = array<i64: 512, 8>}]} {
    %c0 = arith.constant 0 : index
    %c0_0 = arith.constant 0 : index
    %0 = vector.load %arg2[%c0, %c0_0] : memref<512x72xbf16, #tpu.memory_space<vmem>>, vector<512x72xbf16>
    %c0_1 = arith.constant 0 : index
    %c0_2 = arith.constant 0 : index
    %1 = vector.load %arg3[%c0_1, %c0_2] : memref<72x8xbf16, #tpu.memory_space<vmem>>, vector<72x8xbf16>
    %cst = arith.constant dense<0.000000e+00> : vector<512x8xf32>
    %2 = tpu.matmul %0, %1, %cst {dimension_numbers = #tpu.dot_dimension_numbers<[1], [0], [0], [1], [0, 0, 1, 1], [], []>} : vector<512x72xbf16>, vector<72x8xbf16>, vector<512x8xf32> -> vector<512x8xf32>
    %c0_3 = arith.constant 0 : index
    %c0_4 = arith.constant 0 : index
    %3 = vector.load %arg4[%c0_3, %c0_4] : memref<1x8xf32, #tpu.memory_space<vmem>>, vector<1x8xf32>
    %4 = vector.broadcast %3 : vector<1x8xf32> to vector<512x8xf32>
    %5 = arith.addf %2, %4 : vector<512x8xf32>
    %cst_5 = arith.constant 0.000000e+00 : f32
    %6 = vector.broadcast %cst_5 : f32 to vector<512x8xf32>
    %7 = arith.maximumf %5, %6 : vector<512x8xf32>
    %8 = arith.truncf %7 : vector<512x8xf32> to vector<512x8xbf16>
    %c0_6 = arith.constant 0 : index
    %c0_7 = arith.constant 0 : index
    %9 = vector.load %arg5[%c0_6, %c0_7] : memref<512x8xbf16, #tpu.memory_space<vmem>>, vector<512x8xbf16>
    tpu.vector_store %arg5[%c0_6, %c0_7], %8 {strides = array<i32>} : memref<512x8xbf16, #tpu.memory_space<vmem>>, vector<512x8xbf16>,
    return
  }
  func.func @transform_0(%arg0: i32, %arg1: i32) -> (i32, i32) {
    %c0_i32 = arith.constant 0 : i32
    %c0_i32_0 = arith.constant 0 : i32
    return %arg0, %c0_i32 : i32, i32
  }
  func.func @transform_1(%arg0: i32, %arg1: i32) -> (i32, i32) {
    %c0_i32 = arith.constant 0 : i32
    %c0_i32_0 = arith.constant 0 : i32
    return %c0_i32, %arg1 : i32, i32
  }
  func.func @transform_2(%arg0: i32, %arg1: i32) -> (i32, i32) {
    %c0_i32 = arith.constant 0 : i32
    %c0_i32_0 = arith.constant 0 : i32
    return %c0_i32, %arg1 : i32, i32
  }
  func.func @transform_3(%arg0: i32, %arg1: i32) -> (i32, i32) {
    %c0_i32 = arith.constant 0 : i32
    return %arg0, %arg1 : i32, i32
  }
}

module attributes {stable_mosaic.version = 11 : i64} {
  func.func @_mm1_kernel(%arg0: i32, %arg1: i32, %arg2: memref<512x72xbf16, #tpu.memory_space<vmem>>, %arg3: memref<72x8xbf16, #tpu.memory_space<vmem>>, %arg4: memref<1x8xf32, #tpu.memory_space<vmem>>, %arg5: memref<512x8xbf16, #tpu.memory_space<vmem>>, %arg6: memref<512x8xbf16, #tpu.memory_space<vmem>>) attributes {dimension_semantics = [#tpu.dimension_semantics<parallel>, #tpu.dimension_semantics<parallel>], iteration_bounds = array<i64: 1, 1>, scalar_prefetch = 0 : i64, scratch_operands = 0 : i64, tpu.core_type = #tpu.core_type<tc>, window_params = [{transform_indices = @transform_0, window_bounds = array<i64: 512, 72>}, {transform_indices = @transform_1, window_bounds = array<i64: 72, 8>}, {transform_indices = @transform_2, window_bounds = array<i64: 1, 8>}, {transform_indices = @transform_3, window_bounds = array<i64: 512, 8>}, {transform_indices = @transform_4, window_bounds = array<i64: 512, 8>}]} {
    %c0 = arith.constant 0 : index
    %c0_0 = arith.constant 0 : index
    %0 = vector.load %arg2[%c0, %c0_0] : memref<512x72xbf16, #tpu.memory_space<vmem>>, vector<512x72xbf16>
    %c0_1 = arith.constant 0 : index
    %c0_2 = arith.constant 0 : index
    %1 = vector.load %arg3[%c0_1, %c0_2] : memref<72x8xbf16, #tpu.memory_space<vmem>>, vector<72x8xbf16>
    %cst = arith.constant dense<0.000000e+00> : vector<512x8xf32>
    %2 = tpu.matmul %0, %1, %cst {dimension_numbers = #tpu.dot_dimension_numbers<[1], [0], [0], [1], [0, 0, 1, 1], [], []>} : vector<512x72xbf16>, vector<72x8xbf16>, vector<512x8xf32> -> vector<512x8xf32>
    %c0_3 = arith.constant 0 : index
    %c0_4 = arith.constant 0 : index
    %3 = vector.load %arg4[%c0_3, %c0_4] : memref<1x8xf32, #tpu.memory_space<vmem>>, vector<1x8xf32>
    %4 = vector.broadcast %3 : vector<1x8xf32> to vector<512x8xf32>
    %5 = arith.addf %2, %4 : vector<512x8xf32>
    %c0_5 = arith.constant 0 : index
    %c0_6 = arith.constant 0 : index
    %6 = vector.load %arg5[%c0_5, %c0_6] : memref<512x8xbf16, #tpu.memory_space<vmem>>, vector<512x8xbf16>
    %7 = arith.extf %6 : vector<512x8xbf16> to vector<512x8xf32>
    %8 = arith.addf %5, %7 : vector<512x8xf32>
    %cst_7 = arith.constant 0.000000e+00 : f32
    %9 = vector.broadcast %cst_7 : f32 to vector<512x8xf32>
    %10 = arith.maximumf %8, %9 : vector<512x8xf32>
    %11 = arith.truncf %10 : vector<512x8xf32> to vector<512x8xbf16>
    %c0_8 = arith.constant 0 : index
    %c0_9 = arith.constant 0 : index
    %12 = vector.load %arg6[%c0_8, %c0_9] : memref<512x8xbf16, #tpu.memory_space<vmem>>, vector<512x8xbf16>
    tpu.vector_store %arg6[%c0_8, %c0_9], %11 {strides = array<i32>} : memref<512x8xbf16, #tpu.memory_space<vmem>>, vector<512x8xbf16>,
    return
  }
  func.func @transform_0(%arg0: i32, %arg1: i32) -> (i32, i32) {
    %c0_i32 = arith.constant 0 : i32
    %c0_i32_0 = arith.constant 0 : i32
    return %arg0, %c0_i32 : i32, i32
  }
  func.func @transform_1(%arg0: i32, %arg1: i32) -> (i32, i32) {
    %c0_i32 = arith.constant 0 : i32
    %c0_i32_0 = arith.constant 0 : i32
    return %c0_i32, %arg1 : i32, i32
  }
  func.func @transform_2(%arg0: i32, %arg1: i32) -> (i32, i32) {
    %c0_i32 = arith.constant 0 : i32
    %c0_i32_0 = arith.constant 0 : i32
    return %c0_i32, %arg1 : i32, i32
  }
  func.func @transform_3(%arg0: i32, %arg1: i32) -> (i32, i32) {
    %c0_i32 = arith.constant 0 : i32
    return %arg0, %arg1 : i32, i32
  }
  func.func @transform_4(%arg0: i32, %arg1: i32) -> (i32, i32) {
    %c0_i32 = arith.constant 0 : i32
    return %arg0, %arg1 : i32, i32
  }
}

module attributes {stable_mosaic.version = 11 : i64} {
  func.func @_mm1_kernel(%arg0: i32, %arg1: i32, %arg2: memref<128x72xbf16, #tpu.memory_space<vmem>>, %arg3: memref<72x8xbf16, #tpu.memory_space<vmem>>, %arg4: memref<1x8xf32, #tpu.memory_space<vmem>>, %arg5: memref<128x8xbf16, #tpu.memory_space<vmem>>) attributes {dimension_semantics = [#tpu.dimension_semantics<parallel>, #tpu.dimension_semantics<parallel>], iteration_bounds = array<i64: 1, 1>, scalar_prefetch = 0 : i64, scratch_operands = 0 : i64, tpu.core_type = #tpu.core_type<tc>, window_params = [{transform_indices = @transform_0, window_bounds = array<i64: 128, 72>}, {transform_indices = @transform_1, window_bounds = array<i64: 72, 8>}, {transform_indices = @transform_2, window_bounds = array<i64: 1, 8>}, {transform_indices = @transform_3, window_bounds = array<i64: 128, 8>}]} {
    %c0 = arith.constant 0 : index
    %c0_0 = arith.constant 0 : index
    %0 = vector.load %arg2[%c0, %c0_0] : memref<128x72xbf16, #tpu.memory_space<vmem>>, vector<128x72xbf16>
    %c0_1 = arith.constant 0 : index
    %c0_2 = arith.constant 0 : index
    %1 = vector.load %arg3[%c0_1, %c0_2] : memref<72x8xbf16, #tpu.memory_space<vmem>>, vector<72x8xbf16>
    %cst = arith.constant dense<0.000000e+00> : vector<128x8xf32>
    %2 = tpu.matmul %0, %1, %cst {dimension_numbers = #tpu.dot_dimension_numbers<[1], [0], [0], [1], [0, 0, 1, 1], [], []>} : vector<128x72xbf16>, vector<72x8xbf16>, vector<128x8xf32> -> vector<128x8xf32>
    %c0_3 = arith.constant 0 : index
    %c0_4 = arith.constant 0 : index
    %3 = vector.load %arg4[%c0_3, %c0_4] : memref<1x8xf32, #tpu.memory_space<vmem>>, vector<1x8xf32>
    %4 = vector.broadcast %3 : vector<1x8xf32> to vector<128x8xf32>
    %5 = arith.addf %2, %4 : vector<128x8xf32>
    %cst_5 = arith.constant 0.000000e+00 : f32
    %6 = vector.broadcast %cst_5 : f32 to vector<128x8xf32>
    %7 = arith.maximumf %5, %6 : vector<128x8xf32>
    %8 = arith.truncf %7 : vector<128x8xf32> to vector<128x8xbf16>
    %c0_6 = arith.constant 0 : index
    %c0_7 = arith.constant 0 : index
    %9 = vector.load %arg5[%c0_6, %c0_7] : memref<128x8xbf16, #tpu.memory_space<vmem>>, vector<128x8xbf16>
    tpu.vector_store %arg5[%c0_6, %c0_7], %8 {strides = array<i32>} : memref<128x8xbf16, #tpu.memory_space<vmem>>, vector<128x8xbf16>,
    return
  }
  func.func @transform_0(%arg0: i32, %arg1: i32) -> (i32, i32) {
    %c0_i32 = arith.constant 0 : i32
    %c0_i32_0 = arith.constant 0 : i32
    return %arg0, %c0_i32 : i32, i32
  }
  func.func @transform_1(%arg0: i32, %arg1: i32) -> (i32, i32) {
    %c0_i32 = arith.constant 0 : i32
    %c0_i32_0 = arith.constant 0 : i32
    return %c0_i32, %arg1 : i32, i32
  }
  func.func @transform_2(%arg0: i32, %arg1: i32) -> (i32, i32) {
    %c0_i32 = arith.constant 0 : i32
    %c0_i32_0 = arith.constant 0 : i32
    return %c0_i32, %arg1 : i32, i32
  }
  func.func @transform_3(%arg0: i32, %arg1: i32) -> (i32, i32) {
    %c0_i32 = arith.constant 0 : i32
    return %arg0, %arg1 : i32, i32
  }
}

module attributes {stable_mosaic.version = 11 : i64} {
  func.func @_mm1_kernel(%arg0: i32, %arg1: i32, %arg2: memref<128x72xbf16, #tpu.memory_space<vmem>>, %arg3: memref<72x8xbf16, #tpu.memory_space<vmem>>, %arg4: memref<1x8xf32, #tpu.memory_space<vmem>>, %arg5: memref<128x8xbf16, #tpu.memory_space<vmem>>, %arg6: memref<128x8xbf16, #tpu.memory_space<vmem>>) attributes {dimension_semantics = [#tpu.dimension_semantics<parallel>, #tpu.dimension_semantics<parallel>], iteration_bounds = array<i64: 1, 1>, scalar_prefetch = 0 : i64, scratch_operands = 0 : i64, tpu.core_type = #tpu.core_type<tc>, window_params = [{transform_indices = @transform_0, window_bounds = array<i64: 128, 72>}, {transform_indices = @transform_1, window_bounds = array<i64: 72, 8>}, {transform_indices = @transform_2, window_bounds = array<i64: 1, 8>}, {transform_indices = @transform_3, window_bounds = array<i64: 128, 8>}, {transform_indices = @transform_4, window_bounds = array<i64: 128, 8>}]} {
    %c0 = arith.constant 0 : index
    %c0_0 = arith.constant 0 : index
    %0 = vector.load %arg2[%c0, %c0_0] : memref<128x72xbf16, #tpu.memory_space<vmem>>, vector<128x72xbf16>
    %c0_1 = arith.constant 0 : index
    %c0_2 = arith.constant 0 : index
    %1 = vector.load %arg3[%c0_1, %c0_2] : memref<72x8xbf16, #tpu.memory_space<vmem>>, vector<72x8xbf16>
    %cst = arith.constant dense<0.000000e+00> : vector<128x8xf32>
    %2 = tpu.matmul %0, %1, %cst {dimension_numbers = #tpu.dot_dimension_numbers<[1], [0], [0], [1], [0, 0, 1, 1], [], []>} : vector<128x72xbf16>, vector<72x8xbf16>, vector<128x8xf32> -> vector<128x8xf32>
    %c0_3 = arith.constant 0 : index
    %c0_4 = arith.constant 0 : index
    %3 = vector.load %arg4[%c0_3, %c0_4] : memref<1x8xf32, #tpu.memory_space<vmem>>, vector<1x8xf32>
    %4 = vector.broadcast %3 : vector<1x8xf32> to vector<128x8xf32>
    %5 = arith.addf %2, %4 : vector<128x8xf32>
    %c0_5 = arith.constant 0 : index
    %c0_6 = arith.constant 0 : index
    %6 = vector.load %arg5[%c0_5, %c0_6] : memref<128x8xbf16, #tpu.memory_space<vmem>>, vector<128x8xbf16>
    %7 = arith.extf %6 : vector<128x8xbf16> to vector<128x8xf32>
    %8 = arith.addf %5, %7 : vector<128x8xf32>
    %cst_7 = arith.constant 0.000000e+00 : f32
    %9 = vector.broadcast %cst_7 : f32 to vector<128x8xf32>
    %10 = arith.maximumf %8, %9 : vector<128x8xf32>
    %11 = arith.truncf %10 : vector<128x8xf32> to vector<128x8xbf16>
    %c0_8 = arith.constant 0 : index
    %c0_9 = arith.constant 0 : index
    %12 = vector.load %arg6[%c0_8, %c0_9] : memref<128x8xbf16, #tpu.memory_space<vmem>>, vector<128x8xbf16>
    tpu.vector_store %arg6[%c0_8, %c0_9], %11 {strides = array<i32>} : memref<128x8xbf16, #tpu.memory_space<vmem>>, vector<128x8xbf16>,
    return
  }
  func.func @transform_0(%arg0: i32, %arg1: i32) -> (i32, i32) {
    %c0_i32 = arith.constant 0 : i32
    %c0_i32_0 = arith.constant 0 : i32
    return %arg0, %c0_i32 : i32, i32
  }
  func.func @transform_1(%arg0: i32, %arg1: i32) -> (i32, i32) {
    %c0_i32 = arith.constant 0 : i32
    %c0_i32_0 = arith.constant 0 : i32
    return %c0_i32, %arg1 : i32, i32
  }
  func.func @transform_2(%arg0: i32, %arg1: i32) -> (i32, i32) {
    %c0_i32 = arith.constant 0 : i32
    %c0_i32_0 = arith.constant 0 : i32
    return %c0_i32, %arg1 : i32, i32
  }
  func.func @transform_3(%arg0: i32, %arg1: i32) -> (i32, i32) {
    %c0_i32 = arith.constant 0 : i32
    return %arg0, %arg1 : i32, i32
  }
  func.func @transform_4(%arg0: i32, %arg1: i32) -> (i32, i32) {
    %c0_i32 = arith.constant 0 : i32
    return %arg0, %arg1 : i32, i32
  }
}

module attributes {stable_mosaic.version = 11 : i64} {
  func.func @_mm1_kernel(%arg0: i32, %arg1: i32, %arg2: memref<16x32xbf16, #tpu.memory_space<vmem>>, %arg3: memref<32x32xbf16, #tpu.memory_space<vmem>>, %arg4: memref<1x32xf32, #tpu.memory_space<vmem>>, %arg5: memref<16x32xf32, #tpu.memory_space<vmem>>) attributes {dimension_semantics = [#tpu.dimension_semantics<parallel>, #tpu.dimension_semantics<parallel>], iteration_bounds = array<i64: 1, 1>, scalar_prefetch = 0 : i64, scratch_operands = 0 : i64, tpu.core_type = #tpu.core_type<tc>, window_params = [{transform_indices = @transform_0, window_bounds = array<i64: 16, 32>}, {transform_indices = @transform_1, window_bounds = array<i64: 32, 32>}, {transform_indices = @transform_2, window_bounds = array<i64: 1, 32>}, {transform_indices = @transform_3, window_bounds = array<i64: 16, 32>}]} {
    %c0 = arith.constant 0 : index
    %c0_0 = arith.constant 0 : index
    %0 = vector.load %arg2[%c0, %c0_0] : memref<16x32xbf16, #tpu.memory_space<vmem>>, vector<16x32xbf16>
    %c0_1 = arith.constant 0 : index
    %c0_2 = arith.constant 0 : index
    %1 = vector.load %arg3[%c0_1, %c0_2] : memref<32x32xbf16, #tpu.memory_space<vmem>>, vector<32x32xbf16>
    %cst = arith.constant dense<0.000000e+00> : vector<16x32xf32>
    %2 = tpu.matmul %0, %1, %cst {dimension_numbers = #tpu.dot_dimension_numbers<[1], [0], [0], [1], [0, 0, 1, 1], [], []>} : vector<16x32xbf16>, vector<32x32xbf16>, vector<16x32xf32> -> vector<16x32xf32>
    %c0_3 = arith.constant 0 : index
    %c0_4 = arith.constant 0 : index
    %3 = vector.load %arg4[%c0_3, %c0_4] : memref<1x32xf32, #tpu.memory_space<vmem>>, vector<1x32xf32>
    %4 = vector.broadcast %3 : vector<1x32xf32> to vector<16x32xf32>
    %5 = arith.addf %2, %4 : vector<16x32xf32>
    %c0_5 = arith.constant 0 : index
    %c0_6 = arith.constant 0 : index
    %6 = vector.load %arg5[%c0_5, %c0_6] : memref<16x32xf32, #tpu.memory_space<vmem>>, vector<16x32xf32>
    tpu.vector_store %arg5[%c0_5, %c0_6], %5 {strides = array<i32>} : memref<16x32xf32, #tpu.memory_space<vmem>>, vector<16x32xf32>,
    return
  }
  func.func @transform_0(%arg0: i32, %arg1: i32) -> (i32, i32) {
    %c0_i32 = arith.constant 0 : i32
    %c0_i32_0 = arith.constant 0 : i32
    return %arg0, %c0_i32 : i32, i32
  }
  func.func @transform_1(%arg0: i32, %arg1: i32) -> (i32, i32) {
    %c0_i32 = arith.constant 0 : i32
    %c0_i32_0 = arith.constant 0 : i32
    return %c0_i32, %arg1 : i32, i32
  }
  func.func @transform_2(%arg0: i32, %arg1: i32) -> (i32, i32) {
    %c0_i32 = arith.constant 0 : i32
    %c0_i32_0 = arith.constant 0 : i32
    return %c0_i32, %arg1 : i32, i32
  }
  func.func @transform_3(%arg0: i32, %arg1: i32) -> (i32, i32) {
    %c0_i32 = arith.constant 0 : i32
    return %arg0, %arg1 : i32, i32
  }
}

module attributes {stable_mosaic.version = 11 : i64} {
  func.func @_ln_mm_kernel(%arg0: i32, %arg1: i32, %arg2: memref<24x32xf32, #tpu.memory_space<vmem>>, %arg3: memref<1x32xf32, #tpu.memory_space<vmem>>, %arg4: memref<1x32xf32, #tpu.memory_space<vmem>>, %arg5: memref<32x96xbf16, #tpu.memory_space<vmem>>, %arg6: memref<24x96xbf16, #tpu.memory_space<vmem>>) attributes {dimension_semantics = [#tpu.dimension_semantics<parallel>, #tpu.dimension_semantics<arbitrary>], iteration_bounds = array<i64: 1, 1>, scalar_prefetch = 0 : i64, scratch_operands = 0 : i64, tpu.core_type = #tpu.core_type<tc>, window_params = [{transform_indices = @transform_0, window_bounds = array<i64: 24, 32>}, {pipeline_mode = #tpu.pipeline_mode<synchronous>, transform_indices = @transform_1, window_bounds = array<i64: 1, 32>}, {pipeline_mode = #tpu.pipeline_mode<synchronous>, transform_indices = @transform_2, window_bounds = array<i64: 1, 32>}, {transform_indices = @transform_3, window_bounds = array<i64: 32, 96>}, {transform_indices = @transform_4, window_bounds = array<i64: 24, 96>}]} {
    %c0 = arith.constant 0 : index
    %c0_0 = arith.constant 0 : index
    %0 = vector.load %arg2[%c0, %c0_0] : memref<24x32xf32, #tpu.memory_space<vmem>>, vector<24x32xf32>
    %cst = arith.constant dense<0.000000e+00> : vector<24xf32>
    %1 = vector.multi_reduction <add>, %0, %cst [1] : vector<24x32xf32> to vector<24xf32>
    %2 = vector.shape_cast %1 : vector<24xf32> to vector<24x1xf32>
    %cst_1 = arith.constant 3.200000e+01 : f32
    %3 = vector.broadcast %cst_1 : f32 to vector<24x1xf32>
    %4 = arith.divf %2, %3 : vector<24x1xf32>
    %5 = vector.broadcast %4 : vector<24x1xf32> to vector<24x32xf32>
    %6 = arith.subf %0, %5 : vector<24x32xf32>
    %7 = arith.mulf %6, %6 : vector<24x32xf32>
    %cst_2 = arith.constant dense<0.000000e+00> : vector<24xf32>
    %8 = vector.multi_reduction <add>, %7, %cst_2 [1] : vector<24x32xf32> to vector<24xf32>
    %9 = vector.shape_cast %8 : vector<24xf32> to vector<24x1xf32>
    %cst_3 = arith.constant 3.200000e+01 : f32
    %10 = vector.broadcast %cst_3 : f32 to vector<24x1xf32>
    %11 = arith.divf %9, %10 : vector<24x1xf32>
    %12 = vector.broadcast %4 : vector<24x1xf32> to vector<24x32xf32>
    %13 = arith.subf %0, %12 : vector<24x32xf32>
    %cst_4 = arith.constant 9.99999974E-6 : f32
    %14 = vector.broadcast %cst_4 : f32 to vector<24x1xf32>
    %15 = arith.addf %11, %14 : vector<24x1xf32>
    %16 = math.rsqrt %15 : vector<24x1xf32>
    %17 = vector.broadcast %16 : vector<24x1xf32> to vector<24x32xf32>
    %18 = arith.mulf %13, %17 : vector<24x32xf32>
    %c0_5 = arith.constant 0 : index
    %c0_6 = arith.constant 0 : index
    %19 = vector.load %arg3[%c0_5, %c0_6] : memref<1x32xf32, #tpu.memory_space<vmem>>, vector<1x32xf32>
    %20 = vector.broadcast %19 : vector<1x32xf32> to vector<24x32xf32>
    %21 = arith.mulf %18, %20 : vector<24x32xf32>
    %c0_7 = arith.constant 0 : index
    %c0_8 = arith.constant 0 : index
    %22 = vector.load %arg4[%c0_7, %c0_8] : memref<1x32xf32, #tpu.memory_space<vmem>>, vector<1x32xf32>
    %23 = vector.broadcast %22 : vector<1x32xf32> to vector<24x32xf32>
    %24 = arith.addf %21, %23 : vector<24x32xf32>
    %25 = arith.truncf %24 : vector<24x32xf32> to vector<24x32xbf16>
    %c0_9 = arith.constant 0 : index
    %c0_10 = arith.constant 0 : index
    %26 = vector.load %arg5[%c0_9, %c0_10] : memref<32x96xbf16, #tpu.memory_space<vmem>>, vector<32x96xbf16>
    %cst_11 = arith.constant dense<0.000000e+00> : vector<24x96xf32>
    %27 = tpu.matmul %25, %26, %cst_11 {dimension_numbers = #tpu.dot_dimension_numbers<[1], [0], [0], [1], [0, 0, 1, 1], [], []>} : vector<24x32xbf16>, vector<32x96xbf16>, vector<24x96xf32> -> vector<24x96xf32>
    %28 = arith.truncf %27 : vector<24x96xf32> to vector<24x96xbf16>
    %c0_12 = arith.constant 0 : index
    %c0_13 = arith.constant 0 : index
    %29 = vector.load %arg6[%c0_12, %c0_13] : memref<24x96xbf16, #tpu.memory_space<vmem>>, vector<24x96xbf16>
    tpu.vector_store %arg6[%c0_12, %c0_13], %28 {strides = array<i32>} : memref<24x96xbf16, #tpu.memory_space<vmem>>, vector<24x96xbf16>,
    return
  }
  func.func @transform_0(%arg0: i32, %arg1: i32) -> (i32, i32) {
    %c0_i32 = arith.constant 0 : i32
    %c0_i32_0 = arith.constant 0 : i32
    return %arg0, %c0_i32 : i32, i32
  }
  func.func @transform_1(%arg0: i32, %arg1: i32) -> (i32, i32) {
    %c0_i32 = arith.constant 0 : i32
    %c0_i32_0 = arith.constant 0 : i32
    %c0_i32_1 = arith.constant 0 : i32
    return %c0_i32, %c0_i32_0 : i32, i32
  }
  func.func @transform_2(%arg0: i32, %arg1: i32) -> (i32, i32) {
    %c0_i32 = arith.constant 0 : i32
    %c0_i32_0 = arith.constant 0 : i32
    %c0_i32_1 = arith.constant 0 : i32
    return %c0_i32, %c0_i32_0 : i32, i32
  }
  func.func @transform_3(%arg0: i32, %arg1: i32) -> (i32, i32) {
    %c0_i32 = arith.constant 0 : i32
    %c0_i32_0 = arith.constant 0 : i32
    return %c0_i32, %arg1 : i32, i32
  }
  func.func @transform_4(%arg0: i32, %arg1: i32) -> (i32, i32) {
    %c0_i32 = arith.constant 0 : i32
    return %arg0, %arg1 : i32, i32
  }
}

module attributes {stable_mosaic.version = 11 : i64} {
  func.func @_attn_kernel(%arg0: i32, %arg1: i32, %arg2: memref<1x1x9x8xbf16, #tpu.memory_space<vmem>>, %arg3: memref<1x1x9x8xbf16, #tpu.memory_space<vmem>>, %arg4: memref<1x1x9x8xbf16, #tpu.memory_space<vmem>>, %arg5: memref<1x1x9x8xbf16, #tpu.memory_space<vmem>>) attributes {dimension_semantics = [#tpu.dimension_semantics<parallel>, #tpu.dimension_semantics<parallel>], iteration_bounds = array<i64: 2, 4>, scalar_prefetch = 0 : i64, scratch_operands = 0 : i64, tpu.core_type = #tpu.core_type<tc>, window_params = [{transform_indices = @transform_0, window_bounds = array<i64: 1, 1, 9, 8>}, {transform_indices = @transform_1, window_bounds = array<i64: 1, 1, 9, 8>}, {transform_indices = @transform_2, window_bounds = array<i64: 1, 1, 9, 8>}, {transform_indices = @transform_3, window_bounds = array<i64: 1, 1, 9, 8>}]} {
    %c0 = arith.constant 0 : index
    %c0_0 = arith.constant 0 : index
    %c0_1 = arith.constant 0 : index
    %c0_2 = arith.constant 0 : index
    %0 = vector.load %arg2[%c0, %c0_0, %c0_1, %c0_2] : memref<1x1x9x8xbf16, #tpu.memory_space<vmem>>, vector<1x1x9x8xbf16>
    %1 = vector.shape_cast %0 : vector<1x1x9x8xbf16> to vector<9x8xbf16>
    %c0_3 = arith.constant 0 : index
    %c0_4 = arith.constant 0 : index
    %c0_5 = arith.constant 0 : index
    %c0_6 = arith.constant 0 : index
    %2 = vector.load %arg3[%c0_3, %c0_4, %c0_5, %c0_6] : memref<1x1x9x8xbf16, #tpu.memory_space<vmem>>, vector<1x1x9x8xbf16>
    %3 = vector.shape_cast %2 : vector<1x1x9x8xbf16> to vector<9x8xbf16>
    %c0_7 = arith.constant 0 : index
    %c0_8 = arith.constant 0 : index
    %c0_9 = arith.constant 0 : index
    %c0_10 = arith.constant 0 : index
    %4 = vector.load %arg4[%c0_7, %c0_8, %c0_9, %c0_10] : memref<1x1x9x8xbf16, #tpu.memory_space<vmem>>, vector<1x1x9x8xbf16>
    %5 = vector.shape_cast %4 : vector<1x1x9x8xbf16> to vector<9x8xbf16>
    %cst = arith.constant dense<0.000000e+00> : vector<9x9xf32>
    %6 = tpu.matmul %1, %3, %cst {dimension_numbers = #tpu.dot_dimension_numbers<[1], [1], [0], [0], [0, 0, 1, 0], [], []>} : vector<9x8xbf16>, vector<9x8xbf16>, vector<9x9xf32> -> vector<9x9xf32>
    %cst_11 = arith.constant 0.353553385 : f32
    %7 = vector.broadcast %cst_11 : f32 to vector<9x9xf32>
    %8 = arith.mulf %6, %7 : vector<9x9xf32>
    %cst_12 = arith.constant dense<0xFF800000> : vector<9xf32>
    %9 = vector.multi_reduction <maximumf>, %8, %cst_12 [1] : vector<9x9xf32> to vector<9xf32>
    %10 = vector.shape_cast %9 : vector<9xf32> to vector<9x1xf32>
    %11 = vector.broadcast %10 : vector<9x1xf32> to vector<9x9xf32>
    %12 = arith.subf %8, %11 : vector<9x9xf32>
    %13 = math.exp %12 : vector<9x9xf32>
    %cst_13 = arith.constant dense<0.000000e+00> : vector<9xf32>
    %14 = vector.multi_reduction <add>, %13, %cst_13 [1] : vector<9x9xf32> to vector<9xf32>
    %15 = vector.shape_cast %14 : vector<9xf32> to vector<9x1xf32>
    %16 = tpu.reciprocal %15 {approx = true} : vector<9x1xf32> -> vector<9x1xf32>
    %17 = vector.broadcast %16 : vector<9x1xf32> to vector<9x9xf32>
    %18 = arith.mulf %13, %17 : vector<9x9xf32>
    %19 = arith.truncf %18 : vector<9x9xf32> to vector<9x9xbf16>
    %cst_14 = arith.constant dense<0.000000e+00> : vector<9x8xf32>
    %20 = tpu.matmul %19, %5, %cst_14 {dimension_numbers = #tpu.dot_dimension_numbers<[1], [0], [0], [1], [0, 0, 1, 1], [], []>} : vector<9x9xbf16>, vector<9x8xbf16>, vector<9x8xf32> -> vector<9x8xf32>
    %21 = arith.truncf %20 : vector<9x8xf32> to vector<9x8xbf16>
    %c0_15 = arith.constant 0 : index
    %c0_16 = arith.constant 0 : index
    %c0_17 = arith.constant 0 : index
    %c0_18 = arith.constant 0 : index
    %22 = vector.load %arg5[%c0_15, %c0_16, %c0_17, %c0_18] : memref<1x1x9x8xbf16, #tpu.memory_space<vmem>>, vector<1x1x9x8xbf16>
    %23 = vector.shape_cast %22 : vector<1x1x9x8xbf16> to vector<9x8xbf16>
    %24 = vector.shape_cast %21 : vector<9x8xbf16> to vector<1x1x9x8xbf16>
    tpu.vector_store %arg5[%c0_15, %c0_16, %c0_17, %c0_18], %24 {strides = array<i32>} : memref<1x1x9x8xbf16, #tpu.memory_space<vmem>>, vector<1x1x9x8xbf16>,
    return
  }
  func.func @transform_0(%arg0: i32, %arg1: i32) -> (i32, i32, i32, i32) {
    %c0_i32 = arith.constant 0 : i32
    %c0_i32_0 = arith.constant 0 : i32
    %c0_i32_1 = arith.constant 0 : i32
    return %arg0, %arg1, %c0_i32, %c0_i32_0 : i32, i32, i32, i32
  }
  func.func @transform_1(%arg0: i32, %arg1: i32) -> (i32, i32, i32, i32) {
    %c0_i32 = arith.constant 0 : i32
    %c0_i32_0 = arith.constant 0 : i32
    %c0_i32_1 = arith.constant 0 : i32
    return %arg0, %arg1, %c0_i32, %c0_i32_0 : i32, i32, i32, i32
  }
  func.func @transform_2(%arg0: i32, %arg1: i32) -> (i32, i32, i32, i32) {
    %c0_i32 = arith.constant 0 : i32
    %c0_i32_0 = arith.constant 0 : i32
    %c0_i32_1 = arith.constant 0 : i32
    return %arg0, %arg1, %c0_i32, %c0_i32_0 : i32, i32, i32, i32
  }
  func.func @transform_3(%arg0: i32, %arg1: i32) -> (i32, i32, i32, i32) {
    %c0_i32 = arith.constant 0 : i32
    %c0_i32_0 = arith.constant 0 : i32
    %c0_i32_1 = arith.constant 0 : i32
    return %arg0, %arg1, %c0_i32, %c0_i32_0 : i32, i32, i32, i32
  }
}

module attributes {stable_mosaic.version = 11 : i64} {
  func.func @_mm1_kernel(%arg0: i32, %arg1: i32, %arg2: memref<24x32xbf16, #tpu.memory_space<vmem>>, %arg3: memref<32x32xbf16, #tpu.memory_space<vmem>>, %arg4: memref<1x32xf32, #tpu.memory_space<vmem>>, %arg5: memref<24x32xf32, #tpu.memory_space<vmem>>, %arg6: memref<24x32xf32, #tpu.memory_space<vmem>>) attributes {dimension_semantics = [#tpu.dimension_semantics<parallel>, #tpu.dimension_semantics<parallel>], iteration_bounds = array<i64: 1, 1>, scalar_prefetch = 0 : i64, scratch_operands = 0 : i64, tpu.core_type = #tpu.core_type<tc>, window_params = [{transform_indices = @transform_0, window_bounds = array<i64: 24, 32>}, {transform_indices = @transform_1, window_bounds = array<i64: 32, 32>}, {transform_indices = @transform_2, window_bounds = array<i64: 1, 32>}, {transform_indices = @transform_3, window_bounds = array<i64: 24, 32>}, {transform_indices = @transform_4, window_bounds = array<i64: 24, 32>}]} {
    %c0 = arith.constant 0 : index
    %c0_0 = arith.constant 0 : index
    %0 = vector.load %arg2[%c0, %c0_0] : memref<24x32xbf16, #tpu.memory_space<vmem>>, vector<24x32xbf16>
    %c0_1 = arith.constant 0 : index
    %c0_2 = arith.constant 0 : index
    %1 = vector.load %arg3[%c0_1, %c0_2] : memref<32x32xbf16, #tpu.memory_space<vmem>>, vector<32x32xbf16>
    %cst = arith.constant dense<0.000000e+00> : vector<24x32xf32>
    %2 = tpu.matmul %0, %1, %cst {dimension_numbers = #tpu.dot_dimension_numbers<[1], [0], [0], [1], [0, 0, 1, 1], [], []>} : vector<24x32xbf16>, vector<32x32xbf16>, vector<24x32xf32> -> vector<24x32xf32>
    %c0_3 = arith.constant 0 : index
    %c0_4 = arith.constant 0 : index
    %3 = vector.load %arg4[%c0_3, %c0_4] : memref<1x32xf32, #tpu.memory_space<vmem>>, vector<1x32xf32>
    %4 = vector.broadcast %3 : vector<1x32xf32> to vector<24x32xf32>
    %5 = arith.addf %2, %4 : vector<24x32xf32>
    %c0_5 = arith.constant 0 : index
    %c0_6 = arith.constant 0 : index
    %6 = vector.load %arg5[%c0_5, %c0_6] : memref<24x32xf32, #tpu.memory_space<vmem>>, vector<24x32xf32>
    %7 = arith.addf %5, %6 : vector<24x32xf32>
    %c0_7 = arith.constant 0 : index
    %c0_8 = arith.constant 0 : index
    %8 = vector.load %arg6[%c0_7, %c0_8] : memref<24x32xf32, #tpu.memory_space<vmem>>, vector<24x32xf32>
    tpu.vector_store %arg6[%c0_7, %c0_8], %7 {strides = array<i32>} : memref<24x32xf32, #tpu.memory_space<vmem>>, vector<24x32xf32>,
    return
  }
  func.func @transform_0(%arg0: i32, %arg1: i32) -> (i32, i32) {
    %c0_i32 = arith.constant 0 : i32
    %c0_i32_0 = arith.constant 0 : i32
    return %arg0, %c0_i32 : i32, i32
  }
  func.func @transform_1(%arg0: i32, %arg1: i32) -> (i32, i32) {
    %c0_i32 = arith.constant 0 : i32
    %c0_i32_0 = arith.constant 0 : i32
    return %c0_i32, %arg1 : i32, i32
  }
  func.func @transform_2(%arg0: i32, %arg1: i32) -> (i32, i32) {
    %c0_i32 = arith.constant 0 : i32
    %c0_i32_0 = arith.constant 0 : i32
    return %c0_i32, %arg1 : i32, i32
  }
  func.func @transform_3(%arg0: i32, %arg1: i32) -> (i32, i32) {
    %c0_i32 = arith.constant 0 : i32
    return %arg0, %arg1 : i32, i32
  }
  func.func @transform_4(%arg0: i32, %arg1: i32) -> (i32, i32) {
    %c0_i32 = arith.constant 0 : i32
    return %arg0, %arg1 : i32, i32
  }
}

module attributes {stable_mosaic.version = 11 : i64} {
  func.func @_ln_mm_kernel(%arg0: i32, %arg1: i32, %arg2: memref<24x32xf32, #tpu.memory_space<vmem>>, %arg3: memref<1x32xf32, #tpu.memory_space<vmem>>, %arg4: memref<1x32xf32, #tpu.memory_space<vmem>>, %arg5: memref<32x128xbf16, #tpu.memory_space<vmem>>, %arg6: memref<1x128xf32, #tpu.memory_space<vmem>>, %arg7: memref<24x128xbf16, #tpu.memory_space<vmem>>) attributes {dimension_semantics = [#tpu.dimension_semantics<parallel>, #tpu.dimension_semantics<arbitrary>], iteration_bounds = array<i64: 1, 1>, scalar_prefetch = 0 : i64, scratch_operands = 0 : i64, tpu.core_type = #tpu.core_type<tc>, window_params = [{transform_indices = @transform_0, window_bounds = array<i64: 24, 32>}, {pipeline_mode = #tpu.pipeline_mode<synchronous>, transform_indices = @transform_1, window_bounds = array<i64: 1, 32>}, {pipeline_mode = #tpu.pipeline_mode<synchronous>, transform_indices = @transform_2, window_bounds = array<i64: 1, 32>}, {transform_indices = @transform_3, window_bounds = array<i64: 32, 128>}, {transform_indices = @transform_4, window_bounds = array<i64: 1, 128>}, {transform_indices = @transform_5, window_bounds = array<i64: 24, 128>}]} {
    %c0 = arith.constant 0 : index
    %c0_0 = arith.constant 0 : index
    %0 = vector.load %arg2[%c0, %c0_0] : memref<24x32xf32, #tpu.memory_space<vmem>>, vector<24x32xf32>
    %cst = arith.constant dense<0.000000e+00> : vector<24xf32>
    %1 = vector.multi_reduction <add>, %0, %cst [1] : vector<24x32xf32> to vector<24xf32>
    %2 = vector.shape_cast %1 : vector<24xf32> to vector<24x1xf32>
    %cst_1 = arith.constant 3.200000e+01 : f32
    %3 = vector.broadcast %cst_1 : f32 to vector<24x1xf32>
    %4 = arith.divf %2, %3 : vector<24x1xf32>
    %5 = vector.broadcast %4 : vector<24x1xf32> to vector<24x32xf32>
    %6 = arith.subf %0, %5 : vector<24x32xf32>
    %7 = arith.mulf %6, %6 : vector<24x32xf32>
    %cst_2 = arith.constant dense<0.000000e+00> : vector<24xf32>
    %8 = vector.multi_reduction <add>, %7, %cst_2 [1] : vector<24x32xf32> to vector<24xf32>
    %9 = vector.shape_cast %8 : vector<24xf32> to vector<24x1xf32>
    %cst_3 = arith.constant 3.200000e+01 : f32
    %10 = vector.broadcast %cst_3 : f32 to vector<24x1xf32>
    %11 = arith.divf %9, %10 : vector<24x1xf32>
    %12 = vector.broadcast %4 : vector<24x1xf32> to vector<24x32xf32>
    %13 = arith.subf %0, %12 : vector<24x32xf32>
    %cst_4 = arith.constant 9.99999974E-6 : f32
    %14 = vector.broadcast %cst_4 : f32 to vector<24x1xf32>
    %15 = arith.addf %11, %14 : vector<24x1xf32>
    %16 = math.rsqrt %15 : vector<24x1xf32>
    %17 = vector.broadcast %16 : vector<24x1xf32> to vector<24x32xf32>
    %18 = arith.mulf %13, %17 : vector<24x32xf32>
    %c0_5 = arith.constant 0 : index
    %c0_6 = arith.constant 0 : index
    %19 = vector.load %arg3[%c0_5, %c0_6] : memref<1x32xf32, #tpu.memory_space<vmem>>, vector<1x32xf32>
    %20 = vector.broadcast %19 : vector<1x32xf32> to vector<24x32xf32>
    %21 = arith.mulf %18, %20 : vector<24x32xf32>
    %c0_7 = arith.constant 0 : index
    %c0_8 = arith.constant 0 : index
    %22 = vector.load %arg4[%c0_7, %c0_8] : memref<1x32xf32, #tpu.memory_space<vmem>>, vector<1x32xf32>
    %23 = vector.broadcast %22 : vector<1x32xf32> to vector<24x32xf32>
    %24 = arith.addf %21, %23 : vector<24x32xf32>
    %25 = arith.truncf %24 : vector<24x32xf32> to vector<24x32xbf16>
    %c0_9 = arith.constant 0 : index
    %c0_10 = arith.constant 0 : index
    %26 = vector.load %arg5[%c0_9, %c0_10] : memref<32x128xbf16, #tpu.memory_space<vmem>>, vector<32x128xbf16>
    %cst_11 = arith.constant dense<0.000000e+00> : vector<24x128xf32>
    %27 = tpu.matmul %25, %26, %cst_11 {dimension_numbers = #tpu.dot_dimension_numbers<[1], [0], [0], [1], [0, 0, 1, 1], [], []>} : vector<24x32xbf16>, vector<32x128xbf16>, vector<24x128xf32> -> vector<24x128xf32>
    %c0_12 = arith.constant 0 : index
    %c0_13 = arith.constant 0 : index
    %28 = vector.load %arg6[%c0_12, %c0_13] : memref<1x128xf32, #tpu.memory_space<vmem>>, vector<1x128xf32>
    %29 = vector.broadcast %28 : vector<1x128xf32> to vector<24x128xf32>
    %30 = arith.addf %27, %29 : vector<24x128xf32>
    %cst_14 = arith.constant 5.000000e-01 : f32
    %31 = vector.broadcast %cst_14 : f32 to vector<24x128xf32>
    %32 = arith.mulf %31, %30 : vector<24x128xf32>
    %cst_15 = arith.constant 0.707106769 : f32
    %33 = vector.broadcast %cst_15 : f32 to vector<24x128xf32>
    %34 = arith.mulf %30, %33 : vector<24x128xf32>
    %35 = math.absf %34 : vector<24x128xf32>
    %cst_16 = arith.constant 0.327591091 : f32
    %36 = vector.broadcast %cst_16 : f32 to vector<24x128xf32>
    %37 = arith.mulf %36, %35 : vector<24x128xf32>
    %cst_17 = arith.constant 1.000000e+00 : f32
    %38 = vector.broadcast %cst_17 : f32 to vector<24x128xf32>
    %39 = arith.addf %38, %37 : vector<24x128xf32>
    %cst_18 = arith.constant 1.000000e+00 : f32
    %40 = vector.broadcast %cst_18 : f32 to vector<24x128xf32>
    %41 = arith.divf %40, %39 : vector<24x128xf32>
    %cst_19 = arith.constant 1.06140542 : f32
    %42 = vector.broadcast %cst_19 : f32 to vector<24x128xf32>
    %43 = arith.mulf %42, %41 : vector<24x128xf32>
    %cst_20 = arith.constant -1.45315206 : f32
    %44 = vector.broadcast %cst_20 : f32 to vector<24x128xf32>
    %45 = arith.addf %43, %44 : vector<24x128xf32>
    %46 = arith.mulf %45, %41 : vector<24x128xf32>
    %cst_21 = arith.constant 1.42141378 : f32
    %47 = vector.broadcast %cst_21 : f32 to vector<24x128xf32>
    %48 = arith.addf %46, %47 : vector<24x128xf32>
    %49 = arith.mulf %48, %41 : vector<24x128xf32>
    %cst_22 = arith.constant -0.284496725 : f32
    %50 = vector.broadcast %cst_22 : f32 to vector<24x128xf32>
    %51 = arith.addf %49, %50 : vector<24x128xf32>
    %52 = arith.mulf %51, %41 : vector<24x128xf32>
    %cst_23 = arith.constant 0.254829586 : f32
    %53 = vector.broadcast %cst_23 : f32 to vector<24x128xf32>
    %54 = arith.addf %52, %53 : vector<24x128xf32>
    %55 = arith.mulf %54, %41 : vector<24x128xf32>
    %cst_24 = arith.constant 0.000000e+00 : f32
    %56 = vector.broadcast %cst_24 : f32 to vector<24x128xf32>
    %57 = arith.subf %56, %35 : vector<24x128xf32>
    %58 = arith.mulf %57, %35 : vector<24x128xf32>
    %59 = math.exp %58 : vector<24x128xf32>
    %60 = arith.mulf %55, %59 : vector<24x128xf32>
    %cst_25 = arith.constant 1.000000e+00 : f32
    %61 = vector.broadcast %cst_25 : f32 to vector<24x128xf32>
    %62 = arith.subf %61, %60 : vector<24x128xf32>
    %cst_26 = arith.constant 0.000000e+00 : f32
    %63 = vector.broadcast %cst_26 : f32 to vector<24x128xf32>
    %64 = arith.cmpf oge, %34, %63 : vector<24x128xf32>
    %cst_27 = arith.constant 0.000000e+00 : f32
    %65 = vector.broadcast %cst_27 : f32 to vector<24x128xf32>
    %66 = arith.subf %65, %62 : vector<24x128xf32>
    %67 = arith.select %64, %62, %66 : vector<24x128xi1>, vector<24x128xf32>
    %cst_28 = arith.constant 1.000000e+00 : f32
    %68 = vector.broadcast %cst_28 : f32 to vector<24x128xf32>
    %69 = arith.addf %68, %67 : vector<24x128xf32>
    %70 = arith.mulf %32, %69 : vector<24x128xf32>
    %71 = arith.truncf %70 : vector<24x128xf32> to vector<24x128xbf16>
    %c0_29 = arith.constant 0 : index
    %c0_30 = arith.constant 0 : index
    %72 = vector.load %arg7[%c0_29, %c0_30] : memref<24x128xbf16, #tpu.memory_space<vmem>>, vector<24x128xbf16>
    tpu.vector_store %arg7[%c0_29, %c0_30], %71 {strides = array<i32>} : memref<24x128xbf16, #tpu.memory_space<vmem>>, vector<24x128xbf16>,
    return
  }
  func.func @transform_0(%arg0: i32, %arg1: i32) -> (i32, i32) {
    %c0_i32 = arith.constant 0 : i32
    %c0_i32_0 = arith.constant 0 : i32
    return %arg0, %c0_i32 : i32, i32
  }
  func.func @transform_1(%arg0: i32, %arg1: i32) -> (i32, i32) {
    %c0_i32 = arith.constant 0 : i32
    %c0_i32_0 = arith.constant 0 : i32
    %c0_i32_1 = arith.constant 0 : i32
    return %c0_i32, %c0_i32_0 : i32, i32
  }
  func.func @transform_2(%arg0: i32, %arg1: i32) -> (i32, i32) {
    %c0_i32 = arith.constant 0 : i32
    %c0_i32_0 = arith.constant 0 : i32
    %c0_i32_1 = arith.constant 0 : i32
    return %c0_i32, %c0_i32_0 : i32, i32
  }
  func.func @transform_3(%arg0: i32, %arg1: i32) -> (i32, i32) {
    %c0_i32 = arith.constant 0 : i32
    %c0_i32_0 = arith.constant 0 : i32
    return %c0_i32, %arg1 : i32, i32
  }
  func.func @transform_4(%arg0: i32, %arg1: i32) -> (i32, i32) {
    %c0_i32 = arith.constant 0 : i32
    %c0_i32_0 = arith.constant 0 : i32
    return %c0_i32, %arg1 : i32, i32
  }
  func.func @transform_5(%arg0: i32, %arg1: i32) -> (i32, i32) {
    %c0_i32 = arith.constant 0 : i32
    return %arg0, %arg1 : i32, i32
  }
}

module attributes {stable_mosaic.version = 11 : i64} {
  func.func @_ln_mm_kernel(%arg0: i32, %arg1: i32, %arg2: memref<8x32xf32, #tpu.memory_space<vmem>>, %arg3: memref<1x32xf32, #tpu.memory_space<vmem>>, %arg4: memref<1x32xf32, #tpu.memory_space<vmem>>, %arg5: memref<32x1xbf16, #tpu.memory_space<vmem>>, %arg6: memref<1x1xf32, #tpu.memory_space<vmem>>, %arg7: memref<8x1xf32, #tpu.memory_space<vmem>>) attributes {dimension_semantics = [#tpu.dimension_semantics<parallel>, #tpu.dimension_semantics<arbitrary>], iteration_bounds = array<i64: 1, 1>, scalar_prefetch = 0 : i64, scratch_operands = 0 : i64, tpu.core_type = #tpu.core_type<tc>, window_params = [{transform_indices = @transform_0, window_bounds = array<i64: 8, 32>}, {pipeline_mode = #tpu.pipeline_mode<synchronous>, transform_indices = @transform_1, window_bounds = array<i64: 1, 32>}, {pipeline_mode = #tpu.pipeline_mode<synchronous>, transform_indices = @transform_2, window_bounds = array<i64: 1, 32>}, {transform_indices = @transform_3, window_bounds = array<i64: 32, 1>}, {transform_indices = @transform_4, window_bounds = array<i64: 1, 1>}, {transform_indices = @transform_5, window_bounds = array<i64: 8, 1>}]} {
    %c0 = arith.constant 0 : index
    %c0_0 = arith.constant 0 : index
    %0 = vector.load %arg2[%c0, %c0_0] : memref<8x32xf32, #tpu.memory_space<vmem>>, vector<8x32xf32>
    %cst = arith.constant dense<0.000000e+00> : vector<8xf32>
    %1 = vector.multi_reduction <add>, %0, %cst [1] : vector<8x32xf32> to vector<8xf32>
    %2 = vector.shape_cast %1 : vector<8xf32> to vector<8x1xf32>
    %cst_1 = arith.constant 3.200000e+01 : f32
    %3 = vector.broadcast %cst_1 : f32 to vector<8x1xf32>
    %4 = arith.divf %2, %3 : vector<8x1xf32>
    %5 = vector.broadcast %4 : vector<8x1xf32> to vector<8x32xf32>
    %6 = arith.subf %0, %5 : vector<8x32xf32>
    %7 = arith.mulf %6, %6 : vector<8x32xf32>
    %cst_2 = arith.constant dense<0.000000e+00> : vector<8xf32>
    %8 = vector.multi_reduction <add>, %7, %cst_2 [1] : vector<8x32xf32> to vector<8xf32>
    %9 = vector.shape_cast %8 : vector<8xf32> to vector<8x1xf32>
    %cst_3 = arith.constant 3.200000e+01 : f32
    %10 = vector.broadcast %cst_3 : f32 to vector<8x1xf32>
    %11 = arith.divf %9, %10 : vector<8x1xf32>
    %12 = vector.broadcast %4 : vector<8x1xf32> to vector<8x32xf32>
    %13 = arith.subf %0, %12 : vector<8x32xf32>
    %cst_4 = arith.constant 9.99999974E-6 : f32
    %14 = vector.broadcast %cst_4 : f32 to vector<8x1xf32>
    %15 = arith.addf %11, %14 : vector<8x1xf32>
    %16 = math.rsqrt %15 : vector<8x1xf32>
    %17 = vector.broadcast %16 : vector<8x1xf32> to vector<8x32xf32>
    %18 = arith.mulf %13, %17 : vector<8x32xf32>
    %c0_5 = arith.constant 0 : index
    %c0_6 = arith.constant 0 : index
    %19 = vector.load %arg3[%c0_5, %c0_6] : memref<1x32xf32, #tpu.memory_space<vmem>>, vector<1x32xf32>
    %20 = vector.broadcast %19 : vector<1x32xf32> to vector<8x32xf32>
    %21 = arith.mulf %18, %20 : vector<8x32xf32>
    %c0_7 = arith.constant 0 : index
    %c0_8 = arith.constant 0 : index
    %22 = vector.load %arg4[%c0_7, %c0_8] : memref<1x32xf32, #tpu.memory_space<vmem>>, vector<1x32xf32>
    %23 = vector.broadcast %22 : vector<1x32xf32> to vector<8x32xf32>
    %24 = arith.addf %21, %23 : vector<8x32xf32>
    %25 = arith.truncf %24 : vector<8x32xf32> to vector<8x32xbf16>
    %c0_9 = arith.constant 0 : index
    %c0_10 = arith.constant 0 : index
    %26 = vector.load %arg5[%c0_9, %c0_10] : memref<32x1xbf16, #tpu.memory_space<vmem>>, vector<32x1xbf16>
    %cst_11 = arith.constant dense<0.000000e+00> : vector<8x1xf32>
    %27 = tpu.matmul %25, %26, %cst_11 {dimension_numbers = #tpu.dot_dimension_numbers<[1], [0], [0], [1], [0, 0, 1, 1], [], []>} : vector<8x32xbf16>, vector<32x1xbf16>, vector<8x1xf32> -> vector<8x1xf32>
    %c0_12 = arith.constant 0 : index
    %c0_13 = arith.constant 0 : index
    %28 = vector.load %arg6[%c0_12, %c0_13] : memref<1x1xf32, #tpu.memory_space<vmem>>, vector<1x1xf32>
    %29 = vector.broadcast %28 : vector<1x1xf32> to vector<8x1xf32>
    %30 = arith.addf %27, %29 : vector<8x1xf32>
    %31 = arith.negf %30 : vector<8x1xf32>
    %32 = math.exp %31 : vector<8x1xf32>
    %cst_14 = arith.constant 1.000000e+00 : f32
    %33 = vector.broadcast %cst_14 : f32 to vector<8x1xf32>
    %34 = arith.addf %33, %32 : vector<8x1xf32>
    %35 = arith.divf %33, %34 : vector<8x1xf32>
    %c0_15 = arith.constant 0 : index
    %c0_16 = arith.constant 0 : index
    %36 = vector.load %arg7[%c0_15, %c0_16] : memref<8x1xf32, #tpu.memory_space<vmem>>, vector<8x1xf32>
    tpu.vector_store %arg7[%c0_15, %c0_16], %35 {strides = array<i32>} : memref<8x1xf32, #tpu.memory_space<vmem>>, vector<8x1xf32>,
    return
  }
  func.func @transform_0(%arg0: i32, %arg1: i32) -> (i32, i32) {
    %c0_i32 = arith.constant 0 : i32
    %c0_i32_0 = arith.constant 0 : i32
    return %arg0, %c0_i32 : i32, i32
  }
  func.func @transform_1(%arg0: i32, %arg1: i32) -> (i32, i32) {
    %c0_i32 = arith.constant 0 : i32
    %c0_i32_0 = arith.constant 0 : i32
    %c0_i32_1 = arith.constant 0 : i32
    return %c0_i32, %c0_i32_0 : i32, i32
  }
  func.func @transform_2(%arg0: i32, %arg1: i32) -> (i32, i32) {
    %c0_i32 = arith.constant 0 : i32
    %c0_i32_0 = arith.constant 0 : i32
    %c0_i32_1 = arith.constant 0 : i32
    return %c0_i32, %c0_i32_0 : i32, i32
  }
  func.func @transform_3(%arg0: i32, %arg1: i32) -> (i32, i32) {
    %c0_i32 = arith.constant 0 : i32
    %c0_i32_0 = arith.constant 0 : i32
    return %c0_i32, %arg1 : i32, i32
  }
  func.func @transform_4(%arg0: i32, %arg1: i32) -> (i32, i32) {
    %c0_i32 = arith.constant 0 : i32
    %c0_i32_0 = arith.constant 0 : i32
    return %c0_i32, %arg1 : i32, i32
  }
  func.func @transform_5(%arg0: i32, %arg1: i32) -> (i32, i32) {
    %c0_i32 = arith.constant 0 : i32
    return %arg0, %arg1 : i32, i32
  }
}

module attributes {stable_mosaic.version = 11 : i64} {
  func.func @_mm1_kernel(%arg0: i32, %arg1: i32, %arg2: memref<24x128xbf16, #tpu.memory_space<vmem>>, %arg3: memref<128x32xbf16, #tpu.memory_space<vmem>>, %arg4: memref<1x32xf32, #tpu.memory_space<vmem>>, %arg5: memref<24x32xf32, #tpu.memory_space<vmem>>, %arg6: memref<24x32xf32, #tpu.memory_space<vmem>>) attributes {dimension_semantics = [#tpu.dimension_semantics<parallel>, #tpu.dimension_semantics<parallel>], iteration_bounds = array<i64: 1, 1>, scalar_prefetch = 0 : i64, scratch_operands = 0 : i64, tpu.core_type = #tpu.core_type<tc>, window_params = [{transform_indices = @transform_0, window_bounds = array<i64: 24, 128>}, {transform_indices = @transform_1, window_bounds = array<i64: 128, 32>}, {transform_indices = @transform_2, window_bounds = array<i64: 1, 32>}, {transform_indices = @transform_3, window_bounds = array<i64: 24, 32>}, {transform_indices = @transform_4, window_bounds = array<i64: 24, 32>}]} {
    %c0 = arith.constant 0 : index
    %c0_0 = arith.constant 0 : index
    %0 = vector.load %arg2[%c0, %c0_0] : memref<24x128xbf16, #tpu.memory_space<vmem>>, vector<24x128xbf16>
    %c0_1 = arith.constant 0 : index
    %c0_2 = arith.constant 0 : index
    %1 = vector.load %arg3[%c0_1, %c0_2] : memref<128x32xbf16, #tpu.memory_space<vmem>>, vector<128x32xbf16>
    %cst = arith.constant dense<0.000000e+00> : vector<24x32xf32>
    %2 = tpu.matmul %0, %1, %cst {dimension_numbers = #tpu.dot_dimension_numbers<[1], [0], [0], [1], [0, 0, 1, 1], [], []>} : vector<24x128xbf16>, vector<128x32xbf16>, vector<24x32xf32> -> vector<24x32xf32>
    %c0_3 = arith.constant 0 : index
    %c0_4 = arith.constant 0 : index
    %3 = vector.load %arg4[%c0_3, %c0_4] : memref<1x32xf32, #tpu.memory_space<vmem>>, vector<1x32xf32>
    %4 = vector.broadcast %3 : vector<1x32xf32> to vector<24x32xf32>
    %5 = arith.addf %2, %4 : vector<24x32xf32>
    %c0_5 = arith.constant 0 : index
    %c0_6 = arith.constant 0 : index
    %6 = vector.load %arg5[%c0_5, %c0_6] : memref<24x32xf32, #tpu.memory_space<vmem>>, vector<24x32xf32>
    %7 = arith.addf %5, %6 : vector<24x32xf32>
    %c0_7 = arith.constant 0 : index
    %c0_8 = arith.constant 0 : index
    %8 = vector.load %arg6[%c0_7, %c0_8] : memref<24x32xf32, #tpu.memory_space<vmem>>, vector<24x32xf32>
    tpu.vector_store %arg6[%c0_7, %c0_8], %7 {strides = array<i32>} : memref<24x32xf32, #tpu.memory_space<vmem>>, vector<24x32xf32>,
    return
  }
  func.func @transform_0(%arg0: i32, %arg1: i32) -> (i32, i32) {
    %c0_i32 = arith.constant 0 : i32
    %c0_i32_0 = arith.constant 0 : i32
    return %arg0, %c0_i32 : i32, i32
  }
  func.func @transform_1(%arg0: i32, %arg1: i32) -> (i32, i32) {
    %c0_i32 = arith.constant 0 : i32
    %c0_i32_0 = arith.constant 0 : i32
    return %c0_i32, %arg1 : i32, i32
  }
  func.func @transform_2(%arg0: i32, %arg1: i32) -> (i32, i32) {
    %c0_i32 = arith.constant 0 : i32
    %c0_i32_0 = arith.constant 0 : i32
    return %c0_i32, %arg1 : i32, i32
  }
  func.func @transform_3(%arg0: i32, %arg1: i32) -> (i32, i32) {
    %c0_i32 = arith.constant 0 : i32
    return %arg0, %arg1 : i32, i32
  }
  func.func @transform_4(%arg0: i32, %arg1: i32) -> (i32, i32) {
    %c0_i32 = arith.constant 0 : i32
    return %arg0, %arg1 : i32, i32
  }
}

</mosaic_0001>

<bundles_post_ra>
// kernel: _lambda_.20
= control target key start
LH: loop header
LB: loop body
LE: loop exit
PB: predicated region body
PF: predicated region fallthrough
CT: control target
= control target key end

     0   :  { %vm86_vm0 = vcmask 1040384   ;;  %v385_v0 = vmov 0.0   ;;  %v386_v2 = vmov 0   ;;  %vm387_vm1 = vmmov 0   ;;  %s495_s1 = inlined_call_operand.vmem [shape: bf16[33,32], index: 1, kind: input, shape index: {}]   ;;  %s496_s0 = inlined_call_operand.vmem [shape: bf16[72,33], index: 0, kind: input, shape index: {}]   ;;  %s497_s2 = inlined_call_operand.vmem [shape: f32[1,32], index: 2, kind: input, shape index: {}]   ;;  %s498_s3 = inlined_call_operand.vmem [shape: f32[1,32], index: 3, kind: input, shape index: {}]   ;;  %s499_s4 = inlined_call_operand.vmem [shape: bf16[72,32], index: 4, kind: output, shape index: {}]  }
   0x1   :  { %324 = vmatprep.subr.bf16.mxu0 %v385_v0  ;;  %v359_v1 = vld [vmem:[%s495_s1 + $0x10] ss:$0 sps:$4 sm:$0x11]   ;;  %v88_v3 = vsel %vm86_vm0, 65535, %v386_v2  ;;  %350 = vmatprep.subr.bf16.mxu1 %v385_v0  ;;  %v360_v5 = vld [vmem:[%s495_s1 + $0x8] sm:$0xff]   ;;  %v361_v6 = vld [vmem:[%s495_s1] sm:$0xff]  }
   0x2   :  { %330 = vmatprep.mubr.msk.bf16.mxu0 %vm387_vm1, %v385_v0  ;;  %342 = vmatprep.mubr.msk.bf16.mxu1 %vm387_vm1, %v385_v0  ;;  %v90_v4 = vand.u32 %v359_v1, %v88_v3  ;;  %v362_v7 = vld [vmem:[%s496_s0] sm:$0xff]   ;;  %v363_v8 = vld [vmem:[%s496_s0 + $0x18] sm:$0xff]   ;;  %vm70_vm2 = vcmask 269312   ;;  %v364_v9 = vld [vmem:[%s496_s0 + $0x8] sm:$0xff]   ;;  %vm269_vm3 = vcmask 257024  }
   0x3   :  { %v365_v10 = vld [vmem:[%s496_s0 + $0x20] ss:$0 sps:$4 sm:$0xff]   ;;  %v366_v11 = vld [vmem:[%s496_s0 + $0x10] sm:$0xff]  }
   0x4   :  { %325 = vmatpush3.bf16.msra.mxu0 %v90_v4  ;;  %353 = vmatpush3.bf16.msra.mxu1 %v90_v4  ;;  %v445_v40 = vld [vmem:[%s497_s2] ss:$0 sm:$0xff] }
   0x5   :  { %326 = vmatprep.subr.bf16.mxu0 %v385_v0  ;;  %351 = vmatprep.subr.bf16.mxu1 %v385_v0  ;;  %v297_v45 = vld [vmem:[%s498_s3] ss:$0 sm:$0xff] }
   0x8   :  { %327 = vmatpush3.bf16.msra.mxu0 %v360_v5  ;;  %354 = vmatpush3.bf16.msra.mxu1 %v360_v5 }
   0x9   :  { %328 = vmatprep.subr.bf16.mxu0 %v385_v0  ;;  %352 = vmatprep.subr.bf16.mxu1 %v385_v0 }
   0xc   :  { %329 = vmatpush3.bf16.msra.mxu0 %v361_v6  ;;  %355 = vmatpush3.bf16.msra.mxu1 %v361_v6 }
   0xf   :  { %331 = vmatmul.mubr.msk.bf16.vlgmr.msra.gmra.mxu0 %vm70_vm2, %v362_v7  ;;  %343 = vmatmul.mubr.msk.bf16.vlgmr.msra.gmra.mxu1 %vm70_vm2, %v363_v8 }
  0x10   :  { %334 = vmatprep.mubr.msk.bf16.mxu0 %vm387_vm1, %v385_v0  ;;  %346 = vmatprep.mubr.msk.bf16.mxu1 %vm387_vm1, %v385_v0 }
  0x17   :  { %335 = vmatmul.mubr.msk.bf16.gmra.mxu0 %vm70_vm2, %v364_v9  ;;  %347 = vmatmul.mubr.msk.bf16.gmra.mxu1 %vm70_vm2, %v365_v10 }
  0x18   :  { %338 = vmatprep.mubr.msk.bf16.mxu0 %vm387_vm1, %v385_v0 }
  0x1f   :  { %339 = vmatmul.mubr.msk.bf16.gmra.mxu0 %vm70_vm2, %v366_v11 }
  0xcf   :  { %v126_v12 = vpop.f32.mrf.mxu0  ;;  %v150_v13 = vpop.f32.mrf.mxu1 }
  0xd0   :  { %v164_v14 = vmax.f32 %v126_v12, 1e-10  ;;  %v170_v15 = vmax.f32 %v150_v13, 1e-10 }
  0xd1   :  { %v332_v16 = vpop.f32.mrf.mxu0  ;;  %v344_v17 = vpop.f32.mrf.mxu1 }
  0xd2   :  { %367 = vlog2.f32 %v164_v14 }
  0xd3   :  { %v129_v18 = vpop.f32.mrf.mxu0  ;;  %369 = vlog2.f32 %v170_v15  ;;  %v153_v19 = vpop.f32.mrf.mxu1 }
  0xd4   :  { %v165_v20 = vmax.f32 %v129_v18, 1e-10  ;;  %v171_v21 = vmax.f32 %v153_v19, 1e-10 }
  0xd5   :  { %v333_v22 = vpop.f32.mrf.mxu0  ;;  %v345_v23 = vpop.f32.mrf.mxu1 }
  0xd6   :  { %371 = vlog2.f32 %v165_v20 }
  0xd7   :  { %v134_v24 = vpop.f32.mrf.mxu0  ;;  %373 = vlog2.f32 %v171_v21  ;;  %v158_v25 = vpop.f32.mrf.mxu1 }
  0xd8   :  { %v166_v26 = vmax.f32 %v134_v24, 1e-10  ;;  %v172_v27 = vmax.f32 %v158_v25, 1e-10 }
  0xd9   :  { %v336_v28 = vpop.f32.mrf.mxu0  ;;  %v348_v29 = vpop.f32.mrf.mxu1 }
  0xda   :  { %375 = vlog2.f32 %v166_v26 }
  0xdb   :  { %v137_v30 = vpop.f32.mrf.mxu0  ;;  %377 = vlog2.f32 %v172_v27  ;;  %v161_v31 = vpop.f32.mrf.mxu1 }
  0xdc   :  { %v167_v32 = vmax.f32 %v137_v30, 1e-10 }
  0xdd   :  { %v337_v33 = vpop.f32.mrf.mxu0  ;;  %v349_v34 = vpop.f32.mrf.mxu1 }
  0xde   :  { %379 = vlog2.f32 %v167_v32 }
  0xdf   :  { %v368_v35 = vpop.eup %367  ;;  %v142_v36 = vpop.f32.mrf.mxu0 }
  0xe0   :  { %v370_v37 = vpop.eup %369  ;;  %v174_v38 = vmul.f32 0.6931472, %v368_v35  ;;  %v168_v39 = vmax.f32 %v142_v36, 1e-10 }
  0xe1   :  { %v186_v41 = vmul.f32 0.6931472, %v370_v37  ;;  %v340_v42 = vpop.f32.mrf.mxu0 }
  0xe2   :  { %v191_v43 = vmul.f32 4.3429446, %v174_v38  ;;  %381 = vlog2.f32 %v168_v39 }
  0xe3   :  { %v372_v44 = vpop.eup %371  ;;  %v197_v46 = vmul.f32 4.3429446, %v186_v41  ;;  %v145_v47 = vpop.f32.mrf.mxu0 }
  0xe4   :  { %v374_v48 = vpop.eup %373  ;;  %v207_v49 = vmul.f32 %v445_v40, %v191_v43  ;;  %v176_v50 = vmul.f32 0.6931472, %v372_v44  ;;  %v169_v51 = vmax.f32 %v145_v47, 1e-10 }
  0xe5   :  { %v213_v52 = vmul.f32 %v445_v40, %v197_v46  ;;  %v188_v53 = vmul.f32 0.6931472, %v374_v48  ;;  %v341_v54 = vpop.f32.mrf.mxu0 }
  0xe6   :  { %v223_v55 = vadd.f32 %v297_v45, %v207_v49  ;;  %v192_v56 = vmul.f32 4.3429446, %v176_v50  ;;  %383 = vlog2.f32 %v169_v51 }
  0xe7   :  { %v376_v57 = vpop.eup %375  ;;  %v229_v58 = vadd.f32 %v297_v45, %v213_v52  ;;  %v198_v59 = vmul.f32 4.3429446, %v188_v53 }
  0xe8   :  { %v378_v60 = vpop.eup %377  ;;  %v307_v61 = vpack.c.bf16 %v223_v55, %v223_v55  ;;  %v208_v62 = vmul.f32 %v445_v40, %v192_v56  ;;  %v178_v63 = vmul.f32 0.6931472, %v376_v57 }
  0xe9   :  { %v313_v0 = vpack.c.bf16 %v229_v58, %v229_v58  ;;  %v214_v1 = vmul.f32 %v445_v40, %v198_v59  ;;  %v190_v2 = vmul.f32 0.6931472, %v378_v60 }
  0xea   :  { %270 = vst.msk [vmem:[%s499_s4] sm:$0xf] %vm269_vm3, %v307_v61  ;;  %v224_v3 = vadd.f32 %v297_v45, %v208_v62  ;;  %v193_v4 = vmul.f32 4.3429446, %v178_v63 }
  0xeb   :  { %v380_v5 = vpop.eup %379  ;;  %276 = vst.msk [vmem:[%s499_s4 + $0x18] sm:$0xf] %vm269_vm3, %v313_v0  ;;  %v230_v6 = vadd.f32 %v297_v45, %v214_v1  ;;  %v199_v7 = vmul.f32 4.3429446, %v190_v2 }
  0xec   :  { %v308_v8 = vpack.c.bf16 %v224_v3, %v224_v3  ;;  %v209_v9 = vmul.f32 %v445_v40, %v193_v4  ;;  %v180_v10 = vmul.f32 0.6931472, %v380_v5 }
  0xed   :  { %v314_v11 = vpack.c.bf16 %v230_v6, %v230_v6  ;;  %v215_v12 = vmul.f32 %v445_v40, %v199_v7 }
  0xee   :  { %271 = vst.msk [vmem:[%s499_s4 + $0x4] sm:$0xf] %vm269_vm3, %v308_v8  ;;  %v225_v13 = vadd.f32 %v297_v45, %v209_v9  ;;  %v194_v14 = vmul.f32 4.3429446, %v180_v10 }
  0xef   :  { %v382_v15 = vpop.eup %381  ;;  %277 = vst.msk [vmem:[%s499_s4 + $0x1c] sm:$0xf] %vm269_vm3, %v314_v11  ;;  %v231_v16 = vadd.f32 %v297_v45, %v215_v12 }
  0xf0   :  { %v309_v17 = vpack.c.bf16 %v225_v13, %v225_v13  ;;  %v210_v18 = vmul.f32 %v445_v40, %v194_v14  ;;  %v182_v19 = vmul.f32 0.6931472, %v382_v15 }
  0xf1   :  { %v315_v20 = vpack.c.bf16 %v231_v16, %v231_v16 }
  0xf2   :  { %272 = vst.msk [vmem:[%s499_s4 + $0x8] sm:$0xf] %vm269_vm3, %v309_v17  ;;  %v226_v21 = vadd.f32 %v297_v45, %v210_v18  ;;  %v195_v22 = vmul.f32 4.3429446, %v182_v19 }
  0xf3   :  { %v384_v23 = vpop.eup %383  ;;  %278 = vst.msk [vmem:[%s499_s4 + $0x20] sm:$0xf] %vm269_vm3, %v315_v20 }
  0xf4   :  { %v310_v24 = vpack.c.bf16 %v226_v21, %v226_v21  ;;  %v211_v25 = vmul.f32 %v445_v40, %v195_v22  ;;  %v184_v26 = vmul.f32 0.6931472, %v384_v23 }
  0xf6   :  { %273 = vst.msk [vmem:[%s499_s4 + $0xc] sm:$0xf] %vm269_vm3, %v310_v24  ;;  %v227_v27 = vadd.f32 %v297_v45, %v211_v25  ;;  %v196_v28 = vmul.f32 4.3429446, %v184_v26 }
  0xf8   :  { %v311_v29 = vpack.c.bf16 %v227_v27, %v227_v27  ;;  %v212_v30 = vmul.f32 %v445_v40, %v196_v28 }
  0xfa   :  { %274 = vst.msk [vmem:[%s499_s4 + $0x10] sm:$0xf] %vm269_vm3, %v311_v29  ;;  %v228_v31 = vadd.f32 %v297_v45, %v212_v30 }
  0xfc   :  { %v312_v32 = vpack.c.bf16 %v228_v31, %v228_v31 }
  0xfe   :  { %275 = vst.msk [vmem:[%s499_s4 + $0x14] sm:$0xf] %vm269_vm3, %v312_v32 }

// kernel: _lambda_.21
= control target key start
LH: loop header
LB: loop body
LE: loop exit
PB: predicated region body
PF: predicated region fallthrough
CT: control target
= control target key end

     0   :  { %s1755_s12 = smov 0   ;;  %s1757_s13 = smov 0   ;;  %s2063_s0 = inlined_call_operand.vmem [shape: bf16[2560,9], index: 0, kind: input, shape index: {}]   ;;  %s2064_s1 = inlined_call_operand.vmem [shape: bf16[9,8], index: 1, kind: input, shape index: {}]   ;;  %s2065_s2 = inlined_call_operand.vmem [shape: f32[1,8], index: 2, kind: input, shape index: {}]   ;;  %s2066_s3 = inlined_call_operand.vmem [shape: bf16[2560,8], index: 3, kind: output, shape index: {}]  }
   0x1   :  { %s1759_s14 = smov 0  }
   0x2 LB: > { %s25_s15 = sadd.s32 1, %s1728_s13  ;;  %p1350_p0 = scmp.ge.s32.totalorder %s1732_s14, 1  ;;  %s1732_s14 = sphi %s1759_s14, %s13_s14   ;;  %s1728_s13 = sphi %s1757_s13, %s2068_s13   ;;  %s1724_s12 = sphi %s1755_s12, %s2067_s12  }
   0x3   : > { %p27_p1 = scmp.ge.s32.totalorder %s25_s15, 5  ;;  %p169_p2 = scmp.lt.s32.totalorder %s1732_s14, 6 }
   0x5   : > { %s2070_s15 = smov (%p27_p1, %s25_s15), 0  ;;  %p170_p3 = pnand %p1350_p0, %p169_p2 }
   0x6   : > { %s1351_s18 = sshll.u32 (!%p170_p3), %s1724_s12, 6 }
   0x7   : > { %173 = sbr.rel (%p170_p3) target bundleno = 284 (0x11c), region = 32  ;;  %p204_p4 = scmp.lt.s32.totalorder (!%p170_p3), %s1351_s18, 319 }
   0xc   : > { %v1677_v0 = vld [vmem:[%s2064_s1] sm:$0x1f]   ;;  %vm561_vm0 = vcmask 1043456   ;;  %vm562_vm1 = vcmask 1044480   ;;  %v1734_v1 = vmov 65535   ;;  %s2072_s18 = smov (!%p204_p4, %s1351_s18), 319 }
   0xd   : > { %v563_v2 = vsel %vm561_vm0, 4294967295, %v1734_v1  ;;  %s1352_s19 = sshll.u32 %s2072_s18, 2  ;;  %vm464_vm2 = vcmask 72704   ;;  %v1853_v37 = vld [vmem:[%s2065_s2] ss:$0 sm:$0xff]  ;;  %vm1177_vm3 = vcmask 60416  }
   0xe   : > { %v564_v3 = vsel %vm562_vm1, %v563_v2, 0  ;;  %s1784_s22 = scalar_lea.vmem %s2063_s0, %s1352_s19  ;;  %s1863_s27 = scalar_lea.vmem %s2066_s3, %s1352_s19 }
   0xf   : > { %v566_v4 = vand.u32 %v1677_v0, %v564_v3  ;;  %v1678_v5 = vld [vmem:[%s1784_s22] sm:$0xff]   ;;  %v1680_v7 = vld [vmem:[%s1784_s22 + $0x8] sm:$0xff]   ;;  %v1682_v9 = vld [vmem:[%s1784_s22 + $0x10] sm:$0xff]  }
  0x10   : > { %v1679_v6 = vld [vmem:[%s1784_s22 + $0x80] sm:$0xff]   ;;  %1586 = vmatprep.mubr.msk.bf16.mxu0 %vm464_vm2, %v1678_v5  ;;  %v1681_v8 = vld [vmem:[%s1784_s22 + $0x88] sm:$0xff]   ;;  %v1683_v10 = vld [vmem:[%s1784_s22 + $0x90] sm:$0xff]  }
  0x11   : > { %1584 = vmatprep.subr.bf16.mxu0 %v566_v4  ;;  %1650 = vmatprep.subr.bf16.mxu1 %v566_v4  ;;  %v1684_v11 = vld [vmem:[%s1784_s22 + $0x18] sm:$0xff]   ;;  %v1686_v13 = vld [vmem:[%s1784_s22 + $0x20] sm:$0xff]   ;;  %v1688_v15 = vld [vmem:[%s1784_s22 + $0x28] sm:$0xff]  }
  0x12   : > { %1585 = vmatpush3.bf16.msra.mxu0 %v566_v4  ;;  %1651 = vmatpush3.bf16.msra.mxu1 %v566_v4  ;;  %v1685_v12 = vld [vmem:[%s1784_s22 + $0x98] sm:$0xff]   ;;  %v1687_v14 = vld [vmem:[%s1784_s22 + $0xa0] sm:$0xff]   ;;  %v1689_v16 = vld [vmem:[%s1784_s22 + $0xa8] sm:$0xff]  }
  0x13   : > { %1618 = vmatprep.mubr.msk.bf16.mxu1 %vm464_vm2, %v1679_v6  ;;  %v1690_v17 = vld [vmem:[%s1784_s22 + $0x30] sm:$0xff]   ;;  %v1692_v19 = vld [vmem:[%s1784_s22 + $0x38] sm:$0xff]   ;;  %v1694_v21 = vld [vmem:[%s1784_s22 + $0x40] sm:$0xff]  }
  0x14   : > { %v1691_v18 = vld [vmem:[%s1784_s22 + $0xb0] sm:$0xff]   ;;  %v1693_v20 = vld [vmem:[%s1784_s22 + $0xb8] sm:$0xff]   ;;  %v1695_v22 = vld [vmem:[%s1784_s22 + $0xc0] sm:$0xff]  }
  0x15   : > { %1587 = vmatmul.mubr.msk.bf16.vlgmr.msra.gmra.mxu0 %vm464_vm2, %v1680_v7  ;;  %1619 = vmatmul.mubr.msk.bf16.vlgmr.msra.gmra.mxu1 %vm464_vm2, %v1681_v8  ;;  %v1696_v23 = vld [vmem:[%s1784_s22 + $0x48] sm:$0xff]   ;;  %v1698_v25 = vld [vmem:[%s1784_s22 + $0x50] sm:$0xff]   ;;  %v1700_v27 = vld [vmem:[%s1784_s22 + $0x58] sm:$0xff]  }
  0x16   : > { %1590 = vmatprep.mubr.msk.bf16.mxu0 %vm464_vm2, %v1682_v9  ;;  %1622 = vmatprep.mubr.msk.bf16.mxu1 %vm464_vm2, %v1683_v10  ;;  %v1697_v24 = vld [vmem:[%s1784_s22 + $0xc8] sm:$0xff]   ;;  %v1699_v26 = vld [vmem:[%s1784_s22 + $0xd0] sm:$0xff]   ;;  %v1701_v28 = vld [vmem:[%s1784_s22 + $0xd8] sm:$0xff]  }
  0x17   : > { %v1702_v29 = vld [vmem:[%s1784_s22 + $0x60] sm:$0xff]   ;;  %v1704_v31 = vld [vmem:[%s1784_s22 + $0x68] sm:$0xff]   ;;  %v1706_v33 = vld [vmem:[%s1784_s22 + $0x70] sm:$0xff]  }
  0x18   : > { %v1703_v30 = vld [vmem:[%s1784_s22 + $0xe0] sm:$0xff]   ;;  %v1705_v32 = vld [vmem:[%s1784_s22 + $0xe8] sm:$0xff]   ;;  %v1707_v34 = vld [vmem:[%s1784_s22 + $0xf0] sm:$0xff]  }
  0x19   : > { %v1708_v35 = vld [vmem:[%s1784_s22 + $0x78] sm:$0xff]  }
  0x1a   : > { %v1709_v36 = vld [vmem:[%s1784_s22 + $0xf8] sm:$0xff]  }
  0x1d   : > { %1591 = vmatmul.mubr.msk.bf16.gmra.mxu0 %vm464_vm2, %v1684_v11  ;;  %1623 = vmatmul.mubr.msk.bf16.gmra.mxu1 %vm464_vm2, %v1685_v12 }
  0x1e   : > { %1594 = vmatprep.mubr.msk.bf16.mxu0 %vm464_vm2, %v1686_v13  ;;  %1626 = vmatprep.mubr.msk.bf16.mxu1 %vm464_vm2, %v1687_v14 }
  0x25   : > { %1595 = vmatmul.mubr.msk.bf16.gmra.mxu0 %vm464_vm2, %v1688_v15  ;;  %1627 = vmatmul.mubr.msk.bf16.gmra.mxu1 %vm464_vm2, %v1689_v16 }
  0x26   : > { %1598 = vmatprep.mubr.msk.bf16.mxu0 %vm464_vm2, %v1690_v17  ;;  %1630 = vmatprep.mubr.msk.bf16.mxu1 %vm464_vm2, %v1691_v18 }
  0x2d   : > { %1599 = vmatmul.mubr.msk.bf16.gmra.mxu0 %vm464_vm2, %v1692_v19  ;;  %1631 = vmatmul.mubr.msk.bf16.gmra.mxu1 %vm464_vm2, %v1693_v20 }
  0x2e   : > { %1602 = vmatprep.mubr.msk.bf16.mxu0 %vm464_vm2, %v1694_v21  ;;  %1634 = vmatprep.mubr.msk.bf16.mxu1 %vm464_vm2, %v1695_v22 }
  0x35   : > { %1603 = vmatmul.mubr.msk.bf16.gmra.mxu0 %vm464_vm2, %v1696_v23  ;;  %1635 = vmatmul.mubr.msk.bf16.gmra.mxu1 %vm464_vm2, %v1697_v24 }
  0x36   : > { %1606 = vmatprep.mubr.msk.bf16.mxu0 %vm464_vm2, %v1698_v25  ;;  %1638 = vmatprep.mubr.msk.bf16.mxu1 %vm464_vm2, %v1699_v26 }
  0x3d   : > { %1607 = vmatmul.mubr.msk.bf16.gmra.mxu0 %vm464_vm2, %v1700_v27  ;;  %1639 = vmatmul.mubr.msk.bf16.gmra.mxu1 %vm464_vm2, %v1701_v28 }
  0x3e   : > { %1610 = vmatprep.mubr.msk.bf16.mxu0 %vm464_vm2, %v1702_v29  ;;  %1642 = vmatprep.mubr.msk.bf16.mxu1 %vm464_vm2, %v1703_v30 }
  0x45   : > { %1611 = vmatmul.mubr.msk.bf16.gmra.mxu0 %vm464_vm2, %v1704_v31  ;;  %1643 = vmatmul.mubr.msk.bf16.gmra.mxu1 %vm464_vm2, %v1705_v32 }
  0x46   : > { %1614 = vmatprep.mubr.msk.bf16.mxu0 %vm464_vm2, %v1706_v33  ;;  %1646 = vmatprep.mubr.msk.bf16.mxu1 %vm464_vm2, %v1707_v34 }
  0x4d   : > { %1615 = vmatmul.mubr.msk.bf16.gmra.mxu0 %vm464_vm2, %v1708_v35  ;;  %1647 = vmatmul.mubr.msk.bf16.gmra.mxu1 %vm464_vm2, %v1709_v36 }
  0xd5   : > { %v1588_v38 = vpop.f32.mrf.mxu0  ;;  %v1620_v40 = vpop.f32.mrf.mxu1 }
  0xd6   : > { %v611_v39 = vadd.f32 %v1588_v38, %v1853_v37  ;;  %v739_v41 = vadd.f32 %v1620_v40, %v1853_v37 }
  0xd7   : > { %v602_v42 = vpop.f32.mrf.mxu0  ;;  %v730_v45 = vpop.f32.mrf.mxu1 }
  0xd8   : > { %v859_v43 = vmax.f32 %v611_v39, 0.0  ;;  %v603_v44 = vadd.f32 %v1853_v37, %v602_v42  ;;  %v891_v46 = vmax.f32 %v739_v41, 0.0  ;;  %v731_v47 = vadd.f32 %v1853_v37, %v730_v45 }
  0xd9   : > { %v1589_v48 = vpop.f32.mrf.mxu0  ;;  %v1621_v52 = vpop.f32.mrf.mxu1 }
  0xda   : > { %v1489_v49 = vpack.c.bf16 %v859_v43, %v859_v43  ;;  %v857_v50 = vmax.f32 %v603_v44, 0.0  ;;  %v614_v51 = vadd.f32 %v1589_v48, %v1853_v37  ;;  %v1521_v53 = vpack.c.bf16 %v891_v46, %v891_v46 }
  0xdb   : > { %v889_v54 = vmax.f32 %v731_v47, 0.0  ;;  %v742_v55 = vadd.f32 %v1621_v52, %v1853_v37  ;;  %v605_v56 = vpop.f32.mrf.mxu0  ;;  %v733_v60 = vpop.f32.mrf.mxu1 }
  0xdc   : > { %1180 = vst.msk [vmem:[%s1863_s27 + $0x8] sm:$0xf] %vm1177_vm3, %v1489_v49  ;;  %v1487_v57 = vpack.c.bf16 %v857_v50, %v857_v50  ;;  %v860_v58 = vmax.f32 %v614_v51, 0.0  ;;  %v606_v59 = vadd.f32 %v1853_v37, %v605_v56  ;;  %1212 = vst.msk [vmem:[%s1863_s27 + $0x88] sm:$0xf] %vm1177_vm3, %v1521_v53  ;;  %v734_v63 = vadd.f32 %v1853_v37, %v733_v60 }
  0xdd   : > { %v1519_v61 = vpack.c.bf16 %v889_v54, %v889_v54  ;;  %v892_v62 = vmax.f32 %v742_v55, 0.0  ;;  %v1592_v0 = vpop.f32.mrf.mxu0  ;;  %v1624_v4 = vpop.f32.mrf.mxu1 }
  0xde   : > { %1178 = vst.msk [vmem:[%s1863_s27] sm:$0xf] %vm1177_vm3, %v1487_v57  ;;  %v1490_v1 = vpack.c.bf16 %v860_v58, %v860_v58  ;;  %v858_v2 = vmax.f32 %v606_v59, 0.0  ;;  %v627_v3 = vadd.f32 %v1592_v0, %v1853_v37  ;;  %v890_v6 = vmax.f32 %v734_v63, 0.0 }
  0xdf   : > { %1210 = vst.msk [vmem:[%s1863_s27 + $0x80] sm:$0xf] %vm1177_vm3, %v1519_v61  ;;  %v1522_v5 = vpack.c.bf16 %v892_v62, %v892_v62  ;;  %v755_v7 = vadd.f32 %v1624_v4, %v1853_v37  ;;  %v618_v8 = vpop.f32.mrf.mxu0  ;;  %v746_v12 = vpop.f32.mrf.mxu1 }
  0xe0   : > { %1181 = vst.msk [vmem:[%s1863_s27 + $0xc] sm:$0xf] %vm1177_vm3, %v1490_v1  ;;  %v1488_v9 = vpack.c.bf16 %v858_v2, %v858_v2  ;;  %v863_v10 = vmax.f32 %v627_v3, 0.0  ;;  %v619_v11 = vadd.f32 %v1853_v37, %v618_v8  ;;  %v1520_v13 = vpack.c.bf16 %v890_v6, %v890_v6 }
  0xe1   : > { %1213 = vst.msk [vmem:[%s1863_s27 + $0x8c] sm:$0xf] %vm1177_vm3, %v1522_v5  ;;  %v895_v14 = vmax.f32 %v755_v7, 0.0  ;;  %v747_v15 = vadd.f32 %v1853_v37, %v746_v12  ;;  %v1593_v16 = vpop.f32.mrf.mxu0  ;;  %v1625_v20 = vpop.f32.mrf.mxu1 }
  0xe2   : > { %1179 = vst.msk [vmem:[%s1863_s27 + $0x4] sm:$0xf] %vm1177_vm3, %v1488_v9  ;;  %v1493_v17 = vpack.c.bf16 %v863_v10, %v863_v10  ;;  %v861_v18 = vmax.f32 %v619_v11, 0.0  ;;  %v630_v19 = vadd.f32 %v1593_v16, %v1853_v37  ;;  %1211 = vst.msk [vmem:[%s1863_s27 + $0x84] sm:$0xf] %vm1177_vm3, %v1520_v13  ;;  %v758_v23 = vadd.f32 %v1625_v20, %v1853_v37 }
  0xe3   : > { %v1525_v21 = vpack.c.bf16 %v895_v14, %v895_v14  ;;  %v893_v22 = vmax.f32 %v747_v15, 0.0  ;;  %v621_v24 = vpop.f32.mrf.mxu0  ;;  %v749_v28 = vpop.f32.mrf.mxu1 }
  0xe4   : > { %1184 = vst.msk [vmem:[%s1863_s27 + $0x18] sm:$0xf] %vm1177_vm3, %v1493_v17  ;;  %v1491_v25 = vpack.c.bf16 %v861_v18, %v861_v18  ;;  %v864_v26 = vmax.f32 %v630_v19, 0.0  ;;  %v622_v27 = vadd.f32 %v1853_v37, %v621_v24  ;;  %v896_v30 = vmax.f32 %v758_v23, 0.0 }
  0xe5   : > { %1216 = vst.msk [vmem:[%s1863_s27 + $0x98] sm:$0xf] %vm1177_vm3, %v1525_v21  ;;  %v1523_v29 = vpack.c.bf16 %v893_v22, %v893_v22  ;;  %v750_v31 = vadd.f32 %v1853_v37, %v749_v28  ;;  %v1596_v32 = vpop.f32.mrf.mxu0  ;;  %v1628_v36 = vpop.f32.mrf.mxu1 }
  0xe6   : > { %1182 = vst.msk [vmem:[%s1863_s27 + $0x10] sm:$0xf] %vm1177_vm3, %v1491_v25  ;;  %v1494_v33 = vpack.c.bf16 %v864_v26, %v864_v26  ;;  %v862_v34 = vmax.f32 %v622_v27, 0.0  ;;  %v643_v35 = vadd.f32 %v1596_v32, %v1853_v37  ;;  %v1526_v38 = vpack.c.bf16 %v896_v30, %v896_v30 }
  0xe7   : > { %1214 = vst.msk [vmem:[%s1863_s27 + $0x90] sm:$0xf] %vm1177_vm3, %v1523_v29  ;;  %v894_v39 = vmax.f32 %v750_v31, 0.0  ;;  %v771_v40 = vadd.f32 %v1628_v36, %v1853_v37  ;;  %v634_v41 = vpop.f32.mrf.mxu0  ;;  %v762_v45 = vpop.f32.mrf.mxu1 }
  0xe8   : > { %1185 = vst.msk [vmem:[%s1863_s27 + $0x1c] sm:$0xf] %vm1177_vm3, %v1494_v33  ;;  %v1492_v42 = vpack.c.bf16 %v862_v34, %v862_v34  ;;  %v867_v43 = vmax.f32 %v643_v35, 0.0  ;;  %v635_v44 = vadd.f32 %v1853_v37, %v634_v41  ;;  %1217 = vst.msk [vmem:[%s1863_s27 + $0x9c] sm:$0xf] %vm1177_vm3, %v1526_v38  ;;  %v763_v48 = vadd.f32 %v1853_v37, %v762_v45 }
  0xe9   : > { %v1524_v46 = vpack.c.bf16 %v894_v39, %v894_v39  ;;  %v899_v47 = vmax.f32 %v771_v40, 0.0  ;;  %v1597_v49 = vpop.f32.mrf.mxu0  ;;  %v1629_v53 = vpop.f32.mrf.mxu1 }
  0xea   : > { %1183 = vst.msk [vmem:[%s1863_s27 + $0x14] sm:$0xf] %vm1177_vm3, %v1492_v42  ;;  %v1497_v50 = vpack.c.bf16 %v867_v43, %v867_v43  ;;  %v865_v51 = vmax.f32 %v635_v44, 0.0  ;;  %v646_v52 = vadd.f32 %v1597_v49, %v1853_v37  ;;  %v897_v55 = vmax.f32 %v763_v48, 0.0 }
  0xeb   : > { %1215 = vst.msk [vmem:[%s1863_s27 + $0x94] sm:$0xf] %vm1177_vm3, %v1524_v46  ;;  %v1529_v54 = vpack.c.bf16 %v899_v47, %v899_v47  ;;  %v774_v56 = vadd.f32 %v1629_v53, %v1853_v37  ;;  %v637_v57 = vpop.f32.mrf.mxu0  ;;  %v765_v61 = vpop.f32.mrf.mxu1 }
  0xec   : > { %1188 = vst.msk [vmem:[%s1863_s27 + $0x28] sm:$0xf] %vm1177_vm3, %v1497_v50  ;;  %v1495_v58 = vpack.c.bf16 %v865_v51, %v865_v51  ;;  %v868_v59 = vmax.f32 %v646_v52, 0.0  ;;  %v638_v60 = vadd.f32 %v1853_v37, %v637_v57  ;;  %v1527_v62 = vpack.c.bf16 %v897_v55, %v897_v55 }
  0xed   : > { %1220 = vst.msk [vmem:[%s1863_s27 + $0xa8] sm:$0xf] %vm1177_vm3, %v1529_v54  ;;  %v900_v63 = vmax.f32 %v774_v56, 0.0  ;;  %v766_v0 = vadd.f32 %v1853_v37, %v765_v61  ;;  %v1600_v1 = vpop.f32.mrf.mxu0  ;;  %v1632_v5 = vpop.f32.mrf.mxu1 }
  0xee   : > { %1186 = vst.msk [vmem:[%s1863_s27 + $0x20] sm:$0xf] %vm1177_vm3, %v1495_v58  ;;  %v1498_v2 = vpack.c.bf16 %v868_v59, %v868_v59  ;;  %v866_v3 = vmax.f32 %v638_v60, 0.0  ;;  %v659_v4 = vadd.f32 %v1600_v1, %v1853_v37  ;;  %1218 = vst.msk [vmem:[%s1863_s27 + $0xa0] sm:$0xf] %vm1177_vm3, %v1527_v62  ;;  %v787_v8 = vadd.f32 %v1632_v5, %v1853_v37 }
  0xef   : > { %v1530_v6 = vpack.c.bf16 %v900_v63, %v900_v63  ;;  %v898_v7 = vmax.f32 %v766_v0, 0.0  ;;  %v650_v9 = vpop.f32.mrf.mxu0  ;;  %v778_v13 = vpop.f32.mrf.mxu1 }
  0xf0   : > { %1189 = vst.msk [vmem:[%s1863_s27 + $0x2c] sm:$0xf] %vm1177_vm3, %v1498_v2  ;;  %v1496_v10 = vpack.c.bf16 %v866_v3, %v866_v3  ;;  %v871_v11 = vmax.f32 %v659_v4, 0.0  ;;  %v651_v12 = vadd.f32 %v1853_v37, %v650_v9  ;;  %v903_v15 = vmax.f32 %v787_v8, 0.0 }
  0xf1   : > { %1221 = vst.msk [vmem:[%s1863_s27 + $0xac] sm:$0xf] %vm1177_vm3, %v1530_v6  ;;  %v1528_v14 = vpack.c.bf16 %v898_v7, %v898_v7  ;;  %v779_v16 = vadd.f32 %v1853_v37, %v778_v13  ;;  %v1601_v17 = vpop.f32.mrf.mxu0  ;;  %v1633_v21 = vpop.f32.mrf.mxu1 }
  0xf2   : > { %1187 = vst.msk [vmem:[%s1863_s27 + $0x24] sm:$0xf] %vm1177_vm3, %v1496_v10  ;;  %v1501_v18 = vpack.c.bf16 %v871_v11, %v871_v11  ;;  %v869_v19 = vmax.f32 %v651_v12, 0.0  ;;  %v662_v20 = vadd.f32 %v1601_v17, %v1853_v37  ;;  %v1533_v22 = vpack.c.bf16 %v903_v15, %v903_v15 }
  0xf3   : > { %1219 = vst.msk [vmem:[%s1863_s27 + $0xa4] sm:$0xf] %vm1177_vm3, %v1528_v14  ;;  %v901_v23 = vmax.f32 %v779_v16, 0.0  ;;  %v790_v24 = vadd.f32 %v1633_v21, %v1853_v37  ;;  %v653_v25 = vpop.f32.mrf.mxu0  ;;  %v781_v29 = vpop.f32.mrf.mxu1 }
  0xf4   : > { %1192 = vst.msk [vmem:[%s1863_s27 + $0x38] sm:$0xf] %vm1177_vm3, %v1501_v18  ;;  %v1499_v26 = vpack.c.bf16 %v869_v19, %v869_v19  ;;  %v872_v27 = vmax.f32 %v662_v20, 0.0  ;;  %v654_v28 = vadd.f32 %v1853_v37, %v653_v25  ;;  %1224 = vst.msk [vmem:[%s1863_s27 + $0xb8] sm:$0xf] %vm1177_vm3, %v1533_v22  ;;  %v782_v32 = vadd.f32 %v1853_v37, %v781_v29 }
  0xf5   : > { %v1531_v30 = vpack.c.bf16 %v901_v23, %v901_v23  ;;  %v904_v31 = vmax.f32 %v790_v24, 0.0  ;;  %v1604_v33 = vpop.f32.mrf.mxu0  ;;  %v1636_v38 = vpop.f32.mrf.mxu1 }
  0xf6   : > { %1190 = vst.msk [vmem:[%s1863_s27 + $0x30] sm:$0xf] %vm1177_vm3, %v1499_v26  ;;  %v1502_v34 = vpack.c.bf16 %v872_v27, %v872_v27  ;;  %v870_v35 = vmax.f32 %v654_v28, 0.0  ;;  %v675_v36 = vadd.f32 %v1604_v33, %v1853_v37  ;;  %v902_v40 = vmax.f32 %v782_v32, 0.0 }
  0xf7   : > { %1222 = vst.msk [vmem:[%s1863_s27 + $0xb0] sm:$0xf] %vm1177_vm3, %v1531_v30  ;;  %v1534_v39 = vpack.c.bf16 %v904_v31, %v904_v31  ;;  %v803_v41 = vadd.f32 %v1636_v38, %v1853_v37  ;;  %v666_v42 = vpop.f32.mrf.mxu0  ;;  %v794_v46 = vpop.f32.mrf.mxu1 }
  0xf8   : > { %1193 = vst.msk [vmem:[%s1863_s27 + $0x3c] sm:$0xf] %vm1177_vm3, %v1502_v34  ;;  %v1500_v43 = vpack.c.bf16 %v870_v35, %v870_v35  ;;  %v875_v44 = vmax.f32 %v675_v36, 0.0  ;;  %v667_v45 = vadd.f32 %v1853_v37, %v666_v42  ;;  %v1532_v47 = vpack.c.bf16 %v902_v40, %v902_v40 }
  0xf9   : > { %1225 = vst.msk [vmem:[%s1863_s27 + $0xbc] sm:$0xf] %vm1177_vm3, %v1534_v39  ;;  %v907_v48 = vmax.f32 %v803_v41, 0.0  ;;  %v795_v49 = vadd.f32 %v1853_v37, %v794_v46  ;;  %v1605_v50 = vpop.f32.mrf.mxu0  ;;  %v1637_v54 = vpop.f32.mrf.mxu1 }
  0xfa   : > { %1191 = vst.msk [vmem:[%s1863_s27 + $0x34] sm:$0xf] %vm1177_vm3, %v1500_v43  ;;  %v1505_v51 = vpack.c.bf16 %v875_v44, %v875_v44  ;;  %v873_v52 = vmax.f32 %v667_v45, 0.0  ;;  %v678_v53 = vadd.f32 %v1605_v50, %v1853_v37  ;;  %1223 = vst.msk [vmem:[%s1863_s27 + $0xb4] sm:$0xf] %vm1177_vm3, %v1532_v47  ;;  %v806_v57 = vadd.f32 %v1637_v54, %v1853_v37 }
  0xfb   : > { %v1537_v55 = vpack.c.bf16 %v907_v48, %v907_v48  ;;  %v905_v56 = vmax.f32 %v795_v49, 0.0  ;;  %v669_v58 = vpop.f32.mrf.mxu0  ;;  %v797_v62 = vpop.f32.mrf.mxu1 }
  0xfc   : > { %1196 = vst.msk [vmem:[%s1863_s27 + $0x48] sm:$0xf] %vm1177_vm3, %v1505_v51  ;;  %v1503_v59 = vpack.c.bf16 %v873_v52, %v873_v52  ;;  %v876_v60 = vmax.f32 %v678_v53, 0.0  ;;  %v670_v61 = vadd.f32 %v1853_v37, %v669_v58  ;;  %v908_v0 = vmax.f32 %v806_v57, 0.0 }
  0xfd   : > { %1228 = vst.msk [vmem:[%s1863_s27 + $0xc8] sm:$0xf] %vm1177_vm3, %v1537_v55  ;;  %v1535_v63 = vpack.c.bf16 %v905_v56, %v905_v56  ;;  %v798_v1 = vadd.f32 %v1853_v37, %v797_v62  ;;  %v1608_v2 = vpop.f32.mrf.mxu0  ;;  %v1640_v6 = vpop.f32.mrf.mxu1 }
  0xfe   : > { %1194 = vst.msk [vmem:[%s1863_s27 + $0x40] sm:$0xf] %vm1177_vm3, %v1503_v59  ;;  %v1506_v3 = vpack.c.bf16 %v876_v60, %v876_v60  ;;  %v874_v4 = vmax.f32 %v670_v61, 0.0  ;;  %v691_v5 = vadd.f32 %v1608_v2, %v1853_v37  ;;  %v1538_v7 = vpack.c.bf16 %v908_v0, %v908_v0 }
  0xff   : > { %1226 = vst.msk [vmem:[%s1863_s27 + $0xc0] sm:$0xf] %vm1177_vm3, %v1535_v63  ;;  %v906_v8 = vmax.f32 %v798_v1, 0.0  ;;  %v819_v9 = vadd.f32 %v1640_v6, %v1853_v37  ;;  %v682_v10 = vpop.f32.mrf.mxu0  ;;  %v810_v14 = vpop.f32.mrf.mxu1 }
 0x100   : > { %1197 = vst.msk [vmem:[%s1863_s27 + $0x4c] sm:$0xf] %vm1177_vm3, %v1506_v3  ;;  %v1504_v11 = vpack.c.bf16 %v874_v4, %v874_v4  ;;  %v879_v12 = vmax.f32 %v691_v5, 0.0  ;;  %v683_v13 = vadd.f32 %v1853_v37, %v682_v10  ;;  %1229 = vst.msk [vmem:[%s1863_s27 + $0xcc] sm:$0xf] %vm1177_vm3, %v1538_v7  ;;  %v811_v17 = vadd.f32 %v1853_v37, %v810_v14 }
 0x101   : > { %v1536_v15 = vpack.c.bf16 %v906_v8, %v906_v8  ;;  %v911_v16 = vmax.f32 %v819_v9, 0.0  ;;  %v1609_v18 = vpop.f32.mrf.mxu0  ;;  %v1641_v22 = vpop.f32.mrf.mxu1 }
 0x102   : > { %1195 = vst.msk [vmem:[%s1863_s27 + $0x44] sm:$0xf] %vm1177_vm3, %v1504_v11  ;;  %v1509_v19 = vpack.c.bf16 %v879_v12, %v879_v12  ;;  %v877_v20 = vmax.f32 %v683_v13, 0.0  ;;  %v694_v21 = vadd.f32 %v1609_v18, %v1853_v37  ;;  %v909_v24 = vmax.f32 %v811_v17, 0.0 }
 0x103   : > { %1227 = vst.msk [vmem:[%s1863_s27 + $0xc4] sm:$0xf] %vm1177_vm3, %v1536_v15  ;;  %v1541_v23 = vpack.c.bf16 %v911_v16, %v911_v16  ;;  %v822_v25 = vadd.f32 %v1641_v22, %v1853_v37  ;;  %v685_v26 = vpop.f32.mrf.mxu0  ;;  %v813_v30 = vpop.f32.mrf.mxu1 }
 0x104   : > { %1200 = vst.msk [vmem:[%s1863_s27 + $0x58] sm:$0xf] %vm1177_vm3, %v1509_v19  ;;  %v1507_v27 = vpack.c.bf16 %v877_v20, %v877_v20  ;;  %v880_v28 = vmax.f32 %v694_v21, 0.0  ;;  %v686_v29 = vadd.f32 %v1853_v37, %v685_v26  ;;  %v1539_v31 = vpack.c.bf16 %v909_v24, %v909_v24 }
 0x105   : > { %1232 = vst.msk [vmem:[%s1863_s27 + $0xd8] sm:$0xf] %vm1177_vm3, %v1541_v23  ;;  %v912_v32 = vmax.f32 %v822_v25, 0.0  ;;  %v814_v33 = vadd.f32 %v1853_v37, %v813_v30  ;;  %v1612_v34 = vpop.f32.mrf.mxu0  ;;  %v1644_v39 = vpop.f32.mrf.mxu1 }
 0x106   : > { %1198 = vst.msk [vmem:[%s1863_s27 + $0x50] sm:$0xf] %vm1177_vm3, %v1507_v27  ;;  %v1510_v35 = vpack.c.bf16 %v880_v28, %v880_v28  ;;  %v878_v36 = vmax.f32 %v686_v29, 0.0  ;;  %v707_v38 = vadd.f32 %v1612_v34, %v1853_v37  ;;  %1230 = vst.msk [vmem:[%s1863_s27 + $0xd0] sm:$0xf] %vm1177_vm3, %v1539_v31  ;;  %v835_v42 = vadd.f32 %v1644_v39, %v1853_v37 }
 0x107   : > { %v1542_v40 = vpack.c.bf16 %v912_v32, %v912_v32  ;;  %v910_v41 = vmax.f32 %v814_v33, 0.0  ;;  %v698_v43 = vpop.f32.mrf.mxu0  ;;  %v826_v47 = vpop.f32.mrf.mxu1 }
 0x108   : > { %1201 = vst.msk [vmem:[%s1863_s27 + $0x5c] sm:$0xf] %vm1177_vm3, %v1510_v35  ;;  %v1508_v44 = vpack.c.bf16 %v878_v36, %v878_v36  ;;  %v883_v45 = vmax.f32 %v707_v38, 0.0  ;;  %v699_v46 = vadd.f32 %v1853_v37, %v698_v43  ;;  %v915_v49 = vmax.f32 %v835_v42, 0.0 }
 0x109   : > { %1233 = vst.msk [vmem:[%s1863_s27 + $0xdc] sm:$0xf] %vm1177_vm3, %v1542_v40  ;;  %v1540_v48 = vpack.c.bf16 %v910_v41, %v910_v41  ;;  %v827_v50 = vadd.f32 %v1853_v37, %v826_v47  ;;  %v1613_v51 = vpop.f32.mrf.mxu0  ;;  %v1645_v55 = vpop.f32.mrf.mxu1 }
 0x10a   : > { %1199 = vst.msk [vmem:[%s1863_s27 + $0x54] sm:$0xf] %vm1177_vm3, %v1508_v44  ;;  %v1513_v52 = vpack.c.bf16 %v883_v45, %v883_v45  ;;  %v881_v53 = vmax.f32 %v699_v46, 0.0  ;;  %v710_v54 = vadd.f32 %v1613_v51, %v1853_v37  ;;  %v1545_v56 = vpack.c.bf16 %v915_v49, %v915_v49 }
 0x10b   : > { %1231 = vst.msk [vmem:[%s1863_s27 + $0xd4] sm:$0xf] %vm1177_vm3, %v1540_v48  ;;  %v913_v57 = vmax.f32 %v827_v50, 0.0  ;;  %v838_v58 = vadd.f32 %v1645_v55, %v1853_v37  ;;  %v701_v59 = vpop.f32.mrf.mxu0  ;;  %v829_v63 = vpop.f32.mrf.mxu1 }
 0x10c   : > { %1204 = vst.msk [vmem:[%s1863_s27 + $0x68] sm:$0xf] %vm1177_vm3, %v1513_v52  ;;  %v1511_v60 = vpack.c.bf16 %v881_v53, %v881_v53  ;;  %v884_v61 = vmax.f32 %v710_v54, 0.0  ;;  %v702_v62 = vadd.f32 %v1853_v37, %v701_v59  ;;  %1236 = vst.msk [vmem:[%s1863_s27 + $0xe8] sm:$0xf] %vm1177_vm3, %v1545_v56  ;;  %v830_v2 = vadd.f32 %v1853_v37, %v829_v63 }
 0x10d   : > { %v1543_v0 = vpack.c.bf16 %v913_v57, %v913_v57  ;;  %v916_v1 = vmax.f32 %v838_v58, 0.0  ;;  %v1616_v3 = vpop.f32.mrf.mxu0  ;;  %v1648_v7 = vpop.f32.mrf.mxu1 }
 0x10e   : > { %1202 = vst.msk [vmem:[%s1863_s27 + $0x60] sm:$0xf] %vm1177_vm3, %v1511_v60  ;;  %v1514_v4 = vpack.c.bf16 %v884_v61, %v884_v61  ;;  %v882_v5 = vmax.f32 %v702_v62, 0.0  ;;  %v723_v6 = vadd.f32 %v1616_v3, %v1853_v37  ;;  %v914_v9 = vmax.f32 %v830_v2, 0.0 }
 0x10f   : > { %1234 = vst.msk [vmem:[%s1863_s27 + $0xe0] sm:$0xf] %vm1177_vm3, %v1543_v0  ;;  %v1546_v8 = vpack.c.bf16 %v916_v1, %v916_v1  ;;  %v851_v10 = vadd.f32 %v1648_v7, %v1853_v37  ;;  %v714_v11 = vpop.f32.mrf.mxu0  ;;  %v842_v15 = vpop.f32.mrf.mxu1 }
 0x110   : > { %1205 = vst.msk [vmem:[%s1863_s27 + $0x6c] sm:$0xf] %vm1177_vm3, %v1514_v4  ;;  %v1512_v12 = vpack.c.bf16 %v882_v5, %v882_v5  ;;  %v887_v13 = vmax.f32 %v723_v6, 0.0  ;;  %v715_v14 = vadd.f32 %v1853_v37, %v714_v11  ;;  %v1544_v16 = vpack.c.bf16 %v914_v9, %v914_v9 }
 0x111   : > { %1237 = vst.msk [vmem:[%s1863_s27 + $0xec] sm:$0xf] %vm1177_vm3, %v1546_v8  ;;  %v919_v17 = vmax.f32 %v851_v10, 0.0  ;;  %v843_v18 = vadd.f32 %v1853_v37, %v842_v15  ;;  %v1617_v19 = vpop.f32.mrf.mxu0  ;;  %v1649_v23 = vpop.f32.mrf.mxu1 }
 0x112   : > { %1203 = vst.msk [vmem:[%s1863_s27 + $0x64] sm:$0xf] %vm1177_vm3, %v1512_v12  ;;  %v1517_v20 = vpack.c.bf16 %v887_v13, %v887_v13  ;;  %v885_v21 = vmax.f32 %v715_v14, 0.0  ;;  %v726_v22 = vadd.f32 %v1617_v19, %v1853_v37  ;;  %1235 = vst.msk [vmem:[%s1863_s27 + $0xe4] sm:$0xf] %vm1177_vm3, %v1544_v16  ;;  %v854_v26 = vadd.f32 %v1649_v23, %v1853_v37 }
 0x113   : > { %v1549_v24 = vpack.c.bf16 %v919_v17, %v919_v17  ;;  %v917_v25 = vmax.f32 %v843_v18, 0.0  ;;  %v717_v27 = vpop.f32.mrf.mxu0  ;;  %v845_v31 = vpop.f32.mrf.mxu1 }
 0x114   : > { %1208 = vst.msk [vmem:[%s1863_s27 + $0x78] sm:$0xf] %vm1177_vm3, %v1517_v20  ;;  %v1515_v28 = vpack.c.bf16 %v885_v21, %v885_v21  ;;  %v888_v29 = vmax.f32 %v726_v22, 0.0  ;;  %v718_v30 = vadd.f32 %v1853_v37, %v717_v27  ;;  %v920_v33 = vmax.f32 %v854_v26, 0.0 }
 0x115   : > { %1240 = vst.msk [vmem:[%s1863_s27 + $0xf8] sm:$0xf] %vm1177_vm3, %v1549_v24  ;;  %v1547_v32 = vpack.c.bf16 %v917_v25, %v917_v25  ;;  %v846_v34 = vadd.f32 %v1853_v37, %v845_v31 }
 0x116   : > { %1206 = vst.msk [vmem:[%s1863_s27 + $0x70] sm:$0xf] %vm1177_vm3, %v1515_v28  ;;  %v1518_v35 = vpack.c.bf16 %v888_v29, %v888_v29  ;;  %v886_v36 = vmax.f32 %v718_v30, 0.0  ;;  %v1550_v38 = vpack.c.bf16 %v920_v33, %v920_v33 }
 0x117   : > { %1238 = vst.msk [vmem:[%s1863_s27 + $0xf0] sm:$0xf] %vm1177_vm3, %v1547_v32  ;;  %v918_v39 = vmax.f32 %v846_v34, 0.0 }
 0x118   : > { %1209 = vst.msk [vmem:[%s1863_s27 + $0x7c] sm:$0xf] %vm1177_vm3, %v1518_v35  ;;  %v1516_v40 = vpack.c.bf16 %v886_v36, %v886_v36  ;;  %1241 = vst.msk [vmem:[%s1863_s27 + $0xfc] sm:$0xf] %vm1177_vm3, %v1550_v38 }
 0x119   : > { %v1548_v41 = vpack.c.bf16 %v918_v39, %v918_v39 }
 0x11a   : > { %1207 = vst.msk [vmem:[%s1863_s27 + $0x74] sm:$0xf] %vm1177_vm3, %v1516_v40 }
 0x11b   : > { %1239 = vst.msk [vmem:[%s1863_s27 + $0xf4] sm:$0xf] %vm1177_vm3, %v1548_v41 }
 0x11c PF: > { %s13_s14 = sadd.s32 1, %s1732_s14   ;;  %s2067_s12 = smov %s1728_s13 }
 0x11d   : > { %p10_p5 = scmp.ge.s32.totalorder %s13_s14, 7   ;;  %s2068_s13 = smov %s2070_s15 }
 0x11f   :  { %12 = sbr.rel (!%p10_p5) target bundleno = 2 (0x2), region = 68 }

// kernel: _lambda_.22
= control target key start
LH: loop header
LB: loop body
LE: loop exit
PB: predicated region body
PF: predicated region fallthrough
CT: control target
= control target key end

     0   :  { %s1691_s12 = smov 0   ;;  %s1693_s13 = smov 0   ;;  %s1999_s0 = inlined_call_operand.vmem [shape: bf16[2560,9], index: 0, kind: input, shape index: {}]   ;;  %s2000_s1 = inlined_call_operand.vmem [shape: bf16[9,8], index: 1, kind: input, shape index: {}]   ;;  %s2001_s2 = inlined_call_operand.vmem [shape: f32[1,8], index: 2, kind: input, shape index: {}]   ;;  %s2002_s3 = inlined_call_operand.vmem [shape: bf16[2560,8], index: 3, kind: output, shape index: {}]  }
   0x1   :  { %s1695_s14 = smov 0  }
   0x2 LB: > { %s25_s15 = sadd.s32 1, %s1664_s13  ;;  %p1286_p0 = scmp.ge.s32.totalorder %s1668_s14, 1  ;;  %s1668_s14 = sphi %s1695_s14, %s13_s14   ;;  %s1664_s13 = sphi %s1693_s13, %s2004_s13   ;;  %s1660_s12 = sphi %s1691_s12, %s2003_s12  }
   0x3   : > { %p27_p1 = scmp.ge.s32.totalorder %s25_s15, 5  ;;  %p169_p2 = scmp.lt.s32.totalorder %s1668_s14, 6 }
   0x5   : > { %s2006_s15 = smov (%p27_p1, %s25_s15), 0  ;;  %p170_p3 = pnand %p1286_p0, %p169_p2 }
   0x6   : > { %s1287_s18 = sshll.u32 (!%p170_p3), %s1660_s12, 6 }
   0x7   : > { %173 = sbr.rel (%p170_p3) target bundleno = 281 (0x119), region = 32  ;;  %p204_p4 = scmp.lt.s32.totalorder (!%p170_p3), %s1287_s18, 319 }
   0xc   : > { %v1613_v0 = vld [vmem:[%s2000_s1] sm:$0x1f]   ;;  %vm561_vm0 = vcmask 1043456   ;;  %vm562_vm1 = vcmask 1044480   ;;  %v1670_v1 = vmov 65535   ;;  %s2008_s18 = smov (!%p204_p4, %s1287_s18), 319 }
   0xd   : > { %v563_v2 = vsel %vm561_vm0, 4294967295, %v1670_v1  ;;  %s1288_s19 = sshll.u32 %s2008_s18, 2  ;;  %vm464_vm2 = vcmask 72704   ;;  %v1789_v37 = vld [vmem:[%s2001_s2] ss:$0 sm:$0xff]  ;;  %vm1113_vm3 = vcmask 60416  }
   0xe   : > { %v564_v3 = vsel %vm562_vm1, %v563_v2, 0  ;;  %s1720_s22 = scalar_lea.vmem %s1999_s0, %s1288_s19  ;;  %s1797_s27 = scalar_lea.vmem %s2002_s3, %s1288_s19 }
   0xf   : > { %v566_v4 = vand.u32 %v1613_v0, %v564_v3  ;;  %v1614_v5 = vld [vmem:[%s1720_s22] sm:$0xff]   ;;  %v1616_v7 = vld [vmem:[%s1720_s22 + $0x8] sm:$0xff]   ;;  %v1618_v9 = vld [vmem:[%s1720_s22 + $0x10] sm:$0xff]  }
  0x10   : > { %v1615_v6 = vld [vmem:[%s1720_s22 + $0x80] sm:$0xff]   ;;  %1522 = vmatprep.mubr.msk.bf16.mxu0 %vm464_vm2, %v1614_v5  ;;  %v1617_v8 = vld [vmem:[%s1720_s22 + $0x88] sm:$0xff]   ;;  %v1619_v10 = vld [vmem:[%s1720_s22 + $0x90] sm:$0xff]  }
  0x11   : > { %1520 = vmatprep.subr.bf16.mxu0 %v566_v4  ;;  %1586 = vmatprep.subr.bf16.mxu1 %v566_v4  ;;  %v1620_v11 = vld [vmem:[%s1720_s22 + $0x18] sm:$0xff]   ;;  %v1622_v13 = vld [vmem:[%s1720_s22 + $0x20] sm:$0xff]   ;;  %v1624_v15 = vld [vmem:[%s1720_s22 + $0x28] sm:$0xff]  }
  0x12   : > { %1521 = vmatpush3.bf16.msra.mxu0 %v566_v4  ;;  %1587 = vmatpush3.bf16.msra.mxu1 %v566_v4  ;;  %v1621_v12 = vld [vmem:[%s1720_s22 + $0x98] sm:$0xff]   ;;  %v1623_v14 = vld [vmem:[%s1720_s22 + $0xa0] sm:$0xff]   ;;  %v1625_v16 = vld [vmem:[%s1720_s22 + $0xa8] sm:$0xff]  }
  0x13   : > { %1554 = vmatprep.mubr.msk.bf16.mxu1 %vm464_vm2, %v1615_v6  ;;  %v1626_v17 = vld [vmem:[%s1720_s22 + $0x30] sm:$0xff]   ;;  %v1628_v19 = vld [vmem:[%s1720_s22 + $0x38] sm:$0xff]   ;;  %v1630_v21 = vld [vmem:[%s1720_s22 + $0x40] sm:$0xff]  }
  0x14   : > { %v1627_v18 = vld [vmem:[%s1720_s22 + $0xb0] sm:$0xff]   ;;  %v1629_v20 = vld [vmem:[%s1720_s22 + $0xb8] sm:$0xff]   ;;  %v1631_v22 = vld [vmem:[%s1720_s22 + $0xc0] sm:$0xff]  }
  0x15   : > { %1523 = vmatmul.mubr.msk.bf16.vlgmr.msra.gmra.mxu0 %vm464_vm2, %v1616_v7  ;;  %1555 = vmatmul.mubr.msk.bf16.vlgmr.msra.gmra.mxu1 %vm464_vm2, %v1617_v8  ;;  %v1632_v23 = vld [vmem:[%s1720_s22 + $0x48] sm:$0xff]   ;;  %v1634_v25 = vld [vmem:[%s1720_s22 + $0x50] sm:$0xff]   ;;  %v1636_v27 = vld [vmem:[%s1720_s22 + $0x58] sm:$0xff]  }
  0x16   : > { %1526 = vmatprep.mubr.msk.bf16.mxu0 %vm464_vm2, %v1618_v9  ;;  %1558 = vmatprep.mubr.msk.bf16.mxu1 %vm464_vm2, %v1619_v10  ;;  %v1633_v24 = vld [vmem:[%s1720_s22 + $0xc8] sm:$0xff]   ;;  %v1635_v26 = vld [vmem:[%s1720_s22 + $0xd0] sm:$0xff]   ;;  %v1637_v28 = vld [vmem:[%s1720_s22 + $0xd8] sm:$0xff]  }
  0x17   : > { %v1638_v29 = vld [vmem:[%s1720_s22 + $0x60] sm:$0xff]   ;;  %v1640_v31 = vld [vmem:[%s1720_s22 + $0x68] sm:$0xff]   ;;  %v1642_v33 = vld [vmem:[%s1720_s22 + $0x70] sm:$0xff]  }
  0x18   : > { %v1639_v30 = vld [vmem:[%s1720_s22 + $0xe0] sm:$0xff]   ;;  %v1641_v32 = vld [vmem:[%s1720_s22 + $0xe8] sm:$0xff]   ;;  %v1643_v34 = vld [vmem:[%s1720_s22 + $0xf0] sm:$0xff]  }
  0x19   : > { %v1644_v35 = vld [vmem:[%s1720_s22 + $0x78] sm:$0xff]  }
  0x1a   : > { %v1645_v36 = vld [vmem:[%s1720_s22 + $0xf8] sm:$0xff]  }
  0x1d   : > { %1527 = vmatmul.mubr.msk.bf16.gmra.mxu0 %vm464_vm2, %v1620_v11  ;;  %1559 = vmatmul.mubr.msk.bf16.gmra.mxu1 %vm464_vm2, %v1621_v12 }
  0x1e   : > { %1530 = vmatprep.mubr.msk.bf16.mxu0 %vm464_vm2, %v1622_v13  ;;  %1562 = vmatprep.mubr.msk.bf16.mxu1 %vm464_vm2, %v1623_v14 }
  0x25   : > { %1531 = vmatmul.mubr.msk.bf16.gmra.mxu0 %vm464_vm2, %v1624_v15  ;;  %1563 = vmatmul.mubr.msk.bf16.gmra.mxu1 %vm464_vm2, %v1625_v16 }
  0x26   : > { %1534 = vmatprep.mubr.msk.bf16.mxu0 %vm464_vm2, %v1626_v17  ;;  %1566 = vmatprep.mubr.msk.bf16.mxu1 %vm464_vm2, %v1627_v18 }
  0x2d   : > { %1535 = vmatmul.mubr.msk.bf16.gmra.mxu0 %vm464_vm2, %v1628_v19  ;;  %1567 = vmatmul.mubr.msk.bf16.gmra.mxu1 %vm464_vm2, %v1629_v20 }
  0x2e   : > { %1538 = vmatprep.mubr.msk.bf16.mxu0 %vm464_vm2, %v1630_v21  ;;  %1570 = vmatprep.mubr.msk.bf16.mxu1 %vm464_vm2, %v1631_v22 }
  0x35   : > { %1539 = vmatmul.mubr.msk.bf16.gmra.mxu0 %vm464_vm2, %v1632_v23  ;;  %1571 = vmatmul.mubr.msk.bf16.gmra.mxu1 %vm464_vm2, %v1633_v24 }
  0x36   : > { %1542 = vmatprep.mubr.msk.bf16.mxu0 %vm464_vm2, %v1634_v25  ;;  %1574 = vmatprep.mubr.msk.bf16.mxu1 %vm464_vm2, %v1635_v26 }
  0x3d   : > { %1543 = vmatmul.mubr.msk.bf16.gmra.mxu0 %vm464_vm2, %v1636_v27  ;;  %1575 = vmatmul.mubr.msk.bf16.gmra.mxu1 %vm464_vm2, %v1637_v28 }
  0x3e   : > { %1546 = vmatprep.mubr.msk.bf16.mxu0 %vm464_vm2, %v1638_v29  ;;  %1578 = vmatprep.mubr.msk.bf16.mxu1 %vm464_vm2, %v1639_v30 }
  0x45   : > { %1547 = vmatmul.mubr.msk.bf16.gmra.mxu0 %vm464_vm2, %v1640_v31  ;;  %1579 = vmatmul.mubr.msk.bf16.gmra.mxu1 %vm464_vm2, %v1641_v32 }
  0x46   : > { %1550 = vmatprep.mubr.msk.bf16.mxu0 %vm464_vm2, %v1642_v33  ;;  %1582 = vmatprep.mubr.msk.bf16.mxu1 %vm464_vm2, %v1643_v34 }
  0x4d   : > { %1551 = vmatmul.mubr.msk.bf16.gmra.mxu0 %vm464_vm2, %v1644_v35  ;;  %1583 = vmatmul.mubr.msk.bf16.gmra.mxu1 %vm464_vm2, %v1645_v36 }
  0xd5   : > { %v1524_v38 = vpop.f32.mrf.mxu0  ;;  %v1556_v40 = vpop.f32.mrf.mxu1 }
  0xd6   : > { %v611_v39 = vadd.f32 %v1524_v38, %v1789_v37  ;;  %v739_v41 = vadd.f32 %v1556_v40, %v1789_v37 }
  0xd7   : > { %v602_v42 = vpop.f32.mrf.mxu0  ;;  %v730_v45 = vpop.f32.mrf.mxu1 }
  0xd8   : > { %v1425_v43 = vpack.c.bf16 %v611_v39, %v611_v39  ;;  %v603_v44 = vadd.f32 %v1789_v37, %v602_v42  ;;  %v1457_v46 = vpack.c.bf16 %v739_v41, %v739_v41  ;;  %v731_v47 = vadd.f32 %v1789_v37, %v730_v45 }
  0xd9   : > { %v1525_v48 = vpop.f32.mrf.mxu0  ;;  %v1557_v51 = vpop.f32.mrf.mxu1 }
  0xda   : > { %1116 = vst.msk [vmem:[%s1797_s27 + $0x8] sm:$0xf] %vm1113_vm3, %v1425_v43  ;;  %v1423_v49 = vpack.c.bf16 %v603_v44, %v603_v44  ;;  %v614_v50 = vadd.f32 %v1525_v48, %v1789_v37  ;;  %1148 = vst.msk [vmem:[%s1797_s27 + $0x88] sm:$0xf] %vm1113_vm3, %v1457_v46  ;;  %v1455_v52 = vpack.c.bf16 %v731_v47, %v731_v47 }
  0xdb   : > { %v742_v53 = vadd.f32 %v1557_v51, %v1789_v37  ;;  %v605_v54 = vpop.f32.mrf.mxu0  ;;  %v733_v57 = vpop.f32.mrf.mxu1 }
  0xdc   : > { %1114 = vst.msk [vmem:[%s1797_s27] sm:$0xf] %vm1113_vm3, %v1423_v49  ;;  %v1426_v55 = vpack.c.bf16 %v614_v50, %v614_v50  ;;  %v606_v56 = vadd.f32 %v1789_v37, %v605_v54  ;;  %1146 = vst.msk [vmem:[%s1797_s27 + $0x80] sm:$0xf] %vm1113_vm3, %v1455_v52  ;;  %v734_v59 = vadd.f32 %v1789_v37, %v733_v57 }
  0xdd   : > { %v1458_v58 = vpack.c.bf16 %v742_v53, %v742_v53  ;;  %v1528_v60 = vpop.f32.mrf.mxu0  ;;  %v1560_v63 = vpop.f32.mrf.mxu1 }
  0xde   : > { %1117 = vst.msk [vmem:[%s1797_s27 + $0xc] sm:$0xf] %vm1113_vm3, %v1426_v55  ;;  %v1424_v61 = vpack.c.bf16 %v606_v56, %v606_v56  ;;  %v627_v62 = vadd.f32 %v1528_v60, %v1789_v37  ;;  %v1456_v0 = vpack.c.bf16 %v734_v59, %v734_v59  ;;  %v755_v1 = vadd.f32 %v1560_v63, %v1789_v37 }
  0xdf   : > { %1149 = vst.msk [vmem:[%s1797_s27 + $0x8c] sm:$0xf] %vm1113_vm3, %v1458_v58  ;;  %v618_v2 = vpop.f32.mrf.mxu0  ;;  %v746_v5 = vpop.f32.mrf.mxu1 }
  0xe0   : > { %1115 = vst.msk [vmem:[%s1797_s27 + $0x4] sm:$0xf] %vm1113_vm3, %v1424_v61  ;;  %v1429_v3 = vpack.c.bf16 %v627_v62, %v627_v62  ;;  %v619_v4 = vadd.f32 %v1789_v37, %v618_v2  ;;  %1147 = vst.msk [vmem:[%s1797_s27 + $0x84] sm:$0xf] %vm1113_vm3, %v1456_v0  ;;  %v1461_v6 = vpack.c.bf16 %v755_v1, %v755_v1 }
  0xe1   : > { %v747_v7 = vadd.f32 %v1789_v37, %v746_v5  ;;  %v1529_v8 = vpop.f32.mrf.mxu0  ;;  %v1561_v11 = vpop.f32.mrf.mxu1 }
  0xe2   : > { %1120 = vst.msk [vmem:[%s1797_s27 + $0x18] sm:$0xf] %vm1113_vm3, %v1429_v3  ;;  %v1427_v9 = vpack.c.bf16 %v619_v4, %v619_v4  ;;  %v630_v10 = vadd.f32 %v1529_v8, %v1789_v37  ;;  %1152 = vst.msk [vmem:[%s1797_s27 + $0x98] sm:$0xf] %vm1113_vm3, %v1461_v6  ;;  %v758_v13 = vadd.f32 %v1561_v11, %v1789_v37 }
  0xe3   : > { %v1459_v12 = vpack.c.bf16 %v747_v7, %v747_v7  ;;  %v621_v14 = vpop.f32.mrf.mxu0  ;;  %v749_v17 = vpop.f32.mrf.mxu1 }
  0xe4   : > { %1118 = vst.msk [vmem:[%s1797_s27 + $0x10] sm:$0xf] %vm1113_vm3, %v1427_v9  ;;  %v1430_v15 = vpack.c.bf16 %v630_v10, %v630_v10  ;;  %v622_v16 = vadd.f32 %v1789_v37, %v621_v14  ;;  %v1462_v18 = vpack.c.bf16 %v758_v13, %v758_v13  ;;  %v750_v19 = vadd.f32 %v1789_v37, %v749_v17 }
  0xe5   : > { %1150 = vst.msk [vmem:[%s1797_s27 + $0x90] sm:$0xf] %vm1113_vm3, %v1459_v12  ;;  %v1532_v20 = vpop.f32.mrf.mxu0  ;;  %v1564_v23 = vpop.f32.mrf.mxu1 }
  0xe6   : > { %1121 = vst.msk [vmem:[%s1797_s27 + $0x1c] sm:$0xf] %vm1113_vm3, %v1430_v15  ;;  %v1428_v21 = vpack.c.bf16 %v622_v16, %v622_v16  ;;  %v643_v22 = vadd.f32 %v1532_v20, %v1789_v37  ;;  %1153 = vst.msk [vmem:[%s1797_s27 + $0x9c] sm:$0xf] %vm1113_vm3, %v1462_v18  ;;  %v1460_v24 = vpack.c.bf16 %v750_v19, %v750_v19 }
  0xe7   : > { %v771_v25 = vadd.f32 %v1564_v23, %v1789_v37  ;;  %v634_v26 = vpop.f32.mrf.mxu0  ;;  %v762_v29 = vpop.f32.mrf.mxu1 }
  0xe8   : > { %1119 = vst.msk [vmem:[%s1797_s27 + $0x14] sm:$0xf] %vm1113_vm3, %v1428_v21  ;;  %v1433_v27 = vpack.c.bf16 %v643_v22, %v643_v22  ;;  %v635_v28 = vadd.f32 %v1789_v37, %v634_v26  ;;  %1151 = vst.msk [vmem:[%s1797_s27 + $0x94] sm:$0xf] %vm1113_vm3, %v1460_v24  ;;  %v763_v31 = vadd.f32 %v1789_v37, %v762_v29 }
  0xe9   : > { %v1465_v30 = vpack.c.bf16 %v771_v25, %v771_v25  ;;  %v1533_v32 = vpop.f32.mrf.mxu0  ;;  %v1565_v35 = vpop.f32.mrf.mxu1 }
  0xea   : > { %1124 = vst.msk [vmem:[%s1797_s27 + $0x28] sm:$0xf] %vm1113_vm3, %v1433_v27  ;;  %v1431_v33 = vpack.c.bf16 %v635_v28, %v635_v28  ;;  %v646_v34 = vadd.f32 %v1533_v32, %v1789_v37  ;;  %v1463_v36 = vpack.c.bf16 %v763_v31, %v763_v31  ;;  %v774_v38 = vadd.f32 %v1565_v35, %v1789_v37 }
  0xeb   : > { %1156 = vst.msk [vmem:[%s1797_s27 + $0xa8] sm:$0xf] %vm1113_vm3, %v1465_v30  ;;  %v637_v39 = vpop.f32.mrf.mxu0  ;;  %v765_v42 = vpop.f32.mrf.mxu1 }
  0xec   : > { %1122 = vst.msk [vmem:[%s1797_s27 + $0x20] sm:$0xf] %vm1113_vm3, %v1431_v33  ;;  %v1434_v40 = vpack.c.bf16 %v646_v34, %v646_v34  ;;  %v638_v41 = vadd.f32 %v1789_v37, %v637_v39  ;;  %1154 = vst.msk [vmem:[%s1797_s27 + $0xa0] sm:$0xf] %vm1113_vm3, %v1463_v36  ;;  %v1466_v43 = vpack.c.bf16 %v774_v38, %v774_v38 }
  0xed   : > { %v766_v44 = vadd.f32 %v1789_v37, %v765_v42  ;;  %v1536_v45 = vpop.f32.mrf.mxu0  ;;  %v1568_v48 = vpop.f32.mrf.mxu1 }
  0xee   : > { %1125 = vst.msk [vmem:[%s1797_s27 + $0x2c] sm:$0xf] %vm1113_vm3, %v1434_v40  ;;  %v1432_v46 = vpack.c.bf16 %v638_v41, %v638_v41  ;;  %v659_v47 = vadd.f32 %v1536_v45, %v1789_v37  ;;  %1157 = vst.msk [vmem:[%s1797_s27 + $0xac] sm:$0xf] %vm1113_vm3, %v1466_v43  ;;  %v787_v50 = vadd.f32 %v1568_v48, %v1789_v37 }
  0xef   : > { %v1464_v49 = vpack.c.bf16 %v766_v44, %v766_v44  ;;  %v650_v51 = vpop.f32.mrf.mxu0  ;;  %v778_v54 = vpop.f32.mrf.mxu1 }
  0xf0   : > { %1123 = vst.msk [vmem:[%s1797_s27 + $0x24] sm:$0xf] %vm1113_vm3, %v1432_v46  ;;  %v1437_v52 = vpack.c.bf16 %v659_v47, %v659_v47  ;;  %v651_v53 = vadd.f32 %v1789_v37, %v650_v51  ;;  %v1469_v55 = vpack.c.bf16 %v787_v50, %v787_v50  ;;  %v779_v56 = vadd.f32 %v1789_v37, %v778_v54 }
  0xf1   : > { %1155 = vst.msk [vmem:[%s1797_s27 + $0xa4] sm:$0xf] %vm1113_vm3, %v1464_v49  ;;  %v1537_v57 = vpop.f32.mrf.mxu0  ;;  %v1569_v60 = vpop.f32.mrf.mxu1 }
  0xf2   : > { %1128 = vst.msk [vmem:[%s1797_s27 + $0x38] sm:$0xf] %vm1113_vm3, %v1437_v52  ;;  %v1435_v58 = vpack.c.bf16 %v651_v53, %v651_v53  ;;  %v662_v59 = vadd.f32 %v1537_v57, %v1789_v37  ;;  %1160 = vst.msk [vmem:[%s1797_s27 + $0xb8] sm:$0xf] %vm1113_vm3, %v1469_v55  ;;  %v1467_v61 = vpack.c.bf16 %v779_v56, %v779_v56 }
  0xf3   : > { %v790_v62 = vadd.f32 %v1569_v60, %v1789_v37  ;;  %v653_v63 = vpop.f32.mrf.mxu0  ;;  %v781_v2 = vpop.f32.mrf.mxu1 }
  0xf4   : > { %1126 = vst.msk [vmem:[%s1797_s27 + $0x30] sm:$0xf] %vm1113_vm3, %v1435_v58  ;;  %v1438_v0 = vpack.c.bf16 %v662_v59, %v662_v59  ;;  %v654_v1 = vadd.f32 %v1789_v37, %v653_v63  ;;  %1158 = vst.msk [vmem:[%s1797_s27 + $0xb0] sm:$0xf] %vm1113_vm3, %v1467_v61  ;;  %v782_v4 = vadd.f32 %v1789_v37, %v781_v2 }
  0xf5   : > { %v1470_v3 = vpack.c.bf16 %v790_v62, %v790_v62  ;;  %v1540_v5 = vpop.f32.mrf.mxu0  ;;  %v1572_v8 = vpop.f32.mrf.mxu1 }
  0xf6   : > { %1129 = vst.msk [vmem:[%s1797_s27 + $0x3c] sm:$0xf] %vm1113_vm3, %v1438_v0  ;;  %v1436_v6 = vpack.c.bf16 %v654_v1, %v654_v1  ;;  %v675_v7 = vadd.f32 %v1540_v5, %v1789_v37  ;;  %v1468_v9 = vpack.c.bf16 %v782_v4, %v782_v4  ;;  %v803_v10 = vadd.f32 %v1572_v8, %v1789_v37 }
  0xf7   : > { %1161 = vst.msk [vmem:[%s1797_s27 + $0xbc] sm:$0xf] %vm1113_vm3, %v1470_v3  ;;  %v666_v11 = vpop.f32.mrf.mxu0  ;;  %v794_v14 = vpop.f32.mrf.mxu1 }
  0xf8   : > { %1127 = vst.msk [vmem:[%s1797_s27 + $0x34] sm:$0xf] %vm1113_vm3, %v1436_v6  ;;  %v1441_v12 = vpack.c.bf16 %v675_v7, %v675_v7  ;;  %v667_v13 = vadd.f32 %v1789_v37, %v666_v11  ;;  %1159 = vst.msk [vmem:[%s1797_s27 + $0xb4] sm:$0xf] %vm1113_vm3, %v1468_v9  ;;  %v1473_v15 = vpack.c.bf16 %v803_v10, %v803_v10 }
  0xf9   : > { %v795_v16 = vadd.f32 %v1789_v37, %v794_v14  ;;  %v1541_v17 = vpop.f32.mrf.mxu0  ;;  %v1573_v20 = vpop.f32.mrf.mxu1 }
  0xfa   : > { %1132 = vst.msk [vmem:[%s1797_s27 + $0x48] sm:$0xf] %vm1113_vm3, %v1441_v12  ;;  %v1439_v18 = vpack.c.bf16 %v667_v13, %v667_v13  ;;  %v678_v19 = vadd.f32 %v1541_v17, %v1789_v37  ;;  %1164 = vst.msk [vmem:[%s1797_s27 + $0xc8] sm:$0xf] %vm1113_vm3, %v1473_v15  ;;  %v806_v22 = vadd.f32 %v1573_v20, %v1789_v37 }
  0xfb   : > { %v1471_v21 = vpack.c.bf16 %v795_v16, %v795_v16  ;;  %v669_v23 = vpop.f32.mrf.mxu0  ;;  %v797_v26 = vpop.f32.mrf.mxu1 }
  0xfc   : > { %1130 = vst.msk [vmem:[%s1797_s27 + $0x40] sm:$0xf] %vm1113_vm3, %v1439_v18  ;;  %v1442_v24 = vpack.c.bf16 %v678_v19, %v678_v19  ;;  %v670_v25 = vadd.f32 %v1789_v37, %v669_v23  ;;  %v1474_v27 = vpack.c.bf16 %v806_v22, %v806_v22  ;;  %v798_v28 = vadd.f32 %v1789_v37, %v797_v26 }
  0xfd   : > { %1162 = vst.msk [vmem:[%s1797_s27 + $0xc0] sm:$0xf] %vm1113_vm3, %v1471_v21  ;;  %v1544_v29 = vpop.f32.mrf.mxu0  ;;  %v1576_v32 = vpop.f32.mrf.mxu1 }
  0xfe   : > { %1133 = vst.msk [vmem:[%s1797_s27 + $0x4c] sm:$0xf] %vm1113_vm3, %v1442_v24  ;;  %v1440_v30 = vpack.c.bf16 %v670_v25, %v670_v25  ;;  %v691_v31 = vadd.f32 %v1544_v29, %v1789_v37  ;;  %1165 = vst.msk [vmem:[%s1797_s27 + $0xcc] sm:$0xf] %vm1113_vm3, %v1474_v27  ;;  %v1472_v33 = vpack.c.bf16 %v798_v28, %v798_v28 }
  0xff   : > { %v819_v34 = vadd.f32 %v1576_v32, %v1789_v37  ;;  %v682_v35 = vpop.f32.mrf.mxu0  ;;  %v810_v39 = vpop.f32.mrf.mxu1 }
 0x100   : > { %1131 = vst.msk [vmem:[%s1797_s27 + $0x44] sm:$0xf] %vm1113_vm3, %v1440_v30  ;;  %v1445_v36 = vpack.c.bf16 %v691_v31, %v691_v31  ;;  %v683_v38 = vadd.f32 %v1789_v37, %v682_v35  ;;  %1163 = vst.msk [vmem:[%s1797_s27 + $0xc4] sm:$0xf] %vm1113_vm3, %v1472_v33  ;;  %v811_v41 = vadd.f32 %v1789_v37, %v810_v39 }
 0x101   : > { %v1477_v40 = vpack.c.bf16 %v819_v34, %v819_v34  ;;  %v1545_v42 = vpop.f32.mrf.mxu0  ;;  %v1577_v45 = vpop.f32.mrf.mxu1 }
 0x102   : > { %1136 = vst.msk [vmem:[%s1797_s27 + $0x58] sm:$0xf] %vm1113_vm3, %v1445_v36  ;;  %v1443_v43 = vpack.c.bf16 %v683_v38, %v683_v38  ;;  %v694_v44 = vadd.f32 %v1545_v42, %v1789_v37  ;;  %v1475_v46 = vpack.c.bf16 %v811_v41, %v811_v41  ;;  %v822_v47 = vadd.f32 %v1577_v45, %v1789_v37 }
 0x103   : > { %1168 = vst.msk [vmem:[%s1797_s27 + $0xd8] sm:$0xf] %vm1113_vm3, %v1477_v40  ;;  %v685_v48 = vpop.f32.mrf.mxu0  ;;  %v813_v51 = vpop.f32.mrf.mxu1 }
 0x104   : > { %1134 = vst.msk [vmem:[%s1797_s27 + $0x50] sm:$0xf] %vm1113_vm3, %v1443_v43  ;;  %v1446_v49 = vpack.c.bf16 %v694_v44, %v694_v44  ;;  %v686_v50 = vadd.f32 %v1789_v37, %v685_v48  ;;  %1166 = vst.msk [vmem:[%s1797_s27 + $0xd0] sm:$0xf] %vm1113_vm3, %v1475_v46  ;;  %v1478_v52 = vpack.c.bf16 %v822_v47, %v822_v47 }
 0x105   : > { %v814_v53 = vadd.f32 %v1789_v37, %v813_v51  ;;  %v1548_v54 = vpop.f32.mrf.mxu0  ;;  %v1580_v57 = vpop.f32.mrf.mxu1 }
 0x106   : > { %1137 = vst.msk [vmem:[%s1797_s27 + $0x5c] sm:$0xf] %vm1113_vm3, %v1446_v49  ;;  %v1444_v55 = vpack.c.bf16 %v686_v50, %v686_v50  ;;  %v707_v56 = vadd.f32 %v1548_v54, %v1789_v37  ;;  %1169 = vst.msk [vmem:[%s1797_s27 + $0xdc] sm:$0xf] %vm1113_vm3, %v1478_v52  ;;  %v835_v59 = vadd.f32 %v1580_v57, %v1789_v37 }
 0x107   : > { %v1476_v58 = vpack.c.bf16 %v814_v53, %v814_v53  ;;  %v698_v60 = vpop.f32.mrf.mxu0  ;;  %v826_v63 = vpop.f32.mrf.mxu1 }
 0x108   : > { %1135 = vst.msk [vmem:[%s1797_s27 + $0x54] sm:$0xf] %vm1113_vm3, %v1444_v55  ;;  %v1449_v61 = vpack.c.bf16 %v707_v56, %v707_v56  ;;  %v699_v62 = vadd.f32 %v1789_v37, %v698_v60  ;;  %v1481_v0 = vpack.c.bf16 %v835_v59, %v835_v59  ;;  %v827_v1 = vadd.f32 %v1789_v37, %v826_v63 }
 0x109   : > { %1167 = vst.msk [vmem:[%s1797_s27 + $0xd4] sm:$0xf] %vm1113_vm3, %v1476_v58  ;;  %v1549_v2 = vpop.f32.mrf.mxu0  ;;  %v1581_v5 = vpop.f32.mrf.mxu1 }
 0x10a   : > { %1140 = vst.msk [vmem:[%s1797_s27 + $0x68] sm:$0xf] %vm1113_vm3, %v1449_v61  ;;  %v1447_v3 = vpack.c.bf16 %v699_v62, %v699_v62  ;;  %v710_v4 = vadd.f32 %v1549_v2, %v1789_v37  ;;  %1172 = vst.msk [vmem:[%s1797_s27 + $0xe8] sm:$0xf] %vm1113_vm3, %v1481_v0  ;;  %v1479_v6 = vpack.c.bf16 %v827_v1, %v827_v1 }
 0x10b   : > { %v838_v7 = vadd.f32 %v1581_v5, %v1789_v37  ;;  %v701_v8 = vpop.f32.mrf.mxu0  ;;  %v829_v11 = vpop.f32.mrf.mxu1 }
 0x10c   : > { %1138 = vst.msk [vmem:[%s1797_s27 + $0x60] sm:$0xf] %vm1113_vm3, %v1447_v3  ;;  %v1450_v9 = vpack.c.bf16 %v710_v4, %v710_v4  ;;  %v702_v10 = vadd.f32 %v1789_v37, %v701_v8  ;;  %1170 = vst.msk [vmem:[%s1797_s27 + $0xe0] sm:$0xf] %vm1113_vm3, %v1479_v6  ;;  %v830_v13 = vadd.f32 %v1789_v37, %v829_v11 }
 0x10d   : > { %v1482_v12 = vpack.c.bf16 %v838_v7, %v838_v7  ;;  %v1552_v14 = vpop.f32.mrf.mxu0  ;;  %v1584_v17 = vpop.f32.mrf.mxu1 }
 0x10e   : > { %1141 = vst.msk [vmem:[%s1797_s27 + $0x6c] sm:$0xf] %vm1113_vm3, %v1450_v9  ;;  %v1448_v15 = vpack.c.bf16 %v702_v10, %v702_v10  ;;  %v723_v16 = vadd.f32 %v1552_v14, %v1789_v37  ;;  %v1480_v18 = vpack.c.bf16 %v830_v13, %v830_v13  ;;  %v851_v19 = vadd.f32 %v1584_v17, %v1789_v37 }
 0x10f   : > { %1173 = vst.msk [vmem:[%s1797_s27 + $0xec] sm:$0xf] %vm1113_vm3, %v1482_v12  ;;  %v714_v20 = vpop.f32.mrf.mxu0  ;;  %v842_v23 = vpop.f32.mrf.mxu1 }
 0x110   : > { %1139 = vst.msk [vmem:[%s1797_s27 + $0x64] sm:$0xf] %vm1113_vm3, %v1448_v15  ;;  %v1453_v21 = vpack.c.bf16 %v723_v16, %v723_v16  ;;  %v715_v22 = vadd.f32 %v1789_v37, %v714_v20  ;;  %1171 = vst.msk [vmem:[%s1797_s27 + $0xe4] sm:$0xf] %vm1113_vm3, %v1480_v18  ;;  %v1485_v24 = vpack.c.bf16 %v851_v19, %v851_v19 }
 0x111   : > { %v843_v25 = vadd.f32 %v1789_v37, %v842_v23  ;;  %v1553_v26 = vpop.f32.mrf.mxu0  ;;  %v1585_v29 = vpop.f32.mrf.mxu1 }
 0x112   : > { %1144 = vst.msk [vmem:[%s1797_s27 + $0x78] sm:$0xf] %vm1113_vm3, %v1453_v21  ;;  %v1451_v27 = vpack.c.bf16 %v715_v22, %v715_v22  ;;  %v726_v28 = vadd.f32 %v1553_v26, %v1789_v37  ;;  %1176 = vst.msk [vmem:[%s1797_s27 + $0xf8] sm:$0xf] %vm1113_vm3, %v1485_v24  ;;  %v854_v31 = vadd.f32 %v1585_v29, %v1789_v37 }
 0x113   : > { %v1483_v30 = vpack.c.bf16 %v843_v25, %v843_v25  ;;  %v717_v32 = vpop.f32.mrf.mxu0  ;;  %v845_v35 = vpop.f32.mrf.mxu1 }
 0x114   : > { %1142 = vst.msk [vmem:[%s1797_s27 + $0x70] sm:$0xf] %vm1113_vm3, %v1451_v27  ;;  %v1454_v33 = vpack.c.bf16 %v726_v28, %v726_v28  ;;  %v718_v34 = vadd.f32 %v1789_v37, %v717_v32  ;;  %v1486_v36 = vpack.c.bf16 %v854_v31, %v854_v31  ;;  %v846_v38 = vadd.f32 %v1789_v37, %v845_v35 }
 0x115   : > { %1174 = vst.msk [vmem:[%s1797_s27 + $0xf0] sm:$0xf] %vm1113_vm3, %v1483_v30 }
 0x116   : > { %1145 = vst.msk [vmem:[%s1797_s27 + $0x7c] sm:$0xf] %vm1113_vm3, %v1454_v33  ;;  %v1452_v39 = vpack.c.bf16 %v718_v34, %v718_v34  ;;  %1177 = vst.msk [vmem:[%s1797_s27 + $0xfc] sm:$0xf] %vm1113_vm3, %v1486_v36  ;;  %v1484_v40 = vpack.c.bf16 %v846_v38, %v846_v38 }
 0x118   : > { %1143 = vst.msk [vmem:[%s1797_s27 + $0x74] sm:$0xf] %vm1113_vm3, %v1452_v39  ;;  %1175 = vst.msk [vmem:[%s1797_s27 + $0xf4] sm:$0xf] %vm1113_vm3, %v1484_v40 }
 0x119 PF: > { %s13_s14 = sadd.s32 1, %s1668_s14   ;;  %s2003_s12 = smov %s1664_s13 }
 0x11a   : > { %p10_p5 = scmp.ge.s32.totalorder %s13_s14, 7   ;;  %s2004_s13 = smov %s2006_s15 }
 0x11c   :  { %12 = sbr.rel (!%p10_p5) target bundleno = 2 (0x2), region = 68 }

// kernel: _lambda_.23
= control target key start
LH: loop header
LB: loop body
LE: loop exit
PB: predicated region body
PF: predicated region fallthrough
CT: control target
= control target key end

     0   :  { %s2242_s15 = smov 0   ;;  %s2244_s16 = smov 0   ;;  %s2853_s0 = inlined_call_operand.vmem [shape: bf16[2560,72], index: 0, kind: input, shape index: {}]   ;;  %s2854_s1 = inlined_call_operand.vmem [shape: bf16[72,8], index: 1, kind: input, shape index: {}]   ;;  %s2855_s2 = inlined_call_operand.vmem [shape: f32[1,8], index: 2, kind: input, shape index: {}]   ;;  %s2856_s3 = inlined_call_operand.vmem [shape: bf16[2560,8], index: 3, kind: input, shape index: {}]   ;;  %s2857_s4 = inlined_call_operand.vmem [shape: bf16[2560,8], index: 4, kind: output, shape index: {}]  }
   0x1   :  { %s2246_s17 = smov 0  }
   0x2 LB: > { %s26_s18 = sadd.s32 1, %s2211_s16  ;;  %p1643_p0 = scmp.ge.s32.totalorder %s2215_s17, 1  ;;  %s2215_s17 = sphi %s2246_s17, %s14_s17   ;;  %s2211_s16 = sphi %s2244_s16, %s2906_s16   ;;  %s2207_s15 = sphi %s2242_s15, %s2905_s15  }
   0x3   : > { %p28_p1 = scmp.ge.s32.totalorder %s26_s18, 5  ;;  %p210_p2 = scmp.lt.s32.totalorder %s2215_s17, 6 }
   0x5   : > { %s2908_s18 = smov (%p28_p1, %s26_s18), 0  ;;  %p211_p3 = pnand %p1643_p0, %p210_p2 }
   0x6   : > { %s1644_s23 = sshll.u32 (!%p211_p3), %s2207_s15, 6 }
   0x7   : > { %214 = sbr.rel (%p211_p3) target bundleno = 310 (0x136), region = 36  ;;  %p255_p4 = scmp.lt.s32.totalorder (!%p211_p3), %s1644_s23, 319 }
   0xc   : > { %v2156_v0 = vld [vmem:[%s2854_s1 + $0x20] ss:$0 sps:$4 sm:$0xff]   ;;  %vm650_vm0 = vcmask 1043456   ;;  %v2157_v1 = vld [vmem:[%s2854_s1 + $0x18] sm:$0xff]   ;;  %v2158_v3 = vld [vmem:[%s2854_s1 + $0x10] sm:$0xff]   ;;  %s2910_s23 = smov (!%p255_p4, %s1644_s23), 319 }
   0xd   : > { %2130 = vmatprep.subr.msk.bf16.mxu0 %vm650_vm0, %v2156_v0  ;;  %2131 = vmatprep.subr.msk.bf16.mxu1 %vm650_vm0, %v2156_v0  ;;  %v652_v2 = vsel %vm650_vm0, %v2156_v0, 0  ;;  %v2159_v4 = vld [vmem:[%s2854_s1 + $0x8] sm:$0xff]   ;;  %s2272_s28 = sshll.u32 %s2910_s23, 2  ;;  %vm553_vm1 = vcmask 588800   ;;  %v2160_v7 = vld [vmem:[%s2854_s1] sm:$0xff]   ;;  %vm1455_vm2 = vcmask 60416  }
   0xe   : > { %2047 = vmatpush3.bf16.msra.mxu0 %v652_v2  ;;  %2125 = vmatpush3.bf16.msra.mxu1 %v652_v2  ;;  %s2278_s5 = scalar_lea.vmem %s2853_s0, %s2272_s28  ;;  %s2351_s10 = scalar_lea.vmem %s2856_s3, %s2272_s28 }
   0xf   : > { %2048 = vmatprep.subr.bf16.mxu0 %v2157_v1  ;;  %2121 = vmatprep.subr.bf16.mxu1 %v2157_v1  ;;  %v2161_v5 = vld [vmem:[%s2278_s5] sm:$0xff]   ;;  %v2163_v8 = vld [vmem:[%s2278_s5 + $0x8] sm:$0xff]   ;;  %v2165_v10 = vld [vmem:[%s2278_s5 + $0x10] sm:$0xff]   ;;  %s2532_s15 = scalar_lea.vmem %s2857_s4, %s2272_s28 }
  0x10   : > { %v2162_v6 = vld [vmem:[%s2278_s5 + $0x80] sm:$0xff]   ;;  %2056 = vmatprep.mubr.msk.bf16.mxu0 %vm553_vm1, %v2161_v5  ;;  %v2164_v9 = vld [vmem:[%s2278_s5 + $0x88] sm:$0xff]   ;;  %v2166_v11 = vld [vmem:[%s2278_s5 + $0x90] sm:$0xff]  }
  0x11   : > { %2088 = vmatprep.mubr.msk.bf16.mxu1 %vm553_vm1, %v2162_v6  ;;  %v2167_v12 = vld [vmem:[%s2278_s5 + $0x18] sm:$0xff]   ;;  %v2169_v14 = vld [vmem:[%s2278_s5 + $0x20] sm:$0xff]   ;;  %v2171_v16 = vld [vmem:[%s2278_s5 + $0x28] sm:$0xff]  }
  0x12   : > { %2049 = vmatpush3.bf16.msra.mxu0 %v2157_v1  ;;  %2126 = vmatpush3.bf16.msra.mxu1 %v2157_v1  ;;  %v2168_v13 = vld [vmem:[%s2278_s5 + $0x98] sm:$0xff]   ;;  %v2170_v15 = vld [vmem:[%s2278_s5 + $0xa0] sm:$0xff]   ;;  %v2172_v17 = vld [vmem:[%s2278_s5 + $0xa8] sm:$0xff]  }
  0x13   : > { %2050 = vmatprep.subr.bf16.mxu0 %v2158_v3  ;;  %2122 = vmatprep.subr.bf16.mxu1 %v2158_v3  ;;  %v2173_v18 = vld [vmem:[%s2278_s5 + $0x30] sm:$0xff]   ;;  %v2175_v20 = vld [vmem:[%s2278_s5 + $0x38] sm:$0xff]   ;;  %v2177_v22 = vld [vmem:[%s2278_s5 + $0x40] sm:$0xff]  }
  0x14   : > { %v2174_v19 = vld [vmem:[%s2278_s5 + $0xb0] sm:$0xff]   ;;  %v2176_v21 = vld [vmem:[%s2278_s5 + $0xb8] sm:$0xff]   ;;  %v2178_v23 = vld [vmem:[%s2278_s5 + $0xc0] sm:$0xff]  }
  0x15   : > { %v2179_v24 = vld [vmem:[%s2278_s5 + $0x48] sm:$0xff]   ;;  %v2181_v26 = vld [vmem:[%s2278_s5 + $0x50] sm:$0xff]   ;;  %v2183_v28 = vld [vmem:[%s2278_s5 + $0x58] sm:$0xff]  }
  0x16   : > { %2051 = vmatpush3.bf16.msra.mxu0 %v2158_v3  ;;  %2127 = vmatpush3.bf16.msra.mxu1 %v2158_v3  ;;  %v2180_v25 = vld [vmem:[%s2278_s5 + $0xc8] sm:$0xff]   ;;  %v2182_v27 = vld [vmem:[%s2278_s5 + $0xd0] sm:$0xff]   ;;  %v2184_v29 = vld [vmem:[%s2278_s5 + $0xd8] sm:$0xff]  }
  0x17   : > { %2052 = vmatprep.subr.bf16.mxu0 %v2159_v4  ;;  %2123 = vmatprep.subr.bf16.mxu1 %v2159_v4  ;;  %v2185_v30 = vld [vmem:[%s2278_s5 + $0x60] sm:$0xff]   ;;  %v2187_v32 = vld [vmem:[%s2278_s5 + $0x68] sm:$0xff]   ;;  %v2189_v34 = vld [vmem:[%s2278_s5 + $0x70] sm:$0xff]  }
  0x18   : > { %v2186_v31 = vld [vmem:[%s2278_s5 + $0xe0] sm:$0xff]   ;;  %v2188_v33 = vld [vmem:[%s2278_s5 + $0xe8] sm:$0xff]   ;;  %v2190_v35 = vld [vmem:[%s2278_s5 + $0xf0] sm:$0xff]  }
  0x19   : > { %v2191_v36 = vld [vmem:[%s2278_s5 + $0x78] sm:$0xff]   ;;  %v2354_v38 = vld [vmem:[%s2351_s10 + $0x8] sm:$0xff]   ;;  %v2360_v40 = vld [vmem:[%s2351_s10] sm:$0xff]  }
  0x1a   : > { %2053 = vmatpush3.bf16.msra.mxu0 %v2159_v4  ;;  %2128 = vmatpush3.bf16.msra.mxu1 %v2159_v4  ;;  %v2192_v37 = vld [vmem:[%s2278_s5 + $0xf8] sm:$0xff]   ;;  %v2357_v39 = vld [vmem:[%s2351_s10 + $0x88] sm:$0xff]   ;;  %v2363_v41 = vld [vmem:[%s2351_s10 + $0x80] sm:$0xff]   ;;  %v1856_v46 = vunpack.c.l.bf16 %v2354_v38  ;;  %v1852_v48 = vunpack.c.l.bf16 %v2360_v40  ;;  %v1857_v51 = vunpack.c.h.bf16 %v2354_v38  ;;  %v1853_v53 = vunpack.c.h.bf16 %v2360_v40 }
  0x1b   : > { %2054 = vmatprep.subr.bf16.mxu0 %v2160_v7  ;;  %2124 = vmatprep.subr.bf16.mxu1 %v2160_v7  ;;  %v2366_v42 = vld [vmem:[%s2351_s10 + $0x18] sm:$0xff]   ;;  %v2372_v44 = vld [vmem:[%s2351_s10 + $0x10] sm:$0xff]   ;;  %v1920_v47 = vunpack.c.l.bf16 %v2357_v39  ;;  %v1916_v49 = vunpack.c.l.bf16 %v2363_v41  ;;  %v2382_v50 = vld [vmem:[%s2351_s10 + $0x28] sm:$0xff]   ;;  %v1921_v52 = vunpack.c.h.bf16 %v2357_v39  ;;  %v1917_v54 = vunpack.c.h.bf16 %v2363_v41 }
  0x1c   : > { %v2369_v43 = vld [vmem:[%s2351_s10 + $0x98] sm:$0xff]   ;;  %v2375_v45 = vld [vmem:[%s2351_s10 + $0x90] sm:$0xff]   ;;  %v2389_v55 = vld [vmem:[%s2351_s10 + $0xa8] sm:$0xff]   ;;  %v1864_v58 = vunpack.c.l.bf16 %v2366_v42  ;;  %v1860_v60 = vunpack.c.l.bf16 %v2372_v44  ;;  %v1865_v63 = vunpack.c.h.bf16 %v2366_v42  ;;  %v1861_v1 = vunpack.c.h.bf16 %v2372_v44 }
  0x1d   : > { %v2392_v56 = vld [vmem:[%s2351_s10 + $0x20] sm:$0xff]   ;;  %v1928_v59 = vunpack.c.l.bf16 %v2369_v43  ;;  %v1924_v61 = vunpack.c.l.bf16 %v2375_v45  ;;  %v2402_v62 = vld [vmem:[%s2351_s10 + $0x38] sm:$0xff]   ;;  %v1929_v0 = vunpack.c.h.bf16 %v2369_v43  ;;  %v2412_v4 = vld [vmem:[%s2351_s10 + $0x30] sm:$0xff]  }
  0x1e   : > { %2055 = vmatpush3.bf16.msra.mxu0 %v2160_v7  ;;  %2129 = vmatpush3.bf16.msra.mxu1 %v2160_v7  ;;  %v2395_v57 = vld [vmem:[%s2351_s10 + $0xa0] sm:$0xff]   ;;  %v2409_v3 = vld [vmem:[%s2351_s10 + $0xb8] sm:$0xff]   ;;  %v2415_v5 = vld [vmem:[%s2351_s10 + $0xb0] sm:$0xff]  }
  0x21   : > { %2057 = vmatmul.mubr.msk.bf16.vlgmr.msra.gmra.mxu0 %vm553_vm1, %v2163_v8  ;;  %2089 = vmatmul.mubr.msk.bf16.vlgmr.msra.gmra.mxu1 %vm553_vm1, %v2164_v9 }
  0x22   : > { %2060 = vmatprep.mubr.msk.bf16.mxu0 %vm553_vm1, %v2165_v10  ;;  %2092 = vmatprep.mubr.msk.bf16.mxu1 %vm553_vm1, %v2166_v11  ;;  %v2422_v10 = vld [vmem:[%s2351_s10 + $0x48] sm:$0xff]  }
  0x29   : > { %2061 = vmatmul.mubr.msk.bf16.gmra.mxu0 %vm553_vm1, %v2167_v12  ;;  %2093 = vmatmul.mubr.msk.bf16.gmra.mxu1 %vm553_vm1, %v2168_v13  ;;  %v2505_v13 = vld [vmem:[%s2351_s10 + $0x70] sm:$0xff]  }
  0x2a   : > { %2064 = vmatprep.mubr.msk.bf16.mxu0 %vm553_vm1, %v2169_v14  ;;  %2096 = vmatprep.mubr.msk.bf16.mxu1 %vm553_vm1, %v2170_v15  ;;  %v2429_v15 = vld [vmem:[%s2351_s10 + $0xc8] sm:$0xff]   ;;  %v2508_v12 = vld [vmem:[%s2351_s10 + $0xf0] sm:$0xff]  }
  0x31   : > { %2065 = vmatmul.mubr.msk.bf16.gmra.mxu0 %vm553_vm1, %v2171_v16  ;;  %2097 = vmatmul.mubr.msk.bf16.gmra.mxu1 %vm553_vm1, %v2172_v17  ;;  %v2432_v16 = vld [vmem:[%s2351_s10 + $0x40] sm:$0xff]  }
  0x32   : > { %2068 = vmatprep.mubr.msk.bf16.mxu0 %vm553_vm1, %v2173_v18  ;;  %2100 = vmatprep.mubr.msk.bf16.mxu1 %vm553_vm1, %v2174_v19  ;;  %v2435_v17 = vld [vmem:[%s2351_s10 + $0xc0] sm:$0xff]   ;;  %v2494_v19 = vld [vmem:[%s2351_s10 + $0xf8] sm:$0xff]  }
  0x39   : > { %2069 = vmatmul.mubr.msk.bf16.gmra.mxu0 %vm553_vm1, %v2175_v20  ;;  %2101 = vmatmul.mubr.msk.bf16.gmra.mxu1 %vm553_vm1, %v2176_v21  ;;  %v2491_v20 = vld [vmem:[%s2351_s10 + $0x78] sm:$0xff]  }
  0x3a   : > { %2072 = vmatprep.mubr.msk.bf16.mxu0 %vm553_vm1, %v2177_v22  ;;  %2104 = vmatprep.mubr.msk.bf16.mxu1 %vm553_vm1, %v2178_v23  ;;  %v2442_v22 = vld [vmem:[%s2351_s10 + $0x58] sm:$0xff]  }
  0x41   : > { %2073 = vmatmul.mubr.msk.bf16.gmra.mxu0 %vm553_vm1, %v2179_v24  ;;  %2105 = vmatmul.mubr.msk.bf16.gmra.mxu1 %vm553_vm1, %v2180_v25  ;;  %v2469_v25 = vld [vmem:[%s2351_s10 + $0xe8] sm:$0xff]  }
  0x42   : > { %2076 = vmatprep.mubr.msk.bf16.mxu0 %vm553_vm1, %v2181_v26  ;;  %2108 = vmatprep.mubr.msk.bf16.mxu1 %vm553_vm1, %v2182_v27  ;;  %v2449_v27 = vld [vmem:[%s2351_s10 + $0xd8] sm:$0xff]   ;;  %v1908_v26 = vunpack.c.l.bf16 %v2505_v13 }
  0x49   : > { %2077 = vmatmul.mubr.msk.bf16.gmra.mxu0 %vm553_vm1, %v2183_v28  ;;  %2109 = vmatmul.mubr.msk.bf16.gmra.mxu1 %vm553_vm1, %v2184_v29  ;;  %v2452_v28 = vld [vmem:[%s2351_s10 + $0x50] sm:$0xff]  }
  0x4a   : > { %2080 = vmatprep.mubr.msk.bf16.mxu0 %vm553_vm1, %v2185_v30  ;;  %2112 = vmatprep.mubr.msk.bf16.mxu1 %vm553_vm1, %v2186_v31  ;;  %v2455_v29 = vld [vmem:[%s2351_s10 + $0xd0] sm:$0xff]   ;;  %v2472_v30 = vld [vmem:[%s2351_s10 + $0x60] sm:$0xff]  }
  0x4b   : > { %v2475_v31 = vld [vmem:[%s2351_s10 + $0xe0] sm:$0xff]  }
  0x51   : > { %2081 = vmatmul.mubr.msk.bf16.gmra.mxu0 %vm553_vm1, %v2187_v32  ;;  %2113 = vmatmul.mubr.msk.bf16.gmra.mxu1 %vm553_vm1, %v2188_v33  ;;  %v2480_v33 = vld [vmem:[%s2855_s2] ss:$0 sm:$0xff] }
  0x52   : > { %2084 = vmatprep.mubr.msk.bf16.mxu0 %vm553_vm1, %v2189_v34  ;;  %2116 = vmatprep.mubr.msk.bf16.mxu1 %vm553_vm1, %v2190_v35  ;;  %v2462_v34 = vld [vmem:[%s2351_s10 + $0x68] sm:$0xff]  }
  0x59   : > { %2085 = vmatmul.mubr.msk.bf16.gmra.mxu0 %vm553_vm1, %v2191_v36  ;;  %2117 = vmatmul.mubr.msk.bf16.gmra.mxu1 %vm553_vm1, %v2192_v37 }
  0xe1   : > { %v2058_v36 = vpop.f32.mrf.mxu0  ;;  %v2090_v35 = vpop.f32.mrf.mxu1 }
  0xe2   : > { %v697_v24 = vadd.f32 %v2058_v36, %v2480_v33  ;;  %v825_v23 = vadd.f32 %v2090_v35, %v2480_v33 }
  0xe3   : > { %v688_v11 = vpop.f32.mrf.mxu0  ;;  %v816_v37 = vpop.f32.mrf.mxu1 }
  0xe4   : > { %v1073_v35 = vadd.f32 %v1856_v46, %v697_v24  ;;  %v1105_v14 = vadd.f32 %v1920_v47, %v825_v23  ;;  %v689_v21 = vadd.f32 %v2480_v33, %v688_v11  ;;  %v817_v9 = vadd.f32 %v2480_v33, %v816_v37 }
  0xe5   : > { %v2059_v8 = vpop.f32.mrf.mxu0  ;;  %v2091_v7 = vpop.f32.mrf.mxu1 }
  0xe6   : > { %v1137_v6 = vmax.f32 %v1073_v35, 0.0  ;;  %v1169_v2 = vmax.f32 %v1105_v14, 0.0  ;;  %v1071_v46 = vadd.f32 %v1852_v48, %v689_v21  ;;  %v1103_v47 = vadd.f32 %v1916_v49, %v817_v9 }
  0xe7   : > { %v700_v11 = vadd.f32 %v2059_v8, %v2480_v33  ;;  %v828_v23 = vadd.f32 %v2091_v7, %v2480_v33  ;;  %v691_v24 = vpop.f32.mrf.mxu0  ;;  %v819_v37 = vpop.f32.mrf.mxu1  ;;  %v1973_v48 = vunpack.c.h.bf16 %v2508_v12 }
  0xe8   : > { %v1788_v21 = vpack.c.bf16 %v1137_v6, %v1137_v6  ;;  %v1820_v35 = vpack.c.bf16 %v1169_v2, %v1169_v2  ;;  %v1135_v49 = vmax.f32 %v1071_v46, 0.0  ;;  %v1167_v9 = vmax.f32 %v1103_v47, 0.0 }
  0xe9   : > { %v1074_v36 = vadd.f32 %v1857_v51, %v700_v11  ;;  %v1106_v8 = vadd.f32 %v1921_v52, %v828_v23  ;;  %v692_v18 = vadd.f32 %v2480_v33, %v691_v24  ;;  %v820_v7 = vadd.f32 %v2480_v33, %v819_v37  ;;  %v2062_v32 = vpop.f32.mrf.mxu0  ;;  %v2094_v14 = vpop.f32.mrf.mxu1 }
  0xea   : > { %1458 = vst.msk [vmem:[%s2532_s15 + $0x8] sm:$0xf] %vm1455_vm2, %v1788_v21  ;;  %1490 = vst.msk [vmem:[%s2532_s15 + $0x88] sm:$0xf] %vm1455_vm2, %v1820_v35  ;;  %v1786_v2 = vpack.c.bf16 %v1135_v49, %v1135_v49  ;;  %v1818_v6 = vpack.c.bf16 %v1167_v9, %v1167_v9  ;;  %v713_v38 = vadd.f32 %v2062_v32, %v2480_v33 }
  0xeb   : > { %v841_v51 = vadd.f32 %v2094_v14, %v2480_v33  ;;  %v1138_v39 = vmax.f32 %v1074_v36, 0.0  ;;  %v1170_v52 = vmax.f32 %v1106_v8, 0.0  ;;  %v1072_v46 = vadd.f32 %v1853_v53, %v692_v18  ;;  %v704_v11 = vpop.f32.mrf.mxu0  ;;  %v832_v23 = vpop.f32.mrf.mxu1 }
  0xec   : > { %v1104_v47 = vadd.f32 %v1917_v54, %v820_v7  ;;  %1456 = vst.msk [vmem:[%s2532_s15] sm:$0xf] %vm1455_vm2, %v1786_v2  ;;  %1488 = vst.msk [vmem:[%s2532_s15 + $0x80] sm:$0xf] %vm1455_vm2, %v1818_v6  ;;  %v1077_v32 = vadd.f32 %v1864_v58, %v713_v38  ;;  %v705_v40 = vadd.f32 %v2480_v33, %v704_v11 }
  0xed   : > { %v1109_v36 = vadd.f32 %v1928_v59, %v841_v51  ;;  %v833_v53 = vadd.f32 %v2480_v33, %v832_v23  ;;  %v1789_v41 = vpack.c.bf16 %v1138_v39, %v1138_v39  ;;  %v1821_v54 = vpack.c.bf16 %v1170_v52, %v1170_v52  ;;  %v2063_v37 = vpop.f32.mrf.mxu0  ;;  %v2095_v14 = vpop.f32.mrf.mxu1 }
  0xee   : > { %v1136_v18 = vmax.f32 %v1072_v46, 0.0  ;;  %v1168_v24 = vmax.f32 %v1104_v47, 0.0  ;;  %v1141_v21 = vmax.f32 %v1077_v32, 0.0  ;;  %v1075_v58 = vadd.f32 %v1860_v60, %v705_v40 }
  0xef   : > { %v1173_v35 = vmax.f32 %v1109_v36, 0.0  ;;  %v1107_v59 = vadd.f32 %v1924_v61, %v833_v53  ;;  %1459 = vst.msk [vmem:[%s2532_s15 + $0xc] sm:$0xf] %vm1455_vm2, %v1789_v41  ;;  %1491 = vst.msk [vmem:[%s2532_s15 + $0x8c] sm:$0xf] %vm1455_vm2, %v1821_v54  ;;  %v716_v8 = vadd.f32 %v2063_v37, %v2480_v33  ;;  %v844_v7 = vadd.f32 %v2095_v14, %v2480_v33  ;;  %v707_v2 = vpop.f32.mrf.mxu0  ;;  %v835_v6 = vpop.f32.mrf.mxu1 }
  0xf0   : > { %v1787_v49 = vpack.c.bf16 %v1136_v18, %v1136_v18  ;;  %v1819_v9 = vpack.c.bf16 %v1168_v24, %v1168_v24  ;;  %v1792_v38 = vpack.c.bf16 %v1141_v21, %v1141_v21  ;;  %v1139_v60 = vmax.f32 %v1075_v58, 0.0 }
  0xf1   : > { %v1824_v51 = vpack.c.bf16 %v1173_v35, %v1173_v35  ;;  %v1171_v39 = vmax.f32 %v1107_v59, 0.0  ;;  %v1078_v61 = vadd.f32 %v1865_v63, %v716_v8  ;;  %v1110_v52 = vadd.f32 %v1929_v0, %v844_v7  ;;  %v2066_v11 = vpop.f32.mrf.mxu0  ;;  %v2098_v23 = vpop.f32.mrf.mxu1 }
  0xf2   : > { %1457 = vst.msk [vmem:[%s2532_s15 + $0x4] sm:$0xf] %vm1455_vm2, %v1787_v49  ;;  %1489 = vst.msk [vmem:[%s2532_s15 + $0x84] sm:$0xf] %vm1455_vm2, %v1819_v9  ;;  %v708_v46 = vadd.f32 %v2480_v33, %v707_v2  ;;  %v836_v47 = vadd.f32 %v2480_v33, %v835_v6  ;;  %v1790_v32 = vpack.c.bf16 %v1139_v60, %v1139_v60  ;;  %v2858_v53 = vunpack.c.h.bf16 %v2375_v45 }
  0xf3   : > { %1462 = vst.msk [vmem:[%s2532_s15 + $0x18] sm:$0xf] %vm1455_vm2, %v1792_v38  ;;  %1494 = vst.msk [vmem:[%s2532_s15 + $0x98] sm:$0xf] %vm1455_vm2, %v1824_v51  ;;  %v1822_v36 = vpack.c.bf16 %v1171_v39, %v1171_v39  ;;  %v729_v42 = vadd.f32 %v2066_v11, %v2480_v33  ;;  %v857_v63 = vadd.f32 %v2098_v23, %v2480_v33  ;;  %v1142_v43 = vmax.f32 %v1078_v61, 0.0  ;;  %v720_v54 = vpop.f32.mrf.mxu0  ;;  %v848_v18 = vpop.f32.mrf.mxu1 }
  0xf4   : > { %v1174_v0 = vmax.f32 %v1110_v52, 0.0  ;;  %v1076_v40 = vadd.f32 %v1861_v1, %v708_v46  ;;  %v1108_v41 = vadd.f32 %v2858_v53, %v836_v47  ;;  %1460 = vst.msk [vmem:[%s2532_s15 + $0x10] sm:$0xf] %vm1455_vm2, %v1790_v32  ;;  %v2859_v24 = vunpack.c.l.bf16 %v2382_v50 }
  0xf5   : > { %1492 = vst.msk [vmem:[%s2532_s15 + $0x90] sm:$0xf] %vm1455_vm2, %v1822_v36  ;;  %v2860_v14 = vunpack.c.l.bf16 %v2389_v55  ;;  %v721_v44 = vadd.f32 %v2480_v33, %v720_v54  ;;  %v849_v1 = vadd.f32 %v2480_v33, %v848_v18  ;;  %v1793_v45 = vpack.c.bf16 %v1142_v43, %v1142_v43  ;;  %v2067_v49 = vpop.f32.mrf.mxu0  ;;  %v2099_v9 = vpop.f32.mrf.mxu1 }
  0xf6   : > { %v1081_v37 = vadd.f32 %v2859_v24, %v729_v42  ;;  %v1825_v35 = vpack.c.bf16 %v1174_v0, %v1174_v0  ;;  %v1140_v58 = vmax.f32 %v1076_v40, 0.0  ;;  %v1172_v59 = vmax.f32 %v1108_v41, 0.0 }
  0xf7   : > { %v1113_v21 = vadd.f32 %v2860_v14, %v857_v63  ;;  %v2861_v2 = vunpack.c.l.bf16 %v2392_v56  ;;  %v2862_v38 = vunpack.c.l.bf16 %v2395_v57  ;;  %1463 = vst.msk [vmem:[%s2532_s15 + $0x1c] sm:$0xf] %vm1455_vm2, %v1793_v45  ;;  %v732_v61 = vadd.f32 %v2067_v49, %v2480_v33  ;;  %v723_v46 = vpop.f32.mrf.mxu0  ;;  %v851_v47 = vpop.f32.mrf.mxu1 }
  0xf8   : > { %v1145_v8 = vmax.f32 %v1081_v37, 0.0  ;;  %1495 = vst.msk [vmem:[%s2532_s15 + $0x9c] sm:$0xf] %vm1455_vm2, %v1825_v35  ;;  %v1791_v60 = vpack.c.bf16 %v1140_v58, %v1140_v58  ;;  %v1823_v39 = vpack.c.bf16 %v1172_v59, %v1172_v59  ;;  %v860_v52 = vadd.f32 %v2099_v9, %v2480_v33 }
  0xf9   : > { %v1177_v7 = vmax.f32 %v1113_v21, 0.0  ;;  %v1079_v6 = vadd.f32 %v2861_v2, %v721_v44  ;;  %v1111_v51 = vadd.f32 %v2862_v38, %v849_v1  ;;  %v2863_v42 = vunpack.c.h.bf16 %v2382_v50  ;;  %v2070_v41 = vpop.f32.mrf.mxu0  ;;  %v2102_v54 = vpop.f32.mrf.mxu1 }
  0xfa   : > { %v1796_v11 = vpack.c.bf16 %v1145_v8, %v1145_v8  ;;  %1461 = vst.msk [vmem:[%s2532_s15 + $0x14] sm:$0xf] %vm1455_vm2, %v1791_v60  ;;  %1493 = vst.msk [vmem:[%s2532_s15 + $0x94] sm:$0xf] %vm1455_vm2, %v1823_v39  ;;  %v2864_v43 = vunpack.c.h.bf16 %v2389_v55  ;;  %v724_v40 = vadd.f32 %v2480_v33, %v723_v46  ;;  %v852_v53 = vadd.f32 %v2480_v33, %v851_v47 }
  0xfb   : > { %v1828_v23 = vpack.c.bf16 %v1177_v7, %v1177_v7  ;;  %v1143_v32 = vmax.f32 %v1079_v6, 0.0  ;;  %v1175_v36 = vmax.f32 %v1111_v51, 0.0  ;;  %v1082_v63 = vadd.f32 %v2863_v42, %v732_v61  ;;  %v736_v35 = vpop.f32.mrf.mxu0  ;;  %v864_v58 = vpop.f32.mrf.mxu1 }
  0xfc   : > { %v1114_v0 = vadd.f32 %v2864_v43, %v860_v52  ;;  %1466 = vst.msk [vmem:[%s2532_s15 + $0x28] sm:$0xf] %vm1455_vm2, %v1796_v11  ;;  %v745_v50 = vadd.f32 %v2070_v41, %v2480_v33  ;;  %v873_v37 = vadd.f32 %v2102_v54, %v2480_v33  ;;  %v2865_v21 = vunpack.c.h.bf16 %v2392_v56 }
  0xfd   : > { %1498 = vst.msk [vmem:[%s2532_s15 + $0xa8] sm:$0xf] %vm1455_vm2, %v1828_v23  ;;  %v1794_v18 = vpack.c.bf16 %v1143_v32, %v1143_v32  ;;  %v1826_v24 = vpack.c.bf16 %v1175_v36, %v1175_v36  ;;  %v1146_v55 = vmax.f32 %v1082_v63, 0.0  ;;  %v2866_v1 = vunpack.c.h.bf16 %v2395_v57  ;;  %v2071_v51 = vpop.f32.mrf.mxu0  ;;  %v2103_v60 = vpop.f32.mrf.mxu1 }
  0xfe   : > { %v1178_v14 = vmax.f32 %v1114_v0, 0.0  ;;  %v1080_v44 = vadd.f32 %v2865_v21, %v724_v40  ;;  %v2867_v59 = vunpack.c.l.bf16 %v2402_v62  ;;  %v2868_v9 = vunpack.c.l.bf16 %v2409_v3 }
  0xff   : > { %v1112_v45 = vadd.f32 %v2866_v1, %v852_v53  ;;  %1464 = vst.msk [vmem:[%s2532_s15 + $0x20] sm:$0xf] %vm1455_vm2, %v1794_v18  ;;  %1496 = vst.msk [vmem:[%s2532_s15 + $0xa0] sm:$0xf] %vm1455_vm2, %v1826_v24  ;;  %v737_v56 = vadd.f32 %v2480_v33, %v736_v35  ;;  %v865_v7 = vadd.f32 %v2480_v33, %v864_v58  ;;  %v2869_v52 = vunpack.c.l.bf16 %v2412_v4  ;;  %v739_v63 = vpop.f32.mrf.mxu0  ;;  %v867_v43 = vpop.f32.mrf.mxu1 }
 0x100   : > { %v1085_v49 = vadd.f32 %v2867_v59, %v745_v50  ;;  %v1117_v8 = vadd.f32 %v2868_v9, %v873_v37  ;;  %v1797_v57 = vpack.c.bf16 %v1146_v55, %v1146_v55  ;;  %v1829_v2 = vpack.c.bf16 %v1178_v14, %v1178_v14 }
 0x101   : > { %v1144_v6 = vmax.f32 %v1080_v44, 0.0  ;;  %v1176_v38 = vmax.f32 %v1112_v45, 0.0  ;;  %v1083_v46 = vadd.f32 %v2869_v52, %v737_v56  ;;  %v2870_v47 = vunpack.c.l.bf16 %v2415_v5  ;;  %v2074_v14 = vpop.f32.mrf.mxu0  ;;  %v2106_v21 = vpop.f32.mrf.mxu1 }
 0x102   : > { %v1149_v39 = vmax.f32 %v1085_v49, 0.0  ;;  %v1181_v61 = vmax.f32 %v1117_v8, 0.0  ;;  %1467 = vst.msk [vmem:[%s2532_s15 + $0x2c] sm:$0xf] %vm1455_vm2, %v1797_v57  ;;  %1499 = vst.msk [vmem:[%s2532_s15 + $0xac] sm:$0xf] %vm1455_vm2, %v1829_v2  ;;  %v748_v36 = vadd.f32 %v2071_v51, %v2480_v33  ;;  %v876_v42 = vadd.f32 %v2103_v60, %v2480_v33 }
 0x103   : > { %v1115_v11 = vadd.f32 %v2870_v47, %v865_v7  ;;  %v1795_v23 = vpack.c.bf16 %v1144_v6, %v1144_v6  ;;  %v1827_v32 = vpack.c.bf16 %v1176_v38, %v1176_v38  ;;  %v1147_v53 = vmax.f32 %v1083_v46, 0.0  ;;  %v752_v8 = vpop.f32.mrf.mxu0  ;;  %v880_v56 = vpop.f32.mrf.mxu1 }
 0x104   : > { %v1800_v0 = vpack.c.bf16 %v1149_v39, %v1149_v39  ;;  %v1832_v40 = vpack.c.bf16 %v1181_v61, %v1181_v61  ;;  %v2871_v54 = vunpack.c.h.bf16 %v2402_v62  ;;  %v2872_v24 = vunpack.c.h.bf16 %v2409_v3 }
 0x105   : > { %v1179_v41 = vmax.f32 %v1115_v11, 0.0  ;;  %1465 = vst.msk [vmem:[%s2532_s15 + $0x24] sm:$0xf] %vm1455_vm2, %v1795_v23  ;;  %1497 = vst.msk [vmem:[%s2532_s15 + $0xa4] sm:$0xf] %vm1455_vm2, %v1827_v32  ;;  %v740_v37 = vadd.f32 %v2480_v33, %v739_v63  ;;  %v868_v55 = vadd.f32 %v2480_v33, %v867_v43  ;;  %v1798_v44 = vpack.c.bf16 %v1147_v53, %v1147_v53  ;;  %v2075_v61 = vpop.f32.mrf.mxu0  ;;  %v2107_v52 = vpop.f32.mrf.mxu1 }
 0x106   : > { %v1086_v18 = vadd.f32 %v2871_v54, %v748_v36  ;;  %v1118_v50 = vadd.f32 %v2872_v24, %v876_v42  ;;  %1470 = vst.msk [vmem:[%s2532_s15 + $0x38] sm:$0xf] %vm1455_vm2, %v1800_v0  ;;  %1502 = vst.msk [vmem:[%s2532_s15 + $0xb8] sm:$0xf] %vm1455_vm2, %v1832_v40  ;;  %v761_v62 = vadd.f32 %v2074_v14, %v2480_v33  ;;  %v2873_v58 = vunpack.c.h.bf16 %v2412_v4 }
 0x107   : > { %v1830_v1 = vpack.c.bf16 %v1179_v41, %v1179_v41  ;;  %v889_v45 = vadd.f32 %v2106_v21, %v2480_v33  ;;  %v2874_v49 = vunpack.c.h.bf16 %v2415_v5  ;;  %1468 = vst.msk [vmem:[%s2532_s15 + $0x30] sm:$0xf] %vm1455_vm2, %v1798_v44  ;;  %v2875_v7 = vunpack.c.l.bf16 %v2422_v10  ;;  %v755_v40 = vpop.f32.mrf.mxu0  ;;  %v883_v53 = vpop.f32.mrf.mxu1 }
 0x108   : > { %v1150_v3 = vmax.f32 %v1086_v18, 0.0  ;;  %v1182_v35 = vmax.f32 %v1118_v50, 0.0  ;;  %v1084_v59 = vadd.f32 %v2873_v58, %v740_v37  ;;  %v2876_v2 = vunpack.c.l.bf16 %v2429_v15 }
 0x109   : > { %v1116_v9 = vadd.f32 %v2874_v49, %v868_v55  ;;  %1500 = vst.msk [vmem:[%s2532_s15 + $0xb0] sm:$0xf] %vm1455_vm2, %v1830_v1  ;;  %v1089_v57 = vadd.f32 %v2875_v7, %v761_v62  ;;  %v753_v4 = vadd.f32 %v2480_v33, %v752_v8  ;;  %v881_v38 = vadd.f32 %v2480_v33, %v880_v56  ;;  %v2078_v1 = vpop.f32.mrf.mxu0  ;;  %v2110_v62 = vpop.f32.mrf.mxu1 }
 0x10a   : > { %v1121_v6 = vadd.f32 %v2876_v2, %v889_v45  ;;  %v1801_v5 = vpack.c.bf16 %v1150_v3, %v1150_v3  ;;  %v1833_v51 = vpack.c.bf16 %v1182_v35, %v1182_v35  ;;  %v1148_v60 = vmax.f32 %v1084_v59, 0.0 }
 0x10b   : > { %v1180_v39 = vmax.f32 %v1116_v9, 0.0  ;;  %v1153_v46 = vmax.f32 %v1089_v57, 0.0  ;;  %v2877_v11 = vunpack.c.l.bf16 %v2432_v16  ;;  %v2878_v32 = vunpack.c.l.bf16 %v2435_v17  ;;  %v768_v56 = vpop.f32.mrf.mxu0  ;;  %v896_v7 = vpop.f32.mrf.mxu1 }
 0x10c   : > { %v1185_v47 = vmax.f32 %v1121_v6, 0.0  ;;  %1471 = vst.msk [vmem:[%s2532_s15 + $0x3c] sm:$0xf] %vm1455_vm2, %v1801_v5  ;;  %1503 = vst.msk [vmem:[%s2532_s15 + $0xbc] sm:$0xf] %vm1455_vm2, %v1833_v51  ;;  %v1799_v42 = vpack.c.bf16 %v1148_v60, %v1148_v60  ;;  %v764_v43 = vadd.f32 %v2075_v61, %v2480_v33  ;;  %v892_v0 = vadd.f32 %v2107_v52, %v2480_v33 }
 0x10d   : > { %v1087_v23 = vadd.f32 %v2877_v11, %v753_v4  ;;  %v1119_v36 = vadd.f32 %v2878_v32, %v881_v38  ;;  %v1831_v63 = vpack.c.bf16 %v1180_v39, %v1180_v39  ;;  %v1804_v41 = vpack.c.bf16 %v1153_v46, %v1153_v46  ;;  %v2079_v39 = vpop.f32.mrf.mxu0  ;;  %v2111_v61 = vpop.f32.mrf.mxu1 }
 0x10e   : > { %v1836_v54 = vpack.c.bf16 %v1185_v47, %v1185_v47  ;;  %1469 = vst.msk [vmem:[%s2532_s15 + $0x34] sm:$0xf] %vm1455_vm2, %v1799_v42  ;;  %v2879_v50 = vunpack.c.h.bf16 %v2422_v10  ;;  %v2880_v55 = vunpack.c.h.bf16 %v2429_v15  ;;  %v756_v21 = vadd.f32 %v2480_v33, %v755_v40 }
 0x10f   : > { %v1151_v18 = vmax.f32 %v1087_v23, 0.0  ;;  %v1183_v24 = vmax.f32 %v1119_v36, 0.0  ;;  %1501 = vst.msk [vmem:[%s2532_s15 + $0xb4] sm:$0xf] %vm1455_vm2, %v1831_v63  ;;  %v884_v44 = vadd.f32 %v2480_v33, %v883_v53  ;;  %1474 = vst.msk [vmem:[%s2532_s15 + $0x48] sm:$0xf] %vm1455_vm2, %v1804_v41  ;;  %v777_v10 = vadd.f32 %v2078_v1, %v2480_v33  ;;  %v899_v40 = vpop.f32.mrf.mxu1 }
 0x110   : > { %v1090_v37 = vadd.f32 %v2879_v50, %v764_v43  ;;  %v1122_v14 = vadd.f32 %v2880_v55, %v892_v0  ;;  %1506 = vst.msk [vmem:[%s2532_s15 + $0xc8] sm:$0xf] %vm1455_vm2, %v1836_v54  ;;  %v905_v35 = vadd.f32 %v2110_v62, %v2480_v33  ;;  %v2881_v59 = vunpack.c.h.bf16 %v2432_v16  ;;  %v771_v0 = vpop.f32.mrf.mxu0 }
 0x111   : > { %v1802_v45 = vpack.c.bf16 %v1151_v18, %v1151_v18  ;;  %v1834_v3 = vpack.c.bf16 %v1183_v24, %v1183_v24  ;;  %v2882_v9 = vunpack.c.h.bf16 %v2435_v17  ;;  %v2883_v57 = vunpack.c.l.bf16 %v2442_v22  ;;  %v2114_v1 = vpop.f32.mrf.mxu1 }
 0x112   : > { %v1154_v15 = vmax.f32 %v1090_v37, 0.0  ;;  %v1186_v58 = vmax.f32 %v1122_v14, 0.0  ;;  %v1088_v49 = vadd.f32 %v2881_v59, %v756_v21  ;;  %v2884_v6 = vunpack.c.l.bf16 %v2449_v27 }
 0x113   : > { %v1120_v8 = vadd.f32 %v2882_v9, %v884_v44  ;;  %1472 = vst.msk [vmem:[%s2532_s15 + $0x40] sm:$0xf] %vm1455_vm2, %v1802_v45  ;;  %1504 = vst.msk [vmem:[%s2532_s15 + $0xc0] sm:$0xf] %vm1455_vm2, %v1834_v3  ;;  %v1093_v2 = vadd.f32 %v2883_v57, %v777_v10  ;;  %v769_v16 = vadd.f32 %v2480_v33, %v768_v56  ;;  %v2885_v47 = vunpack.c.l.bf16 %v2452_v28  ;;  %v2082_v44 = vpop.f32.mrf.mxu0  ;;  %v912_v9 = vpop.f32.mrf.mxu1 }
 0x114   : > { %v1125_v4 = vadd.f32 %v2884_v6, %v905_v35  ;;  %v897_v38 = vadd.f32 %v2480_v33, %v896_v7  ;;  %v1805_v17 = vpack.c.bf16 %v1154_v15, %v1154_v15  ;;  %v1837_v5 = vpack.c.bf16 %v1186_v58, %v1186_v58 }
 0x115   : > { %v1152_v51 = vmax.f32 %v1088_v49, 0.0  ;;  %v1184_v60 = vmax.f32 %v1120_v8, 0.0  ;;  %v1157_v52 = vmax.f32 %v1093_v2, 0.0  ;;  %v1091_v11 = vadd.f32 %v2885_v47, %v769_v16  ;;  %v784_v49 = vpop.f32.mrf.mxu0 }
 0x116   : > { %v1189_v46 = vmax.f32 %v1125_v4, 0.0  ;;  %v2886_v23 = vunpack.c.l.bf16 %v2455_v29  ;;  %1475 = vst.msk [vmem:[%s2532_s15 + $0x4c] sm:$0xf] %vm1455_vm2, %v1805_v17  ;;  %1507 = vst.msk [vmem:[%s2532_s15 + $0xcc] sm:$0xf] %vm1455_vm2, %v1837_v5  ;;  %v780_v63 = vadd.f32 %v2079_v39, %v2480_v33  ;;  %v908_v43 = vadd.f32 %v2111_v61, %v2480_v33  ;;  %v2115_v17 = vpop.f32.mrf.mxu1 }
 0x117   : > { %v1803_v36 = vpack.c.bf16 %v1152_v51, %v1152_v51  ;;  %v1835_v42 = vpack.c.bf16 %v1184_v60, %v1184_v60  ;;  %v1808_v53 = vpack.c.bf16 %v1157_v52, %v1157_v52  ;;  %v1155_v54 = vmax.f32 %v1091_v11, 0.0 }
 0x118   : > { %v1123_v32 = vadd.f32 %v2886_v23, %v897_v38  ;;  %v1840_v41 = vpack.c.bf16 %v1189_v46, %v1189_v46  ;;  %v2887_v24 = vunpack.c.h.bf16 %v2442_v22  ;;  %v2888_v37 = vunpack.c.h.bf16 %v2449_v27  ;;  %v2083_v38 = vpop.f32.mrf.mxu0 }
 0x119   : > { %1473 = vst.msk [vmem:[%s2532_s15 + $0x44] sm:$0xf] %vm1455_vm2, %v1803_v36  ;;  %1505 = vst.msk [vmem:[%s2532_s15 + $0xc4] sm:$0xf] %vm1455_vm2, %v1835_v42  ;;  %v772_v14 = vadd.f32 %v2480_v33, %v771_v0  ;;  %v900_v21 = vadd.f32 %v2480_v33, %v899_v40  ;;  %v1806_v62 = vpack.c.bf16 %v1155_v54, %v1155_v54  ;;  %v2889_v35 = vunpack.c.h.bf16 %v2452_v28  ;;  %v915_v36 = vpop.f32.mrf.mxu1 }
 0x11a   : > { %v1187_v18 = vmax.f32 %v1123_v32, 0.0  ;;  %v1094_v50 = vadd.f32 %v2887_v24, %v780_v63  ;;  %v1126_v55 = vadd.f32 %v2888_v37, %v908_v43  ;;  %1478 = vst.msk [vmem:[%s2532_s15 + $0x58] sm:$0xf] %vm1455_vm2, %v1808_v53  ;;  %1510 = vst.msk [vmem:[%s2532_s15 + $0xd8] sm:$0xf] %vm1455_vm2, %v1840_v41  ;;  %v793_v22 = vadd.f32 %v2082_v44, %v2480_v33  ;;  %v787_v32 = vpop.f32.mrf.mxu0 }
 0x11b   : > { %v921_v3 = vadd.f32 %v2114_v1, %v2480_v33  ;;  %v1092_v15 = vadd.f32 %v2889_v35, %v772_v14  ;;  %v2890_v58 = vunpack.c.h.bf16 %v2455_v29  ;;  %1476 = vst.msk [vmem:[%s2532_s15 + $0x50] sm:$0xf] %vm1455_vm2, %v1806_v62  ;;  %v2891_v8 = vunpack.c.l.bf16 %v2462_v34  ;;  %v2118_v37 = vpop.f32.mrf.mxu1 }
 0x11c   : > { %v1838_v45 = vpack.c.bf16 %v1187_v18, %v1187_v18  ;;  %v1158_v27 = vmax.f32 %v1094_v50, 0.0  ;;  %v1190_v10 = vmax.f32 %v1126_v55, 0.0  ;;  %v2892_v7 = vunpack.c.l.bf16 %v2469_v25  ;;  %v2086_v50 = vpop.f32.mrf.mxu0 }
 0x11d   : > { %v1124_v59 = vadd.f32 %v2890_v58, %v900_v21  ;;  %v1097_v56 = vadd.f32 %v2891_v8, %v793_v22  ;;  %v785_v28 = vadd.f32 %v2480_v33, %v784_v49  ;;  %v913_v2 = vadd.f32 %v2480_v33, %v912_v9 }
 0x11e   : > { %1508 = vst.msk [vmem:[%s2532_s15 + $0xd0] sm:$0xf] %vm1455_vm2, %v1838_v45  ;;  %v1129_v57 = vadd.f32 %v2892_v7, %v921_v3  ;;  %v1809_v29 = vpack.c.bf16 %v1158_v27, %v1158_v27  ;;  %v1841_v6 = vpack.c.bf16 %v1190_v10, %v1190_v10  ;;  %v1156_v4 = vmax.f32 %v1092_v15, 0.0  ;;  %v800_v3 = vpop.f32.mrf.mxu0  ;;  %v928_v27 = vpop.f32.mrf.mxu1 }
 0x11f   : > { %v1188_v16 = vmax.f32 %v1124_v59, 0.0  ;;  %v1161_v5 = vmax.f32 %v1097_v56, 0.0  ;;  %v2893_v60 = vunpack.c.l.bf16 %v2472_v30  ;;  %v2894_v61 = vunpack.c.l.bf16 %v2475_v31 }
 0x120   : > { %v1193_v51 = vmax.f32 %v1129_v57, 0.0  ;;  %1479 = vst.msk [vmem:[%s2532_s15 + $0x5c] sm:$0xf] %vm1455_vm2, %v1809_v29  ;;  %1511 = vst.msk [vmem:[%s2532_s15 + $0xdc] sm:$0xf] %vm1455_vm2, %v1841_v6  ;;  %v1807_v46 = vpack.c.bf16 %v1156_v4, %v1156_v4  ;;  %v796_v11 = vadd.f32 %v2083_v38, %v2480_v33  ;;  %v924_v23 = vadd.f32 %v2115_v17, %v2480_v33  ;;  %v2087_v56 = vpop.f32.mrf.mxu0  ;;  %v2119_v7 = vpop.f32.mrf.mxu1 }
 0x121   : > { %v1095_v39 = vadd.f32 %v2893_v60, %v785_v28  ;;  %v1127_v52 = vadd.f32 %v2894_v61, %v913_v2  ;;  %v1839_v47 = vpack.c.bf16 %v1188_v16, %v1188_v16  ;;  %v1812_v42 = vpack.c.bf16 %v1161_v5, %v1161_v5 }
 0x122   : > { %v1844_v63 = vpack.c.bf16 %v1193_v51, %v1193_v51  ;;  %1477 = vst.msk [vmem:[%s2532_s15 + $0x54] sm:$0xf] %vm1455_vm2, %v1807_v46  ;;  %v2895_v40 = vunpack.c.h.bf16 %v2462_v34  ;;  %v2896_v41 = vunpack.c.h.bf16 %v2469_v25  ;;  %v788_v18 = vadd.f32 %v2480_v33, %v787_v32  ;;  %v803_v5 = vpop.f32.mrf.mxu0  ;;  %v931_v51 = vpop.f32.mrf.mxu1 }
 0x123   : > { %v1159_v43 = vmax.f32 %v1095_v39, 0.0  ;;  %v1191_v0 = vmax.f32 %v1127_v52, 0.0  ;;  %1509 = vst.msk [vmem:[%s2532_s15 + $0xd4] sm:$0xf] %vm1455_vm2, %v1839_v47  ;;  %v916_v24 = vadd.f32 %v2480_v33, %v915_v36  ;;  %1482 = vst.msk [vmem:[%s2532_s15 + $0x68] sm:$0xf] %vm1455_vm2, %v1812_v42  ;;  %v809_v34 = vadd.f32 %v2086_v50, %v2480_v33 }
 0x124   : > { %v1098_v53 = vadd.f32 %v2895_v40, %v796_v11  ;;  %v1130_v54 = vadd.f32 %v2896_v41, %v924_v23  ;;  %1514 = vst.msk [vmem:[%s2532_s15 + $0xe8] sm:$0xf] %vm1455_vm2, %v1844_v63  ;;  %v937_v21 = vadd.f32 %v2118_v37, %v2480_v33  ;;  %v2897_v1 = vunpack.c.h.bf16 %v2472_v30 }
 0x125   : > { %v1810_v55 = vpack.c.bf16 %v1159_v43, %v1159_v43  ;;  %v1842_v14 = vpack.c.bf16 %v1191_v0, %v1191_v0  ;;  %v2898_v45 = vunpack.c.h.bf16 %v2475_v31  ;;  %v2899_v10 = vunpack.c.l.bf16 %v2491_v20 }
 0x126   : > { %v1162_v25 = vmax.f32 %v1098_v53, 0.0  ;;  %v1194_v44 = vmax.f32 %v1130_v54, 0.0  ;;  %v1096_v62 = vadd.f32 %v2897_v1, %v788_v18  ;;  %v2900_v15 = vunpack.c.l.bf16 %v2494_v19 }
 0x127   : > { %v1128_v22 = vadd.f32 %v2898_v45, %v916_v24  ;;  %1480 = vst.msk [vmem:[%s2532_s15 + $0x60] sm:$0xf] %vm1455_vm2, %v1810_v55  ;;  %1512 = vst.msk [vmem:[%s2532_s15 + $0xe0] sm:$0xf] %vm1455_vm2, %v1842_v14  ;;  %v1101_v35 = vadd.f32 %v2899_v10, %v809_v34  ;;  %v801_v30 = vadd.f32 %v2480_v33, %v800_v3  ;;  %v2901_v29 = vunpack.c.l.bf16 %v2508_v12 }
 0x128   : > { %v1133_v58 = vadd.f32 %v2900_v15, %v937_v21  ;;  %v929_v59 = vadd.f32 %v2480_v33, %v928_v27  ;;  %v1813_v31 = vpack.c.bf16 %v1162_v25, %v1162_v25  ;;  %v1845_v49 = vpack.c.bf16 %v1194_v44, %v1194_v44 }
 0x129   : > { %v1160_v9 = vmax.f32 %v1096_v62, 0.0  ;;  %v1192_v8 = vmax.f32 %v1128_v22, 0.0  ;;  %v1165_v57 = vmax.f32 %v1101_v35, 0.0  ;;  %v1099_v2 = vadd.f32 %v1908_v26, %v801_v30 }
 0x12a   : > { %v1197_v28 = vmax.f32 %v1133_v58, 0.0  ;;  %v1131_v6 = vadd.f32 %v2901_v29, %v929_v59  ;;  %1483 = vst.msk [vmem:[%s2532_s15 + $0x6c] sm:$0xf] %vm1455_vm2, %v1813_v31  ;;  %1515 = vst.msk [vmem:[%s2532_s15 + $0xec] sm:$0xf] %vm1455_vm2, %v1845_v49  ;;  %v812_v38 = vadd.f32 %v2087_v56, %v2480_v33  ;;  %v940_v17 = vadd.f32 %v2119_v7, %v2480_v33 }
 0x12b   : > { %v1811_v4 = vpack.c.bf16 %v1160_v9, %v1160_v9  ;;  %v1843_v16 = vpack.c.bf16 %v1192_v8, %v1192_v8  ;;  %v1816_v60 = vpack.c.bf16 %v1165_v57, %v1165_v57  ;;  %v1163_v26 = vmax.f32 %v1099_v2, 0.0 }
 0x12c   : > { %v1848_v39 = vpack.c.bf16 %v1197_v28, %v1197_v28  ;;  %v1195_v61 = vmax.f32 %v1131_v6, 0.0  ;;  %v2902_v52 = vunpack.c.h.bf16 %v2491_v20  ;;  %v2903_v47 = vunpack.c.h.bf16 %v2494_v19 }
 0x12d   : > { %1481 = vst.msk [vmem:[%s2532_s15 + $0x64] sm:$0xf] %vm1455_vm2, %v1811_v4  ;;  %1513 = vst.msk [vmem:[%s2532_s15 + $0xe4] sm:$0xf] %vm1455_vm2, %v1843_v16  ;;  %v804_v23 = vadd.f32 %v2480_v33, %v803_v5  ;;  %v932_v32 = vadd.f32 %v2480_v33, %v931_v51  ;;  %v1814_v36 = vpack.c.bf16 %v1163_v26, %v1163_v26  ;;  %v2904_v43 = vunpack.c.h.bf16 %v2505_v13 }
 0x12e   : > { %v1102_v46 = vadd.f32 %v2902_v52, %v812_v38  ;;  %v1134_v11 = vadd.f32 %v2903_v47, %v940_v17  ;;  %1486 = vst.msk [vmem:[%s2532_s15 + $0x78] sm:$0xf] %vm1455_vm2, %v1816_v60  ;;  %1518 = vst.msk [vmem:[%s2532_s15 + $0xf8] sm:$0xf] %vm1455_vm2, %v1848_v39  ;;  %v1846_v42 = vpack.c.bf16 %v1195_v61, %v1195_v61 }
 0x12f   : > { %v1100_v19 = vadd.f32 %v2904_v43, %v804_v23  ;;  %v1132_v0 = vadd.f32 %v1973_v48, %v932_v32  ;;  %1484 = vst.msk [vmem:[%s2532_s15 + $0x70] sm:$0xf] %vm1455_vm2, %v1814_v36 }
 0x130   : > { %v1166_v63 = vmax.f32 %v1102_v46, 0.0  ;;  %v1198_v20 = vmax.f32 %v1134_v11, 0.0  ;;  %1516 = vst.msk [vmem:[%s2532_s15 + $0xf0] sm:$0xf] %vm1455_vm2, %v1846_v42 }
 0x131   : > { %v1164_v53 = vmax.f32 %v1100_v19, 0.0  ;;  %v1196_v41 = vmax.f32 %v1132_v0, 0.0 }
 0x132   : > { %v1817_v33 = vpack.c.bf16 %v1166_v63, %v1166_v63  ;;  %v1849_v40 = vpack.c.bf16 %v1198_v20, %v1198_v20 }
 0x133   : > { %v1815_v54 = vpack.c.bf16 %v1164_v53, %v1164_v53  ;;  %v1847_v18 = vpack.c.bf16 %v1196_v41, %v1196_v41 }
 0x134   : > { %1487 = vst.msk [vmem:[%s2532_s15 + $0x7c] sm:$0xf] %vm1455_vm2, %v1817_v33  ;;  %1519 = vst.msk [vmem:[%s2532_s15 + $0xfc] sm:$0xf] %vm1455_vm2, %v1849_v40 }
 0x135   : > { %1485 = vst.msk [vmem:[%s2532_s15 + $0x74] sm:$0xf] %vm1455_vm2, %v1815_v54  ;;  %1517 = vst.msk [vmem:[%s2532_s15 + $0xf4] sm:$0xf] %vm1455_vm2, %v1847_v18 }
 0x136 PF: > { %s14_s17 = sadd.s32 1, %s2215_s17   ;;  %s2905_s15 = smov %s2211_s16 }
 0x137   : > { %p11_p5 = scmp.ge.s32.totalorder %s14_s17, 7   ;;  %s2906_s16 = smov %s2908_s18 }
 0x139   :  { %13 = sbr.rel (!%p11_p5) target bundleno = 2 (0x2), region = 75 }

// kernel: _lambda_.24
= control target key start
LH: loop header
LB: loop body
LE: loop exit
PB: predicated region body
PF: predicated region fallthrough
CT: control target
= control target key end

     0   :  { %vm379_vm0 = vcmask 1043456   ;;  %vm282_vm1 = vcmask 588800   ;;  %vm992_vm2 = vcmask 60416   ;;  %s1907_s1 = inlined_call_operand.vmem [shape: bf16[72,8], index: 1, kind: input, shape index: {}]   ;;  %s1908_s0 = inlined_call_operand.vmem [shape: bf16[512,72], index: 0, kind: input, shape index: {}]   ;;  %s1909_s2 = inlined_call_operand.vmem [shape: f32[1,8], index: 2, kind: input, shape index: {}]   ;;  %s1910_s3 = inlined_call_operand.vmem [shape: bf16[512,8], index: 3, kind: output, shape index: {}]  }
   0x1   :  { %v1382_v0 = vld [vmem:[%s1907_s1 + $0x20] ss:$0 sps:$4 sm:$0xff]   ;;  %v1383_v1 = vld [vmem:[%s1907_s1 + $0x18] sm:$0xff]   ;;  %v1384_v3 = vld [vmem:[%s1907_s1 + $0x10] sm:$0xff]  }
   0x2   :  { %1380 = vmatprep.subr.msk.bf16.mxu0 %vm379_vm0, %v1382_v0  ;;  %1381 = vmatprep.subr.msk.bf16.mxu1 %vm379_vm0, %v1382_v0  ;;  %v381_v2 = vsel %vm379_vm0, %v1382_v0, 0  ;;  %v1387_v4 = vld [vmem:[%s1908_s0] sm:$0xff]   ;;  %v1385_v6 = vld [vmem:[%s1907_s1 + $0x8] sm:$0xff]   ;;  %v1391_v10 = vld [vmem:[%s1908_s0 + $0x10] sm:$0xff]  }
   0x3   :  { %1297 = vmatpush3.bf16.msra.mxu0 %v381_v2  ;;  %1375 = vmatpush3.bf16.msra.mxu1 %v381_v2  ;;  %v1388_v5 = vld [vmem:[%s1908_s0 + $0x80] sm:$0xff]   ;;  %v1389_v8 = vld [vmem:[%s1908_s0 + $0x8] sm:$0xff]   ;;  %v1392_v11 = vld [vmem:[%s1908_s0 + $0x90] sm:$0xff]  }
   0x4   :  { %1298 = vmatprep.subr.bf16.mxu0 %v1383_v1  ;;  %1371 = vmatprep.subr.bf16.mxu1 %v1383_v1  ;;  %v1386_v7 = vld [vmem:[%s1907_s1] sm:$0xff]   ;;  %v1390_v9 = vld [vmem:[%s1908_s0 + $0x88] sm:$0xff]   ;;  %v1393_v12 = vld [vmem:[%s1908_s0 + $0x18] sm:$0xff]  }
   0x5   :  { %1306 = vmatprep.mubr.msk.bf16.mxu0 %vm282_vm1, %v1387_v4  ;;  %1338 = vmatprep.mubr.msk.bf16.mxu1 %vm282_vm1, %v1388_v5  ;;  %v1394_v13 = vld [vmem:[%s1908_s0 + $0x98] sm:$0xff]   ;;  %v1395_v14 = vld [vmem:[%s1908_s0 + $0x20] sm:$0xff]   ;;  %v1397_v16 = vld [vmem:[%s1908_s0 + $0x28] sm:$0xff]  }
   0x6   :  { %v1396_v15 = vld [vmem:[%s1908_s0 + $0xa0] sm:$0xff]   ;;  %v1398_v17 = vld [vmem:[%s1908_s0 + $0xa8] sm:$0xff]   ;;  %v1399_v18 = vld [vmem:[%s1908_s0 + $0x30] sm:$0xff]  }
   0x7   :  { %1299 = vmatpush3.bf16.msra.mxu0 %v1383_v1  ;;  %1376 = vmatpush3.bf16.msra.mxu1 %v1383_v1  ;;  %v1400_v19 = vld [vmem:[%s1908_s0 + $0xb0] sm:$0xff]   ;;  %v1401_v20 = vld [vmem:[%s1908_s0 + $0x38] sm:$0xff]   ;;  %v1403_v22 = vld [vmem:[%s1908_s0 + $0x40] sm:$0xff]  }
   0x8   :  { %1300 = vmatprep.subr.bf16.mxu0 %v1384_v3  ;;  %1372 = vmatprep.subr.bf16.mxu1 %v1384_v3  ;;  %v1402_v21 = vld [vmem:[%s1908_s0 + $0xb8] sm:$0xff]   ;;  %v1404_v23 = vld [vmem:[%s1908_s0 + $0xc0] sm:$0xff]   ;;  %v1405_v24 = vld [vmem:[%s1908_s0 + $0x48] sm:$0xff]  }
   0x9   :  { %v1406_v25 = vld [vmem:[%s1908_s0 + $0xc8] sm:$0xff]   ;;  %v1407_v26 = vld [vmem:[%s1908_s0 + $0x50] sm:$0xff]   ;;  %v1409_v28 = vld [vmem:[%s1908_s0 + $0x58] sm:$0xff]  }
   0xa   :  { %v1408_v27 = vld [vmem:[%s1908_s0 + $0xd0] sm:$0xff]   ;;  %v1410_v29 = vld [vmem:[%s1908_s0 + $0xd8] sm:$0xff]   ;;  %v1411_v30 = vld [vmem:[%s1908_s0 + $0x60] sm:$0xff]  }
   0xb   :  { %1301 = vmatpush3.bf16.msra.mxu0 %v1384_v3  ;;  %1377 = vmatpush3.bf16.msra.mxu1 %v1384_v3  ;;  %v1412_v31 = vld [vmem:[%s1908_s0 + $0xe0] sm:$0xff]   ;;  %v1413_v32 = vld [vmem:[%s1908_s0 + $0x68] sm:$0xff]   ;;  %v1415_v34 = vld [vmem:[%s1908_s0 + $0x70] sm:$0xff]  }
   0xc   :  { %1302 = vmatprep.subr.bf16.mxu0 %v1385_v6  ;;  %1373 = vmatprep.subr.bf16.mxu1 %v1385_v6  ;;  %v1414_v33 = vld [vmem:[%s1908_s0 + $0xe8] sm:$0xff]   ;;  %v1416_v35 = vld [vmem:[%s1908_s0 + $0xf0] sm:$0xff]   ;;  %v1417_v36 = vld [vmem:[%s1908_s0 + $0x78] sm:$0xff]  }
   0xd   :  { %v1418_v37 = vld [vmem:[%s1908_s0 + $0xf8] sm:$0xff]   ;;  %v1585_v38 = vld [vmem:[%s1909_s2] ss:$0 sm:$0xff] }
   0xf   :  { %1303 = vmatpush3.bf16.msra.mxu0 %v1385_v6  ;;  %1378 = vmatpush3.bf16.msra.mxu1 %v1385_v6 }
  0x10   :  { %1304 = vmatprep.subr.bf16.mxu0 %v1386_v7  ;;  %1374 = vmatprep.subr.bf16.mxu1 %v1386_v7 }
  0x13   :  { %1305 = vmatpush3.bf16.msra.mxu0 %v1386_v7  ;;  %1379 = vmatpush3.bf16.msra.mxu1 %v1386_v7 }
  0x16   :  { %1307 = vmatmul.mubr.msk.bf16.vlgmr.msra.gmra.mxu0 %vm282_vm1, %v1389_v8  ;;  %1339 = vmatmul.mubr.msk.bf16.vlgmr.msra.gmra.mxu1 %vm282_vm1, %v1390_v9 }
  0x17   :  { %1310 = vmatprep.mubr.msk.bf16.mxu0 %vm282_vm1, %v1391_v10  ;;  %1342 = vmatprep.mubr.msk.bf16.mxu1 %vm282_vm1, %v1392_v11 }
  0x1e   :  { %1311 = vmatmul.mubr.msk.bf16.gmra.mxu0 %vm282_vm1, %v1393_v12  ;;  %1343 = vmatmul.mubr.msk.bf16.gmra.mxu1 %vm282_vm1, %v1394_v13 }
  0x1f   :  { %1314 = vmatprep.mubr.msk.bf16.mxu0 %vm282_vm1, %v1395_v14  ;;  %1346 = vmatprep.mubr.msk.bf16.mxu1 %vm282_vm1, %v1396_v15 }
  0x26   :  { %1315 = vmatmul.mubr.msk.bf16.gmra.mxu0 %vm282_vm1, %v1397_v16  ;;  %1347 = vmatmul.mubr.msk.bf16.gmra.mxu1 %vm282_vm1, %v1398_v17 }
  0x27   :  { %1318 = vmatprep.mubr.msk.bf16.mxu0 %vm282_vm1, %v1399_v18  ;;  %1350 = vmatprep.mubr.msk.bf16.mxu1 %vm282_vm1, %v1400_v19 }
  0x2e   :  { %1319 = vmatmul.mubr.msk.bf16.gmra.mxu0 %vm282_vm1, %v1401_v20  ;;  %1351 = vmatmul.mubr.msk.bf16.gmra.mxu1 %vm282_vm1, %v1402_v21 }
  0x2f   :  { %1322 = vmatprep.mubr.msk.bf16.mxu0 %vm282_vm1, %v1403_v22  ;;  %1354 = vmatprep.mubr.msk.bf16.mxu1 %vm282_vm1, %v1404_v23 }
  0x36   :  { %1323 = vmatmul.mubr.msk.bf16.gmra.mxu0 %vm282_vm1, %v1405_v24  ;;  %1355 = vmatmul.mubr.msk.bf16.gmra.mxu1 %vm282_vm1, %v1406_v25 }
  0x37   :  { %1326 = vmatprep.mubr.msk.bf16.mxu0 %vm282_vm1, %v1407_v26  ;;  %1358 = vmatprep.mubr.msk.bf16.mxu1 %vm282_vm1, %v1408_v27 }
  0x3e   :  { %1327 = vmatmul.mubr.msk.bf16.gmra.mxu0 %vm282_vm1, %v1409_v28  ;;  %1359 = vmatmul.mubr.msk.bf16.gmra.mxu1 %vm282_vm1, %v1410_v29 }
  0x3f   :  { %1330 = vmatprep.mubr.msk.bf16.mxu0 %vm282_vm1, %v1411_v30  ;;  %1362 = vmatprep.mubr.msk.bf16.mxu1 %vm282_vm1, %v1412_v31 }
  0x46   :  { %1331 = vmatmul.mubr.msk.bf16.gmra.mxu0 %vm282_vm1, %v1413_v32  ;;  %1363 = vmatmul.mubr.msk.bf16.gmra.mxu1 %vm282_vm1, %v1414_v33 }
  0x47   :  { %1334 = vmatprep.mubr.msk.bf16.mxu0 %vm282_vm1, %v1415_v34  ;;  %1366 = vmatprep.mubr.msk.bf16.mxu1 %vm282_vm1, %v1416_v35 }
  0x4e   :  { %1335 = vmatmul.mubr.msk.bf16.gmra.mxu0 %vm282_vm1, %v1417_v36  ;;  %1367 = vmatmul.mubr.msk.bf16.gmra.mxu1 %vm282_vm1, %v1418_v37 }
  0xd6   :  { %v1308_v39 = vpop.f32.mrf.mxu0  ;;  %v1340_v40 = vpop.f32.mrf.mxu1 }
  0xd7   :  { %v426_v41 = vadd.f32 %v1308_v39, %v1585_v38  ;;  %v554_v42 = vadd.f32 %v1340_v40, %v1585_v38 }
  0xd8   :  { %v417_v43 = vpop.f32.mrf.mxu0  ;;  %v545_v44 = vpop.f32.mrf.mxu1 }
  0xd9   :  { %v674_v45 = vmax.f32 %v426_v41, 0.0  ;;  %v706_v46 = vmax.f32 %v554_v42, 0.0  ;;  %v418_v47 = vadd.f32 %v1585_v38, %v417_v43  ;;  %v546_v48 = vadd.f32 %v1585_v38, %v545_v44 }
  0xda   :  { %v1309_v49 = vpop.f32.mrf.mxu0  ;;  %v1341_v50 = vpop.f32.mrf.mxu1 }
  0xdb   :  { %v1197_v51 = vpack.c.bf16 %v674_v45, %v674_v45  ;;  %v1229_v52 = vpack.c.bf16 %v706_v46, %v706_v46  ;;  %v672_v53 = vmax.f32 %v418_v47, 0.0  ;;  %v704_v54 = vmax.f32 %v546_v48, 0.0 }
  0xdc   :  { %v429_v55 = vadd.f32 %v1309_v49, %v1585_v38  ;;  %v557_v56 = vadd.f32 %v1341_v50, %v1585_v38  ;;  %v420_v57 = vpop.f32.mrf.mxu0  ;;  %v548_v58 = vpop.f32.mrf.mxu1 }
  0xdd   :  { %995 = vst.msk [vmem:[%s1910_s3 + $0x8] sm:$0xf] %vm992_vm2, %v1197_v51  ;;  %1027 = vst.msk [vmem:[%s1910_s3 + $0x88] sm:$0xf] %vm992_vm2, %v1229_v52  ;;  %v1195_v59 = vpack.c.bf16 %v672_v53, %v672_v53  ;;  %v1227_v60 = vpack.c.bf16 %v704_v54, %v704_v54  ;;  %v421_v61 = vadd.f32 %v1585_v38, %v420_v57 }
  0xde   :  { %v549_v62 = vadd.f32 %v1585_v38, %v548_v58  ;;  %v675_v63 = vmax.f32 %v429_v55, 0.0  ;;  %v707_v0 = vmax.f32 %v557_v56, 0.0  ;;  %v1312_v1 = vpop.f32.mrf.mxu0  ;;  %v1344_v2 = vpop.f32.mrf.mxu1 }
  0xdf   :  { %993 = vst.msk [vmem:[%s1910_s3] sm:$0xf] %vm992_vm2, %v1195_v59  ;;  %1025 = vst.msk [vmem:[%s1910_s3 + $0x80] sm:$0xf] %vm992_vm2, %v1227_v60  ;;  %v673_v3 = vmax.f32 %v421_v61, 0.0  ;;  %v442_v5 = vadd.f32 %v1312_v1, %v1585_v38  ;;  %v570_v6 = vadd.f32 %v1344_v2, %v1585_v38 }
  0xe0   :  { %v705_v4 = vmax.f32 %v549_v62, 0.0  ;;  %v1198_v7 = vpack.c.bf16 %v675_v63, %v675_v63  ;;  %v1230_v8 = vpack.c.bf16 %v707_v0, %v707_v0  ;;  %v433_v9 = vpop.f32.mrf.mxu0  ;;  %v561_v10 = vpop.f32.mrf.mxu1 }
  0xe1   :  { %v1196_v11 = vpack.c.bf16 %v673_v3, %v673_v3  ;;  %v678_v13 = vmax.f32 %v442_v5, 0.0  ;;  %v710_v14 = vmax.f32 %v570_v6, 0.0  ;;  %v434_v15 = vadd.f32 %v1585_v38, %v433_v9 }
  0xe2   :  { %v1228_v12 = vpack.c.bf16 %v705_v4, %v705_v4  ;;  %996 = vst.msk [vmem:[%s1910_s3 + $0xc] sm:$0xf] %vm992_vm2, %v1198_v7  ;;  %1028 = vst.msk [vmem:[%s1910_s3 + $0x8c] sm:$0xf] %vm992_vm2, %v1230_v8  ;;  %v562_v16 = vadd.f32 %v1585_v38, %v561_v10  ;;  %v1313_v17 = vpop.f32.mrf.mxu0  ;;  %v1345_v18 = vpop.f32.mrf.mxu1 }
  0xe3   :  { %994 = vst.msk [vmem:[%s1910_s3 + $0x4] sm:$0xf] %vm992_vm2, %v1196_v11  ;;  %v1201_v19 = vpack.c.bf16 %v678_v13, %v678_v13  ;;  %v1233_v20 = vpack.c.bf16 %v710_v14, %v710_v14  ;;  %v445_v21 = vadd.f32 %v1313_v17, %v1585_v38  ;;  %v573_v22 = vadd.f32 %v1345_v18, %v1585_v38 }
  0xe4   :  { %1026 = vst.msk [vmem:[%s1910_s3 + $0x84] sm:$0xf] %vm992_vm2, %v1228_v12  ;;  %v676_v23 = vmax.f32 %v434_v15, 0.0  ;;  %v708_v24 = vmax.f32 %v562_v16, 0.0  ;;  %v436_v25 = vpop.f32.mrf.mxu0  ;;  %v564_v26 = vpop.f32.mrf.mxu1 }
  0xe5   :  { %999 = vst.msk [vmem:[%s1910_s3 + $0x18] sm:$0xf] %vm992_vm2, %v1201_v19  ;;  %1031 = vst.msk [vmem:[%s1910_s3 + $0x98] sm:$0xf] %vm992_vm2, %v1233_v20  ;;  %v679_v27 = vmax.f32 %v445_v21, 0.0  ;;  %v711_v28 = vmax.f32 %v573_v22, 0.0  ;;  %v437_v29 = vadd.f32 %v1585_v38, %v436_v25  ;;  %v565_v30 = vadd.f32 %v1585_v38, %v564_v26 }
  0xe6   :  { %v1199_v31 = vpack.c.bf16 %v676_v23, %v676_v23  ;;  %v1231_v32 = vpack.c.bf16 %v708_v24, %v708_v24  ;;  %v1316_v33 = vpop.f32.mrf.mxu0  ;;  %v1348_v34 = vpop.f32.mrf.mxu1 }
  0xe7   :  { %v1202_v35 = vpack.c.bf16 %v679_v27, %v679_v27  ;;  %v1234_v36 = vpack.c.bf16 %v711_v28, %v711_v28  ;;  %v677_v37 = vmax.f32 %v437_v29, 0.0  ;;  %v709_v39 = vmax.f32 %v565_v30, 0.0 }
  0xe8   :  { %997 = vst.msk [vmem:[%s1910_s3 + $0x10] sm:$0xf] %vm992_vm2, %v1199_v31  ;;  %1029 = vst.msk [vmem:[%s1910_s3 + $0x90] sm:$0xf] %vm992_vm2, %v1231_v32  ;;  %v458_v40 = vadd.f32 %v1316_v33, %v1585_v38  ;;  %v586_v41 = vadd.f32 %v1348_v34, %v1585_v38  ;;  %v449_v42 = vpop.f32.mrf.mxu0  ;;  %v577_v43 = vpop.f32.mrf.mxu1 }
  0xe9   :  { %1000 = vst.msk [vmem:[%s1910_s3 + $0x1c] sm:$0xf] %vm992_vm2, %v1202_v35  ;;  %1032 = vst.msk [vmem:[%s1910_s3 + $0x9c] sm:$0xf] %vm992_vm2, %v1234_v36  ;;  %v1200_v44 = vpack.c.bf16 %v677_v37, %v677_v37  ;;  %v1232_v45 = vpack.c.bf16 %v709_v39, %v709_v39  ;;  %v450_v46 = vadd.f32 %v1585_v38, %v449_v42 }
  0xea   :  { %v578_v47 = vadd.f32 %v1585_v38, %v577_v43  ;;  %v682_v48 = vmax.f32 %v458_v40, 0.0  ;;  %v714_v49 = vmax.f32 %v586_v41, 0.0  ;;  %v1317_v50 = vpop.f32.mrf.mxu0  ;;  %v1349_v51 = vpop.f32.mrf.mxu1 }
  0xeb   :  { %998 = vst.msk [vmem:[%s1910_s3 + $0x14] sm:$0xf] %vm992_vm2, %v1200_v44  ;;  %1030 = vst.msk [vmem:[%s1910_s3 + $0x94] sm:$0xf] %vm992_vm2, %v1232_v45  ;;  %v680_v52 = vmax.f32 %v450_v46, 0.0  ;;  %v461_v54 = vadd.f32 %v1317_v50, %v1585_v38  ;;  %v589_v55 = vadd.f32 %v1349_v51, %v1585_v38 }
  0xec   :  { %v712_v53 = vmax.f32 %v578_v47, 0.0  ;;  %v1205_v56 = vpack.c.bf16 %v682_v48, %v682_v48  ;;  %v1237_v57 = vpack.c.bf16 %v714_v49, %v714_v49  ;;  %v452_v58 = vpop.f32.mrf.mxu0  ;;  %v580_v59 = vpop.f32.mrf.mxu1 }
  0xed   :  { %v1203_v60 = vpack.c.bf16 %v680_v52, %v680_v52  ;;  %v683_v62 = vmax.f32 %v461_v54, 0.0  ;;  %v715_v63 = vmax.f32 %v589_v55, 0.0  ;;  %v453_v0 = vadd.f32 %v1585_v38, %v452_v58 }
  0xee   :  { %v1235_v61 = vpack.c.bf16 %v712_v53, %v712_v53  ;;  %1003 = vst.msk [vmem:[%s1910_s3 + $0x28] sm:$0xf] %vm992_vm2, %v1205_v56  ;;  %1035 = vst.msk [vmem:[%s1910_s3 + $0xa8] sm:$0xf] %vm992_vm2, %v1237_v57  ;;  %v581_v1 = vadd.f32 %v1585_v38, %v580_v59  ;;  %v1320_v2 = vpop.f32.mrf.mxu0  ;;  %v1352_v3 = vpop.f32.mrf.mxu1 }
  0xef   :  { %1001 = vst.msk [vmem:[%s1910_s3 + $0x20] sm:$0xf] %vm992_vm2, %v1203_v60  ;;  %v1206_v4 = vpack.c.bf16 %v683_v62, %v683_v62  ;;  %v1238_v5 = vpack.c.bf16 %v715_v63, %v715_v63  ;;  %v474_v6 = vadd.f32 %v1320_v2, %v1585_v38  ;;  %v602_v7 = vadd.f32 %v1352_v3, %v1585_v38 }
  0xf0   :  { %1033 = vst.msk [vmem:[%s1910_s3 + $0xa0] sm:$0xf] %vm992_vm2, %v1235_v61  ;;  %v681_v8 = vmax.f32 %v453_v0, 0.0  ;;  %v713_v9 = vmax.f32 %v581_v1, 0.0  ;;  %v465_v10 = vpop.f32.mrf.mxu0  ;;  %v593_v11 = vpop.f32.mrf.mxu1 }
  0xf1   :  { %1004 = vst.msk [vmem:[%s1910_s3 + $0x2c] sm:$0xf] %vm992_vm2, %v1206_v4  ;;  %1036 = vst.msk [vmem:[%s1910_s3 + $0xac] sm:$0xf] %vm992_vm2, %v1238_v5  ;;  %v686_v12 = vmax.f32 %v474_v6, 0.0  ;;  %v718_v13 = vmax.f32 %v602_v7, 0.0  ;;  %v466_v14 = vadd.f32 %v1585_v38, %v465_v10  ;;  %v594_v15 = vadd.f32 %v1585_v38, %v593_v11 }
  0xf2   :  { %v1204_v16 = vpack.c.bf16 %v681_v8, %v681_v8  ;;  %v1236_v17 = vpack.c.bf16 %v713_v9, %v713_v9  ;;  %v1321_v18 = vpop.f32.mrf.mxu0  ;;  %v1353_v19 = vpop.f32.mrf.mxu1 }
  0xf3   :  { %v1209_v20 = vpack.c.bf16 %v686_v12, %v686_v12  ;;  %v1241_v21 = vpack.c.bf16 %v718_v13, %v718_v13  ;;  %v684_v22 = vmax.f32 %v466_v14, 0.0  ;;  %v716_v23 = vmax.f32 %v594_v15, 0.0 }
  0xf4   :  { %1002 = vst.msk [vmem:[%s1910_s3 + $0x24] sm:$0xf] %vm992_vm2, %v1204_v16  ;;  %1034 = vst.msk [vmem:[%s1910_s3 + $0xa4] sm:$0xf] %vm992_vm2, %v1236_v17  ;;  %v477_v24 = vadd.f32 %v1321_v18, %v1585_v38  ;;  %v605_v25 = vadd.f32 %v1353_v19, %v1585_v38  ;;  %v468_v26 = vpop.f32.mrf.mxu0  ;;  %v596_v27 = vpop.f32.mrf.mxu1 }
  0xf5   :  { %1007 = vst.msk [vmem:[%s1910_s3 + $0x38] sm:$0xf] %vm992_vm2, %v1209_v20  ;;  %1039 = vst.msk [vmem:[%s1910_s3 + $0xb8] sm:$0xf] %vm992_vm2, %v1241_v21  ;;  %v1207_v28 = vpack.c.bf16 %v684_v22, %v684_v22  ;;  %v1239_v29 = vpack.c.bf16 %v716_v23, %v716_v23  ;;  %v469_v30 = vadd.f32 %v1585_v38, %v468_v26 }
  0xf6   :  { %v597_v31 = vadd.f32 %v1585_v38, %v596_v27  ;;  %v687_v32 = vmax.f32 %v477_v24, 0.0  ;;  %v719_v33 = vmax.f32 %v605_v25, 0.0  ;;  %v1324_v34 = vpop.f32.mrf.mxu0  ;;  %v1356_v35 = vpop.f32.mrf.mxu1 }
  0xf7   :  { %1005 = vst.msk [vmem:[%s1910_s3 + $0x30] sm:$0xf] %vm992_vm2, %v1207_v28  ;;  %1037 = vst.msk [vmem:[%s1910_s3 + $0xb0] sm:$0xf] %vm992_vm2, %v1239_v29  ;;  %v685_v36 = vmax.f32 %v469_v30, 0.0  ;;  %v490_v39 = vadd.f32 %v1324_v34, %v1585_v38  ;;  %v618_v40 = vadd.f32 %v1356_v35, %v1585_v38 }
  0xf8   :  { %v717_v37 = vmax.f32 %v597_v31, 0.0  ;;  %v1210_v41 = vpack.c.bf16 %v687_v32, %v687_v32  ;;  %v1242_v42 = vpack.c.bf16 %v719_v33, %v719_v33  ;;  %v481_v43 = vpop.f32.mrf.mxu0  ;;  %v609_v44 = vpop.f32.mrf.mxu1 }
  0xf9   :  { %v1208_v45 = vpack.c.bf16 %v685_v36, %v685_v36  ;;  %v690_v47 = vmax.f32 %v490_v39, 0.0  ;;  %v722_v48 = vmax.f32 %v618_v40, 0.0  ;;  %v482_v49 = vadd.f32 %v1585_v38, %v481_v43 }
  0xfa   :  { %v1240_v46 = vpack.c.bf16 %v717_v37, %v717_v37  ;;  %1008 = vst.msk [vmem:[%s1910_s3 + $0x3c] sm:$0xf] %vm992_vm2, %v1210_v41  ;;  %1040 = vst.msk [vmem:[%s1910_s3 + $0xbc] sm:$0xf] %vm992_vm2, %v1242_v42  ;;  %v610_v50 = vadd.f32 %v1585_v38, %v609_v44  ;;  %v1325_v51 = vpop.f32.mrf.mxu0  ;;  %v1357_v52 = vpop.f32.mrf.mxu1 }
  0xfb   :  { %1006 = vst.msk [vmem:[%s1910_s3 + $0x34] sm:$0xf] %vm992_vm2, %v1208_v45  ;;  %v1213_v53 = vpack.c.bf16 %v690_v47, %v690_v47  ;;  %v1245_v54 = vpack.c.bf16 %v722_v48, %v722_v48  ;;  %v493_v55 = vadd.f32 %v1325_v51, %v1585_v38  ;;  %v621_v56 = vadd.f32 %v1357_v52, %v1585_v38 }
  0xfc   :  { %1038 = vst.msk [vmem:[%s1910_s3 + $0xb4] sm:$0xf] %vm992_vm2, %v1240_v46  ;;  %v688_v57 = vmax.f32 %v482_v49, 0.0  ;;  %v720_v58 = vmax.f32 %v610_v50, 0.0  ;;  %v484_v59 = vpop.f32.mrf.mxu0  ;;  %v612_v60 = vpop.f32.mrf.mxu1 }
  0xfd   :  { %1011 = vst.msk [vmem:[%s1910_s3 + $0x48] sm:$0xf] %vm992_vm2, %v1213_v53  ;;  %1043 = vst.msk [vmem:[%s1910_s3 + $0xc8] sm:$0xf] %vm992_vm2, %v1245_v54  ;;  %v691_v61 = vmax.f32 %v493_v55, 0.0  ;;  %v723_v62 = vmax.f32 %v621_v56, 0.0  ;;  %v485_v63 = vadd.f32 %v1585_v38, %v484_v59  ;;  %v613_v0 = vadd.f32 %v1585_v38, %v612_v60 }
  0xfe   :  { %v1211_v1 = vpack.c.bf16 %v688_v57, %v688_v57  ;;  %v1243_v2 = vpack.c.bf16 %v720_v58, %v720_v58  ;;  %v1328_v3 = vpop.f32.mrf.mxu0  ;;  %v1360_v4 = vpop.f32.mrf.mxu1 }
  0xff   :  { %v1214_v5 = vpack.c.bf16 %v691_v61, %v691_v61  ;;  %v1246_v6 = vpack.c.bf16 %v723_v62, %v723_v62  ;;  %v689_v7 = vmax.f32 %v485_v63, 0.0  ;;  %v721_v8 = vmax.f32 %v613_v0, 0.0 }
 0x100   :  { %1009 = vst.msk [vmem:[%s1910_s3 + $0x40] sm:$0xf] %vm992_vm2, %v1211_v1  ;;  %1041 = vst.msk [vmem:[%s1910_s3 + $0xc0] sm:$0xf] %vm992_vm2, %v1243_v2  ;;  %v506_v9 = vadd.f32 %v1328_v3, %v1585_v38  ;;  %v634_v10 = vadd.f32 %v1360_v4, %v1585_v38  ;;  %v497_v11 = vpop.f32.mrf.mxu0  ;;  %v625_v12 = vpop.f32.mrf.mxu1 }
 0x101   :  { %1012 = vst.msk [vmem:[%s1910_s3 + $0x4c] sm:$0xf] %vm992_vm2, %v1214_v5  ;;  %1044 = vst.msk [vmem:[%s1910_s3 + $0xcc] sm:$0xf] %vm992_vm2, %v1246_v6  ;;  %v1212_v13 = vpack.c.bf16 %v689_v7, %v689_v7  ;;  %v1244_v14 = vpack.c.bf16 %v721_v8, %v721_v8  ;;  %v498_v15 = vadd.f32 %v1585_v38, %v497_v11 }
 0x102   :  { %v626_v16 = vadd.f32 %v1585_v38, %v625_v12  ;;  %v694_v17 = vmax.f32 %v506_v9, 0.0  ;;  %v726_v18 = vmax.f32 %v634_v10, 0.0  ;;  %v1329_v19 = vpop.f32.mrf.mxu0  ;;  %v1361_v20 = vpop.f32.mrf.mxu1 }
 0x103   :  { %1010 = vst.msk [vmem:[%s1910_s3 + $0x44] sm:$0xf] %vm992_vm2, %v1212_v13  ;;  %1042 = vst.msk [vmem:[%s1910_s3 + $0xc4] sm:$0xf] %vm992_vm2, %v1244_v14  ;;  %v692_v21 = vmax.f32 %v498_v15, 0.0  ;;  %v509_v23 = vadd.f32 %v1329_v19, %v1585_v38  ;;  %v637_v24 = vadd.f32 %v1361_v20, %v1585_v38 }
 0x104   :  { %v724_v22 = vmax.f32 %v626_v16, 0.0  ;;  %v1217_v25 = vpack.c.bf16 %v694_v17, %v694_v17  ;;  %v1249_v26 = vpack.c.bf16 %v726_v18, %v726_v18  ;;  %v500_v27 = vpop.f32.mrf.mxu0  ;;  %v628_v28 = vpop.f32.mrf.mxu1 }
 0x105   :  { %v1215_v29 = vpack.c.bf16 %v692_v21, %v692_v21  ;;  %v695_v31 = vmax.f32 %v509_v23, 0.0  ;;  %v727_v32 = vmax.f32 %v637_v24, 0.0  ;;  %v501_v33 = vadd.f32 %v1585_v38, %v500_v27 }
 0x106   :  { %v1247_v30 = vpack.c.bf16 %v724_v22, %v724_v22  ;;  %1015 = vst.msk [vmem:[%s1910_s3 + $0x58] sm:$0xf] %vm992_vm2, %v1217_v25  ;;  %1047 = vst.msk [vmem:[%s1910_s3 + $0xd8] sm:$0xf] %vm992_vm2, %v1249_v26  ;;  %v629_v34 = vadd.f32 %v1585_v38, %v628_v28  ;;  %v1332_v35 = vpop.f32.mrf.mxu0  ;;  %v1364_v36 = vpop.f32.mrf.mxu1 }
 0x107   :  { %1013 = vst.msk [vmem:[%s1910_s3 + $0x50] sm:$0xf] %vm992_vm2, %v1215_v29  ;;  %v1218_v37 = vpack.c.bf16 %v695_v31, %v695_v31  ;;  %v1250_v39 = vpack.c.bf16 %v727_v32, %v727_v32  ;;  %v522_v40 = vadd.f32 %v1332_v35, %v1585_v38  ;;  %v650_v41 = vadd.f32 %v1364_v36, %v1585_v38 }
 0x108   :  { %1045 = vst.msk [vmem:[%s1910_s3 + $0xd0] sm:$0xf] %vm992_vm2, %v1247_v30  ;;  %v693_v42 = vmax.f32 %v501_v33, 0.0  ;;  %v725_v43 = vmax.f32 %v629_v34, 0.0  ;;  %v513_v44 = vpop.f32.mrf.mxu0  ;;  %v641_v45 = vpop.f32.mrf.mxu1 }
 0x109   :  { %1016 = vst.msk [vmem:[%s1910_s3 + $0x5c] sm:$0xf] %vm992_vm2, %v1218_v37  ;;  %1048 = vst.msk [vmem:[%s1910_s3 + $0xdc] sm:$0xf] %vm992_vm2, %v1250_v39  ;;  %v698_v46 = vmax.f32 %v522_v40, 0.0  ;;  %v730_v47 = vmax.f32 %v650_v41, 0.0  ;;  %v514_v48 = vadd.f32 %v1585_v38, %v513_v44  ;;  %v642_v49 = vadd.f32 %v1585_v38, %v641_v45 }
 0x10a   :  { %v1216_v50 = vpack.c.bf16 %v693_v42, %v693_v42  ;;  %v1248_v51 = vpack.c.bf16 %v725_v43, %v725_v43  ;;  %v1333_v52 = vpop.f32.mrf.mxu0  ;;  %v1365_v53 = vpop.f32.mrf.mxu1 }
 0x10b   :  { %v1221_v54 = vpack.c.bf16 %v698_v46, %v698_v46  ;;  %v1253_v55 = vpack.c.bf16 %v730_v47, %v730_v47  ;;  %v696_v56 = vmax.f32 %v514_v48, 0.0  ;;  %v728_v57 = vmax.f32 %v642_v49, 0.0 }
 0x10c   :  { %1014 = vst.msk [vmem:[%s1910_s3 + $0x54] sm:$0xf] %vm992_vm2, %v1216_v50  ;;  %1046 = vst.msk [vmem:[%s1910_s3 + $0xd4] sm:$0xf] %vm992_vm2, %v1248_v51  ;;  %v525_v58 = vadd.f32 %v1333_v52, %v1585_v38  ;;  %v653_v59 = vadd.f32 %v1365_v53, %v1585_v38  ;;  %v516_v60 = vpop.f32.mrf.mxu0  ;;  %v644_v61 = vpop.f32.mrf.mxu1 }
 0x10d   :  { %1019 = vst.msk [vmem:[%s1910_s3 + $0x68] sm:$0xf] %vm992_vm2, %v1221_v54  ;;  %1051 = vst.msk [vmem:[%s1910_s3 + $0xe8] sm:$0xf] %vm992_vm2, %v1253_v55  ;;  %v1219_v62 = vpack.c.bf16 %v696_v56, %v696_v56  ;;  %v1251_v63 = vpack.c.bf16 %v728_v57, %v728_v57  ;;  %v517_v0 = vadd.f32 %v1585_v38, %v516_v60 }
 0x10e   :  { %v645_v1 = vadd.f32 %v1585_v38, %v644_v61  ;;  %v699_v2 = vmax.f32 %v525_v58, 0.0  ;;  %v731_v3 = vmax.f32 %v653_v59, 0.0  ;;  %v1336_v4 = vpop.f32.mrf.mxu0  ;;  %v1368_v5 = vpop.f32.mrf.mxu1 }
 0x10f   :  { %1017 = vst.msk [vmem:[%s1910_s3 + $0x60] sm:$0xf] %vm992_vm2, %v1219_v62  ;;  %1049 = vst.msk [vmem:[%s1910_s3 + $0xe0] sm:$0xf] %vm992_vm2, %v1251_v63  ;;  %v697_v6 = vmax.f32 %v517_v0, 0.0  ;;  %v538_v8 = vadd.f32 %v1336_v4, %v1585_v38  ;;  %v666_v9 = vadd.f32 %v1368_v5, %v1585_v38 }
 0x110   :  { %v729_v7 = vmax.f32 %v645_v1, 0.0  ;;  %v1222_v10 = vpack.c.bf16 %v699_v2, %v699_v2  ;;  %v1254_v11 = vpack.c.bf16 %v731_v3, %v731_v3  ;;  %v529_v12 = vpop.f32.mrf.mxu0  ;;  %v657_v13 = vpop.f32.mrf.mxu1 }
 0x111   :  { %v1220_v14 = vpack.c.bf16 %v697_v6, %v697_v6  ;;  %v702_v16 = vmax.f32 %v538_v8, 0.0  ;;  %v734_v17 = vmax.f32 %v666_v9, 0.0  ;;  %v530_v18 = vadd.f32 %v1585_v38, %v529_v12 }
 0x112   :  { %v1252_v15 = vpack.c.bf16 %v729_v7, %v729_v7  ;;  %1020 = vst.msk [vmem:[%s1910_s3 + $0x6c] sm:$0xf] %vm992_vm2, %v1222_v10  ;;  %1052 = vst.msk [vmem:[%s1910_s3 + $0xec] sm:$0xf] %vm992_vm2, %v1254_v11  ;;  %v658_v19 = vadd.f32 %v1585_v38, %v657_v13  ;;  %v1337_v20 = vpop.f32.mrf.mxu0  ;;  %v1369_v21 = vpop.f32.mrf.mxu1 }
 0x113   :  { %1018 = vst.msk [vmem:[%s1910_s3 + $0x64] sm:$0xf] %vm992_vm2, %v1220_v14  ;;  %v1225_v22 = vpack.c.bf16 %v702_v16, %v702_v16  ;;  %v1257_v23 = vpack.c.bf16 %v734_v17, %v734_v17  ;;  %v541_v24 = vadd.f32 %v1337_v20, %v1585_v38  ;;  %v669_v25 = vadd.f32 %v1369_v21, %v1585_v38 }
 0x114   :  { %1050 = vst.msk [vmem:[%s1910_s3 + $0xe4] sm:$0xf] %vm992_vm2, %v1252_v15  ;;  %v700_v26 = vmax.f32 %v530_v18, 0.0  ;;  %v732_v27 = vmax.f32 %v658_v19, 0.0  ;;  %v532_v28 = vpop.f32.mrf.mxu0  ;;  %v660_v29 = vpop.f32.mrf.mxu1 }
 0x115   :  { %1023 = vst.msk [vmem:[%s1910_s3 + $0x78] sm:$0xf] %vm992_vm2, %v1225_v22  ;;  %1055 = vst.msk [vmem:[%s1910_s3 + $0xf8] sm:$0xf] %vm992_vm2, %v1257_v23  ;;  %v703_v30 = vmax.f32 %v541_v24, 0.0  ;;  %v735_v31 = vmax.f32 %v669_v25, 0.0  ;;  %v533_v32 = vadd.f32 %v1585_v38, %v532_v28  ;;  %v661_v33 = vadd.f32 %v1585_v38, %v660_v29 }
 0x116   :  { %v1223_v34 = vpack.c.bf16 %v700_v26, %v700_v26  ;;  %v1255_v35 = vpack.c.bf16 %v732_v27, %v732_v27 }
 0x117   :  { %v1226_v36 = vpack.c.bf16 %v703_v30, %v703_v30  ;;  %v1258_v37 = vpack.c.bf16 %v735_v31, %v735_v31  ;;  %v701_v39 = vmax.f32 %v533_v32, 0.0  ;;  %v733_v40 = vmax.f32 %v661_v33, 0.0 }
 0x118   :  { %1021 = vst.msk [vmem:[%s1910_s3 + $0x70] sm:$0xf] %vm992_vm2, %v1223_v34  ;;  %1053 = vst.msk [vmem:[%s1910_s3 + $0xf0] sm:$0xf] %vm992_vm2, %v1255_v35 }
 0x119   :  { %1024 = vst.msk [vmem:[%s1910_s3 + $0x7c] sm:$0xf] %vm992_vm2, %v1226_v36  ;;  %1056 = vst.msk [vmem:[%s1910_s3 + $0xfc] sm:$0xf] %vm992_vm2, %v1258_v37  ;;  %v1224_v38 = vpack.c.bf16 %v701_v39, %v701_v39  ;;  %v1256_v41 = vpack.c.bf16 %v733_v40, %v733_v40 }
 0x11b   :  { %1022 = vst.msk [vmem:[%s1910_s3 + $0x74] sm:$0xf] %vm992_vm2, %v1224_v38  ;;  %1054 = vst.msk [vmem:[%s1910_s3 + $0xf4] sm:$0xf] %vm992_vm2, %v1256_v41 }

// kernel: _lambda_.25
= control target key start
LH: loop header
LB: loop body
LE: loop exit
PB: predicated region body
PF: predicated region fallthrough
CT: control target
= control target key end

     0   :  { %vm382_vm0 = vcmask 1043456   ;;  %vm285_vm1 = vcmask 588800   ;;  %vm1187_vm2 = vcmask 60416   ;;  %s2618_s1 = inlined_call_operand.vmem [shape: bf16[72,8], index: 1, kind: input, shape index: {}]   ;;  %s2619_s0 = inlined_call_operand.vmem [shape: bf16[512,72], index: 0, kind: input, shape index: {}]   ;;  %s2620_s3 = inlined_call_operand.vmem [shape: bf16[512,8], index: 3, kind: input, shape index: {}]   ;;  %s2621_s2 = inlined_call_operand.vmem [shape: f32[1,8], index: 2, kind: input, shape index: {}]   ;;  %s2622_s4 = inlined_call_operand.vmem [shape: bf16[512,8], index: 4, kind: output, shape index: {}]  }
   0x1   :  { %v1736_v0 = vld [vmem:[%s2618_s1 + $0x20] ss:$0 sps:$4 sm:$0xff]   ;;  %v1737_v1 = vld [vmem:[%s2618_s1 + $0x18] sm:$0xff]   ;;  %v1738_v3 = vld [vmem:[%s2618_s1 + $0x10] sm:$0xff]  }
   0x2   :  { %1734 = vmatprep.subr.msk.bf16.mxu0 %vm382_vm0, %v1736_v0  ;;  %1735 = vmatprep.subr.msk.bf16.mxu1 %vm382_vm0, %v1736_v0  ;;  %v384_v2 = vsel %vm382_vm0, %v1736_v0, 0  ;;  %v1741_v4 = vld [vmem:[%s2619_s0] sm:$0xff]   ;;  %v1739_v6 = vld [vmem:[%s2618_s1 + $0x8] sm:$0xff]   ;;  %v1745_v10 = vld [vmem:[%s2619_s0 + $0x10] sm:$0xff]  }
   0x3   :  { %1651 = vmatpush3.bf16.msra.mxu0 %v384_v2  ;;  %1729 = vmatpush3.bf16.msra.mxu1 %v384_v2  ;;  %v1742_v5 = vld [vmem:[%s2619_s0 + $0x80] sm:$0xff]   ;;  %v1743_v8 = vld [vmem:[%s2619_s0 + $0x8] sm:$0xff]   ;;  %v1746_v11 = vld [vmem:[%s2619_s0 + $0x90] sm:$0xff]  }
   0x4   :  { %1652 = vmatprep.subr.bf16.mxu0 %v1737_v1  ;;  %1725 = vmatprep.subr.bf16.mxu1 %v1737_v1  ;;  %v1740_v7 = vld [vmem:[%s2618_s1] sm:$0xff]   ;;  %v1744_v9 = vld [vmem:[%s2619_s0 + $0x88] sm:$0xff]   ;;  %v1747_v12 = vld [vmem:[%s2619_s0 + $0x18] sm:$0xff]  }
   0x5   :  { %1660 = vmatprep.mubr.msk.bf16.mxu0 %vm285_vm1, %v1741_v4  ;;  %1692 = vmatprep.mubr.msk.bf16.mxu1 %vm285_vm1, %v1742_v5  ;;  %v1748_v13 = vld [vmem:[%s2619_s0 + $0x98] sm:$0xff]   ;;  %v1749_v14 = vld [vmem:[%s2619_s0 + $0x20] sm:$0xff]   ;;  %v1751_v16 = vld [vmem:[%s2619_s0 + $0x28] sm:$0xff]  }
   0x6   :  { %v1750_v15 = vld [vmem:[%s2619_s0 + $0xa0] sm:$0xff]   ;;  %v1752_v17 = vld [vmem:[%s2619_s0 + $0xa8] sm:$0xff]   ;;  %v1753_v18 = vld [vmem:[%s2619_s0 + $0x30] sm:$0xff]  }
   0x7   :  { %1653 = vmatpush3.bf16.msra.mxu0 %v1737_v1  ;;  %1730 = vmatpush3.bf16.msra.mxu1 %v1737_v1  ;;  %v1754_v19 = vld [vmem:[%s2619_s0 + $0xb0] sm:$0xff]   ;;  %v1755_v20 = vld [vmem:[%s2619_s0 + $0x38] sm:$0xff]   ;;  %v1757_v22 = vld [vmem:[%s2619_s0 + $0x40] sm:$0xff]  }
   0x8   :  { %1654 = vmatprep.subr.bf16.mxu0 %v1738_v3  ;;  %1726 = vmatprep.subr.bf16.mxu1 %v1738_v3  ;;  %v1756_v21 = vld [vmem:[%s2619_s0 + $0xb8] sm:$0xff]   ;;  %v1758_v23 = vld [vmem:[%s2619_s0 + $0xc0] sm:$0xff]   ;;  %v1759_v24 = vld [vmem:[%s2619_s0 + $0x48] sm:$0xff]  }
   0x9   :  { %v1760_v25 = vld [vmem:[%s2619_s0 + $0xc8] sm:$0xff]   ;;  %v1761_v26 = vld [vmem:[%s2619_s0 + $0x50] sm:$0xff]   ;;  %v1763_v28 = vld [vmem:[%s2619_s0 + $0x58] sm:$0xff]  }
   0xa   :  { %v1762_v27 = vld [vmem:[%s2619_s0 + $0xd0] sm:$0xff]   ;;  %v1764_v29 = vld [vmem:[%s2619_s0 + $0xd8] sm:$0xff]   ;;  %v1765_v30 = vld [vmem:[%s2619_s0 + $0x60] sm:$0xff]  }
   0xb   :  { %1655 = vmatpush3.bf16.msra.mxu0 %v1738_v3  ;;  %1731 = vmatpush3.bf16.msra.mxu1 %v1738_v3  ;;  %v1766_v31 = vld [vmem:[%s2619_s0 + $0xe0] sm:$0xff]   ;;  %v1767_v32 = vld [vmem:[%s2619_s0 + $0x68] sm:$0xff]   ;;  %v1769_v34 = vld [vmem:[%s2619_s0 + $0x70] sm:$0xff]  }
   0xc   :  { %1656 = vmatprep.subr.bf16.mxu0 %v1739_v6  ;;  %1727 = vmatprep.subr.bf16.mxu1 %v1739_v6  ;;  %v1768_v33 = vld [vmem:[%s2619_s0 + $0xe8] sm:$0xff]   ;;  %v1770_v35 = vld [vmem:[%s2619_s0 + $0xf0] sm:$0xff]   ;;  %v1771_v36 = vld [vmem:[%s2619_s0 + $0x78] sm:$0xff]  }
   0xd   :  { %v1772_v37 = vld [vmem:[%s2619_s0 + $0xf8] sm:$0xff]   ;;  %v1944_v38 = vld [vmem:[%s2620_s3 + $0x8] sm:$0xff]   ;;  %v1954_v40 = vld [vmem:[%s2620_s3] sm:$0xff]  }
   0xe   :  { %v1949_v39 = vld [vmem:[%s2620_s3 + $0x88] sm:$0xff]   ;;  %v1959_v41 = vld [vmem:[%s2620_s3 + $0x80] sm:$0xff]   ;;  %v1964_v42 = vld [vmem:[%s2620_s3 + $0x18] sm:$0xff]   ;;  %v1460_v46 = vunpack.c.l.bf16 %v1944_v38  ;;  %v1456_v48 = vunpack.c.l.bf16 %v1954_v40  ;;  %v1461_v51 = vunpack.c.h.bf16 %v1944_v38  ;;  %v1457_v53 = vunpack.c.h.bf16 %v1954_v40 }
   0xf   :  { %1657 = vmatpush3.bf16.msra.mxu0 %v1739_v6  ;;  %1732 = vmatpush3.bf16.msra.mxu1 %v1739_v6  ;;  %v1969_v43 = vld [vmem:[%s2620_s3 + $0x98] sm:$0xff]   ;;  %v1974_v44 = vld [vmem:[%s2620_s3 + $0x10] sm:$0xff]   ;;  %v1524_v47 = vunpack.c.l.bf16 %v1949_v39  ;;  %v1520_v49 = vunpack.c.l.bf16 %v1959_v41  ;;  %v1988_v50 = vld [vmem:[%s2620_s3 + $0x28] sm:$0xff]   ;;  %v1525_v52 = vunpack.c.h.bf16 %v1949_v39  ;;  %v1521_v54 = vunpack.c.h.bf16 %v1959_v41 }
  0x10   :  { %1658 = vmatprep.subr.bf16.mxu0 %v1740_v7  ;;  %1728 = vmatprep.subr.bf16.mxu1 %v1740_v7  ;;  %v1979_v45 = vld [vmem:[%s2620_s3 + $0x90] sm:$0xff]   ;;  %v1997_v55 = vld [vmem:[%s2620_s3 + $0xa8] sm:$0xff]   ;;  %v2002_v56 = vld [vmem:[%s2620_s3 + $0x20] sm:$0xff]   ;;  %v1468_v58 = vunpack.c.l.bf16 %v1964_v42  ;;  %v1532_v59 = vunpack.c.l.bf16 %v1969_v43  ;;  %v1464_v60 = vunpack.c.l.bf16 %v1974_v44  ;;  %v1469_v63 = vunpack.c.h.bf16 %v1964_v42 }
  0x11   :  { %v2007_v57 = vld [vmem:[%s2620_s3 + $0xa0] sm:$0xff]   ;;  %v1528_v61 = vunpack.c.l.bf16 %v1979_v45  ;;  %v2016_v62 = vld [vmem:[%s2620_s3 + $0x38] sm:$0xff]   ;;  %v1533_v0 = vunpack.c.h.bf16 %v1969_v43  ;;  %v1465_v1 = vunpack.c.h.bf16 %v1974_v44  ;;  %v2030_v4 = vld [vmem:[%s2620_s3 + $0x30] sm:$0xff]   ;;  %v2625_v44 = vunpack.c.l.bf16 %v1997_v55 }
  0x12   :  { %v2025_v3 = vld [vmem:[%s2620_s3 + $0xb8] sm:$0xff]   ;;  %v2035_v5 = vld [vmem:[%s2620_s3 + $0xb0] sm:$0xff]  }
  0x13   :  { %1659 = vmatpush3.bf16.msra.mxu0 %v1740_v7  ;;  %1733 = vmatpush3.bf16.msra.mxu1 %v1740_v7 }
  0x16   :  { %1661 = vmatmul.mubr.msk.bf16.vlgmr.msra.gmra.mxu0 %vm285_vm1, %v1743_v8  ;;  %1693 = vmatmul.mubr.msk.bf16.vlgmr.msra.gmra.mxu1 %vm285_vm1, %v1744_v9 }
  0x17   :  { %1664 = vmatprep.mubr.msk.bf16.mxu0 %vm285_vm1, %v1745_v10  ;;  %1696 = vmatprep.mubr.msk.bf16.mxu1 %vm285_vm1, %v1746_v11  ;;  %v2044_v10 = vld [vmem:[%s2620_s3 + $0x48] sm:$0xff]  }
  0x1e   :  { %1665 = vmatmul.mubr.msk.bf16.gmra.mxu0 %vm285_vm1, %v1747_v12  ;;  %1697 = vmatmul.mubr.msk.bf16.gmra.mxu1 %vm285_vm1, %v1748_v13  ;;  %v2155_v13 = vld [vmem:[%s2620_s3 + $0x70] sm:$0xff]  }
  0x1f   :  { %1668 = vmatprep.mubr.msk.bf16.mxu0 %vm285_vm1, %v1749_v14  ;;  %1700 = vmatprep.mubr.msk.bf16.mxu1 %vm285_vm1, %v1750_v15  ;;  %v2053_v15 = vld [vmem:[%s2620_s3 + $0xc8] sm:$0xff]  }
  0x26   :  { %1669 = vmatmul.mubr.msk.bf16.gmra.mxu0 %vm285_vm1, %v1751_v16  ;;  %1701 = vmatmul.mubr.msk.bf16.gmra.mxu1 %vm285_vm1, %v1752_v17  ;;  %v2058_v16 = vld [vmem:[%s2620_s3 + $0x40] sm:$0xff]  }
  0x27   :  { %1672 = vmatprep.mubr.msk.bf16.mxu0 %vm285_vm1, %v1753_v18  ;;  %1704 = vmatprep.mubr.msk.bf16.mxu1 %vm285_vm1, %v1754_v19  ;;  %v2063_v17 = vld [vmem:[%s2620_s3 + $0xc0] sm:$0xff]  }
  0x2e   :  { %1673 = vmatmul.mubr.msk.bf16.gmra.mxu0 %vm285_vm1, %v1755_v20  ;;  %1705 = vmatmul.mubr.msk.bf16.gmra.mxu1 %vm285_vm1, %v1756_v21  ;;  %v2137_v20 = vld [vmem:[%s2620_s3 + $0x78] sm:$0xff]  }
  0x2f   :  { %1676 = vmatprep.mubr.msk.bf16.mxu0 %vm285_vm1, %v1757_v22  ;;  %1708 = vmatprep.mubr.msk.bf16.mxu1 %vm285_vm1, %v1758_v23  ;;  %v2072_v22 = vld [vmem:[%s2620_s3 + $0x58] sm:$0xff]  }
  0x36   :  { %1677 = vmatmul.mubr.msk.bf16.gmra.mxu0 %vm285_vm1, %v1759_v24  ;;  %1709 = vmatmul.mubr.msk.bf16.gmra.mxu1 %vm285_vm1, %v1760_v25  ;;  %v2160_v24 = vld [vmem:[%s2620_s3 + $0xf0] sm:$0xff]  }
  0x37   :  { %1680 = vmatprep.mubr.msk.bf16.mxu0 %vm285_vm1, %v1761_v26  ;;  %1712 = vmatprep.mubr.msk.bf16.mxu1 %vm285_vm1, %v1762_v27  ;;  %v2081_v27 = vld [vmem:[%s2620_s3 + $0xd8] sm:$0xff]   ;;  %v1577_v18 = vunpack.c.h.bf16 %v2160_v24 }
  0x3e   :  { %1681 = vmatmul.mubr.msk.bf16.gmra.mxu0 %vm285_vm1, %v1763_v28  ;;  %1713 = vmatmul.mubr.msk.bf16.gmra.mxu1 %vm285_vm1, %v1764_v29  ;;  %v2086_v28 = vld [vmem:[%s2620_s3 + $0x50] sm:$0xff]  }
  0x3f   :  { %1684 = vmatprep.mubr.msk.bf16.mxu0 %vm285_vm1, %v1765_v30  ;;  %1716 = vmatprep.mubr.msk.bf16.mxu1 %vm285_vm1, %v1766_v31  ;;  %v2091_v29 = vld [vmem:[%s2620_s3 + $0xd0] sm:$0xff]   ;;  %v2109_v31 = vld [vmem:[%s2620_s3 + $0xe8] sm:$0xff]  }
  0x46   :  { %1685 = vmatmul.mubr.msk.bf16.gmra.mxu0 %vm285_vm1, %v1767_v32  ;;  %1717 = vmatmul.mubr.msk.bf16.gmra.mxu1 %vm285_vm1, %v1768_v33  ;;  %v2114_v33 = vld [vmem:[%s2620_s3 + $0x60] sm:$0xff]  }
  0x47   :  { %1688 = vmatprep.mubr.msk.bf16.mxu0 %vm285_vm1, %v1769_v34  ;;  %1720 = vmatprep.mubr.msk.bf16.mxu1 %vm285_vm1, %v1770_v35  ;;  %v2100_v34 = vld [vmem:[%s2620_s3 + $0x68] sm:$0xff]   ;;  %v2119_v35 = vld [vmem:[%s2620_s3 + $0xe0] sm:$0xff]  }
  0x4e   :  { %1689 = vmatmul.mubr.msk.bf16.gmra.mxu0 %vm285_vm1, %v1771_v36  ;;  %1721 = vmatmul.mubr.msk.bf16.gmra.mxu1 %vm285_vm1, %v1772_v37  ;;  %v2124_v37 = vld [vmem:[%s2621_s2] ss:$0 sm:$0xff]  ;;  %v2142_v36 = vld [vmem:[%s2620_s3 + $0xf8] sm:$0xff]  }
  0xd6   :  { %v1662_v32 = vpop.f32.mrf.mxu0  ;;  %v1694_v30 = vpop.f32.mrf.mxu1 }
  0xd7   :  { %v429_v26 = vadd.f32 %v1662_v32, %v2124_v37  ;;  %v557_v19 = vadd.f32 %v1694_v30, %v2124_v37  ;;  %v1513_v30 = vunpack.c.h.bf16 %v2155_v13 }
  0xd8   :  { %v420_v23 = vpop.f32.mrf.mxu0  ;;  %v548_v21 = vpop.f32.mrf.mxu1 }
  0xd9   :  { %v805_v25 = vadd.f32 %v1460_v46, %v429_v26  ;;  %v837_v12 = vadd.f32 %v1524_v47, %v557_v19  ;;  %v421_v11 = vadd.f32 %v2124_v37, %v420_v23  ;;  %v549_v9 = vadd.f32 %v2124_v37, %v548_v21 }
  0xda   :  { %v1663_v8 = vpop.f32.mrf.mxu0  ;;  %v1695_v7 = vpop.f32.mrf.mxu1 }
  0xdb   :  { %v869_v6 = vmax.f32 %v805_v25, 0.0  ;;  %v901_v2 = vmax.f32 %v837_v12, 0.0  ;;  %v803_v46 = vadd.f32 %v1456_v48, %v421_v11  ;;  %v835_v47 = vadd.f32 %v1520_v49, %v549_v9 }
  0xdc   :  { %v432_v19 = vadd.f32 %v1663_v8, %v2124_v37  ;;  %v560_v21 = vadd.f32 %v1695_v7, %v2124_v37  ;;  %v423_v23 = vpop.f32.mrf.mxu0  ;;  %v551_v26 = vpop.f32.mrf.mxu1 }
  0xdd   :  { %v1392_v32 = vpack.c.bf16 %v869_v6, %v869_v6  ;;  %v1424_v14 = vpack.c.bf16 %v901_v2, %v901_v2  ;;  %v867_v25 = vmax.f32 %v803_v46, 0.0  ;;  %v899_v12 = vmax.f32 %v835_v47, 0.0 }
  0xde   :  { %v806_v48 = vadd.f32 %v1461_v51, %v432_v19  ;;  %v838_v49 = vadd.f32 %v1525_v52, %v560_v21  ;;  %v424_v8 = vadd.f32 %v2124_v37, %v423_v23  ;;  %v552_v7 = vadd.f32 %v2124_v37, %v551_v26  ;;  %v1666_v9 = vpop.f32.mrf.mxu0  ;;  %v1698_v11 = vpop.f32.mrf.mxu1 }
  0xdf   :  { %1190 = vst.msk [vmem:[%s2622_s4 + $0x8] sm:$0xf] %vm1187_vm2, %v1392_v32  ;;  %1222 = vst.msk [vmem:[%s2622_s4 + $0x88] sm:$0xf] %vm1187_vm2, %v1424_v14  ;;  %v1390_v38 = vpack.c.bf16 %v867_v25, %v867_v25  ;;  %v1422_v51 = vpack.c.bf16 %v899_v12, %v899_v12  ;;  %v445_v39 = vadd.f32 %v1666_v9, %v2124_v37 }
  0xe0   :  { %v573_v52 = vadd.f32 %v1698_v11, %v2124_v37  ;;  %v870_v2 = vmax.f32 %v806_v48, 0.0  ;;  %v902_v6 = vmax.f32 %v838_v49, 0.0  ;;  %v804_v46 = vadd.f32 %v1457_v53, %v424_v8  ;;  %v436_v32 = vpop.f32.mrf.mxu0  ;;  %v564_v19 = vpop.f32.mrf.mxu1 }
  0xe1   :  { %v836_v47 = vadd.f32 %v1521_v54, %v552_v7  ;;  %1188 = vst.msk [vmem:[%s2622_s4] sm:$0xf] %vm1187_vm2, %v1390_v38  ;;  %1220 = vst.msk [vmem:[%s2622_s4 + $0x80] sm:$0xf] %vm1187_vm2, %v1422_v51  ;;  %v809_v14 = vadd.f32 %v1468_v58, %v445_v39  ;;  %v437_v41 = vadd.f32 %v2124_v37, %v436_v32 }
  0xe2   :  { %v841_v40 = vadd.f32 %v1532_v59, %v573_v52  ;;  %v565_v53 = vadd.f32 %v2124_v37, %v564_v19  ;;  %v1393_v54 = vpack.c.bf16 %v870_v2, %v870_v2  ;;  %v1425_v21 = vpack.c.bf16 %v902_v6, %v902_v6  ;;  %v1667_v25 = vpop.f32.mrf.mxu0  ;;  %v1699_v12 = vpop.f32.mrf.mxu1 }
  0xe3   :  { %v868_v23 = vmax.f32 %v804_v46, 0.0  ;;  %v900_v26 = vmax.f32 %v836_v47, 0.0  ;;  %v873_v48 = vmax.f32 %v809_v14, 0.0  ;;  %v807_v8 = vadd.f32 %v1464_v60, %v437_v41 }
  0xe4   :  { %v905_v49 = vmax.f32 %v841_v40, 0.0  ;;  %v839_v58 = vadd.f32 %v1528_v61, %v565_v53  ;;  %1191 = vst.msk [vmem:[%s2622_s4 + $0xc] sm:$0xf] %vm1187_vm2, %v1393_v54  ;;  %1223 = vst.msk [vmem:[%s2622_s4 + $0x8c] sm:$0xf] %vm1187_vm2, %v1425_v21  ;;  %v448_v9 = vadd.f32 %v1667_v25, %v2124_v37  ;;  %v576_v11 = vadd.f32 %v1699_v12, %v2124_v37  ;;  %v439_v60 = vpop.f32.mrf.mxu0  ;;  %v567_v38 = vpop.f32.mrf.mxu1 }
  0xe5   :  { %v1391_v59 = vpack.c.bf16 %v868_v23, %v868_v23  ;;  %v1423_v7 = vpack.c.bf16 %v900_v26, %v900_v26  ;;  %v1396_v51 = vpack.c.bf16 %v873_v48, %v873_v48  ;;  %v871_v39 = vmax.f32 %v807_v8, 0.0 }
  0xe6   :  { %v1428_v61 = vpack.c.bf16 %v905_v49, %v905_v49  ;;  %v903_v52 = vmax.f32 %v839_v58, 0.0  ;;  %v810_v2 = vadd.f32 %v1469_v63, %v448_v9  ;;  %v842_v6 = vadd.f32 %v1533_v0, %v576_v11  ;;  %v1670_v32 = vpop.f32.mrf.mxu0  ;;  %v1702_v19 = vpop.f32.mrf.mxu1 }
  0xe7   :  { %1189 = vst.msk [vmem:[%s2622_s4 + $0x4] sm:$0xf] %vm1187_vm2, %v1391_v59  ;;  %1221 = vst.msk [vmem:[%s2622_s4 + $0x84] sm:$0xf] %vm1187_vm2, %v1423_v7  ;;  %v440_v46 = vadd.f32 %v2124_v37, %v439_v60  ;;  %v568_v47 = vadd.f32 %v2124_v37, %v567_v38  ;;  %v1394_v42 = vpack.c.bf16 %v871_v39, %v871_v39  ;;  %v2623_v53 = vunpack.c.h.bf16 %v1979_v45 }
  0xe8   :  { %1194 = vst.msk [vmem:[%s2622_s4 + $0x18] sm:$0xf] %vm1187_vm2, %v1396_v51  ;;  %1226 = vst.msk [vmem:[%s2622_s4 + $0x98] sm:$0xf] %vm1187_vm2, %v1428_v61  ;;  %v1426_v63 = vpack.c.bf16 %v903_v52, %v903_v52  ;;  %v461_v43 = vadd.f32 %v1670_v32, %v2124_v37  ;;  %v589_v0 = vadd.f32 %v1702_v19, %v2124_v37  ;;  %v874_v14 = vmax.f32 %v810_v2, 0.0  ;;  %v452_v21 = vpop.f32.mrf.mxu0  ;;  %v580_v23 = vpop.f32.mrf.mxu1 }
  0xe9   :  { %v906_v40 = vmax.f32 %v842_v6, 0.0  ;;  %v808_v41 = vadd.f32 %v1465_v1, %v440_v46  ;;  %v840_v54 = vadd.f32 %v2623_v53, %v568_v47  ;;  %1192 = vst.msk [vmem:[%s2622_s4 + $0x10] sm:$0xf] %vm1187_vm2, %v1394_v42  ;;  %v2624_v26 = vunpack.c.l.bf16 %v1988_v50 }
  0xea   :  { %1224 = vst.msk [vmem:[%s2622_s4 + $0x90] sm:$0xf] %vm1187_vm2, %v1426_v63  ;;  %v845_v1 = vadd.f32 %v2625_v44, %v589_v0  ;;  %v453_v45 = vadd.f32 %v2124_v37, %v452_v21  ;;  %v581_v12 = vadd.f32 %v2124_v37, %v580_v23  ;;  %v1397_v48 = vpack.c.bf16 %v874_v14, %v874_v14  ;;  %v1671_v59 = vpop.f32.mrf.mxu0  ;;  %v1703_v7 = vpop.f32.mrf.mxu1 }
  0xeb   :  { %v813_v25 = vadd.f32 %v2624_v26, %v461_v43  ;;  %v1429_v49 = vpack.c.bf16 %v906_v40, %v906_v40  ;;  %v872_v8 = vmax.f32 %v808_v41, 0.0  ;;  %v904_v58 = vmax.f32 %v840_v54, 0.0 }
  0xec   :  { %v909_v11 = vmax.f32 %v845_v1, 0.0  ;;  %v2626_v60 = vunpack.c.l.bf16 %v2002_v56  ;;  %v2627_v51 = vunpack.c.l.bf16 %v2007_v57  ;;  %1195 = vst.msk [vmem:[%s2622_s4 + $0x1c] sm:$0xf] %vm1187_vm2, %v1397_v48  ;;  %v464_v2 = vadd.f32 %v1671_v59, %v2124_v37  ;;  %v455_v46 = vpop.f32.mrf.mxu0  ;;  %v583_v47 = vpop.f32.mrf.mxu1 }
  0xed   :  { %v877_v9 = vmax.f32 %v813_v25, 0.0  ;;  %1227 = vst.msk [vmem:[%s2622_s4 + $0x9c] sm:$0xf] %vm1187_vm2, %v1429_v49  ;;  %v1395_v39 = vpack.c.bf16 %v872_v8, %v872_v8  ;;  %v1427_v52 = vpack.c.bf16 %v904_v58, %v904_v58  ;;  %v592_v6 = vadd.f32 %v1703_v7, %v2124_v37 }
  0xee   :  { %v811_v38 = vadd.f32 %v2626_v60, %v453_v45  ;;  %v843_v61 = vadd.f32 %v2627_v51, %v581_v12  ;;  %v1432_v19 = vpack.c.bf16 %v909_v11, %v909_v11  ;;  %v2628_v43 = vunpack.c.h.bf16 %v1988_v50  ;;  %v1674_v54 = vpop.f32.mrf.mxu0  ;;  %v1706_v21 = vpop.f32.mrf.mxu1 }
  0xef   :  { %v1400_v32 = vpack.c.bf16 %v877_v9, %v877_v9  ;;  %1193 = vst.msk [vmem:[%s2622_s4 + $0x14] sm:$0xf] %vm1187_vm2, %v1395_v39  ;;  %1225 = vst.msk [vmem:[%s2622_s4 + $0x94] sm:$0xf] %vm1187_vm2, %v1427_v52  ;;  %v2629_v14 = vunpack.c.h.bf16 %v1997_v55  ;;  %v456_v41 = vadd.f32 %v2124_v37, %v455_v46  ;;  %v584_v53 = vadd.f32 %v2124_v37, %v583_v47 }
  0xf0   :  { %v875_v42 = vmax.f32 %v811_v38, 0.0  ;;  %v907_v63 = vmax.f32 %v843_v61, 0.0  ;;  %v814_v0 = vadd.f32 %v2628_v43, %v464_v2  ;;  %1230 = vst.msk [vmem:[%s2622_s4 + $0xa8] sm:$0xf] %vm1187_vm2, %v1432_v19  ;;  %v477_v55 = vadd.f32 %v1674_v54, %v2124_v37  ;;  %v468_v49 = vpop.f32.mrf.mxu0  ;;  %v596_v8 = vpop.f32.mrf.mxu1 }
  0xf1   :  { %v846_v40 = vadd.f32 %v2629_v14, %v592_v6  ;;  %1198 = vst.msk [vmem:[%s2622_s4 + $0x28] sm:$0xf] %vm1187_vm2, %v1400_v32  ;;  %v605_v26 = vadd.f32 %v1706_v21, %v2124_v37  ;;  %v2630_v1 = vunpack.c.h.bf16 %v2002_v56  ;;  %v2631_v12 = vunpack.c.h.bf16 %v2007_v57 }
  0xf2   :  { %v1398_v50 = vpack.c.bf16 %v875_v42, %v875_v42  ;;  %v1430_v23 = vpack.c.bf16 %v907_v63, %v907_v63  ;;  %v878_v25 = vmax.f32 %v814_v0, 0.0  ;;  %v2632_v58 = vunpack.c.l.bf16 %v2016_v62  ;;  %v1675_v61 = vpop.f32.mrf.mxu0  ;;  %v1707_v39 = vpop.f32.mrf.mxu1 }
  0xf3   :  { %v910_v44 = vmax.f32 %v846_v40, 0.0  ;;  %v812_v45 = vadd.f32 %v2630_v1, %v456_v41  ;;  %v844_v48 = vadd.f32 %v2631_v12, %v584_v53  ;;  %v2633_v56 = vunpack.c.l.bf16 %v2025_v3 }
  0xf4   :  { %1196 = vst.msk [vmem:[%s2622_s4 + $0x20] sm:$0xf] %vm1187_vm2, %v1398_v50  ;;  %1228 = vst.msk [vmem:[%s2622_s4 + $0xa0] sm:$0xf] %vm1187_vm2, %v1430_v23  ;;  %v817_v59 = vadd.f32 %v2632_v58, %v477_v55  ;;  %v469_v57 = vadd.f32 %v2124_v37, %v468_v49  ;;  %v597_v9 = vadd.f32 %v2124_v37, %v596_v8  ;;  %v2634_v6 = vunpack.c.l.bf16 %v2030_v4  ;;  %v471_v0 = vpop.f32.mrf.mxu0  ;;  %v599_v14 = vpop.f32.mrf.mxu1 }
  0xf5   :  { %v849_v7 = vadd.f32 %v2633_v56, %v605_v26  ;;  %v1401_v11 = vpack.c.bf16 %v878_v25, %v878_v25  ;;  %v1433_v60 = vpack.c.bf16 %v910_v44, %v910_v44  ;;  %v876_v38 = vmax.f32 %v812_v45, 0.0 }
  0xf6   :  { %v908_v51 = vmax.f32 %v844_v48, 0.0  ;;  %v881_v52 = vmax.f32 %v817_v59, 0.0  ;;  %v815_v46 = vadd.f32 %v2634_v6, %v469_v57  ;;  %v2635_v47 = vunpack.c.l.bf16 %v2035_v5  ;;  %v1678_v44 = vpop.f32.mrf.mxu0  ;;  %v1710_v1 = vpop.f32.mrf.mxu1 }
  0xf7   :  { %v913_v2 = vmax.f32 %v849_v7, 0.0  ;;  %1199 = vst.msk [vmem:[%s2622_s4 + $0x2c] sm:$0xf] %vm1187_vm2, %v1401_v11  ;;  %1231 = vst.msk [vmem:[%s2622_s4 + $0xac] sm:$0xf] %vm1187_vm2, %v1433_v60  ;;  %v1399_v19 = vpack.c.bf16 %v876_v38, %v876_v38  ;;  %v480_v63 = vadd.f32 %v1675_v61, %v2124_v37  ;;  %v608_v43 = vadd.f32 %v1707_v39, %v2124_v37 }
  0xf8   :  { %v847_v32 = vadd.f32 %v2635_v47, %v597_v9  ;;  %v1431_v42 = vpack.c.bf16 %v908_v51, %v908_v51  ;;  %v1404_v40 = vpack.c.bf16 %v881_v52, %v881_v52  ;;  %v879_v53 = vmax.f32 %v815_v46, 0.0  ;;  %v484_v7 = vpop.f32.mrf.mxu0  ;;  %v612_v57 = vpop.f32.mrf.mxu1 }
  0xf9   :  { %v1436_v41 = vpack.c.bf16 %v913_v2, %v913_v2  ;;  %1197 = vst.msk [vmem:[%s2622_s4 + $0x24] sm:$0xf] %vm1187_vm2, %v1399_v19  ;;  %v2636_v21 = vunpack.c.h.bf16 %v2016_v62  ;;  %v2637_v23 = vunpack.c.h.bf16 %v2025_v3  ;;  %v472_v26 = vadd.f32 %v2124_v37, %v471_v0 }
  0xfa   :  { %v911_v54 = vmax.f32 %v847_v32, 0.0  ;;  %1229 = vst.msk [vmem:[%s2622_s4 + $0xa4] sm:$0xf] %vm1187_vm2, %v1431_v42  ;;  %v600_v25 = vadd.f32 %v2124_v37, %v599_v14  ;;  %1202 = vst.msk [vmem:[%s2622_s4 + $0x38] sm:$0xf] %vm1187_vm2, %v1404_v40  ;;  %v1402_v62 = vpack.c.bf16 %v879_v53, %v879_v53  ;;  %v493_v3 = vadd.f32 %v1678_v44, %v2124_v37  ;;  %v1679_v2 = vpop.f32.mrf.mxu0  ;;  %v1711_v6 = vpop.f32.mrf.mxu1 }
  0xfb   :  { %v818_v50 = vadd.f32 %v2636_v21, %v480_v63  ;;  %v850_v55 = vadd.f32 %v2637_v23, %v608_v43  ;;  %1234 = vst.msk [vmem:[%s2622_s4 + $0xb8] sm:$0xf] %vm1187_vm2, %v1436_v41  ;;  %v621_v12 = vadd.f32 %v1710_v1, %v2124_v37  ;;  %v2638_v8 = vunpack.c.h.bf16 %v2030_v4 }
  0xfc   :  { %v1434_v45 = vpack.c.bf16 %v911_v54, %v911_v54  ;;  %v2639_v59 = vunpack.c.h.bf16 %v2035_v5  ;;  %1200 = vst.msk [vmem:[%s2622_s4 + $0x30] sm:$0xf] %vm1187_vm2, %v1402_v62  ;;  %v2640_v9 = vunpack.c.l.bf16 %v2044_v10  ;;  %v2641_v4 = vunpack.c.l.bf16 %v2053_v15  ;;  %v487_v41 = vpop.f32.mrf.mxu0  ;;  %v615_v53 = vpop.f32.mrf.mxu1 }
  0xfd   :  { %v882_v48 = vmax.f32 %v818_v50, 0.0  ;;  %v914_v49 = vmax.f32 %v850_v55, 0.0  ;;  %v816_v58 = vadd.f32 %v2638_v8, %v472_v26  ;;  %v485_v5 = vadd.f32 %v2124_v37, %v484_v7 }
  0xfe   :  { %v848_v56 = vadd.f32 %v2639_v59, %v600_v25  ;;  %1232 = vst.msk [vmem:[%s2622_s4 + $0xb0] sm:$0xf] %vm1187_vm2, %v1434_v45  ;;  %v821_v11 = vadd.f32 %v2640_v9, %v493_v3  ;;  %v853_v60 = vadd.f32 %v2641_v4, %v621_v12  ;;  %v613_v38 = vadd.f32 %v2124_v37, %v612_v57  ;;  %v1682_v45 = vpop.f32.mrf.mxu0  ;;  %v1714_v3 = vpop.f32.mrf.mxu1 }
  0xff   :  { %v1405_v51 = vpack.c.bf16 %v882_v48, %v882_v48  ;;  %v1437_v61 = vpack.c.bf16 %v914_v49, %v914_v49  ;;  %v880_v39 = vmax.f32 %v816_v58, 0.0  ;;  %v2642_v32 = vunpack.c.l.bf16 %v2058_v16 }
 0x100   :  { %v912_v52 = vmax.f32 %v848_v56, 0.0  ;;  %v885_v46 = vmax.f32 %v821_v11, 0.0  ;;  %v917_v47 = vmax.f32 %v853_v60, 0.0  ;;  %v2643_v42 = vunpack.c.l.bf16 %v2063_v17  ;;  %v500_v57 = vpop.f32.mrf.mxu0  ;;  %v628_v9 = vpop.f32.mrf.mxu1 }
 0x101   :  { %v819_v19 = vadd.f32 %v2642_v32, %v485_v5  ;;  %1203 = vst.msk [vmem:[%s2622_s4 + $0x3c] sm:$0xf] %vm1187_vm2, %v1405_v51  ;;  %1235 = vst.msk [vmem:[%s2622_s4 + $0xbc] sm:$0xf] %vm1187_vm2, %v1437_v61  ;;  %v1403_v43 = vpack.c.bf16 %v880_v39, %v880_v39  ;;  %v496_v14 = vadd.f32 %v1679_v2, %v2124_v37  ;;  %v2644_v55 = vunpack.c.h.bf16 %v2044_v10 }
 0x102   :  { %v851_v63 = vadd.f32 %v2643_v42, %v613_v38  ;;  %v1435_v0 = vpack.c.bf16 %v912_v52, %v912_v52  ;;  %v624_v40 = vadd.f32 %v1711_v6, %v2124_v37  ;;  %v1408_v54 = vpack.c.bf16 %v885_v46, %v885_v46  ;;  %v1683_v52 = vpop.f32.mrf.mxu0  ;;  %v1715_v2 = vpop.f32.mrf.mxu1 }
 0x103   :  { %v1440_v21 = vpack.c.bf16 %v917_v47, %v917_v47  ;;  %v883_v50 = vmax.f32 %v819_v19, 0.0  ;;  %1201 = vst.msk [vmem:[%s2622_s4 + $0x34] sm:$0xf] %vm1187_vm2, %v1403_v43  ;;  %v822_v26 = vadd.f32 %v2644_v55, %v496_v14  ;;  %v2645_v25 = vunpack.c.h.bf16 %v2053_v15 }
 0x104   :  { %v915_v23 = vmax.f32 %v851_v63, 0.0  ;;  %1233 = vst.msk [vmem:[%s2622_s4 + $0xb4] sm:$0xf] %vm1187_vm2, %v1435_v0  ;;  %v488_v1 = vadd.f32 %v2124_v37, %v487_v41  ;;  %v616_v62 = vadd.f32 %v2124_v37, %v615_v53  ;;  %1206 = vst.msk [vmem:[%s2622_s4 + $0x48] sm:$0xf] %vm1187_vm2, %v1408_v54  ;;  %v509_v15 = vadd.f32 %v1682_v45, %v2124_v37  ;;  %v631_v41 = vpop.f32.mrf.mxu1 }
 0x105   :  { %v854_v44 = vadd.f32 %v2645_v25, %v624_v40  ;;  %1238 = vst.msk [vmem:[%s2622_s4 + $0xc8] sm:$0xf] %vm1187_vm2, %v1440_v21  ;;  %v1406_v10 = vpack.c.bf16 %v883_v50, %v883_v50  ;;  %v637_v48 = vadd.f32 %v1714_v3, %v2124_v37  ;;  %v886_v49 = vmax.f32 %v822_v26, 0.0  ;;  %v503_v40 = vpop.f32.mrf.mxu0 }
 0x106   :  { %v1438_v12 = vpack.c.bf16 %v915_v23, %v915_v23  ;;  %v2646_v58 = vunpack.c.h.bf16 %v2058_v16  ;;  %v2647_v56 = vunpack.c.h.bf16 %v2063_v17  ;;  %v2648_v11 = vunpack.c.l.bf16 %v2072_v22  ;;  %v1718_v45 = vpop.f32.mrf.mxu1 }
 0x107   :  { %v918_v8 = vmax.f32 %v854_v44, 0.0  ;;  %1204 = vst.msk [vmem:[%s2622_s4 + $0x40] sm:$0xf] %vm1187_vm2, %v1406_v10  ;;  %v2649_v16 = vunpack.c.l.bf16 %v2081_v27  ;;  %v501_v17 = vadd.f32 %v2124_v37, %v500_v57  ;;  %v629_v5 = vadd.f32 %v2124_v37, %v628_v9 }
 0x108   :  { %v820_v59 = vadd.f32 %v2646_v58, %v488_v1  ;;  %v852_v7 = vadd.f32 %v2647_v56, %v616_v62  ;;  %1236 = vst.msk [vmem:[%s2622_s4 + $0xc0] sm:$0xf] %vm1187_vm2, %v1438_v12  ;;  %v825_v4 = vadd.f32 %v2648_v11, %v509_v15  ;;  %v1409_v38 = vpack.c.bf16 %v886_v49, %v886_v49  ;;  %v1686_v62 = vpop.f32.mrf.mxu0  ;;  %v644_v56 = vpop.f32.mrf.mxu1 }
 0x109   :  { %v857_v60 = vadd.f32 %v2649_v16, %v637_v48  ;;  %v1441_v51 = vpack.c.bf16 %v918_v8, %v918_v8  ;;  %v2650_v47 = vunpack.c.l.bf16 %v2086_v28  ;;  %v2651_v19 = vunpack.c.l.bf16 %v2091_v29 }
 0x10a   :  { %v884_v61 = vmax.f32 %v820_v59, 0.0  ;;  %v916_v39 = vmax.f32 %v852_v7, 0.0  ;;  %v889_v6 = vmax.f32 %v825_v4, 0.0  ;;  %1207 = vst.msk [vmem:[%s2622_s4 + $0x4c] sm:$0xf] %vm1187_vm2, %v1409_v38  ;;  %v512_v0 = vadd.f32 %v1683_v52, %v2124_v37  ;;  %v516_v59 = vpop.f32.mrf.mxu0  ;;  %v1719_v38 = vpop.f32.mrf.mxu1 }
 0x10b   :  { %v921_v46 = vmax.f32 %v857_v60, 0.0  ;;  %v823_v32 = vadd.f32 %v2650_v47, %v501_v17  ;;  %v855_v42 = vadd.f32 %v2651_v19, %v629_v5  ;;  %1239 = vst.msk [vmem:[%s2622_s4 + $0xcc] sm:$0xf] %vm1187_vm2, %v1441_v51  ;;  %v640_v14 = vadd.f32 %v1715_v2, %v2124_v37 }
 0x10c   :  { %v1407_v63 = vpack.c.bf16 %v884_v61, %v884_v61  ;;  %v1439_v43 = vpack.c.bf16 %v916_v39, %v916_v39  ;;  %v1412_v53 = vpack.c.bf16 %v889_v6, %v889_v6  ;;  %v2652_v23 = vunpack.c.h.bf16 %v2072_v22  ;;  %v1687_v5 = vpop.f32.mrf.mxu0 }
 0x10d   :  { %v1444_v54 = vpack.c.bf16 %v921_v46, %v921_v46  ;;  %v887_v21 = vmax.f32 %v823_v32, 0.0  ;;  %v919_v50 = vmax.f32 %v855_v42, 0.0  ;;  %v2653_v26 = vunpack.c.h.bf16 %v2081_v27 }
 0x10e   :  { %1205 = vst.msk [vmem:[%s2622_s4 + $0x44] sm:$0xf] %vm1187_vm2, %v1407_v63  ;;  %1237 = vst.msk [vmem:[%s2622_s4 + $0xc4] sm:$0xf] %vm1187_vm2, %v1439_v43  ;;  %v826_v55 = vadd.f32 %v2652_v23, %v512_v0  ;;  %v504_v44 = vadd.f32 %v2124_v37, %v503_v40  ;;  %v632_v1 = vadd.f32 %v2124_v37, %v631_v41  ;;  %v2654_v48 = vunpack.c.h.bf16 %v2086_v28  ;;  %v519_v42 = vpop.f32.mrf.mxu0  ;;  %v647_v63 = vpop.f32.mrf.mxu1 }
 0x10f   :  { %v858_v25 = vadd.f32 %v2653_v26, %v640_v14  ;;  %1210 = vst.msk [vmem:[%s2622_s4 + $0x58] sm:$0xf] %vm1187_vm2, %v1412_v53  ;;  %1242 = vst.msk [vmem:[%s2622_s4 + $0xd8] sm:$0xf] %vm1187_vm2, %v1444_v54  ;;  %v1410_v22 = vpack.c.bf16 %v887_v21, %v887_v21  ;;  %v1442_v3 = vpack.c.bf16 %v919_v50, %v919_v50  ;;  %v2655_v8 = vunpack.c.h.bf16 %v2091_v29 }
 0x110   :  { %v525_v27 = vadd.f32 %v1686_v62, %v2124_v37  ;;  %v653_v10 = vadd.f32 %v1718_v45, %v2124_v37  ;;  %v890_v12 = vmax.f32 %v826_v55, 0.0  ;;  %v824_v49 = vadd.f32 %v2654_v48, %v504_v44  ;;  %v1690_v55 = vpop.f32.mrf.mxu0  ;;  %v1722_v26 = vpop.f32.mrf.mxu1 }
 0x111   :  { %v922_v15 = vmax.f32 %v858_v25, 0.0  ;;  %v856_v58 = vadd.f32 %v2655_v8, %v632_v1  ;;  %1208 = vst.msk [vmem:[%s2622_s4 + $0x50] sm:$0xf] %vm1187_vm2, %v1410_v22  ;;  %1240 = vst.msk [vmem:[%s2622_s4 + $0xd0] sm:$0xf] %vm1187_vm2, %v1442_v3  ;;  %v2656_v7 = vunpack.c.l.bf16 %v2100_v34  ;;  %v2657_v28 = vunpack.c.l.bf16 %v2109_v31 }
 0x112   :  { %v517_v29 = vadd.f32 %v2124_v37, %v516_v59  ;;  %v645_v11 = vadd.f32 %v2124_v37, %v644_v56  ;;  %v1413_v4 = vpack.c.bf16 %v890_v12, %v890_v12  ;;  %v888_v60 = vmax.f32 %v824_v49, 0.0  ;;  %v660_v12 = vpop.f32.mrf.mxu1 }
 0x113   :  { %v829_v57 = vadd.f32 %v2656_v7, %v525_v27  ;;  %v861_v9 = vadd.f32 %v2657_v28, %v653_v10  ;;  %v1445_v16 = vpack.c.bf16 %v922_v15, %v922_v15  ;;  %v920_v17 = vmax.f32 %v856_v58, 0.0  ;;  %v532_v10 = vpop.f32.mrf.mxu0 }
 0x114   :  { %v2658_v39 = vunpack.c.l.bf16 %v2114_v33  ;;  %v2659_v2 = vunpack.c.l.bf16 %v2119_v35  ;;  %1211 = vst.msk [vmem:[%s2622_s4 + $0x5c] sm:$0xf] %vm1187_vm2, %v1413_v4  ;;  %v1411_v46 = vpack.c.bf16 %v888_v60, %v888_v60  ;;  %v528_v32 = vadd.f32 %v1687_v5, %v2124_v37  ;;  %v1723_v28 = vpop.f32.mrf.mxu1 }
 0x115   :  { %v893_v51 = vmax.f32 %v829_v57, 0.0  ;;  %v925_v61 = vmax.f32 %v861_v9, 0.0  ;;  %1243 = vst.msk [vmem:[%s2622_s4 + $0xdc] sm:$0xf] %vm1187_vm2, %v1445_v16  ;;  %v1443_v47 = vpack.c.bf16 %v920_v17, %v920_v17  ;;  %v656_v19 = vadd.f32 %v1719_v38, %v2124_v37  ;;  %v1691_v57 = vpop.f32.mrf.mxu0 }
 0x116   :  { %v827_v52 = vadd.f32 %v2658_v39, %v517_v29  ;;  %v859_v6 = vadd.f32 %v2659_v2, %v645_v11  ;;  %1209 = vst.msk [vmem:[%s2622_s4 + $0x54] sm:$0xf] %vm1187_vm2, %v1411_v46  ;;  %v2660_v41 = vunpack.c.h.bf16 %v2100_v34  ;;  %v2661_v54 = vunpack.c.h.bf16 %v2109_v31  ;;  %v663_v39 = vpop.f32.mrf.mxu1 }
 0x117   :  { %v1416_v43 = vpack.c.bf16 %v893_v51, %v893_v51  ;;  %v1448_v0 = vpack.c.bf16 %v925_v61, %v925_v61  ;;  %1241 = vst.msk [vmem:[%s2622_s4 + $0xd4] sm:$0xf] %vm1187_vm2, %v1443_v47  ;;  %v520_v50 = vadd.f32 %v2124_v37, %v519_v42  ;;  %v648_v23 = vadd.f32 %v2124_v37, %v647_v63  ;;  %v535_v61 = vpop.f32.mrf.mxu0 }
 0x118   :  { %v891_v14 = vmax.f32 %v827_v52, 0.0  ;;  %v923_v40 = vmax.f32 %v859_v6, 0.0  ;;  %v830_v53 = vadd.f32 %v2660_v41, %v528_v32  ;;  %v862_v21 = vadd.f32 %v2661_v54, %v656_v19 }
 0x119   :  { %1214 = vst.msk [vmem:[%s2622_s4 + $0x68] sm:$0xf] %vm1187_vm2, %v1416_v43  ;;  %1246 = vst.msk [vmem:[%s2622_s4 + $0xe8] sm:$0xf] %vm1187_vm2, %v1448_v0  ;;  %v541_v31 = vadd.f32 %v1690_v55, %v2124_v37  ;;  %v669_v44 = vadd.f32 %v1722_v26, %v2124_v37  ;;  %v2662_v45 = vunpack.c.h.bf16 %v2114_v33  ;;  %v2663_v3 = vunpack.c.h.bf16 %v2119_v35 }
 0x11a   :  { %v1414_v34 = vpack.c.bf16 %v891_v14, %v891_v14  ;;  %v1446_v25 = vpack.c.bf16 %v923_v40, %v923_v40  ;;  %v894_v1 = vmax.f32 %v830_v53, 0.0  ;;  %v926_v62 = vmax.f32 %v862_v21, 0.0 }
 0x11b   :  { %v828_v22 = vadd.f32 %v2662_v45, %v520_v50  ;;  %v860_v27 = vadd.f32 %v2663_v3, %v648_v23  ;;  %v2664_v15 = vunpack.c.l.bf16 %v2137_v20  ;;  %v2665_v33 = vunpack.c.l.bf16 %v2142_v36 }
 0x11c   :  { %1212 = vst.msk [vmem:[%s2622_s4 + $0x60] sm:$0xf] %vm1187_vm2, %v1414_v34  ;;  %1244 = vst.msk [vmem:[%s2622_s4 + $0xe0] sm:$0xf] %vm1187_vm2, %v1446_v25  ;;  %v533_v35 = vadd.f32 %v2124_v37, %v532_v10  ;;  %v661_v8 = vadd.f32 %v2124_v37, %v660_v12  ;;  %v1417_v58 = vpack.c.bf16 %v894_v1, %v894_v1  ;;  %v2666_v11 = vunpack.c.l.bf16 %v2155_v13 }
 0x11d   :  { %v833_v48 = vadd.f32 %v2664_v15, %v541_v31  ;;  %v865_v49 = vadd.f32 %v2665_v33, %v669_v44  ;;  %v1449_v59 = vpack.c.bf16 %v926_v62, %v926_v62  ;;  %v892_v56 = vmax.f32 %v828_v22, 0.0 }
 0x11e   :  { %v924_v7 = vmax.f32 %v860_v27, 0.0  ;;  %v831_v4 = vadd.f32 %v2666_v11, %v533_v35  ;;  %v2667_v16 = vunpack.c.l.bf16 %v2160_v24  ;;  %1215 = vst.msk [vmem:[%s2622_s4 + $0x6c] sm:$0xf] %vm1187_vm2, %v1417_v58  ;;  %v544_v38 = vadd.f32 %v1691_v57, %v2124_v37 }
 0x11f   :  { %v897_v9 = vmax.f32 %v833_v48, 0.0  ;;  %v929_v29 = vmax.f32 %v865_v49, 0.0  ;;  %1247 = vst.msk [vmem:[%s2622_s4 + $0xec] sm:$0xf] %vm1187_vm2, %v1449_v59  ;;  %v1415_v17 = vpack.c.bf16 %v892_v56, %v892_v56  ;;  %v672_v51 = vadd.f32 %v1723_v28, %v2124_v37 }
 0x120   :  { %v863_v60 = vadd.f32 %v2667_v16, %v661_v8  ;;  %v1447_v5 = vpack.c.bf16 %v924_v7, %v924_v7  ;;  %v895_v6 = vmax.f32 %v831_v4, 0.0  ;;  %v2668_v47 = vunpack.c.h.bf16 %v2137_v20 }
 0x121   :  { %v1420_v52 = vpack.c.bf16 %v897_v9, %v897_v9  ;;  %v1452_v2 = vpack.c.bf16 %v929_v29, %v929_v29  ;;  %1213 = vst.msk [vmem:[%s2622_s4 + $0x64] sm:$0xf] %vm1187_vm2, %v1415_v17  ;;  %v2669_v19 = vunpack.c.h.bf16 %v2142_v36  ;;  %v536_v63 = vadd.f32 %v2124_v37, %v535_v61 }
 0x122   :  { %v927_v46 = vmax.f32 %v863_v60, 0.0  ;;  %1245 = vst.msk [vmem:[%s2622_s4 + $0xe4] sm:$0xf] %vm1187_vm2, %v1447_v5  ;;  %v834_v32 = vadd.f32 %v2668_v47, %v544_v38  ;;  %v664_v43 = vadd.f32 %v2124_v37, %v663_v39  ;;  %v1418_v0 = vpack.c.bf16 %v895_v6, %v895_v6 }
 0x123   :  { %v866_v42 = vadd.f32 %v2669_v19, %v672_v51  ;;  %1218 = vst.msk [vmem:[%s2622_s4 + $0x78] sm:$0xf] %vm1187_vm2, %v1420_v52  ;;  %1250 = vst.msk [vmem:[%s2622_s4 + $0xf8] sm:$0xf] %vm1187_vm2, %v1452_v2  ;;  %v832_v36 = vadd.f32 %v1513_v30, %v536_v63 }
 0x124   :  { %v1450_v20 = vpack.c.bf16 %v927_v46, %v927_v46  ;;  %v898_v14 = vmax.f32 %v834_v32, 0.0  ;;  %v864_v37 = vadd.f32 %v1577_v18, %v664_v43  ;;  %1216 = vst.msk [vmem:[%s2622_s4 + $0x70] sm:$0xf] %vm1187_vm2, %v1418_v0 }
 0x125   :  { %v930_v40 = vmax.f32 %v866_v42, 0.0  ;;  %v896_v54 = vmax.f32 %v832_v36, 0.0 }
 0x126   :  { %1248 = vst.msk [vmem:[%s2622_s4 + $0xf0] sm:$0xf] %vm1187_vm2, %v1450_v20  ;;  %v1421_v41 = vpack.c.bf16 %v898_v14, %v898_v14  ;;  %v928_v21 = vmax.f32 %v864_v37, 0.0 }
 0x127   :  { %v1453_v53 = vpack.c.bf16 %v930_v40, %v930_v40  ;;  %v1419_v13 = vpack.c.bf16 %v896_v54, %v896_v54 }
 0x128   :  { %1219 = vst.msk [vmem:[%s2622_s4 + $0x7c] sm:$0xf] %vm1187_vm2, %v1421_v41  ;;  %v1451_v18 = vpack.c.bf16 %v928_v21, %v928_v21 }
 0x129   :  { %1251 = vst.msk [vmem:[%s2622_s4 + $0xfc] sm:$0xf] %vm1187_vm2, %v1453_v53  ;;  %1217 = vst.msk [vmem:[%s2622_s4 + $0x74] sm:$0xf] %vm1187_vm2, %v1419_v13 }
 0x12a   :  { %1249 = vst.msk [vmem:[%s2622_s4 + $0xf4] sm:$0xf] %vm1187_vm2, %v1451_v18 }

// kernel: _lambda_.26
= control target key start
LH: loop header
LB: loop body
LE: loop exit
PB: predicated region body
PF: predicated region fallthrough
CT: control target
= control target key end

     0   :  { %vm139_vm0 = vcmask 1043456   ;;  %vm114_vm1 = vcmask 588800   ;;  %vm320_vm2 = vcmask 60416   ;;  %s611_s1 = inlined_call_operand.vmem [shape: bf16[72,8], index: 1, kind: input, shape index: {}]   ;;  %s612_s0 = inlined_call_operand.vmem [shape: bf16[128,72], index: 0, kind: input, shape index: {}]   ;;  %s613_s2 = inlined_call_operand.vmem [shape: f32[1,8], index: 2, kind: input, shape index: {}]   ;;  %s614_s3 = inlined_call_operand.vmem [shape: bf16[128,8], index: 3, kind: output, shape index: {}]  }
   0x1   :  { %v446_v0 = vld [vmem:[%s611_s1 + $0x20] ss:$0 sps:$4 sm:$0xff]   ;;  %v447_v1 = vld [vmem:[%s611_s1 + $0x18] sm:$0xff]   ;;  %v448_v3 = vld [vmem:[%s611_s1 + $0x10] sm:$0xff]  }
   0x2   :  { %444 = vmatprep.subr.msk.bf16.mxu0 %vm139_vm0, %v446_v0  ;;  %445 = vmatprep.subr.msk.bf16.mxu1 %vm139_vm0, %v446_v0  ;;  %v141_v2 = vsel %vm139_vm0, %v446_v0, 0  ;;  %v451_v4 = vld [vmem:[%s612_s0] sm:$0xff]   ;;  %v449_v6 = vld [vmem:[%s611_s1 + $0x8] sm:$0xff]   ;;  %v455_v10 = vld [vmem:[%s612_s0 + $0x10] sm:$0xff]  }
   0x3   :  { %409 = vmatpush3.bf16.msra.mxu0 %v141_v2  ;;  %439 = vmatpush3.bf16.msra.mxu1 %v141_v2  ;;  %v452_v5 = vld [vmem:[%s612_s0 + $0x20] sm:$0xff]   ;;  %v453_v8 = vld [vmem:[%s612_s0 + $0x8] sm:$0xff]   ;;  %v456_v11 = vld [vmem:[%s612_s0 + $0x30] sm:$0xff]  }
   0x4   :  { %410 = vmatprep.subr.bf16.mxu0 %v447_v1  ;;  %435 = vmatprep.subr.bf16.mxu1 %v447_v1  ;;  %v450_v7 = vld [vmem:[%s611_s1] sm:$0xff]   ;;  %v454_v9 = vld [vmem:[%s612_s0 + $0x28] sm:$0xff]   ;;  %v457_v12 = vld [vmem:[%s612_s0 + $0x18] sm:$0xff]  }
   0x5   :  { %418 = vmatprep.mubr.msk.bf16.mxu0 %vm114_vm1, %v451_v4  ;;  %426 = vmatprep.mubr.msk.bf16.mxu1 %vm114_vm1, %v452_v5  ;;  %v458_v13 = vld [vmem:[%s612_s0 + $0x38] sm:$0xff]   ;;  %v529_v14 = vld [vmem:[%s613_s2] ss:$0 sm:$0xff] }
   0x7   :  { %411 = vmatpush3.bf16.msra.mxu0 %v447_v1  ;;  %440 = vmatpush3.bf16.msra.mxu1 %v447_v1 }
   0x8   :  { %412 = vmatprep.subr.bf16.mxu0 %v448_v3  ;;  %436 = vmatprep.subr.bf16.mxu1 %v448_v3 }
   0xb   :  { %413 = vmatpush3.bf16.msra.mxu0 %v448_v3  ;;  %441 = vmatpush3.bf16.msra.mxu1 %v448_v3 }
   0xc   :  { %414 = vmatprep.subr.bf16.mxu0 %v449_v6  ;;  %437 = vmatprep.subr.bf16.mxu1 %v449_v6 }
   0xf   :  { %415 = vmatpush3.bf16.msra.mxu0 %v449_v6  ;;  %442 = vmatpush3.bf16.msra.mxu1 %v449_v6 }
  0x10   :  { %416 = vmatprep.subr.bf16.mxu0 %v450_v7  ;;  %438 = vmatprep.subr.bf16.mxu1 %v450_v7 }
  0x13   :  { %417 = vmatpush3.bf16.msra.mxu0 %v450_v7  ;;  %443 = vmatpush3.bf16.msra.mxu1 %v450_v7 }
  0x16   :  { %419 = vmatmul.mubr.msk.bf16.vlgmr.msra.gmra.mxu0 %vm114_vm1, %v453_v8  ;;  %427 = vmatmul.mubr.msk.bf16.vlgmr.msra.gmra.mxu1 %vm114_vm1, %v454_v9 }
  0x17   :  { %422 = vmatprep.mubr.msk.bf16.mxu0 %vm114_vm1, %v455_v10  ;;  %430 = vmatprep.mubr.msk.bf16.mxu1 %vm114_vm1, %v456_v11 }
  0x1e   :  { %423 = vmatmul.mubr.msk.bf16.gmra.mxu0 %vm114_vm1, %v457_v12  ;;  %431 = vmatmul.mubr.msk.bf16.gmra.mxu1 %vm114_vm1, %v458_v13 }
  0xd6   :  { %v420_v15 = vpop.f32.mrf.mxu0  ;;  %v428_v16 = vpop.f32.mrf.mxu1 }
  0xd7   :  { %v186_v17 = vadd.f32 %v420_v15, %v529_v14  ;;  %v218_v18 = vadd.f32 %v428_v16, %v529_v14 }
  0xd8   :  { %v177_v19 = vpop.f32.mrf.mxu0  ;;  %v209_v20 = vpop.f32.mrf.mxu1 }
  0xd9   :  { %v242_v21 = vmax.f32 %v186_v17, 0.0  ;;  %v250_v22 = vmax.f32 %v218_v18, 0.0  ;;  %v178_v23 = vadd.f32 %v529_v14, %v177_v19  ;;  %v210_v24 = vadd.f32 %v529_v14, %v209_v20 }
  0xda   :  { %v421_v25 = vpop.f32.mrf.mxu0  ;;  %v429_v26 = vpop.f32.mrf.mxu1 }
  0xdb   :  { %v381_v27 = vpack.c.bf16 %v242_v21, %v242_v21  ;;  %v389_v28 = vpack.c.bf16 %v250_v22, %v250_v22  ;;  %v240_v29 = vmax.f32 %v178_v23, 0.0  ;;  %v248_v30 = vmax.f32 %v210_v24, 0.0 }
  0xdc   :  { %v189_v31 = vadd.f32 %v421_v25, %v529_v14  ;;  %v221_v32 = vadd.f32 %v429_v26, %v529_v14  ;;  %v180_v33 = vpop.f32.mrf.mxu0  ;;  %v212_v34 = vpop.f32.mrf.mxu1 }
  0xdd   :  { %323 = vst.msk [vmem:[%s614_s3 + $0x8] sm:$0xf] %vm320_vm2, %v381_v27  ;;  %331 = vst.msk [vmem:[%s614_s3 + $0x28] sm:$0xf] %vm320_vm2, %v389_v28  ;;  %v379_v35 = vpack.c.bf16 %v240_v29, %v240_v29  ;;  %v387_v36 = vpack.c.bf16 %v248_v30, %v248_v30  ;;  %v181_v37 = vadd.f32 %v529_v14, %v180_v33 }
  0xde   :  { %v213_v38 = vadd.f32 %v529_v14, %v212_v34  ;;  %v243_v39 = vmax.f32 %v189_v31, 0.0  ;;  %v251_v40 = vmax.f32 %v221_v32, 0.0  ;;  %v424_v41 = vpop.f32.mrf.mxu0  ;;  %v432_v42 = vpop.f32.mrf.mxu1 }
  0xdf   :  { %321 = vst.msk [vmem:[%s614_s3] sm:$0xf] %vm320_vm2, %v379_v35  ;;  %329 = vst.msk [vmem:[%s614_s3 + $0x20] sm:$0xf] %vm320_vm2, %v387_v36  ;;  %v241_v43 = vmax.f32 %v181_v37, 0.0  ;;  %v202_v45 = vadd.f32 %v424_v41, %v529_v14  ;;  %v234_v46 = vadd.f32 %v432_v42, %v529_v14 }
  0xe0   :  { %v249_v44 = vmax.f32 %v213_v38, 0.0  ;;  %v382_v47 = vpack.c.bf16 %v243_v39, %v243_v39  ;;  %v390_v48 = vpack.c.bf16 %v251_v40, %v251_v40  ;;  %v193_v49 = vpop.f32.mrf.mxu0  ;;  %v225_v50 = vpop.f32.mrf.mxu1 }
  0xe1   :  { %v380_v51 = vpack.c.bf16 %v241_v43, %v241_v43  ;;  %v246_v53 = vmax.f32 %v202_v45, 0.0  ;;  %v254_v54 = vmax.f32 %v234_v46, 0.0  ;;  %v194_v55 = vadd.f32 %v529_v14, %v193_v49 }
  0xe2   :  { %v388_v52 = vpack.c.bf16 %v249_v44, %v249_v44  ;;  %324 = vst.msk [vmem:[%s614_s3 + $0xc] sm:$0xf] %vm320_vm2, %v382_v47  ;;  %332 = vst.msk [vmem:[%s614_s3 + $0x2c] sm:$0xf] %vm320_vm2, %v390_v48  ;;  %v226_v56 = vadd.f32 %v529_v14, %v225_v50  ;;  %v425_v57 = vpop.f32.mrf.mxu0  ;;  %v433_v58 = vpop.f32.mrf.mxu1 }
  0xe3   :  { %322 = vst.msk [vmem:[%s614_s3 + $0x4] sm:$0xf] %vm320_vm2, %v380_v51  ;;  %v385_v59 = vpack.c.bf16 %v246_v53, %v246_v53  ;;  %v393_v60 = vpack.c.bf16 %v254_v54, %v254_v54  ;;  %v205_v61 = vadd.f32 %v425_v57, %v529_v14  ;;  %v237_v62 = vadd.f32 %v433_v58, %v529_v14 }
  0xe4   :  { %330 = vst.msk [vmem:[%s614_s3 + $0x24] sm:$0xf] %vm320_vm2, %v388_v52  ;;  %v244_v63 = vmax.f32 %v194_v55, 0.0  ;;  %v252_v0 = vmax.f32 %v226_v56, 0.0  ;;  %v196_v1 = vpop.f32.mrf.mxu0  ;;  %v228_v2 = vpop.f32.mrf.mxu1 }
  0xe5   :  { %327 = vst.msk [vmem:[%s614_s3 + $0x18] sm:$0xf] %vm320_vm2, %v385_v59  ;;  %335 = vst.msk [vmem:[%s614_s3 + $0x38] sm:$0xf] %vm320_vm2, %v393_v60  ;;  %v247_v3 = vmax.f32 %v205_v61, 0.0  ;;  %v255_v4 = vmax.f32 %v237_v62, 0.0  ;;  %v197_v5 = vadd.f32 %v529_v14, %v196_v1  ;;  %v229_v6 = vadd.f32 %v529_v14, %v228_v2 }
  0xe6   :  { %v383_v7 = vpack.c.bf16 %v244_v63, %v244_v63  ;;  %v391_v8 = vpack.c.bf16 %v252_v0, %v252_v0 }
  0xe7   :  { %v386_v9 = vpack.c.bf16 %v247_v3, %v247_v3  ;;  %v394_v10 = vpack.c.bf16 %v255_v4, %v255_v4  ;;  %v245_v11 = vmax.f32 %v197_v5, 0.0  ;;  %v253_v12 = vmax.f32 %v229_v6, 0.0 }
  0xe8   :  { %325 = vst.msk [vmem:[%s614_s3 + $0x10] sm:$0xf] %vm320_vm2, %v383_v7  ;;  %333 = vst.msk [vmem:[%s614_s3 + $0x30] sm:$0xf] %vm320_vm2, %v391_v8 }
  0xe9   :  { %328 = vst.msk [vmem:[%s614_s3 + $0x1c] sm:$0xf] %vm320_vm2, %v386_v9  ;;  %336 = vst.msk [vmem:[%s614_s3 + $0x3c] sm:$0xf] %vm320_vm2, %v394_v10  ;;  %v384_v13 = vpack.c.bf16 %v245_v11, %v245_v11  ;;  %v392_v14 = vpack.c.bf16 %v253_v12, %v253_v12 }
  0xeb   :  { %326 = vst.msk [vmem:[%s614_s3 + $0x14] sm:$0xf] %vm320_vm2, %v384_v13  ;;  %334 = vst.msk [vmem:[%s614_s3 + $0x34] sm:$0xf] %vm320_vm2, %v392_v14 }

// kernel: _lambda_.27
= control target key start
LH: loop header
LB: loop body
LE: loop exit
PB: predicated region body
PF: predicated region fallthrough
CT: control target
= control target key end

     0   :  { %vm142_vm0 = vcmask 1043456   ;;  %vm117_vm1 = vcmask 588800   ;;  %vm371_vm2 = vcmask 60416   ;;  %s762_s1 = inlined_call_operand.vmem [shape: bf16[72,8], index: 1, kind: input, shape index: {}]   ;;  %s763_s0 = inlined_call_operand.vmem [shape: bf16[128,72], index: 0, kind: input, shape index: {}]   ;;  %s764_s3 = inlined_call_operand.vmem [shape: bf16[128,8], index: 3, kind: input, shape index: {}]   ;;  %s765_s2 = inlined_call_operand.vmem [shape: f32[1,8], index: 2, kind: input, shape index: {}]   ;;  %s766_s4 = inlined_call_operand.vmem [shape: bf16[128,8], index: 4, kind: output, shape index: {}]  }
   0x1   :  { %v536_v0 = vld [vmem:[%s762_s1 + $0x20] ss:$0 sps:$4 sm:$0xff]   ;;  %v537_v1 = vld [vmem:[%s762_s1 + $0x18] sm:$0xff]   ;;  %v538_v3 = vld [vmem:[%s762_s1 + $0x10] sm:$0xff]  }
   0x2   :  { %534 = vmatprep.subr.msk.bf16.mxu0 %vm142_vm0, %v536_v0  ;;  %535 = vmatprep.subr.msk.bf16.mxu1 %vm142_vm0, %v536_v0  ;;  %v144_v2 = vsel %vm142_vm0, %v536_v0, 0  ;;  %v541_v4 = vld [vmem:[%s763_s0] sm:$0xff]   ;;  %v539_v6 = vld [vmem:[%s762_s1 + $0x8] sm:$0xff]   ;;  %v545_v10 = vld [vmem:[%s763_s0 + $0x10] sm:$0xff]  }
   0x3   :  { %499 = vmatpush3.bf16.msra.mxu0 %v144_v2  ;;  %529 = vmatpush3.bf16.msra.mxu1 %v144_v2  ;;  %v542_v5 = vld [vmem:[%s763_s0 + $0x20] sm:$0xff]   ;;  %v543_v8 = vld [vmem:[%s763_s0 + $0x8] sm:$0xff]   ;;  %v546_v11 = vld [vmem:[%s763_s0 + $0x30] sm:$0xff]  }
   0x4   :  { %500 = vmatprep.subr.bf16.mxu0 %v537_v1  ;;  %525 = vmatprep.subr.bf16.mxu1 %v537_v1  ;;  %v540_v7 = vld [vmem:[%s762_s1] sm:$0xff]   ;;  %v544_v9 = vld [vmem:[%s763_s0 + $0x28] sm:$0xff]   ;;  %v547_v12 = vld [vmem:[%s763_s0 + $0x18] sm:$0xff]  }
   0x5   :  { %508 = vmatprep.mubr.msk.bf16.mxu0 %vm117_vm1, %v541_v4  ;;  %516 = vmatprep.mubr.msk.bf16.mxu1 %vm117_vm1, %v542_v5  ;;  %v548_v13 = vld [vmem:[%s763_s0 + $0x38] sm:$0xff]   ;;  %v478_v14 = vld [vmem:[%s764_s3 + $0x8] sm:$0xff]   ;;  %v630_v16 = vld [vmem:[%s764_s3] sm:$0xff]  }
   0x6   :  { %v482_v15 = vld [vmem:[%s764_s3 + $0x28] sm:$0xff]   ;;  %v635_v17 = vld [vmem:[%s764_s3 + $0x20] sm:$0xff]   ;;  %v452_v19 = vunpack.c.l.bf16 %v478_v14  ;;  %v645_v21 = vld [vmem:[%s764_s3 + $0x18] sm:$0xff]   ;;  %v448_v25 = vunpack.c.l.bf16 %v630_v16  ;;  %v453_v27 = vunpack.c.h.bf16 %v478_v14  ;;  %v449_v35 = vunpack.c.h.bf16 %v630_v16 }
   0x7   :  { %501 = vmatpush3.bf16.msra.mxu0 %v537_v1  ;;  %530 = vmatpush3.bf16.msra.mxu1 %v537_v1  ;;  %v640_v18 = vld [vmem:[%s765_s2] ss:$0 sm:$0xff]  ;;  %v468_v20 = vunpack.c.l.bf16 %v482_v15  ;;  %v650_v22 = vld [vmem:[%s764_s3 + $0x38] sm:$0xff]   ;;  %v464_v26 = vunpack.c.l.bf16 %v635_v17  ;;  %v469_v30 = vunpack.c.h.bf16 %v482_v15  ;;  %v659_v31 = vld [vmem:[%s764_s3 + $0x10] sm:$0xff]   ;;  %v465_v36 = vunpack.c.h.bf16 %v635_v17 }
   0x8   :  { %502 = vmatprep.subr.bf16.mxu0 %v538_v3  ;;  %526 = vmatprep.subr.bf16.mxu1 %v538_v3  ;;  %v664_v32 = vld [vmem:[%s764_s3 + $0x30] sm:$0xff]   ;;  %v460_v37 = vunpack.c.l.bf16 %v645_v21  ;;  %v476_v38 = vunpack.c.l.bf16 %v650_v22  ;;  %v456_v45 = vunpack.c.l.bf16 %v659_v31  ;;  %v461_v47 = vunpack.c.h.bf16 %v645_v21 }
   0x9   :  { %v472_v46 = vunpack.c.l.bf16 %v664_v32  ;;  %v477_v48 = vunpack.c.h.bf16 %v650_v22  ;;  %v457_v57 = vunpack.c.h.bf16 %v659_v31  ;;  %v473_v58 = vunpack.c.h.bf16 %v664_v32 }
   0xb   :  { %503 = vmatpush3.bf16.msra.mxu0 %v538_v3  ;;  %531 = vmatpush3.bf16.msra.mxu1 %v538_v3 }
   0xc   :  { %504 = vmatprep.subr.bf16.mxu0 %v539_v6  ;;  %527 = vmatprep.subr.bf16.mxu1 %v539_v6 }
   0xf   :  { %505 = vmatpush3.bf16.msra.mxu0 %v539_v6  ;;  %532 = vmatpush3.bf16.msra.mxu1 %v539_v6 }
  0x10   :  { %506 = vmatprep.subr.bf16.mxu0 %v540_v7  ;;  %528 = vmatprep.subr.bf16.mxu1 %v540_v7 }
  0x13   :  { %507 = vmatpush3.bf16.msra.mxu0 %v540_v7  ;;  %533 = vmatpush3.bf16.msra.mxu1 %v540_v7 }
  0x16   :  { %509 = vmatmul.mubr.msk.bf16.vlgmr.msra.gmra.mxu0 %vm117_vm1, %v543_v8  ;;  %517 = vmatmul.mubr.msk.bf16.vlgmr.msra.gmra.mxu1 %vm117_vm1, %v544_v9 }
  0x17   :  { %512 = vmatprep.mubr.msk.bf16.mxu0 %vm117_vm1, %v545_v10  ;;  %520 = vmatprep.mubr.msk.bf16.mxu1 %vm117_vm1, %v546_v11 }
  0x1e   :  { %513 = vmatmul.mubr.msk.bf16.gmra.mxu0 %vm117_vm1, %v547_v12  ;;  %521 = vmatmul.mubr.msk.bf16.gmra.mxu1 %vm117_vm1, %v548_v13 }
  0xd6   :  { %v510_v23 = vpop.f32.mrf.mxu0  ;;  %v518_v24 = vpop.f32.mrf.mxu1 }
  0xd7   :  { %v189_v28 = vadd.f32 %v510_v23, %v640_v18  ;;  %v221_v29 = vadd.f32 %v518_v24, %v640_v18 }
  0xd8   :  { %v180_v33 = vpop.f32.mrf.mxu0  ;;  %v212_v34 = vpop.f32.mrf.mxu1 }
  0xd9   :  { %v277_v39 = vadd.f32 %v452_v19, %v189_v28  ;;  %v285_v40 = vadd.f32 %v468_v20, %v221_v29  ;;  %v181_v41 = vadd.f32 %v640_v18, %v180_v33  ;;  %v213_v42 = vadd.f32 %v640_v18, %v212_v34 }
  0xda   :  { %v511_v43 = vpop.f32.mrf.mxu0  ;;  %v519_v44 = vpop.f32.mrf.mxu1 }
  0xdb   :  { %v293_v49 = vmax.f32 %v277_v39, 0.0  ;;  %v301_v50 = vmax.f32 %v285_v40, 0.0  ;;  %v275_v51 = vadd.f32 %v448_v25, %v181_v41  ;;  %v283_v52 = vadd.f32 %v464_v26, %v213_v42 }
  0xdc   :  { %v192_v53 = vadd.f32 %v511_v43, %v640_v18  ;;  %v224_v54 = vadd.f32 %v519_v44, %v640_v18  ;;  %v183_v55 = vpop.f32.mrf.mxu0  ;;  %v215_v56 = vpop.f32.mrf.mxu1 }
  0xdd   :  { %v432_v59 = vpack.c.bf16 %v293_v49, %v293_v49  ;;  %v440_v60 = vpack.c.bf16 %v301_v50, %v301_v50  ;;  %v291_v61 = vmax.f32 %v275_v51, 0.0  ;;  %v299_v62 = vmax.f32 %v283_v52, 0.0 }
  0xde   :  { %v278_v63 = vadd.f32 %v453_v27, %v192_v53  ;;  %v286_v0 = vadd.f32 %v469_v30, %v224_v54  ;;  %v184_v1 = vadd.f32 %v640_v18, %v183_v55  ;;  %v216_v2 = vadd.f32 %v640_v18, %v215_v56  ;;  %v514_v3 = vpop.f32.mrf.mxu0  ;;  %v522_v4 = vpop.f32.mrf.mxu1 }
  0xdf   :  { %374 = vst.msk [vmem:[%s766_s4 + $0x8] sm:$0xf] %vm371_vm2, %v432_v59  ;;  %382 = vst.msk [vmem:[%s766_s4 + $0x28] sm:$0xf] %vm371_vm2, %v440_v60  ;;  %v430_v5 = vpack.c.bf16 %v291_v61, %v291_v61  ;;  %v438_v6 = vpack.c.bf16 %v299_v62, %v299_v62  ;;  %v205_v7 = vadd.f32 %v514_v3, %v640_v18 }
  0xe0   :  { %v237_v8 = vadd.f32 %v522_v4, %v640_v18  ;;  %v294_v9 = vmax.f32 %v278_v63, 0.0  ;;  %v302_v10 = vmax.f32 %v286_v0, 0.0  ;;  %v276_v11 = vadd.f32 %v449_v35, %v184_v1  ;;  %v196_v13 = vpop.f32.mrf.mxu0  ;;  %v228_v14 = vpop.f32.mrf.mxu1 }
  0xe1   :  { %v284_v12 = vadd.f32 %v465_v36, %v216_v2  ;;  %372 = vst.msk [vmem:[%s766_s4] sm:$0xf] %vm371_vm2, %v430_v5  ;;  %380 = vst.msk [vmem:[%s766_s4 + $0x20] sm:$0xf] %vm371_vm2, %v438_v6  ;;  %v281_v15 = vadd.f32 %v460_v37, %v205_v7  ;;  %v197_v17 = vadd.f32 %v640_v18, %v196_v13 }
  0xe2   :  { %v289_v16 = vadd.f32 %v476_v38, %v237_v8  ;;  %v229_v19 = vadd.f32 %v640_v18, %v228_v14  ;;  %v433_v20 = vpack.c.bf16 %v294_v9, %v294_v9  ;;  %v441_v23 = vpack.c.bf16 %v302_v10, %v302_v10  ;;  %v515_v26 = vpop.f32.mrf.mxu0  ;;  %v523_v27 = vpop.f32.mrf.mxu1 }
  0xe3   :  { %v292_v24 = vmax.f32 %v276_v11, 0.0  ;;  %v300_v25 = vmax.f32 %v284_v12, 0.0  ;;  %v297_v28 = vmax.f32 %v281_v15, 0.0  ;;  %v279_v30 = vadd.f32 %v456_v45, %v197_v17 }
  0xe4   :  { %v305_v29 = vmax.f32 %v289_v16, 0.0  ;;  %v287_v33 = vadd.f32 %v472_v46, %v229_v19  ;;  %375 = vst.msk [vmem:[%s766_s4 + $0xc] sm:$0xf] %vm371_vm2, %v433_v20  ;;  %383 = vst.msk [vmem:[%s766_s4 + $0x2c] sm:$0xf] %vm371_vm2, %v441_v23  ;;  %v208_v36 = vadd.f32 %v515_v26, %v640_v18  ;;  %v240_v37 = vadd.f32 %v523_v27, %v640_v18  ;;  %v199_v38 = vpop.f32.mrf.mxu0  ;;  %v231_v39 = vpop.f32.mrf.mxu1 }
  0xe5   :  { %v431_v34 = vpack.c.bf16 %v292_v24, %v292_v24  ;;  %v439_v35 = vpack.c.bf16 %v300_v25, %v300_v25  ;;  %v436_v40 = vpack.c.bf16 %v297_v28, %v297_v28  ;;  %v295_v42 = vmax.f32 %v279_v30, 0.0 }
  0xe6   :  { %v444_v41 = vpack.c.bf16 %v305_v29, %v305_v29  ;;  %v303_v43 = vmax.f32 %v287_v33, 0.0  ;;  %v282_v44 = vadd.f32 %v461_v47, %v208_v36  ;;  %v290_v45 = vadd.f32 %v477_v48, %v240_v37 }
  0xe7   :  { %373 = vst.msk [vmem:[%s766_s4 + $0x4] sm:$0xf] %vm371_vm2, %v431_v34  ;;  %381 = vst.msk [vmem:[%s766_s4 + $0x24] sm:$0xf] %vm371_vm2, %v439_v35  ;;  %v200_v46 = vadd.f32 %v640_v18, %v199_v38  ;;  %v232_v49 = vadd.f32 %v640_v18, %v231_v39  ;;  %v434_v50 = vpack.c.bf16 %v295_v42, %v295_v42 }
  0xe8   :  { %378 = vst.msk [vmem:[%s766_s4 + $0x18] sm:$0xf] %vm371_vm2, %v436_v40  ;;  %386 = vst.msk [vmem:[%s766_s4 + $0x38] sm:$0xf] %vm371_vm2, %v444_v41  ;;  %v442_v21 = vpack.c.bf16 %v303_v43, %v303_v43  ;;  %v298_v47 = vmax.f32 %v282_v44, 0.0  ;;  %v306_v51 = vmax.f32 %v290_v45, 0.0 }
  0xe9   :  { %v280_v22 = vadd.f32 %v457_v57, %v200_v46  ;;  %v288_v18 = vadd.f32 %v473_v58, %v232_v49  ;;  %376 = vst.msk [vmem:[%s766_s4 + $0x10] sm:$0xf] %vm371_vm2, %v434_v50 }
  0xea   :  { %384 = vst.msk [vmem:[%s766_s4 + $0x30] sm:$0xf] %vm371_vm2, %v442_v21  ;;  %v437_v48 = vpack.c.bf16 %v298_v47, %v298_v47  ;;  %v445_v52 = vpack.c.bf16 %v306_v51, %v306_v51 }
  0xeb   :  { %v296_v53 = vmax.f32 %v280_v22, 0.0  ;;  %v304_v54 = vmax.f32 %v288_v18, 0.0 }
  0xec   :  { %379 = vst.msk [vmem:[%s766_s4 + $0x1c] sm:$0xf] %vm371_vm2, %v437_v48  ;;  %387 = vst.msk [vmem:[%s766_s4 + $0x3c] sm:$0xf] %vm371_vm2, %v445_v52 }
  0xed   :  { %v435_v31 = vpack.c.bf16 %v296_v53, %v296_v53  ;;  %v443_v32 = vpack.c.bf16 %v304_v54, %v304_v54 }
  0xef   :  { %377 = vst.msk [vmem:[%s766_s4 + $0x14] sm:$0xf] %vm371_vm2, %v435_v31  ;;  %385 = vst.msk [vmem:[%s766_s4 + $0x34] sm:$0xf] %vm371_vm2, %v443_v32 }

// kernel: _lambda_.28
= control target key start
LH: loop header
LB: loop body
LE: loop exit
PB: predicated region body
PF: predicated region fallthrough
CT: control target
= control target key end

     0   :  { %v117_v0 = vmov 0.0   ;;  %vm118_vm0 = vmmov 0   ;;  %vm45_vm1 = vcmask 261120   ;;  %s157_s1 = inlined_call_operand.vmem [shape: bf16[32,32], index: 1, kind: input, shape index: {}]   ;;  %s158_s0 = inlined_call_operand.vmem [shape: bf16[16,32], index: 0, kind: input, shape index: {}]   ;;  %s159_s2 = inlined_call_operand.vmem [shape: f32[1,32], index: 2, kind: input, shape index: {}]   ;;  %s160_s3 = inlined_call_operand.vmem [shape: f32[16,32], index: 3, kind: output, shape index: {}]  }
   0x1   :  { %104 = vmatprep.subr.bf16.mxu0 %v117_v0  ;;  %v114_v1 = vld [vmem:[%s157_s1 + $0x8] sm:$0xff]   ;;  %108 = vmatprep.mubr.msk.bf16.mxu0 %vm118_vm0, %v117_v0  ;;  %v115_v2 = vld [vmem:[%s157_s1] sm:$0xff]  }
   0x2   :  { %105 = vmatpush3.bf16.msra.mxu0 %v114_v1  ;;  %v116_v3 = vld [vmem:[%s158_s0] sm:$0xff]  }
   0x3   :  { %106 = vmatprep.subr.bf16.mxu0 %v117_v0  ;;  %v96_v4 = vld [vmem:[%s159_s2] ss:$0 sm:$0xff] }
   0x6   :  { %107 = vmatpush3.bf16.msra.mxu0 %v115_v2 }
   0x9   :  { %109 = vmatmul.mubr.msk.bf16.vlgmr.msra.gmra.mxu0 %vm45_vm1, %v116_v3 }
  0xc9   :  { %v83_v5 = vpop.f32.mrf.mxu0 }
  0xca   :  { %v84_v6 = vadd.f32 %v96_v4, %v83_v5 }
  0xcb   :  { %v110_v7 = vpop.f32.mrf.mxu0 }
  0xcc   :  { %90 = vst.msk [vmem:[%s160_s3] sm:$0xff] %vm45_vm1, %v84_v6 }
  0xcd   :  { %v86_v8 = vpop.f32.mrf.mxu0 }
  0xce   :  { %v87_v9 = vadd.f32 %v96_v4, %v86_v8 }
  0xcf   :  { %v111_v10 = vpop.f32.mrf.mxu0 }
  0xd0   :  { %91 = vst.msk [vmem:[%s160_s3 + $0x8] sm:$0xff] %vm45_vm1, %v87_v9 }

// kernel: _lambda_.29
= control target key start
LH: loop header
LB: loop body
LE: loop exit
PB: predicated region body
PF: predicated region fallthrough
CT: control target
= control target key end

     0   :  { %vm21_vm0 = vcmask 261120   ;;  %vm167_vm1 = vcmask 781312   ;;  %s270_s0 = inlined_call_operand.vmem [shape: f32[24,32], index: 0, kind: input, shape index: {}]   ;;  %s271_s3 = inlined_call_operand.vmem [shape: bf16[32,96], index: 3, kind: input, shape index: {}]   ;;  %s272_s1 = inlined_call_operand.vmem [shape: f32[1,32], index: 1, kind: input, shape index: {}]   ;;  %s273_s2 = inlined_call_operand.vmem [shape: f32[1,32], index: 2, kind: input, shape index: {}]   ;;  %s274_s4 = inlined_call_operand.vmem [shape: bf16[24,96], index: 4, kind: output, shape index: {}]  }
   0x1   :  { %v18_v0 = vld [vmem:[%s270_s0] sm:$0xff]  ;;  %v20_v1 = vld [vmem:[%s270_s0 + $0x10] sm:$0xff]  ;;  %v19_v2 = vld [vmem:[%s270_s0 + $0x8] sm:$0xff] }
   0x2   :  { %v22_v3 = vsel %vm21_vm0, %v18_v0, 0.0  ;;  %v28_v4 = vsel %vm21_vm0, %v20_v1, 0.0  ;;  %v25_v5 = vsel %vm21_vm0, %v19_v2, 0.0  ;;  %v199_v21 = vld [vmem:[%s271_s3 + $0x8] sm:$0xff]   ;;  %v200_v22 = vld [vmem:[%s271_s3] sm:$0xff]  }
   0x3   :  { %23 = vadd.xlane.f32.xlu0 %v22_v3  ;;  %29 = vadd.xlane.f32.xlu1 %v28_v4  ;;  %v175_v34 = vld [vmem:[%s272_s1] ss:$0 sm:$0xff] }
   0x4   :  { %191 = vmatprep.subr.bf16.mxu0 %v199_v21  ;;  %v176_v40 = vld [vmem:[%s273_s2] ss:$0 sm:$0xff] }
   0x5   :  { %192 = vmatpush3.bf16.msra.mxu0 %v199_v21 }
   0x6   :  { %193 = vmatprep.subr.bf16.mxu0 %v200_v22 }
   0x7   :  { %26 = vadd.xlane.f32.xlu0 %v25_v5 }
   0x9   :  { %194 = vmatpush3.bf16.msra.mxu0 %v200_v22 }
  0x8c   :  { %v24_v6 = vpop.xlane.xlu0 %23  ;;  %v30_v7 = vpop.xlane.xlu1 %29 }
  0x8d   :  { %v32_v8 = vmul.f32 0.03125, %v24_v6  ;;  %v34_v9 = vmul.f32 0.03125, %v30_v7 }
  0x8f   :  { %v35_v10 = vsub.f32 %v18_v0, %v32_v8  ;;  %v37_v11 = vsub.f32 %v20_v1, %v34_v9 }
  0x90   :  { %v27_v12 = vpop.xlane.xlu0 %26 }
  0x91   :  { %v33_v13 = vmul.f32 0.03125, %v27_v12  ;;  %v38_v14 = vmul.f32 %v35_v10, %v35_v10  ;;  %v40_v15 = vmul.f32 %v37_v11, %v37_v11 }
  0x93   :  { %v36_v16 = vsub.f32 %v19_v2, %v33_v13  ;;  %v41_v17 = vsel %vm21_vm0, %v38_v14, 0.0  ;;  %v47_v18 = vsel %vm21_vm0, %v40_v15, 0.0 }
  0x94   :  { %42 = vadd.xlane.f32.xlu1 %v41_v17 }
  0x95   :  { %v39_v19 = vmul.f32 %v36_v16, %v36_v16 }
  0x97   :  { %v44_v20 = vsel %vm21_vm0, %v39_v19, 0.0 }
  0x98   :  { %48 = vadd.xlane.f32.xlu1 %v47_v18  ;;  %45 = vadd.xlane.f32.xlu0 %v44_v20 }
 0x11d   :  { %v43_v23 = vpop.xlane.xlu1 %42 }
 0x11e   :  { %v50_v24 = vmul.f32 0.03125, %v43_v23 }
 0x120   :  { %v53_v25 = vadd.f32 1e-05, %v50_v24 }
 0x121   :  { %v49_v26 = vpop.xlane.xlu1 %48  ;;  %v46_v27 = vpop.xlane.xlu0 %45 }
 0x122   :  { %201 = vrsqrt.f32 %v53_v25  ;;  %v52_v28 = vmul.f32 0.03125, %v49_v26  ;;  %v51_v29 = vmul.f32 0.03125, %v46_v27 }
 0x124   :  { %v55_v30 = vadd.f32 1e-05, %v52_v28  ;;  %v54_v31 = vadd.f32 1e-05, %v51_v29 }
 0x126   :  { %203 = vrsqrt.f32 %v55_v30 }
 0x127   :  { %205 = vrsqrt.f32 %v54_v31 }
 0x12f   :  { %v202_v32 = vpop.eup %201 }
 0x130   :  { %v59_v33 = vmul.f32 %v202_v32, %v35_v10 }
 0x132   :  { %v69_v39 = vmul.f32 %v175_v34, %v59_v33 }
 0x133   :  { %v204_v35 = vpop.eup %203 }
 0x134   :  { %v206_v36 = vpop.eup %205  ;;  %v61_v37 = vmul.f32 %v204_v35, %v37_v11  ;;  %v79_v44 = vadd.f32 %v176_v40, %v69_v39 }
 0x135   :  { %v60_v38 = vmul.f32 %v206_v36, %v36_v16 }
 0x136   :  { %v71_v41 = vmul.f32 %v175_v34, %v61_v37 }
 0x137   :  { %v70_v42 = vmul.f32 %v175_v34, %v60_v38 }
 0x138   :  { %v81_v43 = vadd.f32 %v176_v40, %v71_v41 }
 0x139   :  { %v80_v45 = vadd.f32 %v176_v40, %v70_v42 }
 0x13a   :  { %v83_v46 = vpack.c.bf16 %v81_v43, %v81_v43 }
 0x13b   :  { %v82_v47 = vpack.c.bf16 %v80_v45, %v79_v44 }
 0x13d   :  { %195 = vmatprep.mubr.msk.bf16.mxu0 %vm21_vm0, %v82_v47 }
 0x13e   :  { %196 = vmatmul.mubr.msk.bf16.vlgmr.msra.gmra.mxu0 %vm21_vm0, %v83_v46 }
 0x1fe   :  { %v197_v48 = vpop.f32.mrf.mxu0 }
 0x1ff   :  { %v186_v49 = vpack.c.bf16 %v197_v48, %v197_v48 }
 0x200   :  { %v140_v50 = vpop.f32.mrf.mxu0 }
 0x201   :  { %170 = vst.msk [vmem:[%s274_s4 + $0x8] sm:$0xf] %vm167_vm1, %v186_v49  ;;  %v184_v51 = vpack.c.bf16 %v140_v50, %v140_v50 }
 0x202   :  { %v198_v52 = vpop.f32.mrf.mxu0 }
 0x203   :  { %168 = vst.msk [vmem:[%s274_s4] sm:$0xf] %vm167_vm1, %v184_v51 }
 0x204   :  { %v143_v53 = vpop.f32.mrf.mxu0 }
 0x205   :  { %v185_v54 = vpack.c.bf16 %v143_v53, %v143_v53 }
 0x207   :  { %169 = vst.msk [vmem:[%s274_s4 + $0x4] sm:$0xf] %vm167_vm1, %v185_v54 }

// kernel: _lambda_.31
= control target key start
LH: loop header
LB: loop body
LE: loop exit
PB: predicated region body
PF: predicated region fallthrough
CT: control target
= control target key end

     0   :  { %vm52_vm0 = vcmask 261120   ;;  %s206_s1 = inlined_call_operand.vmem [shape: bf16[32,32], index: 1, kind: input, shape index: {}]   ;;  %s207_s0 = inlined_call_operand.vmem [shape: bf16[24,32], index: 0, kind: input, shape index: {}]   ;;  %s208_s2 = inlined_call_operand.vmem [shape: f32[1,32], index: 2, kind: input, shape index: {}]   ;;  %s209_s3 = inlined_call_operand.vmem [shape: f32[24,32], index: 3, kind: input, shape index: {}]   ;;  %s210_s4 = inlined_call_operand.vmem [shape: f32[24,32], index: 4, kind: output, shape index: {}]  }
   0x1   :  { %v139_v0 = vld [vmem:[%s206_s1 + $0x8] sm:$0xff]   ;;  %v140_v1 = vld [vmem:[%s206_s1] sm:$0xff]   ;;  %v109_v6 = vld [vmem:[%s209_s3 + $0x10] sm:$0xff] }
   0x2   :  { %131 = vmatprep.subr.bf16.mxu0 %v139_v0  ;;  %v141_v2 = vld [vmem:[%s207_s0] sm:$0xff]   ;;  %v142_v3 = vld [vmem:[%s207_s0 + $0x8] ss:$0 sps:$4 sm:$0xff]  }
   0x3   :  { %132 = vmatpush3.bf16.msra.mxu0 %v139_v0  ;;  %135 = vmatprep.mubr.msk.bf16.mxu0 %vm52_vm0, %v141_v2  ;;  %v120_v4 = vld [vmem:[%s208_s2] ss:$0 sm:$0xff]  ;;  %v108_v15 = vld [vmem:[%s209_s3 + $0x8] sm:$0xff] }
   0x4   :  { %133 = vmatprep.subr.bf16.mxu0 %v140_v1  ;;  %v107_v9 = vld [vmem:[%s209_s3] sm:$0xff] }
   0x7   :  { %134 = vmatpush3.bf16.msra.mxu0 %v140_v1 }
   0xa   :  { %136 = vmatmul.mubr.msk.bf16.vlgmr.msra.gmra.mxu0 %vm52_vm0, %v142_v3 }
  0xca   :  { %v137_v5 = vpop.f32.mrf.mxu0 }
  0xcb   :  { %v102_v7 = vadd.f32 %v137_v5, %v120_v4 }
  0xcc   :  { %v93_v8 = vpop.f32.mrf.mxu0 }
  0xcd   :  { %v112_v10 = vadd.f32 %v109_v6, %v102_v7  ;;  %v94_v11 = vadd.f32 %v120_v4, %v93_v8 }
  0xce   :  { %v138_v12 = vpop.f32.mrf.mxu0 }
  0xcf   :  { %115 = vst.msk [vmem:[%s210_s4 + $0x10] sm:$0xff] %vm52_vm0, %v112_v10  ;;  %v110_v13 = vadd.f32 %v107_v9, %v94_v11 }
  0xd0   :  { %v96_v14 = vpop.f32.mrf.mxu0 }
  0xd1   :  { %113 = vst.msk [vmem:[%s210_s4] sm:$0xff] %vm52_vm0, %v110_v13  ;;  %v97_v16 = vadd.f32 %v120_v4, %v96_v14 }
  0xd3   :  { %v111_v17 = vadd.f32 %v108_v15, %v97_v16 }
  0xd5   :  { %114 = vst.msk [vmem:[%s210_s4 + $0x8] sm:$0xff] %vm52_vm0, %v111_v17 }

// kernel: _lambda_.30
= control target key start
LH: loop header
LB: loop body
LE: loop exit
PB: predicated region body
PF: predicated region fallthrough
CT: control target
= control target key end

     0   :  { %s737_s12 = smov 0   ;;  %s739_s13 = smov 0   ;;  %s805_s0 = inlined_call_operand.vmem [shape: bf16[2,4,9,8], index: 0, kind: input, shape index: {}]   ;;  %s806_s1 = inlined_call_operand.vmem [shape: bf16[2,4,9,8], index: 1, kind: input, shape index: {}]   ;;  %s807_s2 = inlined_call_operand.vmem [shape: bf16[2,4,9,8], index: 2, kind: input, shape index: {}]   ;;  %s808_s3 = inlined_call_operand.vmem [shape: bf16[2,4,9,8], index: 3, kind: output, shape index: {}]  }
   0x1   :  { %s741_s14 = smov 0   ;;  %s743_s15 = smov 0  }
   0x2   :  { %s745_s16 = smov 0  }
   0x3 LB: > { %s22_s17 = sadd.s32 1, %s704_s14  ;;  %s25_s18 = sadd.s32 1, %s708_s15  ;;  %s712_s16 = sphi %s745_s16, %s13_s16   ;;  %s708_s15 = sphi %s743_s15, %s812_s15   ;;  %s704_s14 = sphi %s741_s14, %s811_s14   ;;  %s700_s13 = sphi %s739_s13, %s810_s13   ;;  %s696_s12 = sphi %s737_s12, %s809_s12  }
   0x4   : > { %p23_p0 = scmp.ge.s32.totalorder %s22_s17, 4  ;;  %p580_p1 = scmp.ge.s32.totalorder %s712_s16, 1 }
   0x5   : > { %p189_p2 = scmp.lt.s32.totalorder %s712_s16, 9 }
   0x6   : > { %s814_s17 = smov (%p23_p0, %s22_s17), 0  ;;  %s816_s18 = smov (!%p23_p0, %s25_s18), %s708_s15 }
   0x7   : > { %p190_p3 = pnand %p580_p1, %p189_p2  ;;  %p27_p4 = scmp.ge.s32.totalorder %s816_s18, 2 }
   0x8   : > { %p239_p5 = scmp.lt.s32.totalorder (!%p190_p3), %s700_s13, 1  ;;  %p241_p6 = scmp.lt.s32.totalorder (!%p190_p3), %s696_s12, 3 }
   0x9   : > { %s818_s18 = smov (%p27_p4, %s816_s18), 0  ;;  %193 = sbr.rel (%p190_p3) target bundleno = 742 (0x2e6), region = 32 }
   0xe   : > { %v714_v0 = vmov 0.0   ;;  %vm715_vm0 = vmmov 0   ;;  %s820_s13 = smov (!%p239_p5, %s700_s13), 1  ;;  %s822_s12 = smov (!%p241_p6, %s696_s12), 3  ;;  %vm292_vm1 = vcmask 64512   ;;  %vm342_vm2 = vcmask 72704  }
   0xf   : > { %608 = vmatprep.subr.bf16.mxu0 %v714_v0  ;;  %610 = vmatprep.mubr.msk.bf16.mxu0 %vm715_vm0, %v714_v0  ;;  %s582_s19 = sshll.u32 %s820_s13, 3  ;;  %s581_s20 = sshll.u32 %s822_s12, 1  ;;  %vm346_vm3 = vcmask 65536   ;;  %vm375_vm4 = vcmask 1043456   ;;  %vm376_vm5 = vcmask 1044480   ;;  %v716_v23 = vmov 65535  }
  0x10   : > { %614 = vmatprep.subr.bf16.mxu1 %v714_v0  ;;  %616 = vmatprep.mubr.msk.bf16.mxu1 %vm715_vm0, %v714_v0  ;;  %s245_s21 = sadd.s32 %s582_s19, %s581_s20  ;;  %v377_v24 = vsel %vm375_vm4, 4294967295, %v716_v23  ;;  %vm431_vm6 = vcmask 60416   ;;  %vm433_vm7 = vcmask 57344   ;;  %vm434_vm8 = vsmask.f32 256 }
  0x11   : > { %s767_s22 = sshll.u32 %s245_s21, 2  ;;  %v378_v25 = vsel %vm376_vm5, %v377_v24, 0  ;;  %vm435_vm9 = vmand %vm433_vm7, %vm434_vm8 }
  0x12   : > { %s256_s25 = scalar_lea.vmem %s806_s1, %s767_s22  ;;  %s247_s28 = scalar_lea.vmem %s805_s0, %s767_s22 }
  0x13   : > { %v663_v1 = vld [vmem:[%s256_s25] sm:$0x1f]   ;;  %s265_s4 = scalar_lea.vmem %s807_s2, %s767_s22  ;;  %s274_s7 = scalar_lea.vmem %s808_s3, %s767_s22 }
  0x14   : > { %v297_v2 = vsel %vm292_vm1, %v663_v1, 0  ;;  %v664_v3 = vld [vmem:[%s247_s28] sm:$0x1f]  }
  0x15   : > { %609 = vmatpush3.bf16.xpose.msra.mxu0 %v297_v2  ;;  %v665_v22 = vld [vmem:[%s265_s4] sm:$0x1f]  }
  0x16   : > { %v380_v26 = vand.u32 %v665_v22, %v378_v25  ;;  %v436_v38 = vld [vmem:[%s274_s7 + $0x4] sm:$0x1] }
  0x18   : > { %615 = vmatpush3.bf16.msra.mxu1 %v380_v26 }
  0x1c   : > { %611 = vmatmul.mubr.msk.bf16.vlgmr.msra.gmra.mxu0 %vm292_vm1, %v664_v3 }
  0xdc   : > { %v333_v4 = vpop.f32.mrf.mxu0 }
  0xdd   : > { %v340_v5 = vmul.f32 0.35355338, %v333_v4 }
  0xde   : > { %v612_v6 = vpop.f32.mrf.mxu0 }
  0xdf   : > { %v343_v7 = vsel %vm342_vm2, %v340_v5, -inf }
  0xe0   : > { %344 = vmax.xlane.f32.xlu0 %v343_v7  ;;  %v336_v8 = vpop.f32.mrf.mxu0 }
  0xe1   : > { %v341_v9 = vmul.f32 0.35355338, %v336_v8 }
  0xe2   : > { %v613_v10 = vpop.f32.mrf.mxu0 }
  0xe3   : > { %v347_v11 = vsel %vm346_vm3, %v341_v9, -inf }
  0xe4   : > { %348 = vmax.xlane.f32.xlu0 %v347_v11 }
 0x169   : > { %v345_v12 = vpop.xlane.xlu0 %344 }
 0x16a   : > { %v350_v13 = vsub.f32 %v340_v5, %v345_v12 }
 0x16c   : > { %v352_v14 = vmul.f32 1.442695, %v350_v13 }
 0x16d   : > { %v349_v15 = vpop.xlane.xlu0 %348 }
 0x16e   : > { %666 = vpow2.f32 %v352_v14  ;;  %v351_v16 = vsub.f32 %v341_v9, %v349_v15 }
 0x170   : > { %v354_v17 = vmul.f32 1.442695, %v351_v16 }
 0x172   : > { %668 = vpow2.f32 %v354_v17 }
 0x17b   : > { %v667_v18 = vpop.eup %666 }
 0x17c   : > { %v356_v19 = vsel %vm342_vm2, %v667_v18, 0.0 }
 0x17d   : > { %357 = vadd.xlane.f32.xlu1 %v356_v19 }
 0x17f   : > { %v669_v20 = vpop.eup %668 }
 0x180   : > { %v359_v21 = vsel %vm346_vm3, %v669_v20, 0.0 }
 0x181   : > { %360 = vadd.xlane.f32.xlu1 %v359_v21 }
 0x206   : > { %v358_v27 = vpop.xlane.xlu1 %357 }
 0x207   : > { %670 = vrcp.f32 %v358_v27 }
 0x20a   : > { %v361_v28 = vpop.xlane.xlu1 %360 }
 0x20b   : > { %672 = vrcp.f32 %v361_v28 }
 0x214   : > { %v671_v29 = vpop.eup %670 }
 0x215   : > { %v364_v31 = vmul.f32 %v671_v29, %v667_v18 }
 0x218   : > { %v673_v30 = vpop.eup %672 }
 0x219   : > { %v365_v32 = vmul.f32 %v673_v30, %v669_v20 }
 0x21b   : > { %v366_v33 = vpack.c.bf16 %v365_v32, %v364_v31 }
 0x21d   : > { %617 = vmatmul.mubr.msk.bf16.vlgmr.msra.gmra.mxu1 %vm342_vm2, %v366_v33 }
 0x2dd   : > { %v416_v34 = vpop.f32.mrf.mxu1 }
 0x2de   : > { %v602_v35 = vpack.c.bf16 %v416_v34, %v416_v34 }
 0x2df   : > { %v618_v36 = vpop.f32.mrf.mxu1 }
 0x2e0   : > { %432 = vst.msk [vmem:[%s274_s7] sm:$0xf] %vm431_vm6, %v602_v35 }
 0x2e1   : > { %v419_v37 = vpop.f32.mrf.mxu1 }
 0x2e2   : > { %v603_v39 = vpack.c.bf16 %v419_v37, %v419_v37 }
 0x2e3   : > { %v619_v40 = vpop.f32.mrf.mxu1 }
 0x2e4   : > { %v437_v41 = vsel %vm435_vm9, %v603_v39, %v436_v38 }
 0x2e5   : > { %438 = vst [vmem:[%s274_s7 + $0x4] sm:$0x1] %v437_v41 }
 0x2e6 PF: > { %s13_s16 = sadd.s32 1, %s712_s16   ;;  %s809_s12 = smov %s704_s14 }
 0x2e7   : > { %p10_p7 = scmp.ge.s32.totalorder %s13_s16, 10   ;;  %s810_s13 = smov %s708_s15 }
 0x2e8   : > { %s811_s14 = smov %s814_s17  ;;  %s812_s15 = smov %s818_s18 }
 0x2e9   :  { %12 = sbr.rel (!%p10_p7) target bundleno = 3 (0x3), region = 68 }

// kernel: _lambda_.32
= control target key start
LH: loop header
LB: loop body
LE: loop exit
PB: predicated region body
PF: predicated region fallthrough
CT: control target
= control target key end

     0   :  { %vm24_vm0 = vcmask 261120   ;;  %s407_s0 = inlined_call_operand.vmem [shape: f32[24,32], index: 0, kind: input, shape index: {}]   ;;  %s408_s3 = inlined_call_operand.vmem [shape: bf16[32,128], index: 3, kind: input, shape index: {}]   ;;  %s409_s1 = inlined_call_operand.vmem [shape: f32[1,32], index: 1, kind: input, shape index: {}]   ;;  %s410_s2 = inlined_call_operand.vmem [shape: f32[1,32], index: 2, kind: input, shape index: {}]   ;;  %s411_s4 = inlined_call_operand.vmem [shape: f32[1,128], index: 4, kind: input, shape index: {}]   ;;  %s412_s5 = inlined_call_operand.vmem [shape: bf16[24,128], index: 5, kind: output, shape index: {}]  }
   0x1   :  { %v21_v0 = vld [vmem:[%s407_s0] sm:$0xff]  ;;  %v23_v1 = vld [vmem:[%s407_s0 + $0x10] sm:$0xff]  ;;  %v22_v2 = vld [vmem:[%s407_s0 + $0x8] sm:$0xff] }
   0x2   :  { %v25_v3 = vsel %vm24_vm0, %v21_v0, 0.0  ;;  %v31_v4 = vsel %vm24_vm0, %v23_v1, 0.0  ;;  %v28_v5 = vsel %vm24_vm0, %v22_v2, 0.0  ;;  %v295_v21 = vld [vmem:[%s408_s3 + $0x8] sm:$0xff]   ;;  %v296_v22 = vld [vmem:[%s408_s3] sm:$0xff]  }
   0x3   :  { %26 = vadd.xlane.f32.xlu0 %v25_v3  ;;  %32 = vadd.xlane.f32.xlu1 %v31_v4  ;;  %v265_v34 = vld [vmem:[%s409_s1] ss:$0 sm:$0xff] }
   0x4   :  { %287 = vmatprep.subr.bf16.mxu0 %v295_v21  ;;  %v266_v40 = vld [vmem:[%s410_s2] ss:$0 sm:$0xff] }
   0x5   :  { %288 = vmatpush3.bf16.msra.mxu0 %v295_v21  ;;  %v267_v48 = vld [vmem:[%s411_s4] ss:$0 sm:$0xff] }
   0x6   :  { %289 = vmatprep.subr.bf16.mxu0 %v296_v22 }
   0x7   :  { %29 = vadd.xlane.f32.xlu0 %v28_v5 }
   0x9   :  { %290 = vmatpush3.bf16.msra.mxu0 %v296_v22 }
  0x8c   :  { %v27_v6 = vpop.xlane.xlu0 %26  ;;  %v33_v7 = vpop.xlane.xlu1 %32 }
  0x8d   :  { %v35_v8 = vmul.f32 0.03125, %v27_v6  ;;  %v37_v9 = vmul.f32 0.03125, %v33_v7 }
  0x8f   :  { %v38_v10 = vsub.f32 %v21_v0, %v35_v8  ;;  %v40_v11 = vsub.f32 %v23_v1, %v37_v9 }
  0x90   :  { %v30_v12 = vpop.xlane.xlu0 %29 }
  0x91   :  { %v36_v13 = vmul.f32 0.03125, %v30_v12  ;;  %v41_v14 = vmul.f32 %v38_v10, %v38_v10  ;;  %v43_v15 = vmul.f32 %v40_v11, %v40_v11 }
  0x93   :  { %v39_v16 = vsub.f32 %v22_v2, %v36_v13  ;;  %v44_v17 = vsel %vm24_vm0, %v41_v14, 0.0  ;;  %v50_v18 = vsel %vm24_vm0, %v43_v15, 0.0 }
  0x94   :  { %45 = vadd.xlane.f32.xlu1 %v44_v17 }
  0x95   :  { %v42_v19 = vmul.f32 %v39_v16, %v39_v16 }
  0x97   :  { %v47_v20 = vsel %vm24_vm0, %v42_v19, 0.0 }
  0x98   :  { %51 = vadd.xlane.f32.xlu1 %v50_v18  ;;  %48 = vadd.xlane.f32.xlu0 %v47_v20 }
 0x11d   :  { %v46_v23 = vpop.xlane.xlu1 %45 }
 0x11e   :  { %v53_v24 = vmul.f32 0.03125, %v46_v23 }
 0x120   :  { %v56_v25 = vadd.f32 1e-05, %v53_v24 }
 0x121   :  { %v52_v26 = vpop.xlane.xlu1 %51  ;;  %v49_v27 = vpop.xlane.xlu0 %48 }
 0x122   :  { %297 = vrsqrt.f32 %v56_v25  ;;  %v55_v28 = vmul.f32 0.03125, %v52_v26  ;;  %v54_v29 = vmul.f32 0.03125, %v49_v27 }
 0x124   :  { %v58_v30 = vadd.f32 1e-05, %v55_v28  ;;  %v57_v31 = vadd.f32 1e-05, %v54_v29 }
 0x126   :  { %299 = vrsqrt.f32 %v58_v30 }
 0x127   :  { %301 = vrsqrt.f32 %v57_v31 }
 0x12f   :  { %v298_v32 = vpop.eup %297 }
 0x130   :  { %v62_v33 = vmul.f32 %v298_v32, %v38_v10 }
 0x132   :  { %v72_v39 = vmul.f32 %v265_v34, %v62_v33 }
 0x133   :  { %v300_v35 = vpop.eup %299 }
 0x134   :  { %v302_v36 = vpop.eup %301  ;;  %v64_v37 = vmul.f32 %v300_v35, %v40_v11  ;;  %v82_v44 = vadd.f32 %v266_v40, %v72_v39 }
 0x135   :  { %v63_v38 = vmul.f32 %v302_v36, %v39_v16 }
 0x136   :  { %v74_v41 = vmul.f32 %v265_v34, %v64_v37 }
 0x137   :  { %v73_v42 = vmul.f32 %v265_v34, %v63_v38 }
 0x138   :  { %v84_v43 = vadd.f32 %v266_v40, %v74_v41 }
 0x139   :  { %v83_v45 = vadd.f32 %v266_v40, %v73_v42 }
 0x13a   :  { %v86_v46 = vpack.c.bf16 %v84_v43, %v84_v43 }
 0x13b   :  { %v85_v47 = vpack.c.bf16 %v83_v45, %v82_v44 }
 0x13d   :  { %291 = vmatprep.mubr.msk.bf16.mxu0 %vm24_vm0, %v85_v47 }
 0x13e   :  { %292 = vmatmul.mubr.msk.bf16.vlgmr.msra.gmra.mxu0 %vm24_vm0, %v86_v46 }
 0x1fe   :  { %v293_v49 = vpop.f32.mrf.mxu0 }
 0x1ff   :  { %v377_v50 = vadd.f32 %v293_v49, %v267_v48 }
 0x200   :  { %v150_v51 = vpop.f32.mrf.mxu0 }
 0x201   :  { %v380_v52 = vmul.f32 0.70710677, %v377_v50  ;;  %v382_v53 = vadd.f32 %v267_v48, %v150_v51 }
 0x202   :  { %v294_v54 = vpop.f32.mrf.mxu0 }
 0x203   :  { %v172_v55 = vand.u32 2147483647, %v380_v52  ;;  %v386_v56 = vmul.f32 0.70710677, %v382_v53  ;;  %vm232_vm1 = vcmp.ge.f32.partialorder %v380_v52, 0.0 }
 0x204   :  { %v153_v57 = vpop.f32.mrf.mxu0 }
 0x205   :  { %v175_v58 = vmul.f32 0.3275911, %v172_v55  ;;  %v170_v59 = vand.u32 2147483647, %v386_v56  ;;  %v389_v60 = vadd.f32 %v267_v48, %v153_v57  ;;  %v214_v4 = vsub.f32 0.0, %v172_v55 }
 0x206   :  { %vm230_vm2 = vcmp.ge.f32.partialorder %v386_v56, 0.0 }
 0x207   :  { %v178_v61 = vadd.f32 1.0, %v175_v58  ;;  %v173_v62 = vmul.f32 0.3275911, %v170_v59  ;;  %v392_v63 = vmul.f32 0.70710677, %v389_v60  ;;  %v212_v5 = vsub.f32 0.0, %v170_v59 }
 0x208   :  { %v217_v6 = vmul.f32 %v214_v4, %v172_v55  ;;  %v166_v55 = vmul.f32 0.5, %v377_v50  ;;  %v164_v50 = vmul.f32 0.5, %v382_v53  ;;  %v165_v4 = vmul.f32 0.5, %v389_v60 }
 0x209   :  { %303 = vrcp.f32 %v178_v61  ;;  %v176_v0 = vadd.f32 1.0, %v173_v62  ;;  %v171_v1 = vand.u32 2147483647, %v392_v63  ;;  %v215_v8 = vmul.f32 %v212_v5, %v170_v59 }
 0x20a   :  { %v222_v11 = vmul.f32 1.442695, %v217_v6  ;;  %vm231_vm3 = vcmp.ge.f32.partialorder %v392_v63, 0.0 }
 0x20b   :  { %305 = vrcp.f32 %v176_v0  ;;  %v174_v2 = vmul.f32 0.3275911, %v171_v1  ;;  %v213_v9 = vsub.f32 0.0, %v171_v1  ;;  %v218_v15 = vmul.f32 1.442695, %v215_v8 }
 0x20d   :  { %v177_v3 = vadd.f32 1.0, %v174_v2  ;;  %v216_v16 = vmul.f32 %v213_v9, %v171_v1 }
 0x20f   :  { %307 = vrcp.f32 %v177_v3  ;;  %v220_v23 = vmul.f32 1.442695, %v216_v16 }
 0x210   :  { %309 = vpow2.f32 %v222_v11 }
 0x211   :  { %311 = vpow2.f32 %v218_v15 }
 0x212   :  { %313 = vpow2.f32 %v220_v23 }
 0x216   :  { %v304_v7 = vpop.eup %303 }
 0x217   :  { %v187_v10 = vmul.f32 1.0614054, %v304_v7 }
 0x218   :  { %v306_v12 = vpop.eup %305 }
 0x219   :  { %v190_v13 = vadd.f32 -1.4531521, %v187_v10  ;;  %v185_v14 = vmul.f32 1.0614054, %v306_v12 }
 0x21b   :  { %v193_v17 = vmul.f32 %v304_v7, %v190_v13  ;;  %v188_v18 = vadd.f32 -1.4531521, %v185_v14 }
 0x21c   :  { %v308_v19 = vpop.eup %307 }
 0x21d   :  { %v196_v20 = vadd.f32 1.4214138, %v193_v17  ;;  %v191_v21 = vmul.f32 %v306_v12, %v188_v18  ;;  %v186_v22 = vmul.f32 1.0614054, %v308_v19  ;;  %v310_v37 = vpop.eup %309 }
 0x21e   :  { %v312_v43 = vpop.eup %311 }
 0x21f   :  { %v199_v24 = vmul.f32 %v304_v7, %v196_v20  ;;  %v194_v25 = vadd.f32 1.4214138, %v191_v21  ;;  %v189_v26 = vadd.f32 -1.4531521, %v186_v22  ;;  %v314_v51 = vpop.eup %313 }
 0x221   :  { %v202_v27 = vadd.f32 -0.28449672, %v199_v24  ;;  %v197_v28 = vmul.f32 %v306_v12, %v194_v25  ;;  %v192_v29 = vmul.f32 %v308_v19, %v189_v26 }
 0x223   :  { %v205_v30 = vmul.f32 %v304_v7, %v202_v27  ;;  %v200_v31 = vadd.f32 -0.28449672, %v197_v28  ;;  %v195_v32 = vadd.f32 1.4214138, %v192_v29 }
 0x225   :  { %v208_v33 = vadd.f32 0.2548296, %v205_v30  ;;  %v203_v34 = vmul.f32 %v306_v12, %v200_v31  ;;  %v198_v35 = vmul.f32 %v308_v19, %v195_v32 }
 0x227   :  { %v211_v36 = vmul.f32 %v304_v7, %v208_v33  ;;  %v206_v38 = vadd.f32 0.2548296, %v203_v34  ;;  %v201_v39 = vadd.f32 -0.28449672, %v198_v35 }
 0x229   :  { %v226_v40 = vmul.f32 %v310_v37, %v211_v36  ;;  %v209_v41 = vmul.f32 %v306_v12, %v206_v38  ;;  %v204_v42 = vmul.f32 %v308_v19, %v201_v39 }
 0x22b   :  { %v229_v44 = vsub.f32 1.0, %v226_v40  ;;  %v224_v45 = vmul.f32 %v312_v43, %v209_v41  ;;  %v207_v46 = vadd.f32 0.2548296, %v204_v42 }
 0x22d   :  { %v235_v47 = vsub.f32 0.0, %v229_v44  ;;  %v227_v48 = vsub.f32 1.0, %v224_v45  ;;  %v210_v49 = vmul.f32 %v308_v19, %v207_v46 }
 0x22f   :  { %v238_v54 = vsel %vm232_vm1, %v229_v44, %v235_v47  ;;  %v233_v58 = vsub.f32 0.0, %v227_v48  ;;  %v225_v59 = vmul.f32 %v314_v51, %v210_v49 }
 0x230   :  { %v241_v57 = vadd.f32 1.0, %v238_v54 }
 0x231   :  { %v236_v62 = vsel %vm230_vm2, %v227_v48, %v233_v58  ;;  %v228_v0 = vsub.f32 1.0, %v225_v59 }
 0x232   :  { %v244_v61 = vmul.f32 %v241_v57, %v166_v55  ;;  %v239_v3 = vadd.f32 1.0, %v236_v62 }
 0x233   :  { %v234_v2 = vsub.f32 0.0, %v228_v0 }
 0x234   :  { %v277_v1 = vpack.c.bf16 %v244_v61, %v244_v61  ;;  %v242_v6 = vmul.f32 %v239_v3, %v164_v50 }
 0x235   :  { %v237_v52 = vsel %vm231_vm3, %v228_v0, %v234_v2 }
 0x236   :  { %260 = vst [vmem:[%s412_s5 + $0x8] sm:$0xf] %v277_v1  ;;  %v240_v5 = vadd.f32 1.0, %v237_v52 }
 0x238   :  { %v243_v56 = vmul.f32 %v240_v5, %v165_v4 }
 0x23a   :  { %v281_v7 = vpack.c.bf16 %v243_v56, %v242_v6 }
 0x23c   :  { %282 = vst [vmem:[%s412_s5] sm:$0xff] %v281_v7  }

// kernel: _lambda_.33
= control target key start
LH: loop header
LB: loop body
LE: loop exit
PB: predicated region body
PF: predicated region fallthrough
CT: control target
= control target key end

     0   :  { %vm156_vm0 = vcmask 261120   ;;  %s291_s1 = inlined_call_operand.vmem [shape: bf16[128,32], index: 1, kind: input, shape index: {}]   ;;  %s292_s0 = inlined_call_operand.vmem [shape: bf16[24,128], index: 0, kind: input, shape index: {}]   ;;  %s293_s2 = inlined_call_operand.vmem [shape: f32[1,32], index: 2, kind: input, shape index: {}]   ;;  %s294_s3 = inlined_call_operand.vmem [shape: f32[24,32], index: 3, kind: input, shape index: {}]   ;;  %s295_s4 = inlined_call_operand.vmem [shape: f32[24,32], index: 4, kind: output, shape index: {}]  }
   0x1   :  { %v205_v0 = vld [vmem:[%s291_s1 + $0x38] sm:$0xff]   ;;  %v206_v1 = vld [vmem:[%s291_s1 + $0x30] sm:$0xff]   ;;  %v207_v2 = vld [vmem:[%s291_s1 + $0x28] sm:$0xff]  }
   0x2   :  { %185 = vmatprep.subr.bf16.mxu0 %v205_v0  ;;  %v208_v3 = vld [vmem:[%s291_s1 + $0x20] sm:$0xff]   ;;  %v209_v5 = vld [vmem:[%s291_s1 + $0x18] sm:$0xff]   ;;  %v210_v6 = vld [vmem:[%s291_s1 + $0x10] sm:$0xff]  }
   0x3   :  { %186 = vmatpush3.bf16.msra.mxu0 %v205_v0  ;;  %v213_v4 = vld [vmem:[%s292_s0] sm:$0xff]   ;;  %v211_v7 = vld [vmem:[%s291_s1 + $0x8] sm:$0xff]   ;;  %v152_v12 = vld [vmem:[%s294_s3 + $0x10] sm:$0xff] }
   0x4   :  { %187 = vmatprep.subr.bf16.mxu0 %v206_v1  ;;  %201 = vmatprep.mubr.bf16.mxu0 %v213_v4  ;;  %v212_v8 = vld [vmem:[%s291_s1] sm:$0xff]   ;;  %v214_v9 = vld [vmem:[%s292_s0 + $0x8] ss:$0 sps:$4 sm:$0xff]  }
   0x5   :  { %v164_v10 = vld [vmem:[%s293_s2] ss:$0 sm:$0xff]  ;;  %v151_v21 = vld [vmem:[%s294_s3 + $0x8] sm:$0xff] }
   0x6   :  { %v150_v15 = vld [vmem:[%s294_s3] sm:$0xff] }
   0x7   :  { %188 = vmatpush3.bf16.msra.mxu0 %v206_v1 }
   0x8   :  { %189 = vmatprep.subr.bf16.mxu0 %v207_v2 }
   0xb   :  { %190 = vmatpush3.bf16.msra.mxu0 %v207_v2 }
   0xc   :  { %191 = vmatprep.subr.bf16.mxu0 %v208_v3 }
   0xf   :  { %192 = vmatpush3.bf16.msra.mxu0 %v208_v3 }
  0x10   :  { %193 = vmatprep.subr.bf16.mxu0 %v209_v5 }
  0x13   :  { %194 = vmatpush3.bf16.msra.mxu0 %v209_v5 }
  0x14   :  { %195 = vmatprep.subr.bf16.mxu0 %v210_v6 }
  0x17   :  { %196 = vmatpush3.bf16.msra.mxu0 %v210_v6 }
  0x18   :  { %197 = vmatprep.subr.bf16.mxu0 %v211_v7 }
  0x1b   :  { %198 = vmatpush3.bf16.msra.mxu0 %v211_v7 }
  0x1c   :  { %199 = vmatprep.subr.bf16.mxu0 %v212_v8 }
  0x1f   :  { %200 = vmatpush3.bf16.msra.mxu0 %v212_v8 }
  0x22   :  { %202 = vmatmul.mubr.bf16.vlgmr.msra.gmra.mxu0 %v214_v9 }
  0xe2   :  { %v203_v11 = vpop.f32.mrf.mxu0 }
  0xe3   :  { %v145_v13 = vadd.f32 %v203_v11, %v164_v10 }
  0xe4   :  { %v136_v14 = vpop.f32.mrf.mxu0 }
  0xe5   :  { %v155_v16 = vadd.f32 %v152_v12, %v145_v13  ;;  %v137_v17 = vadd.f32 %v164_v10, %v136_v14 }
  0xe6   :  { %v204_v18 = vpop.f32.mrf.mxu0 }
  0xe7   :  { %159 = vst.msk [vmem:[%s295_s4 + $0x10] sm:$0xff] %vm156_vm0, %v155_v16  ;;  %v153_v19 = vadd.f32 %v150_v15, %v137_v17 }
  0xe8   :  { %v139_v20 = vpop.f32.mrf.mxu0 }
  0xe9   :  { %157 = vst.msk [vmem:[%s295_s4] sm:$0xff] %vm156_vm0, %v153_v19  ;;  %v140_v22 = vadd.f32 %v164_v10, %v139_v20 }
  0xeb   :  { %v154_v23 = vadd.f32 %v151_v21, %v140_v22 }
  0xed   :  { %158 = vst.msk [vmem:[%s295_s4 + $0x8] sm:$0xff] %vm156_vm0, %v154_v23 }

// kernel: _lambda_.39
= control target key start
LH: loop header
LB: loop body
LE: loop exit
PB: predicated region body
PF: predicated region fallthrough
CT: control target
= control target key end

     0   :  { %vm24_vm0 = vcmask 261120   ;;  %v162_v7 = vmov 0.0   ;;  %vm163_vm1 = vmmov 0   ;;  %vm128_vm2 = vcmask 7168   ;;  %s218_s0 = inlined_call_operand.vmem [shape: f32[8,32], index: 0, kind: input, shape index: {}]   ;;  %s219_s3 = inlined_call_operand.vmem [shape: bf16[32,1], index: 3, kind: input, shape index: {}]   ;;  %s220_s4 = inlined_call_operand.<no memory space> [shape: f32[1,1], index: 4, kind: input, shape index: {}]   ;;  %s221_s1 = inlined_call_operand.vmem [shape: f32[1,32], index: 1, kind: input, shape index: {}]   ;;  %s222_s2 = inlined_call_operand.vmem [shape: f32[1,32], index: 2, kind: input, shape index: {}]   ;;  %s223_s5 = inlined_call_operand.vmem [shape: f32[8,1], index: 5, kind: output, shape index: {}]  }
   0x1   :  { %v23_v0 = vld [vmem:[%s218_s0] sm:$0xff]  ;;  %144 = vmatprep.subr.bf16.mxu0 %v162_v7  ;;  %v154_v8 = vld [vmem:[%s219_s3 + $0x8] sm:$0xff]   ;;  %148 = vmatprep.mubr.msk.bf16.mxu0 %vm163_vm1, %v162_v7  ;;  %v10_v10 = vstv %s220_s4 }
   0x2   :  { %v25_v1 = vsel %vm24_vm0, %v23_v0, 0.0  ;;  %145 = vmatpush3.bf16.msra.mxu0 %v154_v8  ;;  %v155_v9 = vld [vmem:[%s219_s3] sm:$0xff]   ;;  %11 = vst [vmem:[#allocation2] sm:$0x1] %v10_v10 }
   0x3   :  { %26 = vadd.xlane.f32.xlu0 %v25_v1  ;;  %146 = vmatprep.subr.bf16.mxu0 %v162_v7  ;;  %v134_v15 = vld [vmem:[%s221_s1] ss:$0 sm:$0xff] }
   0x4   :  { %v135_v17 = vld [vmem:[%s222_s2] ss:$0 sm:$0xff] }
   0x6   :  { %147 = vmatpush3.bf16.msra.mxu0 %v155_v9 }
   0x9   :  { %v136_v21 = vld [vmem:[#allocation2] ss:$0 sm:$0xff] }
  0x8c   :  { %v27_v2 = vpop.xlane.xlu0 %26 }
  0x8d   :  { %v29_v3 = vmul.f32 0.03125, %v27_v2 }
  0x8f   :  { %v30_v4 = vsub.f32 %v23_v0, %v29_v3 }
  0x91   :  { %v31_v5 = vmul.f32 %v30_v4, %v30_v4 }
  0x93   :  { %v32_v6 = vsel %vm24_vm0, %v31_v5, 0.0 }
  0x94   :  { %33 = vadd.xlane.f32.xlu0 %v32_v6 }
 0x11d   :  { %v34_v11 = vpop.xlane.xlu0 %33 }
 0x11e   :  { %v35_v12 = vmul.f32 0.03125, %v34_v11 }
 0x120   :  { %v36_v13 = vadd.f32 1e-05, %v35_v12 }
 0x122   :  { %156 = vrsqrt.f32 %v36_v13 }
 0x12f   :  { %v157_v14 = vpop.eup %156 }
 0x130   :  { %v38_v16 = vmul.f32 %v157_v14, %v30_v4 }
 0x132   :  { %v46_v18 = vmul.f32 %v134_v15, %v38_v16 }
 0x134   :  { %v54_v19 = vadd.f32 %v135_v17, %v46_v18 }
 0x136   :  { %v55_v20 = vpack.c.bf16 %v54_v19, %v54_v19 }
 0x138   :  { %149 = vmatmul.mubr.msk.bf16.vlgmr.msra.gmra.mxu0 %vm24_vm0, %v55_v20 }
 0x1f8   :  { %v116_v22 = vpop.f32.mrf.mxu0 }
 0x1f9   :  { %v117_v23 = vadd.f32 %v136_v21, %v116_v22 }
 0x1fa   :  { %v150_v24 = vpop.f32.mrf.mxu0 }
 0x1fb   :  { %v140_v25 = vmul.f32 -1.442695, %v117_v23 }
 0x1fc   :  { %v119_v26 = vpop.f32.mrf.mxu0 }
 0x1fd   :  { %158 = vpow2.f32 %v140_v25 }
 0x1fe   :  { %v151_v27 = vpop.f32.mrf.mxu0 }
 0x20a   :  { %v159_v28 = vpop.eup %158 }
 0x20b   :  { %v125_v29 = vadd.f32 1.0, %v159_v28 }
 0x20d   :  { %160 = vrcp.f32 %v125_v29 }
 0x21a   :  { %v161_v30 = vpop.eup %160 }
 0x21b   :  { %129 = vst.msk [vmem:[%s223_s5] sm:$0xff] %vm128_vm2, %v161_v30 }

</bundles_post_ra>
